<compile_context>
chip_gen: v5e
topology: v5e:2x2
jax: 0.10.0
libtpu: 0.0.40
codegen_flags: <defaults>
</compile_context>

<pallas_src>
import functools

import jax
import jax.numpy as jnp
from jax.experimental import pallas as pl
from jax.experimental.pallas import tpu as pltpu

ACT_DTYPE = jnp.bfloat16  # activation / MXU-input dtype (accumulation is f32)


def _round_up(x, m):
    return (x + m - 1) // m * m


def _row_tile(m, target=512):
    """Pick a row tile (multiple of 16 for bf16 sublane packing) and padded M."""
    tm = target if m >= target else _round_up(m, 16)
    return tm, _round_up(m, tm)


def _pad_rows(a, mp):
    m = a.shape[0]
    return a if mp == m else jnp.pad(a, ((0, mp - m), (0, 0)))


def _im2col3(x):
    """(N,H,W,C) -> (N*H*W, 9*C) taps of a 3x3 stride-1 pad-1 conv."""
    N, H, W, C = x.shape
    xp = jnp.pad(x, ((0, 0), (1, 1), (1, 1), (0, 0)))
    taps = [xp[:, dy:dy + H, dx:dx + W, :] for dy in range(3) for dx in range(3)]
    return jnp.concatenate(taps, axis=-1).reshape(N * H * W, 9 * C)


# ----------------------------- Pallas kernels ------------------------------

def _gemm_bias_act_kernel(x_ref, w_ref, b_ref, *rest, relu, n_add):
    """o = [relu](x @ w + b) + sum(addends).  x:(tm,K) w:(K,Co) b:(1,Co)."""
    o_ref = rest[n_add]
    acc = jnp.dot(x_ref[...], w_ref[...], preferred_element_type=jnp.float32)
    acc = acc + b_ref[...].astype(jnp.float32)
    if relu:
        acc = jnp.maximum(acc, 0.0)
    for i in range(n_add):
        acc = acc + rest[i][...].astype(jnp.float32)
    o_ref[...] = acc.astype(o_ref.dtype)


def _conv12_kernel(xcol_ref, w1_ref, b1_ref, w2_ref, b2_ref, o_ref):
    """Chained GEMMs: o = relu(relu(xcol @ W1 + b1) @ W2 + b2)."""
    t = jnp.dot(xcol_ref[...], w1_ref[...], preferred_element_type=jnp.float32)
    t = jnp.maximum(t + b1_ref[...].astype(jnp.float32), 0.0)
    t = t.astype(xcol_ref.dtype)                      # keep MXU inputs in bf16
    u = jnp.dot(t, w2_ref[...], preferred_element_type=jnp.float32)
    u = jnp.maximum(u + b2_ref[...].astype(jnp.float32), 0.0)
    o_ref[...] = u.astype(o_ref.dtype)


def _conv34_kernel(xcol_ref, xc_ref, w3_ref, b3_ref, w4_ref, b4_ref, o_ref):
    """o = relu(xcol @ W3 + b3) + concat([relu(xc @ W4 + b4), xc], lanes)."""
    a3 = jnp.dot(xcol_ref[...], w3_ref[...], preferred_element_type=jnp.float32)
    a3 = jnp.maximum(a3 + b3_ref[...].astype(jnp.float32), 0.0)
    a4 = jnp.dot(xc_ref[...], w4_ref[...], preferred_element_type=jnp.float32)
    a4 = jnp.maximum(a4 + b4_ref[...].astype(jnp.float32), 0.0)
    x2 = jnp.concatenate([a4, xc_ref[...].astype(jnp.float32)], axis=-1)
    o_ref[...] = (a3 + x2).astype(o_ref.dtype)


def _maxpool_kernel(t_ref, *rest, ntaps, rep, has_add):
    """o = addend + channel_tile(max over taps, rep)   (or just the max)."""
    o_ref = rest[-1]
    m = t_ref[0]
    for t in range(1, ntaps):
        m = jnp.maximum(m, t_ref[t])
    if has_add:
        rep_m = jnp.concatenate([m] * rep, axis=-1) if rep > 1 else m
        o_ref[...] = rest[0][...] + rep_m             # single full-width store
    else:
        o_ref[...] = m


def _addn_kernel(*refs):
    o_ref = refs[-1]
    acc = refs[0][...].astype(jnp.float32)
    for r in refs[1:-1]:
        acc = acc + r[...].astype(jnp.float32)
    o_ref[...] = acc.astype(o_ref.dtype)


# ------------------------------ op wrappers --------------------------------

def _gemm(xcol, w, b, *, relu, addends=(), out_dtype=ACT_DTYPE):
    """Tiled (M,K)x(K,Co) GEMM with fused bias / ReLU / residual adds."""
    M, K = xcol.shape
    cout = w.shape[-1]
    tm, Mp = _row_tile(M)
    addends = [_pad_rows(a, Mp) for a in addends]
    xcol = _pad_rows(xcol, Mp)
    grid = (Mp // tm,)
    in_specs = ([pl.BlockSpec((tm, K), lambda i: (i, 0)),
                 pl.BlockSpec((K, cout), lambda i: (0, 0)),
                 pl.BlockSpec((1, cout), lambda i: (0, 0))]
                + [pl.BlockSpec((tm, cout), lambda i: (i, 0)) for _ in addends])
    out = pl.pallas_call(
        functools.partial(_gemm_bias_act_kernel, relu=relu, n_add=len(addends)),
        grid=grid,
        in_specs=in_specs,
        out_specs=pl.BlockSpec((tm, cout), lambda i: (i, 0)),
        out_shape=jax.ShapeDtypeStruct((Mp, cout), out_dtype),
        compiler_params=pltpu.CompilerParams(
            dimension_semantics=("parallel",)),
    )(xcol.astype(ACT_DTYPE), w.astype(ACT_DTYPE),
      b.reshape(1, cout).astype(jnp.float32),
      *[a.astype(ACT_DTYPE) for a in addends])
    return out[:M] if Mp != M else out


def conv2d(x, w, b, *, padding, relu=True, addends=(), out_dtype=ACT_DTYPE):
    """x:(N,H,W,Cin)  w:(kh,kw,Cin,Cout)  b:(Cout,).  Stride-1 conv (+ReLU) with
    optional fused residual addends (each (N,Ho,Wo,Cout), added after ReLU)."""
    N, H, W, cin = x.shape
    kh, kw, _, cout = w.shape
    Ho = H + 2 * padding - kh + 1
    Wo = W + 2 * padding - kw + 1
    M = N * Ho * Wo
    if kh == 1 and kw == 1:
        xcol = x.reshape(M, cin)
        wcol = w.reshape(cin, cout)
    else:
        xp = jnp.pad(x, ((0, 0), (padding, padding), (padding, padding), (0, 0)))
        taps = [xp[:, dy:dy + Ho, dx:dx + Wo, :]
                for dy in range(kh) for dx in range(kw)]
        xcol = jnp.concatenate(taps, axis=-1).reshape(M, kh * kw * cin)
        wcol = w.reshape(kh * kw * cin, cout)
    adds = [a.reshape(M, cout) for a in addends]
    out = _gemm(xcol, wcol, b, relu=relu, addends=adds, out_dtype=out_dtype)
    return out.reshape(N, Ho, Wo, cout)


def contraction_front(x, p1, p2):
    """relu(conv2_1x1(relu(conv1_3x3(x)))) as a single pallas_call."""
    N, H, W, ni = x.shape
    c2 = p2['w'].shape[-1]
    M = N * H * W
    xcol = _im2col3(x)
    w1 = p1['w'].reshape(9 * ni, ni)
    w2 = p2['w'].reshape(ni, c2)
    tm, Mp = _row_tile(M)
    xcol = _pad_rows(xcol, Mp)
    out = pl.pallas_call(
        _conv12_kernel,
        grid=(Mp // tm,),
        in_specs=[pl.BlockSpec((tm, 9 * ni), lambda i: (i, 0)),
                  pl.BlockSpec((9 * ni, ni), lambda i: (0, 0)),
                  pl.BlockSpec((1, ni), lambda i: (0, 0)),
                  pl.BlockSpec((ni, c2), lambda i: (0, 0)),
                  pl.BlockSpec((1, c2), lambda i: (0, 0))],
        out_specs=pl.BlockSpec((tm, c2), lambda i: (i, 0)),
        out_shape=jax.ShapeDtypeStruct((Mp, c2), ACT_DTYPE),
        compiler_params=pltpu.CompilerParams(
            dimension_semantics=("parallel",)),
    )(xcol.astype(ACT_DTYPE), w1.astype(ACT_DTYPE),
      p1['b'].reshape(1, ni).astype(jnp.float32),
      w2.astype(ACT_DTYPE), p2['b'].reshape(1, c2).astype(jnp.float32))
    out = out[:M] if Mp != M else out
    return out.reshape(N, H, W, c2)


def contraction_back(x12, x, p3, p4):
    """relu(conv3_3x3(x12)) + cat([relu(conv4_1x1(x)), x], C), single call."""
    N, H, W, c2 = x12.shape
    ni = x.shape[-1]
    M = N * H * W
    xcol = _im2col3(x12)
    xc = x.reshape(M, ni)
    w3 = p3['w'].reshape(9 * c2, c2)
    w4 = p4['w'].reshape(ni, ni)
    tm, Mp = _row_tile(M)
    xcol = _pad_rows(xcol, Mp)
    xc = _pad_rows(xc, Mp)
    out = pl.pallas_call(
        _conv34_kernel,
        grid=(Mp // tm,),
        in_specs=[pl.BlockSpec((tm, 9 * c2), lambda i: (i, 0)),
                  pl.BlockSpec((tm, ni), lambda i: (i, 0)),
                  pl.BlockSpec((9 * c2, c2), lambda i: (0, 0)),
                  pl.BlockSpec((1, c2), lambda i: (0, 0)),
                  pl.BlockSpec((ni, ni), lambda i: (0, 0)),
                  pl.BlockSpec((1, ni), lambda i: (0, 0))],
        out_specs=pl.BlockSpec((tm, c2), lambda i: (i, 0)),
        out_shape=jax.ShapeDtypeStruct((Mp, c2), ACT_DTYPE),
        compiler_params=pltpu.CompilerParams(
            dimension_semantics=("parallel",)),
    )(xcol.astype(ACT_DTYPE), xc.astype(ACT_DTYPE), w3.astype(ACT_DTYPE),
      p3['b'].reshape(1, c2).astype(jnp.float32), w4.astype(ACT_DTYPE),
      p4['b'].reshape(1, ni).astype(jnp.float32))
    out = out[:M] if Mp != M else out
    return out.reshape(N, H, W, c2)


def conv_transpose2d(x, w_t, b):
    """ConvTranspose2d(k=3, stride=2, padding=1, output_padding=1) via sub-pixel
    decomposition: one GEMM over 2x2 patches + pixel shuffle.  w_t:(Cin,Cout,3,3)."""
    N, H, W, cin = x.shape
    _, cout, _, _ = w_t.shape
    xp = jnp.pad(x, ((0, 0), (0, 1), (0, 1), (0, 0)))
    taps = [xp[:, dy:dy + H, dx:dx + W, :] for dy in range(2) for dx in range(2)]
    xcol = jnp.concatenate(taps, axis=-1).reshape(N * H * W, 4 * cin)
    # out[2i+a, 2j+b] = sum_{dy,dx in {0,1}} x[i+dy, j+dx] @ Wsub[dy,dx,:,a,b,:]
    g = lambda ky, kx: w_t[:, :, ky, kx]          # (Cin, Cout)
    wz = jnp.zeros((2, 2, cin, 2, 2, cout), w_t.dtype)
    wz = wz.at[0, 0, :, 0, 0, :].set(g(1, 1))
    wz = wz.at[0, 1, :, 0, 1, :].set(g(1, 0))
    wz = wz.at[0, 0, :, 0, 1, :].set(g(1, 2))
    wz = wz.at[1, 0, :, 1, 0, :].set(g(0, 1))
    wz = wz.at[0, 0, :, 1, 0, :].set(g(2, 1))
    wz = wz.at[1, 1, :, 1, 1, :].set(g(0, 0))
    wz = wz.at[1, 0, :, 1, 1, :].set(g(0, 2))
    wz = wz.at[0, 1, :, 1, 1, :].set(g(2, 0))
    wz = wz.at[0, 0, :, 1, 1, :].set(g(2, 2))
    wcol = wz.reshape(4 * cin, 4 * cout)
    bsub = jnp.tile(b, 4)
    out = _gemm(xcol, wcol, bsub, relu=False)     # (N*H*W, 4*Cout)
    out = out.reshape(N, H, W, 2, 2, cout)
    out = jnp.transpose(out, (0, 1, 3, 2, 4, 5)).reshape(N, 2 * H, 2 * W, cout)
    return out


def maxpool2d(x, *, k=3, s=2, pad=1, addend=None, rep=1):
    """MaxPool2d(k, s, pad); optionally fused `addend + channel_tile(pool(x), rep)`."""
    assert addend is not None or rep == 1
    N, H, W, C = x.shape
    Ho = (H + 2 * pad - k) // s + 1
    Wo = (W + 2 * pad - k) // s + 1
    M = N * Ho * Wo
    co = C * rep
    xp = jnp.pad(x, ((0, 0), (pad, pad), (pad, pad), (0, 0)),
                 constant_values=-jnp.inf)
    taps = [xp[:, dy:dy + (Ho - 1) * s + 1:s, dx:dx + (Wo - 1) * s + 1:s, :]
            .reshape(1, M, C) for dy in range(k) for dx in range(k)]
    xs = jnp.concatenate(taps, axis=0)            # (k*k, M, C)
    if addend is not None:
        addend = addend.reshape(M, co)
    tm, Mp = _row_tile(M)
    if Mp != M:
        xs = jnp.pad(xs, ((0, 0), (0, Mp - M), (0, 0)))
        if addend is not None:
            addend = _pad_rows(addend, Mp)
    grid = (Mp // tm,)
    in_specs = [pl.BlockSpec((k * k, tm, C), lambda i: (0, i, 0))]
    args = [xs.astype(ACT_DTYPE)]
    if addend is not None:
        in_specs.append(pl.BlockSpec((tm, co), lambda i: (i, 0)))
        args.append(addend.astype(ACT_DTYPE))
    out = pl.pallas_call(
        functools.partial(_maxpool_kernel, ntaps=k * k, rep=rep,
                          has_add=addend is not None),
        grid=grid,
        in_specs=in_specs,
        out_specs=pl.BlockSpec((tm, co), lambda i: (i, 0)),
        out_shape=jax.ShapeDtypeStruct((Mp, co), ACT_DTYPE),
        compiler_params=pltpu.CompilerParams(
            dimension_semantics=("parallel",)),
    )(*args)
    out = out[:M] if Mp != M else out
    return out.reshape(N, Ho, Wo, co)


def padd(*xs):
    """Elementwise sum of same-shaped NHWC tensors (lane-dense 2-D view)."""
    shape = xs[0].shape
    R = shape[0] * shape[1]
    L = shape[2] * shape[3]
    xs2 = [v.reshape(R, L) for v in xs]
    tm, Rp = _row_tile(R, target=256)
    xs2 = [_pad_rows(v, Rp) for v in xs2]
    out = pl.pallas_call(
        _addn_kernel,
        grid=(Rp // tm,),
        in_specs=[pl.BlockSpec((tm, L), lambda i: (i, 0)) for _ in xs2],
        out_specs=pl.BlockSpec((tm, L), lambda i: (i, 0)),
        out_shape=jax.ShapeDtypeStruct((Rp, L), xs[0].dtype),
        compiler_params=pltpu.CompilerParams(
            dimension_semantics=("parallel",)),
    )(*xs2)
    out = out[:R] if Rp != R else out
    return out.reshape(shape)


# ----------------------------- parameter init ------------------------------

def _init_conv(key, cin, cout, k):
    wkey, bkey = jax.random.split(key)
    fan_in = cin * k * k
    w = jax.random.normal(wkey, (k, k, cin, cout), jnp.float32) * jnp.sqrt(2.0 / fan_in)
    b = jax.random.normal(bkey, (cout,), jnp.float32) * 0.01
    return dict(w=w, b=b)


def _init_convt(key, cin, cout, k):
    wkey, bkey = jax.random.split(key)
    fan_in = cin * k * k
    w = jax.random.normal(wkey, (cin, cout, k, k), jnp.float32) * jnp.sqrt(2.0 / fan_in)
    b = jax.random.normal(bkey, (cout,), jnp.float32) * 0.01
    return dict(w=w, b=b)


def init_cloudnetp_params(key, n_channels=4, n_classes=1, depth=3):
    keys = iter(jax.random.split(key, 256))
    params = dict(c=[], f=[], e=[], u=[])
    for i in range(depth):
        ni = n_channels * 2 ** i
        params['c'].append(dict(
            conv1=_init_conv(next(keys), ni, ni, 3),
            conv2=_init_conv(next(keys), ni, 2 * ni, 1),
            conv3=_init_conv(next(keys), 2 * ni, 2 * ni, 3),
            conv4=_init_conv(next(keys), ni, ni, 1)))
    for i in range(1, depth):
        ni = n_channels * 2 * 2 ** i
        params['f'].append(dict(conv=_init_conv(next(keys), ni, ni, 3)))
    for i in range(1, depth):
        ni = n_channels * 2 * 2 ** i
        params['e'].append(dict(
            conv_t=_init_convt(next(keys), 2 * ni, ni, 3),
            conv1=_init_conv(next(keys), 2 * ni, ni, 3),
            conv2=_init_conv(next(keys), ni, ni, 3),
            conv3=_init_conv(next(keys), ni, ni, 3)))
    for i in range(depth - 1):
        ni = n_channels * 2 * 2 ** (i + 1)
        params['u'].append(dict(conv=_init_conv(next(keys), ni, n_classes, 1),
                                scale=2 ** (i + 2)))
    params['u'].append(dict(conv=_init_conv(next(keys), n_channels * 2 ** depth, n_classes, 1),
                            scale=2 ** depth))
    params['out_conv'] = _init_conv(next(keys), n_classes, n_classes, 3)
    return params


# ------------------------------ model forward ------------------------------

def _conv_layer(x, p, relu=True, addends=(), out_dtype=ACT_DTYPE):
    k = p['w'].shape[0]
    return conv2d(x, p['w'], p['b'], padding=k // 2, relu=relu,
                  addends=addends, out_dtype=out_dtype)


def _contraction_block(x, p):
    # x1 = relu(conv2(relu(conv1(x))))                         (1 pallas_call)
    x12 = contraction_front(x, p['conv1'], p['conv2'])
    # x  = relu(conv3(x1)) + cat([relu(conv4(x)), x], C)       (1 pallas_call)
    x3 = contraction_back(x12, x, p['conv3'], p['conv4'])
    return maxpool2d(x3, k=3, s=2, pad=1)


def _feedforward_block(xs, p):
    n = len(xs) - 1
    out = xs[n]
    for i in reversed(range(n)):
        s = 2 ** (n - i)
        # maxpool commutes with channel replication -> pool the small tensor and
        # fuse both the channel tiling and the running-sum add into the kernel.
        out = maxpool2d(xs[i], k=3, s=s, pad=1, addend=out, rep=s)
    return _conv_layer(out, p['conv'])


def _expanding_block(pe_out, ff, contr, p):
    if pe_out is None:
        x2 = ff
    else:
        x2 = conv_transpose2d(pe_out, p['conv_t']['w'], p['conv_t']['b'])
    x1 = jnp.concatenate([ff, x2], axis=-1)
    x1 = _conv_layer(x1, p['conv1'])
    x1 = _conv_layer(x1, p['conv2'], addends=(contr, x2))   # contr + relu(conv2) + x2
    return _conv_layer(x1, p['conv3'])


def _upsampling_block(x, p):
    # nearest Upsample then 1x1 Conv+ReLU == 1x1 Conv+ReLU then Upsample (exact),
    # so run the conv on the small tensor and replicate afterwards (XLA glue).
    f = p['scale']
    y = _conv_layer(x, p['conv'])
    return jnp.repeat(jnp.repeat(y, f, axis=1), f, axis=2)


def cloudnetp_forward(params, x_nchw):
    x = jnp.transpose(x_nchw, (0, 2, 3, 1)).astype(ACT_DTYPE)   # NCHW -> NHWC
    c_outs = []
    for cp in params['c']:
        x = _contraction_block(x, cp)
        c_outs.append(x)
    f_outs = []
    for j, fp in enumerate(params['f']):
        f_outs.append(_feedforward_block(list(c_outs[:j + 2]), fp))
    e_outs = [None] * len(f_outs)
    e_out = None
    for j in reversed(range(len(params['e']))):
        e_out = _expanding_block(e_out, f_outs[j], c_outs[j + 1], params['e'][j])
        e_outs[j] = e_out
    n = len(params['u'])
    u_terms = [_upsampling_block(c_outs[n - 1], params['u'][n - 1])]
    for i in range(n - 1):
        u_terms.append(_upsampling_block(e_outs[i], params['u'][i]))
    u_sum = padd(*u_terms)
    out = _conv_layer(u_sum, params['out_conv'], relu=False, out_dtype=jnp.float32)
    return dict(out=jnp.transpose(out, (0, 3, 1, 2)))           # back to NCHW


# ---------------------------------- main ------------------------------------

if __name__ == "__main__":
    key = jax.random.PRNGKey(0)
    pkey, xkey = jax.random.split(key)

    # small configuration consistent with the module: n_channels=4, n_classes=1,
    # inception_depth=3 (spatial must be divisible by 2**depth -> 16x16 input)
    N_CHANNELS, N_CLASSES, DEPTH = 4, 1, 3
    params = init_cloudnetp_params(pkey, N_CHANNELS, N_CLASSES, DEPTH)

    x = jax.random.normal(xkey, (2, N_CHANNELS, 16, 16), jnp.float32)   # NCHW

    fwd = jax.jit(functools.partial(cloudnetp_forward, params))
    out = fwd(x)
    jax.block_until_ready(out)

    assert out['out'].shape == (2, N_CLASSES, 16, 16), out['out'].shape
    assert bool(jnp.all(jnp.isfinite(out['out'])))
    print("KERNEL_OK")
</pallas_src>

<mosaic_0001>
module attributes {stable_mosaic.version = 11 : i64} {
  func.func @_conv12_kernel(%arg0: i32, %arg1: memref<512x36xbf16, #tpu.memory_space<vmem>>, %arg2: memref<36x4xbf16, #tpu.memory_space<vmem>>, %arg3: memref<1x4xf32, #tpu.memory_space<vmem>>, %arg4: memref<4x8xbf16, #tpu.memory_space<vmem>>, %arg5: memref<1x8xf32, #tpu.memory_space<vmem>>, %arg6: memref<512x8xbf16, #tpu.memory_space<vmem>>) attributes {dimension_semantics = [#tpu.dimension_semantics<parallel>], iteration_bounds = array<i64: 1>, scalar_prefetch = 0 : i64, scratch_operands = 0 : i64, tpu.core_type = #tpu.core_type<tc>, window_params = [{transform_indices = @transform_0, window_bounds = array<i64: 512, 36>}, {pipeline_mode = #tpu.pipeline_mode<synchronous>, transform_indices = @transform_1, window_bounds = array<i64: 36, 4>}, {pipeline_mode = #tpu.pipeline_mode<synchronous>, transform_indices = @transform_2, window_bounds = array<i64: 1, 4>}, {pipeline_mode = #tpu.pipeline_mode<synchronous>, transform_indices = @transform_3, window_bounds = array<i64: 4, 8>}, {pipeline_mode = #tpu.pipeline_mode<synchronous>, transform_indices = @transform_4, window_bounds = array<i64: 1, 8>}, {transform_indices = @transform_5, window_bounds = array<i64: 512, 8>}]} {
    %c0 = arith.constant 0 : index
    %c0_0 = arith.constant 0 : index
    %0 = vector.load %arg1[%c0, %c0_0] : memref<512x36xbf16, #tpu.memory_space<vmem>>, vector<512x36xbf16>
    %c0_1 = arith.constant 0 : index
    %c0_2 = arith.constant 0 : index
    %1 = vector.load %arg2[%c0_1, %c0_2] : memref<36x4xbf16, #tpu.memory_space<vmem>>, vector<36x4xbf16>
    %cst = arith.constant dense<0.000000e+00> : vector<512x4xf32>
    %2 = tpu.matmul %0, %1, %cst {dimension_numbers = #tpu.dot_dimension_numbers<[1], [0], [0], [1], [0, 0, 1, 1], [], []>} : vector<512x36xbf16>, vector<36x4xbf16>, vector<512x4xf32> -> vector<512x4xf32>
    %c0_3 = arith.constant 0 : index
    %c0_4 = arith.constant 0 : index
    %3 = vector.load %arg3[%c0_3, %c0_4] : memref<1x4xf32, #tpu.memory_space<vmem>>, vector<1x4xf32>
    %4 = vector.broadcast %3 : vector<1x4xf32> to vector<512x4xf32>
    %5 = arith.addf %2, %4 : vector<512x4xf32>
    %cst_5 = arith.constant 0.000000e+00 : f32
    %6 = vector.broadcast %cst_5 : f32 to vector<512x4xf32>
    %7 = arith.maximumf %5, %6 : vector<512x4xf32>
    %8 = arith.truncf %7 : vector<512x4xf32> to vector<512x4xbf16>
    %c0_6 = arith.constant 0 : index
    %c0_7 = arith.constant 0 : index
    %9 = vector.load %arg4[%c0_6, %c0_7] : memref<4x8xbf16, #tpu.memory_space<vmem>>, vector<4x8xbf16>
    %cst_8 = arith.constant dense<0.000000e+00> : vector<512x8xf32>
    %10 = tpu.matmul %8, %9, %cst_8 {dimension_numbers = #tpu.dot_dimension_numbers<[1], [0], [0], [1], [0, 0, 1, 1], [], []>} : vector<512x4xbf16>, vector<4x8xbf16>, vector<512x8xf32> -> vector<512x8xf32>
    %c0_9 = arith.constant 0 : index
    %c0_10 = arith.constant 0 : index
    %11 = vector.load %arg5[%c0_9, %c0_10] : memref<1x8xf32, #tpu.memory_space<vmem>>, vector<1x8xf32>
    %12 = vector.broadcast %11 : vector<1x8xf32> to vector<512x8xf32>
    %13 = arith.addf %10, %12 : vector<512x8xf32>
    %cst_11 = arith.constant 0.000000e+00 : f32
    %14 = vector.broadcast %cst_11 : f32 to vector<512x8xf32>
    %15 = arith.maximumf %13, %14 : vector<512x8xf32>
    %16 = arith.truncf %15 : vector<512x8xf32> to vector<512x8xbf16>
    %c0_12 = arith.constant 0 : index
    %c0_13 = arith.constant 0 : index
    %17 = vector.load %arg6[%c0_12, %c0_13] : memref<512x8xbf16, #tpu.memory_space<vmem>>, vector<512x8xbf16>
    tpu.vector_store %arg6[%c0_12, %c0_13], %16 {strides = array<i32>} : memref<512x8xbf16, #tpu.memory_space<vmem>>, vector<512x8xbf16>,
    return
  }
  func.func @transform_0(%arg0: i32) -> (i32, i32) {
    %c0_i32 = arith.constant 0 : i32
    %c0_i32_0 = arith.constant 0 : i32
    return %arg0, %c0_i32 : i32, i32
  }
  func.func @transform_1(%arg0: i32) -> (i32, i32) {
    %c0_i32 = arith.constant 0 : i32
    %c0_i32_0 = arith.constant 0 : i32
    %c0_i32_1 = arith.constant 0 : i32
    return %c0_i32, %c0_i32_0 : i32, i32
  }
  func.func @transform_2(%arg0: i32) -> (i32, i32) {
    %c0_i32 = arith.constant 0 : i32
    %c0_i32_0 = arith.constant 0 : i32
    %c0_i32_1 = arith.constant 0 : i32
    return %c0_i32, %c0_i32_0 : i32, i32
  }
  func.func @transform_3(%arg0: i32) -> (i32, i32) {
    %c0_i32 = arith.constant 0 : i32
    %c0_i32_0 = arith.constant 0 : i32
    %c0_i32_1 = arith.constant 0 : i32
    return %c0_i32, %c0_i32_0 : i32, i32
  }
  func.func @transform_4(%arg0: i32) -> (i32, i32) {
    %c0_i32 = arith.constant 0 : i32
    %c0_i32_0 = arith.constant 0 : i32
    %c0_i32_1 = arith.constant 0 : i32
    return %c0_i32, %c0_i32_0 : i32, i32
  }
  func.func @transform_5(%arg0: i32) -> (i32, i32) {
    %c0_i32 = arith.constant 0 : i32
    %c0_i32_0 = arith.constant 0 : i32
    return %arg0, %c0_i32 : i32, i32
  }
}

module attributes {stable_mosaic.version = 11 : i64} {
  func.func @_conv34_kernel(%arg0: i32, %arg1: memref<512x72xbf16, #tpu.memory_space<vmem>>, %arg2: memref<512x4xbf16, #tpu.memory_space<vmem>>, %arg3: memref<72x8xbf16, #tpu.memory_space<vmem>>, %arg4: memref<1x8xf32, #tpu.memory_space<vmem>>, %arg5: memref<4x4xbf16, #tpu.memory_space<vmem>>, %arg6: memref<1x4xf32, #tpu.memory_space<vmem>>, %arg7: memref<512x8xbf16, #tpu.memory_space<vmem>>) attributes {dimension_semantics = [#tpu.dimension_semantics<parallel>], iteration_bounds = array<i64: 1>, scalar_prefetch = 0 : i64, scratch_operands = 0 : i64, tpu.core_type = #tpu.core_type<tc>, window_params = [{transform_indices = @transform_0, window_bounds = array<i64: 512, 72>}, {transform_indices = @transform_1, window_bounds = array<i64: 512, 4>}, {pipeline_mode = #tpu.pipeline_mode<synchronous>, transform_indices = @transform_2, window_bounds = array<i64: 72, 8>}, {pipeline_mode = #tpu.pipeline_mode<synchronous>, transform_indices = @transform_3, window_bounds = array<i64: 1, 8>}, {pipeline_mode = #tpu.pipeline_mode<synchronous>, transform_indices = @transform_4, window_bounds = array<i64: 4, 4>}, {pipeline_mode = #tpu.pipeline_mode<synchronous>, transform_indices = @transform_5, window_bounds = array<i64: 1, 4>}, {transform_indices = @transform_6, window_bounds = array<i64: 512, 8>}]} {
    %c0 = arith.constant 0 : index
    %c0_0 = arith.constant 0 : index
    %0 = vector.load %arg1[%c0, %c0_0] : memref<512x72xbf16, #tpu.memory_space<vmem>>, vector<512x72xbf16>
    %c0_1 = arith.constant 0 : index
    %c0_2 = arith.constant 0 : index
    %1 = vector.load %arg3[%c0_1, %c0_2] : memref<72x8xbf16, #tpu.memory_space<vmem>>, vector<72x8xbf16>
    %cst = arith.constant dense<0.000000e+00> : vector<512x8xf32>
    %2 = tpu.matmul %0, %1, %cst {dimension_numbers = #tpu.dot_dimension_numbers<[1], [0], [0], [1], [0, 0, 1, 1], [], []>} : vector<512x72xbf16>, vector<72x8xbf16>, vector<512x8xf32> -> vector<512x8xf32>
    %c0_3 = arith.constant 0 : index
    %c0_4 = arith.constant 0 : index
    %3 = vector.load %arg4[%c0_3, %c0_4] : memref<1x8xf32, #tpu.memory_space<vmem>>, vector<1x8xf32>
    %4 = vector.broadcast %3 : vector<1x8xf32> to vector<512x8xf32>
    %5 = arith.addf %2, %4 : vector<512x8xf32>
    %cst_5 = arith.constant 0.000000e+00 : f32
    %6 = vector.broadcast %cst_5 : f32 to vector<512x8xf32>
    %7 = arith.maximumf %5, %6 : vector<512x8xf32>
    %c0_6 = arith.constant 0 : index
    %c0_7 = arith.constant 0 : index
    %8 = vector.load %arg2[%c0_6, %c0_7] : memref<512x4xbf16, #tpu.memory_space<vmem>>, vector<512x4xbf16>
    %c0_8 = arith.constant 0 : index
    %c0_9 = arith.constant 0 : index
    %9 = vector.load %arg5[%c0_8, %c0_9] : memref<4x4xbf16, #tpu.memory_space<vmem>>, vector<4x4xbf16>
    %cst_10 = arith.constant dense<0.000000e+00> : vector<512x4xf32>
    %10 = tpu.matmul %8, %9, %cst_10 {dimension_numbers = #tpu.dot_dimension_numbers<[1], [0], [0], [1], [0, 0, 1, 1], [], []>} : vector<512x4xbf16>, vector<4x4xbf16>, vector<512x4xf32> -> vector<512x4xf32>
    %c0_11 = arith.constant 0 : index
    %c0_12 = arith.constant 0 : index
    %11 = vector.load %arg6[%c0_11, %c0_12] : memref<1x4xf32, #tpu.memory_space<vmem>>, vector<1x4xf32>
    %12 = vector.broadcast %11 : vector<1x4xf32> to vector<512x4xf32>
    %13 = arith.addf %10, %12 : vector<512x4xf32>
    %cst_13 = arith.constant 0.000000e+00 : f32
    %14 = vector.broadcast %cst_13 : f32 to vector<512x4xf32>
    %15 = arith.maximumf %13, %14 : vector<512x4xf32>
    %c0_14 = arith.constant 0 : index
    %c0_15 = arith.constant 0 : index
    %16 = vector.load %arg2[%c0_14, %c0_15] : memref<512x4xbf16, #tpu.memory_space<vmem>>, vector<512x4xbf16>
    %17 = arith.extf %16 : vector<512x4xbf16> to vector<512x4xf32>
    %18 = tpu.concatenate %15, %17 in 1 : vector<512x4xf32>, vector<512x4xf32> -> vector<512x8xf32>
    %19 = arith.addf %7, %18 : vector<512x8xf32>
    %20 = arith.truncf %19 : vector<512x8xf32> to vector<512x8xbf16>
    %c0_16 = arith.constant 0 : index
    %c0_17 = arith.constant 0 : index
    %21 = vector.load %arg7[%c0_16, %c0_17] : memref<512x8xbf16, #tpu.memory_space<vmem>>, vector<512x8xbf16>
    tpu.vector_store %arg7[%c0_16, %c0_17], %20 {strides = array<i32>} : memref<512x8xbf16, #tpu.memory_space<vmem>>, vector<512x8xbf16>,
    return
  }
  func.func @transform_0(%arg0: i32) -> (i32, i32) {
    %c0_i32 = arith.constant 0 : i32
    %c0_i32_0 = arith.constant 0 : i32
    return %arg0, %c0_i32 : i32, i32
  }
  func.func @transform_1(%arg0: i32) -> (i32, i32) {
    %c0_i32 = arith.constant 0 : i32
    %c0_i32_0 = arith.constant 0 : i32
    return %arg0, %c0_i32 : i32, i32
  }
  func.func @transform_2(%arg0: i32) -> (i32, i32) {
    %c0_i32 = arith.constant 0 : i32
    %c0_i32_0 = arith.constant 0 : i32
    %c0_i32_1 = arith.constant 0 : i32
    return %c0_i32, %c0_i32_0 : i32, i32
  }
  func.func @transform_3(%arg0: i32) -> (i32, i32) {
    %c0_i32 = arith.constant 0 : i32
    %c0_i32_0 = arith.constant 0 : i32
    %c0_i32_1 = arith.constant 0 : i32
    return %c0_i32, %c0_i32_0 : i32, i32
  }
  func.func @transform_4(%arg0: i32) -> (i32, i32) {
    %c0_i32 = arith.constant 0 : i32
    %c0_i32_0 = arith.constant 0 : i32
    %c0_i32_1 = arith.constant 0 : i32
    return %c0_i32, %c0_i32_0 : i32, i32
  }
  func.func @transform_5(%arg0: i32) -> (i32, i32) {
    %c0_i32 = arith.constant 0 : i32
    %c0_i32_0 = arith.constant 0 : i32
    %c0_i32_1 = arith.constant 0 : i32
    return %c0_i32, %c0_i32_0 : i32, i32
  }
  func.func @transform_6(%arg0: i32) -> (i32, i32) {
    %c0_i32 = arith.constant 0 : i32
    %c0_i32_0 = arith.constant 0 : i32
    return %arg0, %c0_i32 : i32, i32
  }
}

module attributes {stable_mosaic.version = 11 : i64} {
  func.func @_maxpool_kernel(%arg0: i32, %arg1: memref<9x128x8xbf16, #tpu.memory_space<vmem>>, %arg2: memref<128x8xbf16, #tpu.memory_space<vmem>>) attributes {dimension_semantics = [#tpu.dimension_semantics<parallel>], iteration_bounds = array<i64: 1>, scalar_prefetch = 0 : i64, scratch_operands = 0 : i64, tpu.core_type = #tpu.core_type<tc>, window_params = [{transform_indices = @transform_0, window_bounds = array<i64: 9, 128, 8>}, {transform_indices = @transform_1, window_bounds = array<i64: 128, 8>}]} {
    %c0 = arith.constant 0 : index
    %c0_0 = arith.constant 0 : index
    %c0_1 = arith.constant 0 : index
    %0 = vector.load %arg1[%c0, %c0_0, %c0_1] : memref<9x128x8xbf16, #tpu.memory_space<vmem>>, vector<1x128x8xbf16>
    %1 = vector.shape_cast %0 : vector<1x128x8xbf16> to vector<128x8xbf16>
    %c1 = arith.constant 1 : index
    %c0_2 = arith.constant 0 : index
    %c0_3 = arith.constant 0 : index
    %2 = vector.load %arg1[%c1, %c0_2, %c0_3] : memref<9x128x8xbf16, #tpu.memory_space<vmem>>, vector<1x128x8xbf16>
    %3 = vector.shape_cast %2 : vector<1x128x8xbf16> to vector<128x8xbf16>
    %4 = arith.maximumf %1, %3 : vector<128x8xbf16>
    %c2 = arith.constant 2 : index
    %c0_4 = arith.constant 0 : index
    %c0_5 = arith.constant 0 : index
    %5 = vector.load %arg1[%c2, %c0_4, %c0_5] : memref<9x128x8xbf16, #tpu.memory_space<vmem>>, vector<1x128x8xbf16>
    %6 = vector.shape_cast %5 : vector<1x128x8xbf16> to vector<128x8xbf16>
    %7 = arith.maximumf %4, %6 : vector<128x8xbf16>
    %c3 = arith.constant 3 : index
    %c0_6 = arith.constant 0 : index
    %c0_7 = arith.constant 0 : index
    %8 = vector.load %arg1[%c3, %c0_6, %c0_7] : memref<9x128x8xbf16, #tpu.memory_space<vmem>>, vector<1x128x8xbf16>
    %9 = vector.shape_cast %8 : vector<1x128x8xbf16> to vector<128x8xbf16>
    %10 = arith.maximumf %7, %9 : vector<128x8xbf16>
    %c4 = arith.constant 4 : index
    %c0_8 = arith.constant 0 : index
    %c0_9 = arith.constant 0 : index
    %11 = vector.load %arg1[%c4, %c0_8, %c0_9] : memref<9x128x8xbf16, #tpu.memory_space<vmem>>, vector<1x128x8xbf16>
    %12 = vector.shape_cast %11 : vector<1x128x8xbf16> to vector<128x8xbf16>
    %13 = arith.maximumf %10, %12 : vector<128x8xbf16>
    %c5 = arith.constant 5 : index
    %c0_10 = arith.constant 0 : index
    %c0_11 = arith.constant 0 : index
    %14 = vector.load %arg1[%c5, %c0_10, %c0_11] : memref<9x128x8xbf16, #tpu.memory_space<vmem>>, vector<1x128x8xbf16>
    %15 = vector.shape_cast %14 : vector<1x128x8xbf16> to vector<128x8xbf16>
    %16 = arith.maximumf %13, %15 : vector<128x8xbf16>
    %c6 = arith.constant 6 : index
    %c0_12 = arith.constant 0 : index
    %c0_13 = arith.constant 0 : index
    %17 = vector.load %arg1[%c6, %c0_12, %c0_13] : memref<9x128x8xbf16, #tpu.memory_space<vmem>>, vector<1x128x8xbf16>
    %18 = vector.shape_cast %17 : vector<1x128x8xbf16> to vector<128x8xbf16>
    %19 = arith.maximumf %16, %18 : vector<128x8xbf16>
    %c7 = arith.constant 7 : index
    %c0_14 = arith.constant 0 : index
    %c0_15 = arith.constant 0 : index
    %20 = vector.load %arg1[%c7, %c0_14, %c0_15] : memref<9x128x8xbf16, #tpu.memory_space<vmem>>, vector<1x128x8xbf16>
    %21 = vector.shape_cast %20 : vector<1x128x8xbf16> to vector<128x8xbf16>
    %22 = arith.maximumf %19, %21 : vector<128x8xbf16>
    %c8 = arith.constant 8 : index
    %c0_16 = arith.constant 0 : index
    %c0_17 = arith.constant 0 : index
    %23 = vector.load %arg1[%c8, %c0_16, %c0_17] : memref<9x128x8xbf16, #tpu.memory_space<vmem>>, vector<1x128x8xbf16>
    %24 = vector.shape_cast %23 : vector<1x128x8xbf16> to vector<128x8xbf16>
    %25 = arith.maximumf %22, %24 : vector<128x8xbf16>
    %c0_18 = arith.constant 0 : index
    %c0_19 = arith.constant 0 : index
    %26 = vector.load %arg2[%c0_18, %c0_19] : memref<128x8xbf16, #tpu.memory_space<vmem>>, vector<128x8xbf16>
    tpu.vector_store %arg2[%c0_18, %c0_19], %25 {strides = array<i32>} : memref<128x8xbf16, #tpu.memory_space<vmem>>, vector<128x8xbf16>,
    return
  }
  func.func @transform_0(%arg0: i32) -> (i32, i32, i32) {
    %c0_i32 = arith.constant 0 : i32
    %c0_i32_0 = arith.constant 0 : i32
    %c0_i32_1 = arith.constant 0 : i32
    return %c0_i32, %arg0, %c0_i32_0 : i32, i32, i32
  }
  func.func @transform_1(%arg0: i32) -> (i32, i32) {
    %c0_i32 = arith.constant 0 : i32
    %c0_i32_0 = arith.constant 0 : i32
    return %arg0, %c0_i32 : i32, i32
  }
}

module attributes {stable_mosaic.version = 11 : i64} {
  func.func @_conv12_kernel(%arg0: i32, %arg1: memref<128x72xbf16, #tpu.memory_space<vmem>>, %arg2: memref<72x8xbf16, #tpu.memory_space<vmem>>, %arg3: memref<1x8xf32, #tpu.memory_space<vmem>>, %arg4: memref<8x16xbf16, #tpu.memory_space<vmem>>, %arg5: memref<1x16xf32, #tpu.memory_space<vmem>>, %arg6: memref<128x16xbf16, #tpu.memory_space<vmem>>) attributes {dimension_semantics = [#tpu.dimension_semantics<parallel>], iteration_bounds = array<i64: 1>, scalar_prefetch = 0 : i64, scratch_operands = 0 : i64, tpu.core_type = #tpu.core_type<tc>, window_params = [{transform_indices = @transform_0, window_bounds = array<i64: 128, 72>}, {pipeline_mode = #tpu.pipeline_mode<synchronous>, transform_indices = @transform_1, window_bounds = array<i64: 72, 8>}, {pipeline_mode = #tpu.pipeline_mode<synchronous>, transform_indices = @transform_2, window_bounds = array<i64: 1, 8>}, {pipeline_mode = #tpu.pipeline_mode<synchronous>, transform_indices = @transform_3, window_bounds = array<i64: 8, 16>}, {pipeline_mode = #tpu.pipeline_mode<synchronous>, transform_indices = @transform_4, window_bounds = array<i64: 1, 16>}, {transform_indices = @transform_5, window_bounds = array<i64: 128, 16>}]} {
    %c0 = arith.constant 0 : index
    %c0_0 = arith.constant 0 : index
    %0 = vector.load %arg1[%c0, %c0_0] : memref<128x72xbf16, #tpu.memory_space<vmem>>, vector<128x72xbf16>
    %c0_1 = arith.constant 0 : index
    %c0_2 = arith.constant 0 : index
    %1 = vector.load %arg2[%c0_1, %c0_2] : memref<72x8xbf16, #tpu.memory_space<vmem>>, vector<72x8xbf16>
    %cst = arith.constant dense<0.000000e+00> : vector<128x8xf32>
    %2 = tpu.matmul %0, %1, %cst {dimension_numbers = #tpu.dot_dimension_numbers<[1], [0], [0], [1], [0, 0, 1, 1], [], []>} : vector<128x72xbf16>, vector<72x8xbf16>, vector<128x8xf32> -> vector<128x8xf32>
    %c0_3 = arith.constant 0 : index
    %c0_4 = arith.constant 0 : index
    %3 = vector.load %arg3[%c0_3, %c0_4] : memref<1x8xf32, #tpu.memory_space<vmem>>, vector<1x8xf32>
    %4 = vector.broadcast %3 : vector<1x8xf32> to vector<128x8xf32>
    %5 = arith.addf %2, %4 : vector<128x8xf32>
    %cst_5 = arith.constant 0.000000e+00 : f32
    %6 = vector.broadcast %cst_5 : f32 to vector<128x8xf32>
    %7 = arith.maximumf %5, %6 : vector<128x8xf32>
    %8 = arith.truncf %7 : vector<128x8xf32> to vector<128x8xbf16>
    %c0_6 = arith.constant 0 : index
    %c0_7 = arith.constant 0 : index
    %9 = vector.load %arg4[%c0_6, %c0_7] : memref<8x16xbf16, #tpu.memory_space<vmem>>, vector<8x16xbf16>
    %cst_8 = arith.constant dense<0.000000e+00> : vector<128x16xf32>
    %10 = tpu.matmul %8, %9, %cst_8 {dimension_numbers = #tpu.dot_dimension_numbers<[1], [0], [0], [1], [0, 0, 1, 1], [], []>} : vector<128x8xbf16>, vector<8x16xbf16>, vector<128x16xf32> -> vector<128x16xf32>
    %c0_9 = arith.constant 0 : index
    %c0_10 = arith.constant 0 : index
    %11 = vector.load %arg5[%c0_9, %c0_10] : memref<1x16xf32, #tpu.memory_space<vmem>>, vector<1x16xf32>
    %12 = vector.broadcast %11 : vector<1x16xf32> to vector<128x16xf32>
    %13 = arith.addf %10, %12 : vector<128x16xf32>
    %cst_11 = arith.constant 0.000000e+00 : f32
    %14 = vector.broadcast %cst_11 : f32 to vector<128x16xf32>
    %15 = arith.maximumf %13, %14 : vector<128x16xf32>
    %16 = arith.truncf %15 : vector<128x16xf32> to vector<128x16xbf16>
    %c0_12 = arith.constant 0 : index
    %c0_13 = arith.constant 0 : index
    %17 = vector.load %arg6[%c0_12, %c0_13] : memref<128x16xbf16, #tpu.memory_space<vmem>>, vector<128x16xbf16>
    tpu.vector_store %arg6[%c0_12, %c0_13], %16 {strides = array<i32>} : memref<128x16xbf16, #tpu.memory_space<vmem>>, vector<128x16xbf16>,
    return
  }
  func.func @transform_0(%arg0: i32) -> (i32, i32) {
    %c0_i32 = arith.constant 0 : i32
    %c0_i32_0 = arith.constant 0 : i32
    return %arg0, %c0_i32 : i32, i32
  }
  func.func @transform_1(%arg0: i32) -> (i32, i32) {
    %c0_i32 = arith.constant 0 : i32
    %c0_i32_0 = arith.constant 0 : i32
    %c0_i32_1 = arith.constant 0 : i32
    return %c0_i32, %c0_i32_0 : i32, i32
  }
  func.func @transform_2(%arg0: i32) -> (i32, i32) {
    %c0_i32 = arith.constant 0 : i32
    %c0_i32_0 = arith.constant 0 : i32
    %c0_i32_1 = arith.constant 0 : i32
    return %c0_i32, %c0_i32_0 : i32, i32
  }
  func.func @transform_3(%arg0: i32) -> (i32, i32) {
    %c0_i32 = arith.constant 0 : i32
    %c0_i32_0 = arith.constant 0 : i32
    %c0_i32_1 = arith.constant 0 : i32
    return %c0_i32, %c0_i32_0 : i32, i32
  }
  func.func @transform_4(%arg0: i32) -> (i32, i32) {
    %c0_i32 = arith.constant 0 : i32
    %c0_i32_0 = arith.constant 0 : i32
    %c0_i32_1 = arith.constant 0 : i32
    return %c0_i32, %c0_i32_0 : i32, i32
  }
  func.func @transform_5(%arg0: i32) -> (i32, i32) {
    %c0_i32 = arith.constant 0 : i32
    %c0_i32_0 = arith.constant 0 : i32
    return %arg0, %c0_i32 : i32, i32
  }
}

module attributes {stable_mosaic.version = 11 : i64} {
  func.func @_conv34_kernel(%arg0: i32, %arg1: memref<128x144xbf16, #tpu.memory_space<vmem>>, %arg2: memref<128x8xbf16, #tpu.memory_space<vmem>>, %arg3: memref<144x16xbf16, #tpu.memory_space<vmem>>, %arg4: memref<1x16xf32, #tpu.memory_space<vmem>>, %arg5: memref<8x8xbf16, #tpu.memory_space<vmem>>, %arg6: memref<1x8xf32, #tpu.memory_space<vmem>>, %arg7: memref<128x16xbf16, #tpu.memory_space<vmem>>) attributes {dimension_semantics = [#tpu.dimension_semantics<parallel>], iteration_bounds = array<i64: 1>, scalar_prefetch = 0 : i64, scratch_operands = 0 : i64, tpu.core_type = #tpu.core_type<tc>, window_params = [{transform_indices = @transform_0, window_bounds = array<i64: 128, 144>}, {transform_indices = @transform_1, window_bounds = array<i64: 128, 8>}, {pipeline_mode = #tpu.pipeline_mode<synchronous>, transform_indices = @transform_2, window_bounds = array<i64: 144, 16>}, {pipeline_mode = #tpu.pipeline_mode<synchronous>, transform_indices = @transform_3, window_bounds = array<i64: 1, 16>}, {pipeline_mode = #tpu.pipeline_mode<synchronous>, transform_indices = @transform_4, window_bounds = array<i64: 8, 8>}, {pipeline_mode = #tpu.pipeline_mode<synchronous>, transform_indices = @transform_5, window_bounds = array<i64: 1, 8>}, {transform_indices = @transform_6, window_bounds = array<i64: 128, 16>}]} {
    %c0 = arith.constant 0 : index
    %c0_0 = arith.constant 0 : index
    %0 = vector.load %arg1[%c0, %c0_0] : memref<128x144xbf16, #tpu.memory_space<vmem>>, vector<128x144xbf16>
    %c0_1 = arith.constant 0 : index
    %c0_2 = arith.constant 0 : index
    %1 = vector.load %arg3[%c0_1, %c0_2] : memref<144x16xbf16, #tpu.memory_space<vmem>>, vector<144x16xbf16>
    %cst = arith.constant dense<0.000000e+00> : vector<128x16xf32>
    %2 = tpu.matmul %0, %1, %cst {dimension_numbers = #tpu.dot_dimension_numbers<[1], [0], [0], [1], [0, 0, 1, 1], [], []>} : vector<128x144xbf16>, vector<144x16xbf16>, vector<128x16xf32> -> vector<128x16xf32>
    %c0_3 = arith.constant 0 : index
    %c0_4 = arith.constant 0 : index
    %3 = vector.load %arg4[%c0_3, %c0_4] : memref<1x16xf32, #tpu.memory_space<vmem>>, vector<1x16xf32>
    %4 = vector.broadcast %3 : vector<1x16xf32> to vector<128x16xf32>
    %5 = arith.addf %2, %4 : vector<128x16xf32>
    %cst_5 = arith.constant 0.000000e+00 : f32
    %6 = vector.broadcast %cst_5 : f32 to vector<128x16xf32>
    %7 = arith.maximumf %5, %6 : vector<128x16xf32>
    %c0_6 = arith.constant 0 : index
    %c0_7 = arith.constant 0 : index
    %8 = vector.load %arg2[%c0_6, %c0_7] : memref<128x8xbf16, #tpu.memory_space<vmem>>, vector<128x8xbf16>
    %c0_8 = arith.constant 0 : index
    %c0_9 = arith.constant 0 : index
    %9 = vector.load %arg5[%c0_8, %c0_9] : memref<8x8xbf16, #tpu.memory_space<vmem>>, vector<8x8xbf16>
    %cst_10 = arith.constant dense<0.000000e+00> : vector<128x8xf32>
    %10 = tpu.matmul %8, %9, %cst_10 {dimension_numbers = #tpu.dot_dimension_numbers<[1], [0], [0], [1], [0, 0, 1, 1], [], []>} : vector<128x8xbf16>, vector<8x8xbf16>, vector<128x8xf32> -> vector<128x8xf32>
    %c0_11 = arith.constant 0 : index
    %c0_12 = arith.constant 0 : index
    %11 = vector.load %arg6[%c0_11, %c0_12] : memref<1x8xf32, #tpu.memory_space<vmem>>, vector<1x8xf32>
    %12 = vector.broadcast %11 : vector<1x8xf32> to vector<128x8xf32>
    %13 = arith.addf %10, %12 : vector<128x8xf32>
    %cst_13 = arith.constant 0.000000e+00 : f32
    %14 = vector.broadcast %cst_13 : f32 to vector<128x8xf32>
    %15 = arith.maximumf %13, %14 : vector<128x8xf32>
    %c0_14 = arith.constant 0 : index
    %c0_15 = arith.constant 0 : index
    %16 = vector.load %arg2[%c0_14, %c0_15] : memref<128x8xbf16, #tpu.memory_space<vmem>>, vector<128x8xbf16>
    %17 = arith.extf %16 : vector<128x8xbf16> to vector<128x8xf32>
    %18 = tpu.concatenate %15, %17 in 1 : vector<128x8xf32>, vector<128x8xf32> -> vector<128x16xf32>
    %19 = arith.addf %7, %18 : vector<128x16xf32>
    %20 = arith.truncf %19 : vector<128x16xf32> to vector<128x16xbf16>
    %c0_16 = arith.constant 0 : index
    %c0_17 = arith.constant 0 : index
    %21 = vector.load %arg7[%c0_16, %c0_17] : memref<128x16xbf16, #tpu.memory_space<vmem>>, vector<128x16xbf16>
    tpu.vector_store %arg7[%c0_16, %c0_17], %20 {strides = array<i32>} : memref<128x16xbf16, #tpu.memory_space<vmem>>, vector<128x16xbf16>,
    return
  }
  func.func @transform_0(%arg0: i32) -> (i32, i32) {
    %c0_i32 = arith.constant 0 : i32
    %c0_i32_0 = arith.constant 0 : i32
    return %arg0, %c0_i32 : i32, i32
  }
  func.func @transform_1(%arg0: i32) -> (i32, i32) {
    %c0_i32 = arith.constant 0 : i32
    %c0_i32_0 = arith.constant 0 : i32
    return %arg0, %c0_i32 : i32, i32
  }
  func.func @transform_2(%arg0: i32) -> (i32, i32) {
    %c0_i32 = arith.constant 0 : i32
    %c0_i32_0 = arith.constant 0 : i32
    %c0_i32_1 = arith.constant 0 : i32
    return %c0_i32, %c0_i32_0 : i32, i32
  }
  func.func @transform_3(%arg0: i32) -> (i32, i32) {
    %c0_i32 = arith.constant 0 : i32
    %c0_i32_0 = arith.constant 0 : i32
    %c0_i32_1 = arith.constant 0 : i32
    return %c0_i32, %c0_i32_0 : i32, i32
  }
  func.func @transform_4(%arg0: i32) -> (i32, i32) {
    %c0_i32 = arith.constant 0 : i32
    %c0_i32_0 = arith.constant 0 : i32
    %c0_i32_1 = arith.constant 0 : i32
    return %c0_i32, %c0_i32_0 : i32, i32
  }
  func.func @transform_5(%arg0: i32) -> (i32, i32) {
    %c0_i32 = arith.constant 0 : i32
    %c0_i32_0 = arith.constant 0 : i32
    %c0_i32_1 = arith.constant 0 : i32
    return %c0_i32, %c0_i32_0 : i32, i32
  }
  func.func @transform_6(%arg0: i32) -> (i32, i32) {
    %c0_i32 = arith.constant 0 : i32
    %c0_i32_0 = arith.constant 0 : i32
    return %arg0, %c0_i32 : i32, i32
  }
}

module attributes {stable_mosaic.version = 11 : i64} {
  func.func @_maxpool_kernel(%arg0: i32, %arg1: memref<9x32x8xbf16, #tpu.memory_space<vmem>>, %arg2: memref<32x16xbf16, #tpu.memory_space<vmem>>, %arg3: memref<32x16xbf16, #tpu.memory_space<vmem>>) attributes {dimension_semantics = [#tpu.dimension_semantics<parallel>], iteration_bounds = array<i64: 1>, scalar_prefetch = 0 : i64, scratch_operands = 0 : i64, tpu.core_type = #tpu.core_type<tc>, window_params = [{transform_indices = @transform_0, window_bounds = array<i64: 9, 32, 8>}, {transform_indices = @transform_1, window_bounds = array<i64: 32, 16>}, {transform_indices = @transform_2, window_bounds = array<i64: 32, 16>}]} {
    %c0 = arith.constant 0 : index
    %c0_0 = arith.constant 0 : index
    %c0_1 = arith.constant 0 : index
    %0 = vector.load %arg1[%c0, %c0_0, %c0_1] : memref<9x32x8xbf16, #tpu.memory_space<vmem>>, vector<1x32x8xbf16>
    %1 = vector.shape_cast %0 : vector<1x32x8xbf16> to vector<32x8xbf16>
    %c1 = arith.constant 1 : index
    %c0_2 = arith.constant 0 : index
    %c0_3 = arith.constant 0 : index
    %2 = vector.load %arg1[%c1, %c0_2, %c0_3] : memref<9x32x8xbf16, #tpu.memory_space<vmem>>, vector<1x32x8xbf16>
    %3 = vector.shape_cast %2 : vector<1x32x8xbf16> to vector<32x8xbf16>
    %4 = arith.maximumf %1, %3 : vector<32x8xbf16>
    %c2 = arith.constant 2 : index
    %c0_4 = arith.constant 0 : index
    %c0_5 = arith.constant 0 : index
    %5 = vector.load %arg1[%c2, %c0_4, %c0_5] : memref<9x32x8xbf16, #tpu.memory_space<vmem>>, vector<1x32x8xbf16>
    %6 = vector.shape_cast %5 : vector<1x32x8xbf16> to vector<32x8xbf16>
    %7 = arith.maximumf %4, %6 : vector<32x8xbf16>
    %c3 = arith.constant 3 : index
    %c0_6 = arith.constant 0 : index
    %c0_7 = arith.constant 0 : index
    %8 = vector.load %arg1[%c3, %c0_6, %c0_7] : memref<9x32x8xbf16, #tpu.memory_space<vmem>>, vector<1x32x8xbf16>
    %9 = vector.shape_cast %8 : vector<1x32x8xbf16> to vector<32x8xbf16>
    %10 = arith.maximumf %7, %9 : vector<32x8xbf16>
    %c4 = arith.constant 4 : index
    %c0_8 = arith.constant 0 : index
    %c0_9 = arith.constant 0 : index
    %11 = vector.load %arg1[%c4, %c0_8, %c0_9] : memref<9x32x8xbf16, #tpu.memory_space<vmem>>, vector<1x32x8xbf16>
    %12 = vector.shape_cast %11 : vector<1x32x8xbf16> to vector<32x8xbf16>
    %13 = arith.maximumf %10, %12 : vector<32x8xbf16>
    %c5 = arith.constant 5 : index
    %c0_10 = arith.constant 0 : index
    %c0_11 = arith.constant 0 : index
    %14 = vector.load %arg1[%c5, %c0_10, %c0_11] : memref<9x32x8xbf16, #tpu.memory_space<vmem>>, vector<1x32x8xbf16>
    %15 = vector.shape_cast %14 : vector<1x32x8xbf16> to vector<32x8xbf16>
    %16 = arith.maximumf %13, %15 : vector<32x8xbf16>
    %c6 = arith.constant 6 : index
    %c0_12 = arith.constant 0 : index
    %c0_13 = arith.constant 0 : index
    %17 = vector.load %arg1[%c6, %c0_12, %c0_13] : memref<9x32x8xbf16, #tpu.memory_space<vmem>>, vector<1x32x8xbf16>
    %18 = vector.shape_cast %17 : vector<1x32x8xbf16> to vector<32x8xbf16>
    %19 = arith.maximumf %16, %18 : vector<32x8xbf16>
    %c7 = arith.constant 7 : index
    %c0_14 = arith.constant 0 : index
    %c0_15 = arith.constant 0 : index
    %20 = vector.load %arg1[%c7, %c0_14, %c0_15] : memref<9x32x8xbf16, #tpu.memory_space<vmem>>, vector<1x32x8xbf16>
    %21 = vector.shape_cast %20 : vector<1x32x8xbf16> to vector<32x8xbf16>
    %22 = arith.maximumf %19, %21 : vector<32x8xbf16>
    %c8 = arith.constant 8 : index
    %c0_16 = arith.constant 0 : index
    %c0_17 = arith.constant 0 : index
    %23 = vector.load %arg1[%c8, %c0_16, %c0_17] : memref<9x32x8xbf16, #tpu.memory_space<vmem>>, vector<1x32x8xbf16>
    %24 = vector.shape_cast %23 : vector<1x32x8xbf16> to vector<32x8xbf16>
    %25 = arith.maximumf %22, %24 : vector<32x8xbf16>
    %26 = tpu.concatenate %25, %25 in 1 : vector<32x8xbf16>, vector<32x8xbf16> -> vector<32x16xbf16>
    %c0_18 = arith.constant 0 : index
    %c0_19 = arith.constant 0 : index
    %27 = vector.load %arg2[%c0_18, %c0_19] : memref<32x16xbf16, #tpu.memory_space<vmem>>, vector<32x16xbf16>
    %28 = arith.addf %27, %26 : vector<32x16xbf16>
    %c0_20 = arith.constant 0 : index
    %c0_21 = arith.constant 0 : index
    %29 = vector.load %arg3[%c0_20, %c0_21] : memref<32x16xbf16, #tpu.memory_space<vmem>>, vector<32x16xbf16>
    tpu.vector_store %arg3[%c0_20, %c0_21], %28 {strides = array<i32>} : memref<32x16xbf16, #tpu.memory_space<vmem>>, vector<32x16xbf16>,
    return
  }
  func.func @transform_0(%arg0: i32) -> (i32, i32, i32) {
    %c0_i32 = arith.constant 0 : i32
    %c0_i32_0 = arith.constant 0 : i32
    %c0_i32_1 = arith.constant 0 : i32
    return %c0_i32, %arg0, %c0_i32_0 : i32, i32, i32
  }
  func.func @transform_1(%arg0: i32) -> (i32, i32) {
    %c0_i32 = arith.constant 0 : i32
    %c0_i32_0 = arith.constant 0 : i32
    return %arg0, %c0_i32 : i32, i32
  }
  func.func @transform_2(%arg0: i32) -> (i32, i32) {
    %c0_i32 = arith.constant 0 : i32
    %c0_i32_0 = arith.constant 0 : i32
    return %arg0, %c0_i32 : i32, i32
  }
}

module attributes {stable_mosaic.version = 11 : i64} {
  func.func @_maxpool_kernel(%arg0: i32, %arg1: memref<9x32x16xbf16, #tpu.memory_space<vmem>>, %arg2: memref<32x16xbf16, #tpu.memory_space<vmem>>) attributes {dimension_semantics = [#tpu.dimension_semantics<parallel>], iteration_bounds = array<i64: 1>, scalar_prefetch = 0 : i64, scratch_operands = 0 : i64, tpu.core_type = #tpu.core_type<tc>, window_params = [{transform_indices = @transform_0, window_bounds = array<i64: 9, 32, 16>}, {transform_indices = @transform_1, window_bounds = array<i64: 32, 16>}]} {
    %c0 = arith.constant 0 : index
    %c0_0 = arith.constant 0 : index
    %c0_1 = arith.constant 0 : index
    %0 = vector.load %arg1[%c0, %c0_0, %c0_1] : memref<9x32x16xbf16, #tpu.memory_space<vmem>>, vector<1x32x16xbf16>
    %1 = vector.shape_cast %0 : vector<1x32x16xbf16> to vector<32x16xbf16>
    %c1 = arith.constant 1 : index
    %c0_2 = arith.constant 0 : index
    %c0_3 = arith.constant 0 : index
    %2 = vector.load %arg1[%c1, %c0_2, %c0_3] : memref<9x32x16xbf16, #tpu.memory_space<vmem>>, vector<1x32x16xbf16>
    %3 = vector.shape_cast %2 : vector<1x32x16xbf16> to vector<32x16xbf16>
    %4 = arith.maximumf %1, %3 : vector<32x16xbf16>
    %c2 = arith.constant 2 : index
    %c0_4 = arith.constant 0 : index
    %c0_5 = arith.constant 0 : index
    %5 = vector.load %arg1[%c2, %c0_4, %c0_5] : memref<9x32x16xbf16, #tpu.memory_space<vmem>>, vector<1x32x16xbf16>
    %6 = vector.shape_cast %5 : vector<1x32x16xbf16> to vector<32x16xbf16>
    %7 = arith.maximumf %4, %6 : vector<32x16xbf16>
    %c3 = arith.constant 3 : index
    %c0_6 = arith.constant 0 : index
    %c0_7 = arith.constant 0 : index
    %8 = vector.load %arg1[%c3, %c0_6, %c0_7] : memref<9x32x16xbf16, #tpu.memory_space<vmem>>, vector<1x32x16xbf16>
    %9 = vector.shape_cast %8 : vector<1x32x16xbf16> to vector<32x16xbf16>
    %10 = arith.maximumf %7, %9 : vector<32x16xbf16>
    %c4 = arith.constant 4 : index
    %c0_8 = arith.constant 0 : index
    %c0_9 = arith.constant 0 : index
    %11 = vector.load %arg1[%c4, %c0_8, %c0_9] : memref<9x32x16xbf16, #tpu.memory_space<vmem>>, vector<1x32x16xbf16>
    %12 = vector.shape_cast %11 : vector<1x32x16xbf16> to vector<32x16xbf16>
    %13 = arith.maximumf %10, %12 : vector<32x16xbf16>
    %c5 = arith.constant 5 : index
    %c0_10 = arith.constant 0 : index
    %c0_11 = arith.constant 0 : index
    %14 = vector.load %arg1[%c5, %c0_10, %c0_11] : memref<9x32x16xbf16, #tpu.memory_space<vmem>>, vector<1x32x16xbf16>
    %15 = vector.shape_cast %14 : vector<1x32x16xbf16> to vector<32x16xbf16>
    %16 = arith.maximumf %13, %15 : vector<32x16xbf16>
    %c6 = arith.constant 6 : index
    %c0_12 = arith.constant 0 : index
    %c0_13 = arith.constant 0 : index
    %17 = vector.load %arg1[%c6, %c0_12, %c0_13] : memref<9x32x16xbf16, #tpu.memory_space<vmem>>, vector<1x32x16xbf16>
    %18 = vector.shape_cast %17 : vector<1x32x16xbf16> to vector<32x16xbf16>
    %19 = arith.maximumf %16, %18 : vector<32x16xbf16>
    %c7 = arith.constant 7 : index
    %c0_14 = arith.constant 0 : index
    %c0_15 = arith.constant 0 : index
    %20 = vector.load %arg1[%c7, %c0_14, %c0_15] : memref<9x32x16xbf16, #tpu.memory_space<vmem>>, vector<1x32x16xbf16>
    %21 = vector.shape_cast %20 : vector<1x32x16xbf16> to vector<32x16xbf16>
    %22 = arith.maximumf %19, %21 : vector<32x16xbf16>
    %c8 = arith.constant 8 : index
    %c0_16 = arith.constant 0 : index
    %c0_17 = arith.constant 0 : index
    %23 = vector.load %arg1[%c8, %c0_16, %c0_17] : memref<9x32x16xbf16, #tpu.memory_space<vmem>>, vector<1x32x16xbf16>
    %24 = vector.shape_cast %23 : vector<1x32x16xbf16> to vector<32x16xbf16>
    %25 = arith.maximumf %22, %24 : vector<32x16xbf16>
    %c0_18 = arith.constant 0 : index
    %c0_19 = arith.constant 0 : index
    %26 = vector.load %arg2[%c0_18, %c0_19] : memref<32x16xbf16, #tpu.memory_space<vmem>>, vector<32x16xbf16>
    tpu.vector_store %arg2[%c0_18, %c0_19], %25 {strides = array<i32>} : memref<32x16xbf16, #tpu.memory_space<vmem>>, vector<32x16xbf16>,
    return
  }
  func.func @transform_0(%arg0: i32) -> (i32, i32, i32) {
    %c0_i32 = arith.constant 0 : i32
    %c0_i32_0 = arith.constant 0 : i32
    %c0_i32_1 = arith.constant 0 : i32
    return %c0_i32, %arg0, %c0_i32_0 : i32, i32, i32
  }
  func.func @transform_1(%arg0: i32) -> (i32, i32) {
    %c0_i32 = arith.constant 0 : i32
    %c0_i32_0 = arith.constant 0 : i32
    return %arg0, %c0_i32 : i32, i32
  }
}

module attributes {stable_mosaic.version = 11 : i64} {
  func.func @_gemm_bias_act_kernel(%arg0: i32, %arg1: memref<32x144xbf16, #tpu.memory_space<vmem>>, %arg2: memref<144x16xbf16, #tpu.memory_space<vmem>>, %arg3: memref<1x16xf32, #tpu.memory_space<vmem>>, %arg4: memref<32x16xbf16, #tpu.memory_space<vmem>>) attributes {dimension_semantics = [#tpu.dimension_semantics<parallel>], iteration_bounds = array<i64: 1>, scalar_prefetch = 0 : i64, scratch_operands = 0 : i64, tpu.core_type = #tpu.core_type<tc>, window_params = [{transform_indices = @transform_0, window_bounds = array<i64: 32, 144>}, {pipeline_mode = #tpu.pipeline_mode<synchronous>, transform_indices = @transform_1, window_bounds = array<i64: 144, 16>}, {pipeline_mode = #tpu.pipeline_mode<synchronous>, transform_indices = @transform_2, window_bounds = array<i64: 1, 16>}, {transform_indices = @transform_3, window_bounds = array<i64: 32, 16>}]} {
    %c0 = arith.constant 0 : index
    %c0_0 = arith.constant 0 : index
    %0 = vector.load %arg1[%c0, %c0_0] : memref<32x144xbf16, #tpu.memory_space<vmem>>, vector<32x144xbf16>
    %c0_1 = arith.constant 0 : index
    %c0_2 = arith.constant 0 : index
    %1 = vector.load %arg2[%c0_1, %c0_2] : memref<144x16xbf16, #tpu.memory_space<vmem>>, vector<144x16xbf16>
    %cst = arith.constant dense<0.000000e+00> : vector<32x16xf32>
    %2 = tpu.matmul %0, %1, %cst {dimension_numbers = #tpu.dot_dimension_numbers<[1], [0], [0], [1], [0, 0, 1, 1], [], []>} : vector<32x144xbf16>, vector<144x16xbf16>, vector<32x16xf32> -> vector<32x16xf32>
    %c0_3 = arith.constant 0 : index
    %c0_4 = arith.constant 0 : index
    %3 = vector.load %arg3[%c0_3, %c0_4] : memref<1x16xf32, #tpu.memory_space<vmem>>, vector<1x16xf32>
    %4 = vector.broadcast %3 : vector<1x16xf32> to vector<32x16xf32>
    %5 = arith.addf %2, %4 : vector<32x16xf32>
    %cst_5 = arith.constant 0.000000e+00 : f32
    %6 = vector.broadcast %cst_5 : f32 to vector<32x16xf32>
    %7 = arith.maximumf %5, %6 : vector<32x16xf32>
    %8 = arith.truncf %7 : vector<32x16xf32> to vector<32x16xbf16>
    %c0_6 = arith.constant 0 : index
    %c0_7 = arith.constant 0 : index
    %9 = vector.load %arg4[%c0_6, %c0_7] : memref<32x16xbf16, #tpu.memory_space<vmem>>, vector<32x16xbf16>
    tpu.vector_store %arg4[%c0_6, %c0_7], %8 {strides = array<i32>} : memref<32x16xbf16, #tpu.memory_space<vmem>>, vector<32x16xbf16>,
    return
  }
  func.func @transform_0(%arg0: i32) -> (i32, i32) {
    %c0_i32 = arith.constant 0 : i32
    %c0_i32_0 = arith.constant 0 : i32
    return %arg0, %c0_i32 : i32, i32
  }
  func.func @transform_1(%arg0: i32) -> (i32, i32) {
    %c0_i32 = arith.constant 0 : i32
    %c0_i32_0 = arith.constant 0 : i32
    %c0_i32_1 = arith.constant 0 : i32
    return %c0_i32, %c0_i32_0 : i32, i32
  }
  func.func @transform_2(%arg0: i32) -> (i32, i32) {
    %c0_i32 = arith.constant 0 : i32
    %c0_i32_0 = arith.constant 0 : i32
    %c0_i32_1 = arith.constant 0 : i32
    return %c0_i32, %c0_i32_0 : i32, i32
  }
  func.func @transform_3(%arg0: i32) -> (i32, i32) {
    %c0_i32 = arith.constant 0 : i32
    %c0_i32_0 = arith.constant 0 : i32
    return %arg0, %c0_i32 : i32, i32
  }
}

module attributes {stable_mosaic.version = 11 : i64} {
  func.func @_conv12_kernel(%arg0: i32, %arg1: memref<32x144xbf16, #tpu.memory_space<vmem>>, %arg2: memref<144x16xbf16, #tpu.memory_space<vmem>>, %arg3: memref<1x16xf32, #tpu.memory_space<vmem>>, %arg4: memref<16x32xbf16, #tpu.memory_space<vmem>>, %arg5: memref<1x32xf32, #tpu.memory_space<vmem>>, %arg6: memref<32x32xbf16, #tpu.memory_space<vmem>>) attributes {dimension_semantics = [#tpu.dimension_semantics<parallel>], iteration_bounds = array<i64: 1>, scalar_prefetch = 0 : i64, scratch_operands = 0 : i64, tpu.core_type = #tpu.core_type<tc>, window_params = [{transform_indices = @transform_0, window_bounds = array<i64: 32, 144>}, {pipeline_mode = #tpu.pipeline_mode<synchronous>, transform_indices = @transform_1, window_bounds = array<i64: 144, 16>}, {pipeline_mode = #tpu.pipeline_mode<synchronous>, transform_indices = @transform_2, window_bounds = array<i64: 1, 16>}, {pipeline_mode = #tpu.pipeline_mode<synchronous>, transform_indices = @transform_3, window_bounds = array<i64: 16, 32>}, {pipeline_mode = #tpu.pipeline_mode<synchronous>, transform_indices = @transform_4, window_bounds = array<i64: 1, 32>}, {transform_indices = @transform_5, window_bounds = array<i64: 32, 32>}]} {
    %c0 = arith.constant 0 : index
    %c0_0 = arith.constant 0 : index
    %0 = vector.load %arg1[%c0, %c0_0] : memref<32x144xbf16, #tpu.memory_space<vmem>>, vector<32x144xbf16>
    %c0_1 = arith.constant 0 : index
    %c0_2 = arith.constant 0 : index
    %1 = vector.load %arg2[%c0_1, %c0_2] : memref<144x16xbf16, #tpu.memory_space<vmem>>, vector<144x16xbf16>
    %cst = arith.constant dense<0.000000e+00> : vector<32x16xf32>
    %2 = tpu.matmul %0, %1, %cst {dimension_numbers = #tpu.dot_dimension_numbers<[1], [0], [0], [1], [0, 0, 1, 1], [], []>} : vector<32x144xbf16>, vector<144x16xbf16>, vector<32x16xf32> -> vector<32x16xf32>
    %c0_3 = arith.constant 0 : index
    %c0_4 = arith.constant 0 : index
    %3 = vector.load %arg3[%c0_3, %c0_4] : memref<1x16xf32, #tpu.memory_space<vmem>>, vector<1x16xf32>
    %4 = vector.broadcast %3 : vector<1x16xf32> to vector<32x16xf32>
    %5 = arith.addf %2, %4 : vector<32x16xf32>
    %cst_5 = arith.constant 0.000000e+00 : f32
    %6 = vector.broadcast %cst_5 : f32 to vector<32x16xf32>
    %7 = arith.maximumf %5, %6 : vector<32x16xf32>
    %8 = arith.truncf %7 : vector<32x16xf32> to vector<32x16xbf16>
    %c0_6 = arith.constant 0 : index
    %c0_7 = arith.constant 0 : index
    %9 = vector.load %arg4[%c0_6, %c0_7] : memref<16x32xbf16, #tpu.memory_space<vmem>>, vector<16x32xbf16>
    %cst_8 = arith.constant dense<0.000000e+00> : vector<32x32xf32>
    %10 = tpu.matmul %8, %9, %cst_8 {dimension_numbers = #tpu.dot_dimension_numbers<[1], [0], [0], [1], [0, 0, 1, 1], [], []>} : vector<32x16xbf16>, vector<16x32xbf16>, vector<32x32xf32> -> vector<32x32xf32>
    %c0_9 = arith.constant 0 : index
    %c0_10 = arith.constant 0 : index
    %11 = vector.load %arg5[%c0_9, %c0_10] : memref<1x32xf32, #tpu.memory_space<vmem>>, vector<1x32xf32>
    %12 = vector.broadcast %11 : vector<1x32xf32> to vector<32x32xf32>
    %13 = arith.addf %10, %12 : vector<32x32xf32>
    %cst_11 = arith.constant 0.000000e+00 : f32
    %14 = vector.broadcast %cst_11 : f32 to vector<32x32xf32>
    %15 = arith.maximumf %13, %14 : vector<32x32xf32>
    %16 = arith.truncf %15 : vector<32x32xf32> to vector<32x32xbf16>
    %c0_12 = arith.constant 0 : index
    %c0_13 = arith.constant 0 : index
    %17 = vector.load %arg6[%c0_12, %c0_13] : memref<32x32xbf16, #tpu.memory_space<vmem>>, vector<32x32xbf16>
    tpu.vector_store %arg6[%c0_12, %c0_13], %16 {strides = array<i32>} : memref<32x32xbf16, #tpu.memory_space<vmem>>, vector<32x32xbf16>,
    return
  }
  func.func @transform_0(%arg0: i32) -> (i32, i32) {
    %c0_i32 = arith.constant 0 : i32
    %c0_i32_0 = arith.constant 0 : i32
    return %arg0, %c0_i32 : i32, i32
  }
  func.func @transform_1(%arg0: i32) -> (i32, i32) {
    %c0_i32 = arith.constant 0 : i32
    %c0_i32_0 = arith.constant 0 : i32
    %c0_i32_1 = arith.constant 0 : i32
    return %c0_i32, %c0_i32_0 : i32, i32
  }
  func.func @transform_2(%arg0: i32) -> (i32, i32) {
    %c0_i32 = arith.constant 0 : i32
    %c0_i32_0 = arith.constant 0 : i32
    %c0_i32_1 = arith.constant 0 : i32
    return %c0_i32, %c0_i32_0 : i32, i32
  }
  func.func @transform_3(%arg0: i32) -> (i32, i32) {
    %c0_i32 = arith.constant 0 : i32
    %c0_i32_0 = arith.constant 0 : i32
    %c0_i32_1 = arith.constant 0 : i32
    return %c0_i32, %c0_i32_0 : i32, i32
  }
  func.func @transform_4(%arg0: i32) -> (i32, i32) {
    %c0_i32 = arith.constant 0 : i32
    %c0_i32_0 = arith.constant 0 : i32
    %c0_i32_1 = arith.constant 0 : i32
    return %c0_i32, %c0_i32_0 : i32, i32
  }
  func.func @transform_5(%arg0: i32) -> (i32, i32) {
    %c0_i32 = arith.constant 0 : i32
    %c0_i32_0 = arith.constant 0 : i32
    return %arg0, %c0_i32 : i32, i32
  }
}

module attributes {stable_mosaic.version = 11 : i64} {
  func.func @_conv34_kernel(%arg0: i32, %arg1: memref<32x288xbf16, #tpu.memory_space<vmem>>, %arg2: memref<32x16xbf16, #tpu.memory_space<vmem>>, %arg3: memref<288x32xbf16, #tpu.memory_space<vmem>>, %arg4: memref<1x32xf32, #tpu.memory_space<vmem>>, %arg5: memref<16x16xbf16, #tpu.memory_space<vmem>>, %arg6: memref<1x16xf32, #tpu.memory_space<vmem>>, %arg7: memref<32x32xbf16, #tpu.memory_space<vmem>>) attributes {dimension_semantics = [#tpu.dimension_semantics<parallel>], iteration_bounds = array<i64: 1>, scalar_prefetch = 0 : i64, scratch_operands = 0 : i64, tpu.core_type = #tpu.core_type<tc>, window_params = [{transform_indices = @transform_0, window_bounds = array<i64: 32, 288>}, {transform_indices = @transform_1, window_bounds = array<i64: 32, 16>}, {pipeline_mode = #tpu.pipeline_mode<synchronous>, transform_indices = @transform_2, window_bounds = array<i64: 288, 32>}, {pipeline_mode = #tpu.pipeline_mode<synchronous>, transform_indices = @transform_3, window_bounds = array<i64: 1, 32>}, {pipeline_mode = #tpu.pipeline_mode<synchronous>, transform_indices = @transform_4, window_bounds = array<i64: 16, 16>}, {pipeline_mode = #tpu.pipeline_mode<synchronous>, transform_indices = @transform_5, window_bounds = array<i64: 1, 16>}, {transform_indices = @transform_6, window_bounds = array<i64: 32, 32>}]} {
    %c0 = arith.constant 0 : index
    %c0_0 = arith.constant 0 : index
    %0 = vector.load %arg1[%c0, %c0_0] : memref<32x288xbf16, #tpu.memory_space<vmem>>, vector<32x288xbf16>
    %c0_1 = arith.constant 0 : index
    %c0_2 = arith.constant 0 : index
    %1 = vector.load %arg3[%c0_1, %c0_2] : memref<288x32xbf16, #tpu.memory_space<vmem>>, vector<288x32xbf16>
    %cst = arith.constant dense<0.000000e+00> : vector<32x32xf32>
    %2 = tpu.matmul %0, %1, %cst {dimension_numbers = #tpu.dot_dimension_numbers<[1], [0], [0], [1], [0, 0, 1, 1], [], []>} : vector<32x288xbf16>, vector<288x32xbf16>, vector<32x32xf32> -> vector<32x32xf32>
    %c0_3 = arith.constant 0 : index
    %c0_4 = arith.constant 0 : index
    %3 = vector.load %arg4[%c0_3, %c0_4] : memref<1x32xf32, #tpu.memory_space<vmem>>, vector<1x32xf32>
    %4 = vector.broadcast %3 : vector<1x32xf32> to vector<32x32xf32>
    %5 = arith.addf %2, %4 : vector<32x32xf32>
    %cst_5 = arith.constant 0.000000e+00 : f32
    %6 = vector.broadcast %cst_5 : f32 to vector<32x32xf32>
    %7 = arith.maximumf %5, %6 : vector<32x32xf32>
    %c0_6 = arith.constant 0 : index
    %c0_7 = arith.constant 0 : index
    %8 = vector.load %arg2[%c0_6, %c0_7] : memref<32x16xbf16, #tpu.memory_space<vmem>>, vector<32x16xbf16>
    %c0_8 = arith.constant 0 : index
    %c0_9 = arith.constant 0 : index
    %9 = vector.load %arg5[%c0_8, %c0_9] : memref<16x16xbf16, #tpu.memory_space<vmem>>, vector<16x16xbf16>
    %cst_10 = arith.constant dense<0.000000e+00> : vector<32x16xf32>
    %10 = tpu.matmul %8, %9, %cst_10 {dimension_numbers = #tpu.dot_dimension_numbers<[1], [0], [0], [1], [0, 0, 1, 1], [], []>} : vector<32x16xbf16>, vector<16x16xbf16>, vector<32x16xf32> -> vector<32x16xf32>
    %c0_11 = arith.constant 0 : index
    %c0_12 = arith.constant 0 : index
    %11 = vector.load %arg6[%c0_11, %c0_12] : memref<1x16xf32, #tpu.memory_space<vmem>>, vector<1x16xf32>
    %12 = vector.broadcast %11 : vector<1x16xf32> to vector<32x16xf32>
    %13 = arith.addf %10, %12 : vector<32x16xf32>
    %cst_13 = arith.constant 0.000000e+00 : f32
    %14 = vector.broadcast %cst_13 : f32 to vector<32x16xf32>
    %15 = arith.maximumf %13, %14 : vector<32x16xf32>
    %c0_14 = arith.constant 0 : index
    %c0_15 = arith.constant 0 : index
    %16 = vector.load %arg2[%c0_14, %c0_15] : memref<32x16xbf16, #tpu.memory_space<vmem>>, vector<32x16xbf16>
    %17 = arith.extf %16 : vector<32x16xbf16> to vector<32x16xf32>
    %18 = tpu.concatenate %15, %17 in 1 : vector<32x16xf32>, vector<32x16xf32> -> vector<32x32xf32>
    %19 = arith.addf %7, %18 : vector<32x32xf32>
    %20 = arith.truncf %19 : vector<32x32xf32> to vector<32x32xbf16>
    %c0_16 = arith.constant 0 : index
    %c0_17 = arith.constant 0 : index
    %21 = vector.load %arg7[%c0_16, %c0_17] : memref<32x32xbf16, #tpu.memory_space<vmem>>, vector<32x32xbf16>
    tpu.vector_store %arg7[%c0_16, %c0_17], %20 {strides = array<i32>} : memref<32x32xbf16, #tpu.memory_space<vmem>>, vector<32x32xbf16>,
    return
  }
  func.func @transform_0(%arg0: i32) -> (i32, i32) {
    %c0_i32 = arith.constant 0 : i32
    %c0_i32_0 = arith.constant 0 : i32
    return %arg0, %c0_i32 : i32, i32
  }
  func.func @transform_1(%arg0: i32) -> (i32, i32) {
    %c0_i32 = arith.constant 0 : i32
    %c0_i32_0 = arith.constant 0 : i32
    return %arg0, %c0_i32 : i32, i32
  }
  func.func @transform_2(%arg0: i32) -> (i32, i32) {
    %c0_i32 = arith.constant 0 : i32
    %c0_i32_0 = arith.constant 0 : i32
    %c0_i32_1 = arith.constant 0 : i32
    return %c0_i32, %c0_i32_0 : i32, i32
  }
  func.func @transform_3(%arg0: i32) -> (i32, i32) {
    %c0_i32 = arith.constant 0 : i32
    %c0_i32_0 = arith.constant 0 : i32
    %c0_i32_1 = arith.constant 0 : i32
    return %c0_i32, %c0_i32_0 : i32, i32
  }
  func.func @transform_4(%arg0: i32) -> (i32, i32) {
    %c0_i32 = arith.constant 0 : i32
    %c0_i32_0 = arith.constant 0 : i32
    %c0_i32_1 = arith.constant 0 : i32
    return %c0_i32, %c0_i32_0 : i32, i32
  }
  func.func @transform_5(%arg0: i32) -> (i32, i32) {
    %c0_i32 = arith.constant 0 : i32
    %c0_i32_0 = arith.constant 0 : i32
    %c0_i32_1 = arith.constant 0 : i32
    return %c0_i32, %c0_i32_0 : i32, i32
  }
  func.func @transform_6(%arg0: i32) -> (i32, i32) {
    %c0_i32 = arith.constant 0 : i32
    %c0_i32_0 = arith.constant 0 : i32
    return %arg0, %c0_i32 : i32, i32
  }
}

module attributes {stable_mosaic.version = 11 : i64} {
  func.func @_maxpool_kernel(%arg0: i32, %arg1: memref<9x16x16xbf16, #tpu.memory_space<vmem>>, %arg2: memref<16x32xbf16, #tpu.memory_space<vmem>>, %arg3: memref<16x32xbf16, #tpu.memory_space<vmem>>) attributes {dimension_semantics = [#tpu.dimension_semantics<parallel>], iteration_bounds = array<i64: 1>, scalar_prefetch = 0 : i64, scratch_operands = 0 : i64, tpu.core_type = #tpu.core_type<tc>, window_params = [{transform_indices = @transform_0, window_bounds = array<i64: 9, 16, 16>}, {transform_indices = @transform_1, window_bounds = array<i64: 16, 32>}, {transform_indices = @transform_2, window_bounds = array<i64: 16, 32>}]} {
    %c0 = arith.constant 0 : index
    %c0_0 = arith.constant 0 : index
    %c0_1 = arith.constant 0 : index
    %0 = vector.load %arg1[%c0, %c0_0, %c0_1] : memref<9x16x16xbf16, #tpu.memory_space<vmem>>, vector<1x16x16xbf16>
    %1 = vector.shape_cast %0 : vector<1x16x16xbf16> to vector<16x16xbf16>
    %c1 = arith.constant 1 : index
    %c0_2 = arith.constant 0 : index
    %c0_3 = arith.constant 0 : index
    %2 = vector.load %arg1[%c1, %c0_2, %c0_3] : memref<9x16x16xbf16, #tpu.memory_space<vmem>>, vector<1x16x16xbf16>
    %3 = vector.shape_cast %2 : vector<1x16x16xbf16> to vector<16x16xbf16>
    %4 = arith.maximumf %1, %3 : vector<16x16xbf16>
    %c2 = arith.constant 2 : index
    %c0_4 = arith.constant 0 : index
    %c0_5 = arith.constant 0 : index
    %5 = vector.load %arg1[%c2, %c0_4, %c0_5] : memref<9x16x16xbf16, #tpu.memory_space<vmem>>, vector<1x16x16xbf16>
    %6 = vector.shape_cast %5 : vector<1x16x16xbf16> to vector<16x16xbf16>
    %7 = arith.maximumf %4, %6 : vector<16x16xbf16>
    %c3 = arith.constant 3 : index
    %c0_6 = arith.constant 0 : index
    %c0_7 = arith.constant 0 : index
    %8 = vector.load %arg1[%c3, %c0_6, %c0_7] : memref<9x16x16xbf16, #tpu.memory_space<vmem>>, vector<1x16x16xbf16>
    %9 = vector.shape_cast %8 : vector<1x16x16xbf16> to vector<16x16xbf16>
    %10 = arith.maximumf %7, %9 : vector<16x16xbf16>
    %c4 = arith.constant 4 : index
    %c0_8 = arith.constant 0 : index
    %c0_9 = arith.constant 0 : index
    %11 = vector.load %arg1[%c4, %c0_8, %c0_9] : memref<9x16x16xbf16, #tpu.memory_space<vmem>>, vector<1x16x16xbf16>
    %12 = vector.shape_cast %11 : vector<1x16x16xbf16> to vector<16x16xbf16>
    %13 = arith.maximumf %10, %12 : vector<16x16xbf16>
    %c5 = arith.constant 5 : index
    %c0_10 = arith.constant 0 : index
    %c0_11 = arith.constant 0 : index
    %14 = vector.load %arg1[%c5, %c0_10, %c0_11] : memref<9x16x16xbf16, #tpu.memory_space<vmem>>, vector<1x16x16xbf16>
    %15 = vector.shape_cast %14 : vector<1x16x16xbf16> to vector<16x16xbf16>
    %16 = arith.maximumf %13, %15 : vector<16x16xbf16>
    %c6 = arith.constant 6 : index
    %c0_12 = arith.constant 0 : index
    %c0_13 = arith.constant 0 : index
    %17 = vector.load %arg1[%c6, %c0_12, %c0_13] : memref<9x16x16xbf16, #tpu.memory_space<vmem>>, vector<1x16x16xbf16>
    %18 = vector.shape_cast %17 : vector<1x16x16xbf16> to vector<16x16xbf16>
    %19 = arith.maximumf %16, %18 : vector<16x16xbf16>
    %c7 = arith.constant 7 : index
    %c0_14 = arith.constant 0 : index
    %c0_15 = arith.constant 0 : index
    %20 = vector.load %arg1[%c7, %c0_14, %c0_15] : memref<9x16x16xbf16, #tpu.memory_space<vmem>>, vector<1x16x16xbf16>
    %21 = vector.shape_cast %20 : vector<1x16x16xbf16> to vector<16x16xbf16>
    %22 = arith.maximumf %19, %21 : vector<16x16xbf16>
    %c8 = arith.constant 8 : index
    %c0_16 = arith.constant 0 : index
    %c0_17 = arith.constant 0 : index
    %23 = vector.load %arg1[%c8, %c0_16, %c0_17] : memref<9x16x16xbf16, #tpu.memory_space<vmem>>, vector<1x16x16xbf16>
    %24 = vector.shape_cast %23 : vector<1x16x16xbf16> to vector<16x16xbf16>
    %25 = arith.maximumf %22, %24 : vector<16x16xbf16>
    %26 = tpu.concatenate %25, %25 in 1 : vector<16x16xbf16>, vector<16x16xbf16> -> vector<16x32xbf16>
    %c0_18 = arith.constant 0 : index
    %c0_19 = arith.constant 0 : index
    %27 = vector.load %arg2[%c0_18, %c0_19] : memref<16x32xbf16, #tpu.memory_space<vmem>>, vector<16x32xbf16>
    %28 = arith.addf %27, %26 : vector<16x32xbf16>
    %c0_20 = arith.constant 0 : index
    %c0_21 = arith.constant 0 : index
    %29 = vector.load %arg3[%c0_20, %c0_21] : memref<16x32xbf16, #tpu.memory_space<vmem>>, vector<16x32xbf16>
    tpu.vector_store %arg3[%c0_20, %c0_21], %28 {strides = array<i32>} : memref<16x32xbf16, #tpu.memory_space<vmem>>, vector<16x32xbf16>,
    return
  }
  func.func @transform_0(%arg0: i32) -> (i32, i32, i32) {
    %c0_i32 = arith.constant 0 : i32
    %c0_i32_0 = arith.constant 0 : i32
    %c0_i32_1 = arith.constant 0 : i32
    return %c0_i32, %arg0, %c0_i32_0 : i32, i32, i32
  }
  func.func @transform_1(%arg0: i32) -> (i32, i32) {
    %c0_i32 = arith.constant 0 : i32
    %c0_i32_0 = arith.constant 0 : i32
    return %arg0, %c0_i32 : i32, i32
  }
  func.func @transform_2(%arg0: i32) -> (i32, i32) {
    %c0_i32 = arith.constant 0 : i32
    %c0_i32_0 = arith.constant 0 : i32
    return %arg0, %c0_i32 : i32, i32
  }
}

module attributes {stable_mosaic.version = 11 : i64} {
  func.func @_maxpool_kernel(%arg0: i32, %arg1: memref<9x16x32xbf16, #tpu.memory_space<vmem>>, %arg2: memref<16x32xbf16, #tpu.memory_space<vmem>>) attributes {dimension_semantics = [#tpu.dimension_semantics<parallel>], iteration_bounds = array<i64: 1>, scalar_prefetch = 0 : i64, scratch_operands = 0 : i64, tpu.core_type = #tpu.core_type<tc>, window_params = [{transform_indices = @transform_0, window_bounds = array<i64: 9, 16, 32>}, {transform_indices = @transform_1, window_bounds = array<i64: 16, 32>}]} {
    %c0 = arith.constant 0 : index
    %c0_0 = arith.constant 0 : index
    %c0_1 = arith.constant 0 : index
    %0 = vector.load %arg1[%c0, %c0_0, %c0_1] : memref<9x16x32xbf16, #tpu.memory_space<vmem>>, vector<1x16x32xbf16>
    %1 = vector.shape_cast %0 : vector<1x16x32xbf16> to vector<16x32xbf16>
    %c1 = arith.constant 1 : index
    %c0_2 = arith.constant 0 : index
    %c0_3 = arith.constant 0 : index
    %2 = vector.load %arg1[%c1, %c0_2, %c0_3] : memref<9x16x32xbf16, #tpu.memory_space<vmem>>, vector<1x16x32xbf16>
    %3 = vector.shape_cast %2 : vector<1x16x32xbf16> to vector<16x32xbf16>
    %4 = arith.maximumf %1, %3 : vector<16x32xbf16>
    %c2 = arith.constant 2 : index
    %c0_4 = arith.constant 0 : index
    %c0_5 = arith.constant 0 : index
    %5 = vector.load %arg1[%c2, %c0_4, %c0_5] : memref<9x16x32xbf16, #tpu.memory_space<vmem>>, vector<1x16x32xbf16>
    %6 = vector.shape_cast %5 : vector<1x16x32xbf16> to vector<16x32xbf16>
    %7 = arith.maximumf %4, %6 : vector<16x32xbf16>
    %c3 = arith.constant 3 : index
    %c0_6 = arith.constant 0 : index
    %c0_7 = arith.constant 0 : index
    %8 = vector.load %arg1[%c3, %c0_6, %c0_7] : memref<9x16x32xbf16, #tpu.memory_space<vmem>>, vector<1x16x32xbf16>
    %9 = vector.shape_cast %8 : vector<1x16x32xbf16> to vector<16x32xbf16>
    %10 = arith.maximumf %7, %9 : vector<16x32xbf16>
    %c4 = arith.constant 4 : index
    %c0_8 = arith.constant 0 : index
    %c0_9 = arith.constant 0 : index
    %11 = vector.load %arg1[%c4, %c0_8, %c0_9] : memref<9x16x32xbf16, #tpu.memory_space<vmem>>, vector<1x16x32xbf16>
    %12 = vector.shape_cast %11 : vector<1x16x32xbf16> to vector<16x32xbf16>
    %13 = arith.maximumf %10, %12 : vector<16x32xbf16>
    %c5 = arith.constant 5 : index
    %c0_10 = arith.constant 0 : index
    %c0_11 = arith.constant 0 : index
    %14 = vector.load %arg1[%c5, %c0_10, %c0_11] : memref<9x16x32xbf16, #tpu.memory_space<vmem>>, vector<1x16x32xbf16>
    %15 = vector.shape_cast %14 : vector<1x16x32xbf16> to vector<16x32xbf16>
    %16 = arith.maximumf %13, %15 : vector<16x32xbf16>
    %c6 = arith.constant 6 : index
    %c0_12 = arith.constant 0 : index
    %c0_13 = arith.constant 0 : index
    %17 = vector.load %arg1[%c6, %c0_12, %c0_13] : memref<9x16x32xbf16, #tpu.memory_space<vmem>>, vector<1x16x32xbf16>
    %18 = vector.shape_cast %17 : vector<1x16x32xbf16> to vector<16x32xbf16>
    %19 = arith.maximumf %16, %18 : vector<16x32xbf16>
    %c7 = arith.constant 7 : index
    %c0_14 = arith.constant 0 : index
    %c0_15 = arith.constant 0 : index
    %20 = vector.load %arg1[%c7, %c0_14, %c0_15] : memref<9x16x32xbf16, #tpu.memory_space<vmem>>, vector<1x16x32xbf16>
    %21 = vector.shape_cast %20 : vector<1x16x32xbf16> to vector<16x32xbf16>
    %22 = arith.maximumf %19, %21 : vector<16x32xbf16>
    %c8 = arith.constant 8 : index
    %c0_16 = arith.constant 0 : index
    %c0_17 = arith.constant 0 : index
    %23 = vector.load %arg1[%c8, %c0_16, %c0_17] : memref<9x16x32xbf16, #tpu.memory_space<vmem>>, vector<1x16x32xbf16>
    %24 = vector.shape_cast %23 : vector<1x16x32xbf16> to vector<16x32xbf16>
    %25 = arith.maximumf %22, %24 : vector<16x32xbf16>
    %c0_18 = arith.constant 0 : index
    %c0_19 = arith.constant 0 : index
    %26 = vector.load %arg2[%c0_18, %c0_19] : memref<16x32xbf16, #tpu.memory_space<vmem>>, vector<16x32xbf16>
    tpu.vector_store %arg2[%c0_18, %c0_19], %25 {strides = array<i32>} : memref<16x32xbf16, #tpu.memory_space<vmem>>, vector<16x32xbf16>,
    return
  }
  func.func @transform_0(%arg0: i32) -> (i32, i32, i32) {
    %c0_i32 = arith.constant 0 : i32
    %c0_i32_0 = arith.constant 0 : i32
    %c0_i32_1 = arith.constant 0 : i32
    return %c0_i32, %arg0, %c0_i32_0 : i32, i32, i32
  }
  func.func @transform_1(%arg0: i32) -> (i32, i32) {
    %c0_i32 = arith.constant 0 : i32
    %c0_i32_0 = arith.constant 0 : i32
    return %arg0, %c0_i32 : i32, i32
  }
}

module attributes {stable_mosaic.version = 11 : i64} {
  func.func @_maxpool_kernel(%arg0: i32, %arg1: memref<9x16x8xbf16, #tpu.memory_space<vmem>>, %arg2: memref<16x32xbf16, #tpu.memory_space<vmem>>, %arg3: memref<16x32xbf16, #tpu.memory_space<vmem>>) attributes {dimension_semantics = [#tpu.dimension_semantics<parallel>], iteration_bounds = array<i64: 1>, scalar_prefetch = 0 : i64, scratch_operands = 0 : i64, tpu.core_type = #tpu.core_type<tc>, window_params = [{transform_indices = @transform_0, window_bounds = array<i64: 9, 16, 8>}, {transform_indices = @transform_1, window_bounds = array<i64: 16, 32>}, {transform_indices = @transform_2, window_bounds = array<i64: 16, 32>}]} {
    %c0 = arith.constant 0 : index
    %c0_0 = arith.constant 0 : index
    %c0_1 = arith.constant 0 : index
    %0 = vector.load %arg1[%c0, %c0_0, %c0_1] : memref<9x16x8xbf16, #tpu.memory_space<vmem>>, vector<1x16x8xbf16>
    %1 = vector.shape_cast %0 : vector<1x16x8xbf16> to vector<16x8xbf16>
    %c1 = arith.constant 1 : index
    %c0_2 = arith.constant 0 : index
    %c0_3 = arith.constant 0 : index
    %2 = vector.load %arg1[%c1, %c0_2, %c0_3] : memref<9x16x8xbf16, #tpu.memory_space<vmem>>, vector<1x16x8xbf16>
    %3 = vector.shape_cast %2 : vector<1x16x8xbf16> to vector<16x8xbf16>
    %4 = arith.maximumf %1, %3 : vector<16x8xbf16>
    %c2 = arith.constant 2 : index
    %c0_4 = arith.constant 0 : index
    %c0_5 = arith.constant 0 : index
    %5 = vector.load %arg1[%c2, %c0_4, %c0_5] : memref<9x16x8xbf16, #tpu.memory_space<vmem>>, vector<1x16x8xbf16>
    %6 = vector.shape_cast %5 : vector<1x16x8xbf16> to vector<16x8xbf16>
    %7 = arith.maximumf %4, %6 : vector<16x8xbf16>
    %c3 = arith.constant 3 : index
    %c0_6 = arith.constant 0 : index
    %c0_7 = arith.constant 0 : index
    %8 = vector.load %arg1[%c3, %c0_6, %c0_7] : memref<9x16x8xbf16, #tpu.memory_space<vmem>>, vector<1x16x8xbf16>
    %9 = vector.shape_cast %8 : vector<1x16x8xbf16> to vector<16x8xbf16>
    %10 = arith.maximumf %7, %9 : vector<16x8xbf16>
    %c4 = arith.constant 4 : index
    %c0_8 = arith.constant 0 : index
    %c0_9 = arith.constant 0 : index
    %11 = vector.load %arg1[%c4, %c0_8, %c0_9] : memref<9x16x8xbf16, #tpu.memory_space<vmem>>, vector<1x16x8xbf16>
    %12 = vector.shape_cast %11 : vector<1x16x8xbf16> to vector<16x8xbf16>
    %13 = arith.maximumf %10, %12 : vector<16x8xbf16>
    %c5 = arith.constant 5 : index
    %c0_10 = arith.constant 0 : index
    %c0_11 = arith.constant 0 : index
    %14 = vector.load %arg1[%c5, %c0_10, %c0_11] : memref<9x16x8xbf16, #tpu.memory_space<vmem>>, vector<1x16x8xbf16>
    %15 = vector.shape_cast %14 : vector<1x16x8xbf16> to vector<16x8xbf16>
    %16 = arith.maximumf %13, %15 : vector<16x8xbf16>
    %c6 = arith.constant 6 : index
    %c0_12 = arith.constant 0 : index
    %c0_13 = arith.constant 0 : index
    %17 = vector.load %arg1[%c6, %c0_12, %c0_13] : memref<9x16x8xbf16, #tpu.memory_space<vmem>>, vector<1x16x8xbf16>
    %18 = vector.shape_cast %17 : vector<1x16x8xbf16> to vector<16x8xbf16>
    %19 = arith.maximumf %16, %18 : vector<16x8xbf16>
    %c7 = arith.constant 7 : index
    %c0_14 = arith.constant 0 : index
    %c0_15 = arith.constant 0 : index
    %20 = vector.load %arg1[%c7, %c0_14, %c0_15] : memref<9x16x8xbf16, #tpu.memory_space<vmem>>, vector<1x16x8xbf16>
    %21 = vector.shape_cast %20 : vector<1x16x8xbf16> to vector<16x8xbf16>
    %22 = arith.maximumf %19, %21 : vector<16x8xbf16>
    %c8 = arith.constant 8 : index
    %c0_16 = arith.constant 0 : index
    %c0_17 = arith.constant 0 : index
    %23 = vector.load %arg1[%c8, %c0_16, %c0_17] : memref<9x16x8xbf16, #tpu.memory_space<vmem>>, vector<1x16x8xbf16>
    %24 = vector.shape_cast %23 : vector<1x16x8xbf16> to vector<16x8xbf16>
    %25 = arith.maximumf %22, %24 : vector<16x8xbf16>
    %26 = tpu.concatenate %25, %25, %25, %25 in 1 : vector<16x8xbf16>, vector<16x8xbf16>, vector<16x8xbf16>, vector<16x8xbf16> -> vector<16x32xbf16>
    %c0_18 = arith.constant 0 : index
    %c0_19 = arith.constant 0 : index
    %27 = vector.load %arg2[%c0_18, %c0_19] : memref<16x32xbf16, #tpu.memory_space<vmem>>, vector<16x32xbf16>
    %28 = arith.addf %27, %26 : vector<16x32xbf16>
    %c0_20 = arith.constant 0 : index
    %c0_21 = arith.constant 0 : index
    %29 = vector.load %arg3[%c0_20, %c0_21] : memref<16x32xbf16, #tpu.memory_space<vmem>>, vector<16x32xbf16>
    tpu.vector_store %arg3[%c0_20, %c0_21], %28 {strides = array<i32>} : memref<16x32xbf16, #tpu.memory_space<vmem>>, vector<16x32xbf16>,
    return
  }
  func.func @transform_0(%arg0: i32) -> (i32, i32, i32) {
    %c0_i32 = arith.constant 0 : i32
    %c0_i32_0 = arith.constant 0 : i32
    %c0_i32_1 = arith.constant 0 : i32
    return %c0_i32, %arg0, %c0_i32_0 : i32, i32, i32
  }
  func.func @transform_1(%arg0: i32) -> (i32, i32) {
    %c0_i32 = arith.constant 0 : i32
    %c0_i32_0 = arith.constant 0 : i32
    return %arg0, %c0_i32 : i32, i32
  }
  func.func @transform_2(%arg0: i32) -> (i32, i32) {
    %c0_i32 = arith.constant 0 : i32
    %c0_i32_0 = arith.constant 0 : i32
    return %arg0, %c0_i32 : i32, i32
  }
}

module attributes {stable_mosaic.version = 11 : i64} {
  func.func @_gemm_bias_act_kernel(%arg0: i32, %arg1: memref<16x288xbf16, #tpu.memory_space<vmem>>, %arg2: memref<288x32xbf16, #tpu.memory_space<vmem>>, %arg3: memref<1x32xf32, #tpu.memory_space<vmem>>, %arg4: memref<16x32xbf16, #tpu.memory_space<vmem>>) attributes {dimension_semantics = [#tpu.dimension_semantics<parallel>], iteration_bounds = array<i64: 1>, scalar_prefetch = 0 : i64, scratch_operands = 0 : i64, tpu.core_type = #tpu.core_type<tc>, window_params = [{transform_indices = @transform_0, window_bounds = array<i64: 16, 288>}, {pipeline_mode = #tpu.pipeline_mode<synchronous>, transform_indices = @transform_1, window_bounds = array<i64: 288, 32>}, {pipeline_mode = #tpu.pipeline_mode<synchronous>, transform_indices = @transform_2, window_bounds = array<i64: 1, 32>}, {transform_indices = @transform_3, window_bounds = array<i64: 16, 32>}]} {
    %c0 = arith.constant 0 : index
    %c0_0 = arith.constant 0 : index
    %0 = vector.load %arg1[%c0, %c0_0] : memref<16x288xbf16, #tpu.memory_space<vmem>>, vector<16x288xbf16>
    %c0_1 = arith.constant 0 : index
    %c0_2 = arith.constant 0 : index
    %1 = vector.load %arg2[%c0_1, %c0_2] : memref<288x32xbf16, #tpu.memory_space<vmem>>, vector<288x32xbf16>
    %cst = arith.constant dense<0.000000e+00> : vector<16x32xf32>
    %2 = tpu.matmul %0, %1, %cst {dimension_numbers = #tpu.dot_dimension_numbers<[1], [0], [0], [1], [0, 0, 1, 1], [], []>} : vector<16x288xbf16>, vector<288x32xbf16>, vector<16x32xf32> -> vector<16x32xf32>
    %c0_3 = arith.constant 0 : index
    %c0_4 = arith.constant 0 : index
    %3 = vector.load %arg3[%c0_3, %c0_4] : memref<1x32xf32, #tpu.memory_space<vmem>>, vector<1x32xf32>
    %4 = vector.broadcast %3 : vector<1x32xf32> to vector<16x32xf32>
    %5 = arith.addf %2, %4 : vector<16x32xf32>
    %cst_5 = arith.constant 0.000000e+00 : f32
    %6 = vector.broadcast %cst_5 : f32 to vector<16x32xf32>
    %7 = arith.maximumf %5, %6 : vector<16x32xf32>
    %8 = arith.truncf %7 : vector<16x32xf32> to vector<16x32xbf16>
    %c0_6 = arith.constant 0 : index
    %c0_7 = arith.constant 0 : index
    %9 = vector.load %arg4[%c0_6, %c0_7] : memref<16x32xbf16, #tpu.memory_space<vmem>>, vector<16x32xbf16>
    tpu.vector_store %arg4[%c0_6, %c0_7], %8 {strides = array<i32>} : memref<16x32xbf16, #tpu.memory_space<vmem>>, vector<16x32xbf16>,
    return
  }
  func.func @transform_0(%arg0: i32) -> (i32, i32) {
    %c0_i32 = arith.constant 0 : i32
    %c0_i32_0 = arith.constant 0 : i32
    return %arg0, %c0_i32 : i32, i32
  }
  func.func @transform_1(%arg0: i32) -> (i32, i32) {
    %c0_i32 = arith.constant 0 : i32
    %c0_i32_0 = arith.constant 0 : i32
    %c0_i32_1 = arith.constant 0 : i32
    return %c0_i32, %c0_i32_0 : i32, i32
  }
  func.func @transform_2(%arg0: i32) -> (i32, i32) {
    %c0_i32 = arith.constant 0 : i32
    %c0_i32_0 = arith.constant 0 : i32
    %c0_i32_1 = arith.constant 0 : i32
    return %c0_i32, %c0_i32_0 : i32, i32
  }
  func.func @transform_3(%arg0: i32) -> (i32, i32) {
    %c0_i32 = arith.constant 0 : i32
    %c0_i32_0 = arith.constant 0 : i32
    return %arg0, %c0_i32 : i32, i32
  }
}

module attributes {stable_mosaic.version = 11 : i64} {
  func.func @_gemm_bias_act_kernel(%arg0: i32, %arg1: memref<16x288xbf16, #tpu.memory_space<vmem>>, %arg2: memref<288x32xbf16, #tpu.memory_space<vmem>>, %arg3: memref<1x32xf32, #tpu.memory_space<vmem>>, %arg4: memref<16x32xbf16, #tpu.memory_space<vmem>>, %arg5: memref<16x32xbf16, #tpu.memory_space<vmem>>, %arg6: memref<16x32xbf16, #tpu.memory_space<vmem>>) attributes {dimension_semantics = [#tpu.dimension_semantics<parallel>], iteration_bounds = array<i64: 1>, scalar_prefetch = 0 : i64, scratch_operands = 0 : i64, tpu.core_type = #tpu.core_type<tc>, window_params = [{transform_indices = @transform_0, window_bounds = array<i64: 16, 288>}, {pipeline_mode = #tpu.pipeline_mode<synchronous>, transform_indices = @transform_1, window_bounds = array<i64: 288, 32>}, {pipeline_mode = #tpu.pipeline_mode<synchronous>, transform_indices = @transform_2, window_bounds = array<i64: 1, 32>}, {transform_indices = @transform_3, window_bounds = array<i64: 16, 32>}, {transform_indices = @transform_4, window_bounds = array<i64: 16, 32>}, {transform_indices = @transform_5, window_bounds = array<i64: 16, 32>}]} {
    %c0 = arith.constant 0 : index
    %c0_0 = arith.constant 0 : index
    %0 = vector.load %arg1[%c0, %c0_0] : memref<16x288xbf16, #tpu.memory_space<vmem>>, vector<16x288xbf16>
    %c0_1 = arith.constant 0 : index
    %c0_2 = arith.constant 0 : index
    %1 = vector.load %arg2[%c0_1, %c0_2] : memref<288x32xbf16, #tpu.memory_space<vmem>>, vector<288x32xbf16>
    %cst = arith.constant dense<0.000000e+00> : vector<16x32xf32>
    %2 = tpu.matmul %0, %1, %cst {dimension_numbers = #tpu.dot_dimension_numbers<[1], [0], [0], [1], [0, 0, 1, 1], [], []>} : vector<16x288xbf16>, vector<288x32xbf16>, vector<16x32xf32> -> vector<16x32xf32>
    %c0_3 = arith.constant 0 : index
    %c0_4 = arith.constant 0 : index
    %3 = vector.load %arg3[%c0_3, %c0_4] : memref<1x32xf32, #tpu.memory_space<vmem>>, vector<1x32xf32>
    %4 = vector.broadcast %3 : vector<1x32xf32> to vector<16x32xf32>
    %5 = arith.addf %2, %4 : vector<16x32xf32>
    %cst_5 = arith.constant 0.000000e+00 : f32
    %6 = vector.broadcast %cst_5 : f32 to vector<16x32xf32>
    %7 = arith.maximumf %5, %6 : vector<16x32xf32>
    %c0_6 = arith.constant 0 : index
    %c0_7 = arith.constant 0 : index
    %8 = vector.load %arg4[%c0_6, %c0_7] : memref<16x32xbf16, #tpu.memory_space<vmem>>, vector<16x32xbf16>
    %9 = arith.extf %8 : vector<16x32xbf16> to vector<16x32xf32>
    %10 = arith.addf %7, %9 : vector<16x32xf32>
    %c0_8 = arith.constant 0 : index
    %c0_9 = arith.constant 0 : index
    %11 = vector.load %arg5[%c0_8, %c0_9] : memref<16x32xbf16, #tpu.memory_space<vmem>>, vector<16x32xbf16>
    %12 = arith.extf %11 : vector<16x32xbf16> to vector<16x32xf32>
    %13 = arith.addf %10, %12 : vector<16x32xf32>
    %14 = arith.truncf %13 : vector<16x32xf32> to vector<16x32xbf16>
    %c0_10 = arith.constant 0 : index
    %c0_11 = arith.constant 0 : index
    %15 = vector.load %arg6[%c0_10, %c0_11] : memref<16x32xbf16, #tpu.memory_space<vmem>>, vector<16x32xbf16>
    tpu.vector_store %arg6[%c0_10, %c0_11], %14 {strides = array<i32>} : memref<16x32xbf16, #tpu.memory_space<vmem>>, vector<16x32xbf16>,
    return
  }
  func.func @transform_0(%arg0: i32) -> (i32, i32) {
    %c0_i32 = arith.constant 0 : i32
    %c0_i32_0 = arith.constant 0 : i32
    return %arg0, %c0_i32 : i32, i32
  }
  func.func @transform_1(%arg0: i32) -> (i32, i32) {
    %c0_i32 = arith.constant 0 : i32
    %c0_i32_0 = arith.constant 0 : i32
    %c0_i32_1 = arith.constant 0 : i32
    return %c0_i32, %c0_i32_0 : i32, i32
  }
  func.func @transform_2(%arg0: i32) -> (i32, i32) {
    %c0_i32 = arith.constant 0 : i32
    %c0_i32_0 = arith.constant 0 : i32
    %c0_i32_1 = arith.constant 0 : i32
    return %c0_i32, %c0_i32_0 : i32, i32
  }
  func.func @transform_3(%arg0: i32) -> (i32, i32) {
    %c0_i32 = arith.constant 0 : i32
    %c0_i32_0 = arith.constant 0 : i32
    return %arg0, %c0_i32 : i32, i32
  }
  func.func @transform_4(%arg0: i32) -> (i32, i32) {
    %c0_i32 = arith.constant 0 : i32
    %c0_i32_0 = arith.constant 0 : i32
    return %arg0, %c0_i32 : i32, i32
  }
  func.func @transform_5(%arg0: i32) -> (i32, i32) {
    %c0_i32 = arith.constant 0 : i32
    %c0_i32_0 = arith.constant 0 : i32
    return %arg0, %c0_i32 : i32, i32
  }
}

module attributes {stable_mosaic.version = 11 : i64} {
  func.func @_gemm_bias_act_kernel(%arg0: i32, %arg1: memref<16x576xbf16, #tpu.memory_space<vmem>>, %arg2: memref<576x32xbf16, #tpu.memory_space<vmem>>, %arg3: memref<1x32xf32, #tpu.memory_space<vmem>>, %arg4: memref<16x32xbf16, #tpu.memory_space<vmem>>) attributes {dimension_semantics = [#tpu.dimension_semantics<parallel>], iteration_bounds = array<i64: 1>, scalar_prefetch = 0 : i64, scratch_operands = 0 : i64, tpu.core_type = #tpu.core_type<tc>, window_params = [{transform_indices = @transform_0, window_bounds = array<i64: 16, 576>}, {pipeline_mode = #tpu.pipeline_mode<synchronous>, transform_indices = @transform_1, window_bounds = array<i64: 576, 32>}, {pipeline_mode = #tpu.pipeline_mode<synchronous>, transform_indices = @transform_2, window_bounds = array<i64: 1, 32>}, {transform_indices = @transform_3, window_bounds = array<i64: 16, 32>}]} {
    %c0 = arith.constant 0 : index
    %c0_0 = arith.constant 0 : index
    %0 = vector.load %arg1[%c0, %c0_0] : memref<16x576xbf16, #tpu.memory_space<vmem>>, vector<16x576xbf16>
    %c0_1 = arith.constant 0 : index
    %c0_2 = arith.constant 0 : index
    %1 = vector.load %arg2[%c0_1, %c0_2] : memref<576x32xbf16, #tpu.memory_space<vmem>>, vector<576x32xbf16>
    %cst = arith.constant dense<0.000000e+00> : vector<16x32xf32>
    %2 = tpu.matmul %0, %1, %cst {dimension_numbers = #tpu.dot_dimension_numbers<[1], [0], [0], [1], [0, 0, 1, 1], [], []>} : vector<16x576xbf16>, vector<576x32xbf16>, vector<16x32xf32> -> vector<16x32xf32>
    %c0_3 = arith.constant 0 : index
    %c0_4 = arith.constant 0 : index
    %3 = vector.load %arg3[%c0_3, %c0_4] : memref<1x32xf32, #tpu.memory_space<vmem>>, vector<1x32xf32>
    %4 = vector.broadcast %3 : vector<1x32xf32> to vector<16x32xf32>
    %5 = arith.addf %2, %4 : vector<16x32xf32>
    %cst_5 = arith.constant 0.000000e+00 : f32
    %6 = vector.broadcast %cst_5 : f32 to vector<16x32xf32>
    %7 = arith.maximumf %5, %6 : vector<16x32xf32>
    %8 = arith.truncf %7 : vector<16x32xf32> to vector<16x32xbf16>
    %c0_6 = arith.constant 0 : index
    %c0_7 = arith.constant 0 : index
    %9 = vector.load %arg4[%c0_6, %c0_7] : memref<16x32xbf16, #tpu.memory_space<vmem>>, vector<16x32xbf16>
    tpu.vector_store %arg4[%c0_6, %c0_7], %8 {strides = array<i32>} : memref<16x32xbf16, #tpu.memory_space<vmem>>, vector<16x32xbf16>,
    return
  }
  func.func @transform_0(%arg0: i32) -> (i32, i32) {
    %c0_i32 = arith.constant 0 : i32
    %c0_i32_0 = arith.constant 0 : i32
    return %arg0, %c0_i32 : i32, i32
  }
  func.func @transform_1(%arg0: i32) -> (i32, i32) {
    %c0_i32 = arith.constant 0 : i32
    %c0_i32_0 = arith.constant 0 : i32
    %c0_i32_1 = arith.constant 0 : i32
    return %c0_i32, %c0_i32_0 : i32, i32
  }
  func.func @transform_2(%arg0: i32) -> (i32, i32) {
    %c0_i32 = arith.constant 0 : i32
    %c0_i32_0 = arith.constant 0 : i32
    %c0_i32_1 = arith.constant 0 : i32
    return %c0_i32, %c0_i32_0 : i32, i32
  }
  func.func @transform_3(%arg0: i32) -> (i32, i32) {
    %c0_i32 = arith.constant 0 : i32
    %c0_i32_0 = arith.constant 0 : i32
    return %arg0, %c0_i32 : i32, i32
  }
}

module attributes {stable_mosaic.version = 11 : i64} {
  func.func @_gemm_bias_act_kernel(%arg0: i32, %arg1: memref<16x128xbf16, #tpu.memory_space<vmem>>, %arg2: memref<128x64xbf16, #tpu.memory_space<vmem>>, %arg3: memref<1x64xf32, #tpu.memory_space<vmem>>, %arg4: memref<16x64xbf16, #tpu.memory_space<vmem>>) attributes {dimension_semantics = [#tpu.dimension_semantics<parallel>], iteration_bounds = array<i64: 1>, scalar_prefetch = 0 : i64, scratch_operands = 0 : i64, tpu.core_type = #tpu.core_type<tc>, window_params = [{transform_indices = @transform_0, window_bounds = array<i64: 16, 128>}, {pipeline_mode = #tpu.pipeline_mode<synchronous>, transform_indices = @transform_1, window_bounds = array<i64: 128, 64>}, {pipeline_mode = #tpu.pipeline_mode<synchronous>, transform_indices = @transform_2, window_bounds = array<i64: 1, 64>}, {transform_indices = @transform_3, window_bounds = array<i64: 16, 64>}]} {
    %c0 = arith.constant 0 : index
    %c0_0 = arith.constant 0 : index
    %0 = vector.load %arg1[%c0, %c0_0] : memref<16x128xbf16, #tpu.memory_space<vmem>>, vector<16x128xbf16>
    %c0_1 = arith.constant 0 : index
    %c0_2 = arith.constant 0 : index
    %1 = vector.load %arg2[%c0_1, %c0_2] : memref<128x64xbf16, #tpu.memory_space<vmem>>, vector<128x64xbf16>
    %cst = arith.constant dense<0.000000e+00> : vector<16x64xf32>
    %2 = tpu.matmul %0, %1, %cst {dimension_numbers = #tpu.dot_dimension_numbers<[1], [0], [0], [1], [0, 0, 1, 1], [], []>} : vector<16x128xbf16>, vector<128x64xbf16>, vector<16x64xf32> -> vector<16x64xf32>
    %c0_3 = arith.constant 0 : index
    %c0_4 = arith.constant 0 : index
    %3 = vector.load %arg3[%c0_3, %c0_4] : memref<1x64xf32, #tpu.memory_space<vmem>>, vector<1x64xf32>
    %4 = vector.broadcast %3 : vector<1x64xf32> to vector<16x64xf32>
    %5 = arith.addf %2, %4 : vector<16x64xf32>
    %6 = arith.truncf %5 : vector<16x64xf32> to vector<16x64xbf16>
    %c0_5 = arith.constant 0 : index
    %c0_6 = arith.constant 0 : index
    %7 = vector.load %arg4[%c0_5, %c0_6] : memref<16x64xbf16, #tpu.memory_space<vmem>>, vector<16x64xbf16>
    tpu.vector_store %arg4[%c0_5, %c0_6], %6 {strides = array<i32>} : memref<16x64xbf16, #tpu.memory_space<vmem>>, vector<16x64xbf16>,
    return
  }
  func.func @transform_0(%arg0: i32) -> (i32, i32) {
    %c0_i32 = arith.constant 0 : i32
    %c0_i32_0 = arith.constant 0 : i32
    return %arg0, %c0_i32 : i32, i32
  }
  func.func @transform_1(%arg0: i32) -> (i32, i32) {
    %c0_i32 = arith.constant 0 : i32
    %c0_i32_0 = arith.constant 0 : i32
    %c0_i32_1 = arith.constant 0 : i32
    return %c0_i32, %c0_i32_0 : i32, i32
  }
  func.func @transform_2(%arg0: i32) -> (i32, i32) {
    %c0_i32 = arith.constant 0 : i32
    %c0_i32_0 = arith.constant 0 : i32
    %c0_i32_1 = arith.constant 0 : i32
    return %c0_i32, %c0_i32_0 : i32, i32
  }
  func.func @transform_3(%arg0: i32) -> (i32, i32) {
    %c0_i32 = arith.constant 0 : i32
    %c0_i32_0 = arith.constant 0 : i32
    return %arg0, %c0_i32 : i32, i32
  }
}

module attributes {stable_mosaic.version = 11 : i64} {
  func.func @_gemm_bias_act_kernel(%arg0: i32, %arg1: memref<32x288xbf16, #tpu.memory_space<vmem>>, %arg2: memref<288x16xbf16, #tpu.memory_space<vmem>>, %arg3: memref<1x16xf32, #tpu.memory_space<vmem>>, %arg4: memref<32x16xbf16, #tpu.memory_space<vmem>>) attributes {dimension_semantics = [#tpu.dimension_semantics<parallel>], iteration_bounds = array<i64: 1>, scalar_prefetch = 0 : i64, scratch_operands = 0 : i64, tpu.core_type = #tpu.core_type<tc>, window_params = [{transform_indices = @transform_0, window_bounds = array<i64: 32, 288>}, {pipeline_mode = #tpu.pipeline_mode<synchronous>, transform_indices = @transform_1, window_bounds = array<i64: 288, 16>}, {pipeline_mode = #tpu.pipeline_mode<synchronous>, transform_indices = @transform_2, window_bounds = array<i64: 1, 16>}, {transform_indices = @transform_3, window_bounds = array<i64: 32, 16>}]} {
    %c0 = arith.constant 0 : index
    %c0_0 = arith.constant 0 : index
    %0 = vector.load %arg1[%c0, %c0_0] : memref<32x288xbf16, #tpu.memory_space<vmem>>, vector<32x288xbf16>
    %c0_1 = arith.constant 0 : index
    %c0_2 = arith.constant 0 : index
    %1 = vector.load %arg2[%c0_1, %c0_2] : memref<288x16xbf16, #tpu.memory_space<vmem>>, vector<288x16xbf16>
    %cst = arith.constant dense<0.000000e+00> : vector<32x16xf32>
    %2 = tpu.matmul %0, %1, %cst {dimension_numbers = #tpu.dot_dimension_numbers<[1], [0], [0], [1], [0, 0, 1, 1], [], []>} : vector<32x288xbf16>, vector<288x16xbf16>, vector<32x16xf32> -> vector<32x16xf32>
    %c0_3 = arith.constant 0 : index
    %c0_4 = arith.constant 0 : index
    %3 = vector.load %arg3[%c0_3, %c0_4] : memref<1x16xf32, #tpu.memory_space<vmem>>, vector<1x16xf32>
    %4 = vector.broadcast %3 : vector<1x16xf32> to vector<32x16xf32>
    %5 = arith.addf %2, %4 : vector<32x16xf32>
    %cst_5 = arith.constant 0.000000e+00 : f32
    %6 = vector.broadcast %cst_5 : f32 to vector<32x16xf32>
    %7 = arith.maximumf %5, %6 : vector<32x16xf32>
    %8 = arith.truncf %7 : vector<32x16xf32> to vector<32x16xbf16>
    %c0_6 = arith.constant 0 : index
    %c0_7 = arith.constant 0 : index
    %9 = vector.load %arg4[%c0_6, %c0_7] : memref<32x16xbf16, #tpu.memory_space<vmem>>, vector<32x16xbf16>
    tpu.vector_store %arg4[%c0_6, %c0_7], %8 {strides = array<i32>} : memref<32x16xbf16, #tpu.memory_space<vmem>>, vector<32x16xbf16>,
    return
  }
  func.func @transform_0(%arg0: i32) -> (i32, i32) {
    %c0_i32 = arith.constant 0 : i32
    %c0_i32_0 = arith.constant 0 : i32
    return %arg0, %c0_i32 : i32, i32
  }
  func.func @transform_1(%arg0: i32) -> (i32, i32) {
    %c0_i32 = arith.constant 0 : i32
    %c0_i32_0 = arith.constant 0 : i32
    %c0_i32_1 = arith.constant 0 : i32
    return %c0_i32, %c0_i32_0 : i32, i32
  }
  func.func @transform_2(%arg0: i32) -> (i32, i32) {
    %c0_i32 = arith.constant 0 : i32
    %c0_i32_0 = arith.constant 0 : i32
    %c0_i32_1 = arith.constant 0 : i32
    return %c0_i32, %c0_i32_0 : i32, i32
  }
  func.func @transform_3(%arg0: i32) -> (i32, i32) {
    %c0_i32 = arith.constant 0 : i32
    %c0_i32_0 = arith.constant 0 : i32
    return %arg0, %c0_i32 : i32, i32
  }
}

module attributes {stable_mosaic.version = 11 : i64} {
  func.func @_gemm_bias_act_kernel(%arg0: i32, %arg1: memref<32x144xbf16, #tpu.memory_space<vmem>>, %arg2: memref<144x16xbf16, #tpu.memory_space<vmem>>, %arg3: memref<1x16xf32, #tpu.memory_space<vmem>>, %arg4: memref<32x16xbf16, #tpu.memory_space<vmem>>, %arg5: memref<32x16xbf16, #tpu.memory_space<vmem>>, %arg6: memref<32x16xbf16, #tpu.memory_space<vmem>>) attributes {dimension_semantics = [#tpu.dimension_semantics<parallel>], iteration_bounds = array<i64: 1>, scalar_prefetch = 0 : i64, scratch_operands = 0 : i64, tpu.core_type = #tpu.core_type<tc>, window_params = [{transform_indices = @transform_0, window_bounds = array<i64: 32, 144>}, {pipeline_mode = #tpu.pipeline_mode<synchronous>, transform_indices = @transform_1, window_bounds = array<i64: 144, 16>}, {pipeline_mode = #tpu.pipeline_mode<synchronous>, transform_indices = @transform_2, window_bounds = array<i64: 1, 16>}, {transform_indices = @transform_3, window_bounds = array<i64: 32, 16>}, {transform_indices = @transform_4, window_bounds = array<i64: 32, 16>}, {transform_indices = @transform_5, window_bounds = array<i64: 32, 16>}]} {
    %c0 = arith.constant 0 : index
    %c0_0 = arith.constant 0 : index
    %0 = vector.load %arg1[%c0, %c0_0] : memref<32x144xbf16, #tpu.memory_space<vmem>>, vector<32x144xbf16>
    %c0_1 = arith.constant 0 : index
    %c0_2 = arith.constant 0 : index
    %1 = vector.load %arg2[%c0_1, %c0_2] : memref<144x16xbf16, #tpu.memory_space<vmem>>, vector<144x16xbf16>
    %cst = arith.constant dense<0.000000e+00> : vector<32x16xf32>
    %2 = tpu.matmul %0, %1, %cst {dimension_numbers = #tpu.dot_dimension_numbers<[1], [0], [0], [1], [0, 0, 1, 1], [], []>} : vector<32x144xbf16>, vector<144x16xbf16>, vector<32x16xf32> -> vector<32x16xf32>
    %c0_3 = arith.constant 0 : index
    %c0_4 = arith.constant 0 : index
    %3 = vector.load %arg3[%c0_3, %c0_4] : memref<1x16xf32, #tpu.memory_space<vmem>>, vector<1x16xf32>
    %4 = vector.broadcast %3 : vector<1x16xf32> to vector<32x16xf32>
    %5 = arith.addf %2, %4 : vector<32x16xf32>
    %cst_5 = arith.constant 0.000000e+00 : f32
    %6 = vector.broadcast %cst_5 : f32 to vector<32x16xf32>
    %7 = arith.maximumf %5, %6 : vector<32x16xf32>
    %c0_6 = arith.constant 0 : index
    %c0_7 = arith.constant 0 : index
    %8 = vector.load %arg4[%c0_6, %c0_7] : memref<32x16xbf16, #tpu.memory_space<vmem>>, vector<32x16xbf16>
    %9 = arith.extf %8 : vector<32x16xbf16> to vector<32x16xf32>
    %10 = arith.addf %7, %9 : vector<32x16xf32>
    %c0_8 = arith.constant 0 : index
    %c0_9 = arith.constant 0 : index
    %11 = vector.load %arg5[%c0_8, %c0_9] : memref<32x16xbf16, #tpu.memory_space<vmem>>, vector<32x16xbf16>
    %12 = arith.extf %11 : vector<32x16xbf16> to vector<32x16xf32>
    %13 = arith.addf %10, %12 : vector<32x16xf32>
    %14 = arith.truncf %13 : vector<32x16xf32> to vector<32x16xbf16>
    %c0_10 = arith.constant 0 : index
    %c0_11 = arith.constant 0 : index
    %15 = vector.load %arg6[%c0_10, %c0_11] : memref<32x16xbf16, #tpu.memory_space<vmem>>, vector<32x16xbf16>
    tpu.vector_store %arg6[%c0_10, %c0_11], %14 {strides = array<i32>} : memref<32x16xbf16, #tpu.memory_space<vmem>>, vector<32x16xbf16>,
    return
  }
  func.func @transform_0(%arg0: i32) -> (i32, i32) {
    %c0_i32 = arith.constant 0 : i32
    %c0_i32_0 = arith.constant 0 : i32
    return %arg0, %c0_i32 : i32, i32
  }
  func.func @transform_1(%arg0: i32) -> (i32, i32) {
    %c0_i32 = arith.constant 0 : i32
    %c0_i32_0 = arith.constant 0 : i32
    %c0_i32_1 = arith.constant 0 : i32
    return %c0_i32, %c0_i32_0 : i32, i32
  }
  func.func @transform_2(%arg0: i32) -> (i32, i32) {
    %c0_i32 = arith.constant 0 : i32
    %c0_i32_0 = arith.constant 0 : i32
    %c0_i32_1 = arith.constant 0 : i32
    return %c0_i32, %c0_i32_0 : i32, i32
  }
  func.func @transform_3(%arg0: i32) -> (i32, i32) {
    %c0_i32 = arith.constant 0 : i32
    %c0_i32_0 = arith.constant 0 : i32
    return %arg0, %c0_i32 : i32, i32
  }
  func.func @transform_4(%arg0: i32) -> (i32, i32) {
    %c0_i32 = arith.constant 0 : i32
    %c0_i32_0 = arith.constant 0 : i32
    return %arg0, %c0_i32 : i32, i32
  }
  func.func @transform_5(%arg0: i32) -> (i32, i32) {
    %c0_i32 = arith.constant 0 : i32
    %c0_i32_0 = arith.constant 0 : i32
    return %arg0, %c0_i32 : i32, i32
  }
}

module attributes {stable_mosaic.version = 11 : i64} {
  func.func @_gemm_bias_act_kernel(%arg0: i32, %arg1: memref<32x16xbf16, #tpu.memory_space<vmem>>, %arg2: memref<16x1xbf16, #tpu.memory_space<vmem>>, %arg3: memref<1x1xf32, #tpu.memory_space<vmem>>, %arg4: memref<32x1xbf16, #tpu.memory_space<vmem>>) attributes {dimension_semantics = [#tpu.dimension_semantics<parallel>], iteration_bounds = array<i64: 1>, scalar_prefetch = 0 : i64, scratch_operands = 0 : i64, tpu.core_type = #tpu.core_type<tc>, window_params = [{transform_indices = @transform_0, window_bounds = array<i64: 32, 16>}, {pipeline_mode = #tpu.pipeline_mode<synchronous>, transform_indices = @transform_1, window_bounds = array<i64: 16, 1>}, {pipeline_mode = #tpu.pipeline_mode<synchronous>, transform_indices = @transform_2, window_bounds = array<i64: 1, 1>}, {transform_indices = @transform_3, window_bounds = array<i64: 32, 1>}]} {
    %c0 = arith.constant 0 : index
    %c0_0 = arith.constant 0 : index
    %0 = vector.load %arg1[%c0, %c0_0] : memref<32x16xbf16, #tpu.memory_space<vmem>>, vector<32x16xbf16>
    %c0_1 = arith.constant 0 : index
    %c0_2 = arith.constant 0 : index
    %1 = vector.load %arg2[%c0_1, %c0_2] : memref<16x1xbf16, #tpu.memory_space<vmem>>, vector<16x1xbf16>
    %cst = arith.constant dense<0.000000e+00> : vector<32x1xf32>
    %2 = tpu.matmul %0, %1, %cst {dimension_numbers = #tpu.dot_dimension_numbers<[1], [0], [0], [1], [0, 0, 1, 1], [], []>} : vector<32x16xbf16>, vector<16x1xbf16>, vector<32x1xf32> -> vector<32x1xf32>
    %c0_3 = arith.constant 0 : index
    %c0_4 = arith.constant 0 : index
    %3 = vector.load %arg3[%c0_3, %c0_4] : memref<1x1xf32, #tpu.memory_space<vmem>>, vector<1x1xf32>
    %4 = vector.broadcast %3 : vector<1x1xf32> to vector<32x1xf32>
    %5 = arith.addf %2, %4 : vector<32x1xf32>
    %cst_5 = arith.constant 0.000000e+00 : f32
    %6 = vector.broadcast %cst_5 : f32 to vector<32x1xf32>
    %7 = arith.maximumf %5, %6 : vector<32x1xf32>
    %8 = arith.truncf %7 : vector<32x1xf32> to vector<32x1xbf16>
    %c0_6 = arith.constant 0 : index
    %c0_7 = arith.constant 0 : index
    %9 = vector.load %arg4[%c0_6, %c0_7] : memref<32x1xbf16, #tpu.memory_space<vmem>>, vector<32x1xbf16>
    tpu.vector_store %arg4[%c0_6, %c0_7], %8 {strides = array<i32>} : memref<32x1xbf16, #tpu.memory_space<vmem>>, vector<32x1xbf16>,
    return
  }
  func.func @transform_0(%arg0: i32) -> (i32, i32) {
    %c0_i32 = arith.constant 0 : i32
    %c0_i32_0 = arith.constant 0 : i32
    return %arg0, %c0_i32 : i32, i32
  }
  func.func @transform_1(%arg0: i32) -> (i32, i32) {
    %c0_i32 = arith.constant 0 : i32
    %c0_i32_0 = arith.constant 0 : i32
    %c0_i32_1 = arith.constant 0 : i32
    return %c0_i32, %c0_i32_0 : i32, i32
  }
  func.func @transform_2(%arg0: i32) -> (i32, i32) {
    %c0_i32 = arith.constant 0 : i32
    %c0_i32_0 = arith.constant 0 : i32
    %c0_i32_1 = arith.constant 0 : i32
    return %c0_i32, %c0_i32_0 : i32, i32
  }
  func.func @transform_3(%arg0: i32) -> (i32, i32) {
    %c0_i32 = arith.constant 0 : i32
    %c0_i32_0 = arith.constant 0 : i32
    return %arg0, %c0_i32 : i32, i32
  }
}

module attributes {stable_mosaic.version = 11 : i64} {
  func.func @_gemm_bias_act_kernel(%arg0: i32, %arg1: memref<16x32xbf16, #tpu.memory_space<vmem>>, %arg2: memref<32x1xbf16, #tpu.memory_space<vmem>>, %arg3: memref<1x1xf32, #tpu.memory_space<vmem>>, %arg4: memref<16x1xbf16, #tpu.memory_space<vmem>>) attributes {dimension_semantics = [#tpu.dimension_semantics<parallel>], iteration_bounds = array<i64: 1>, scalar_prefetch = 0 : i64, scratch_operands = 0 : i64, tpu.core_type = #tpu.core_type<tc>, window_params = [{transform_indices = @transform_0, window_bounds = array<i64: 16, 32>}, {pipeline_mode = #tpu.pipeline_mode<synchronous>, transform_indices = @transform_1, window_bounds = array<i64: 32, 1>}, {pipeline_mode = #tpu.pipeline_mode<synchronous>, transform_indices = @transform_2, window_bounds = array<i64: 1, 1>}, {transform_indices = @transform_3, window_bounds = array<i64: 16, 1>}]} {
    %c0 = arith.constant 0 : index
    %c0_0 = arith.constant 0 : index
    %0 = vector.load %arg1[%c0, %c0_0] : memref<16x32xbf16, #tpu.memory_space<vmem>>, vector<16x32xbf16>
    %c0_1 = arith.constant 0 : index
    %c0_2 = arith.constant 0 : index
    %1 = vector.load %arg2[%c0_1, %c0_2] : memref<32x1xbf16, #tpu.memory_space<vmem>>, vector<32x1xbf16>
    %cst = arith.constant dense<0.000000e+00> : vector<16x1xf32>
    %2 = tpu.matmul %0, %1, %cst {dimension_numbers = #tpu.dot_dimension_numbers<[1], [0], [0], [1], [0, 0, 1, 1], [], []>} : vector<16x32xbf16>, vector<32x1xbf16>, vector<16x1xf32> -> vector<16x1xf32>
    %c0_3 = arith.constant 0 : index
    %c0_4 = arith.constant 0 : index
    %3 = vector.load %arg3[%c0_3, %c0_4] : memref<1x1xf32, #tpu.memory_space<vmem>>, vector<1x1xf32>
    %4 = vector.broadcast %3 : vector<1x1xf32> to vector<16x1xf32>
    %5 = arith.addf %2, %4 : vector<16x1xf32>
    %cst_5 = arith.constant 0.000000e+00 : f32
    %6 = vector.broadcast %cst_5 : f32 to vector<16x1xf32>
    %7 = arith.maximumf %5, %6 : vector<16x1xf32>
    %8 = arith.truncf %7 : vector<16x1xf32> to vector<16x1xbf16>
    %c0_6 = arith.constant 0 : index
    %c0_7 = arith.constant 0 : index
    %9 = vector.load %arg4[%c0_6, %c0_7] : memref<16x1xbf16, #tpu.memory_space<vmem>>, vector<16x1xbf16>
    tpu.vector_store %arg4[%c0_6, %c0_7], %8 {strides = array<i32>} : memref<16x1xbf16, #tpu.memory_space<vmem>>, vector<16x1xbf16>,
    return
  }
  func.func @transform_0(%arg0: i32) -> (i32, i32) {
    %c0_i32 = arith.constant 0 : i32
    %c0_i32_0 = arith.constant 0 : i32
    return %arg0, %c0_i32 : i32, i32
  }
  func.func @transform_1(%arg0: i32) -> (i32, i32) {
    %c0_i32 = arith.constant 0 : i32
    %c0_i32_0 = arith.constant 0 : i32
    %c0_i32_1 = arith.constant 0 : i32
    return %c0_i32, %c0_i32_0 : i32, i32
  }
  func.func @transform_2(%arg0: i32) -> (i32, i32) {
    %c0_i32 = arith.constant 0 : i32
    %c0_i32_0 = arith.constant 0 : i32
    %c0_i32_1 = arith.constant 0 : i32
    return %c0_i32, %c0_i32_0 : i32, i32
  }
  func.func @transform_3(%arg0: i32) -> (i32, i32) {
    %c0_i32 = arith.constant 0 : i32
    %c0_i32_0 = arith.constant 0 : i32
    return %arg0, %c0_i32 : i32, i32
  }
}

module attributes {stable_mosaic.version = 11 : i64} {
  func.func @_addn_kernel(%arg0: i32, %arg1: memref<32x16xbf16, #tpu.memory_space<vmem>>, %arg2: memref<32x16xbf16, #tpu.memory_space<vmem>>, %arg3: memref<32x16xbf16, #tpu.memory_space<vmem>>, %arg4: memref<32x16xbf16, #tpu.memory_space<vmem>>) attributes {dimension_semantics = [#tpu.dimension_semantics<parallel>], iteration_bounds = array<i64: 1>, scalar_prefetch = 0 : i64, scratch_operands = 0 : i64, tpu.core_type = #tpu.core_type<tc>, window_params = [{transform_indices = @transform_0, window_bounds = array<i64: 32, 16>}, {transform_indices = @transform_1, window_bounds = array<i64: 32, 16>}, {transform_indices = @transform_2, window_bounds = array<i64: 32, 16>}, {transform_indices = @transform_3, window_bounds = array<i64: 32, 16>}]} {
    %c0 = arith.constant 0 : index
    %c0_0 = arith.constant 0 : index
    %0 = vector.load %arg1[%c0, %c0_0] : memref<32x16xbf16, #tpu.memory_space<vmem>>, vector<32x16xbf16>
    %1 = arith.extf %0 : vector<32x16xbf16> to vector<32x16xf32>
    %c0_1 = arith.constant 0 : index
    %c0_2 = arith.constant 0 : index
    %2 = vector.load %arg2[%c0_1, %c0_2] : memref<32x16xbf16, #tpu.memory_space<vmem>>, vector<32x16xbf16>
    %3 = arith.extf %2 : vector<32x16xbf16> to vector<32x16xf32>
    %4 = arith.addf %1, %3 : vector<32x16xf32>
    %c0_3 = arith.constant 0 : index
    %c0_4 = arith.constant 0 : index
    %5 = vector.load %arg3[%c0_3, %c0_4] : memref<32x16xbf16, #tpu.memory_space<vmem>>, vector<32x16xbf16>
    %6 = arith.extf %5 : vector<32x16xbf16> to vector<32x16xf32>
    %7 = arith.addf %4, %6 : vector<32x16xf32>
    %8 = arith.truncf %7 : vector<32x16xf32> to vector<32x16xbf16>
    %c0_5 = arith.constant 0 : index
    %c0_6 = arith.constant 0 : index
    %9 = vector.load %arg4[%c0_5, %c0_6] : memref<32x16xbf16, #tpu.memory_space<vmem>>, vector<32x16xbf16>
    tpu.vector_store %arg4[%c0_5, %c0_6], %8 {strides = array<i32>} : memref<32x16xbf16, #tpu.memory_space<vmem>>, vector<32x16xbf16>,
    return
  }
  func.func @transform_0(%arg0: i32) -> (i32, i32) {
    %c0_i32 = arith.constant 0 : i32
    %c0_i32_0 = arith.constant 0 : i32
    return %arg0, %c0_i32 : i32, i32
  }
  func.func @transform_1(%arg0: i32) -> (i32, i32) {
    %c0_i32 = arith.constant 0 : i32
    %c0_i32_0 = arith.constant 0 : i32
    return %arg0, %c0_i32 : i32, i32
  }
  func.func @transform_2(%arg0: i32) -> (i32, i32) {
    %c0_i32 = arith.constant 0 : i32
    %c0_i32_0 = arith.constant 0 : i32
    return %arg0, %c0_i32 : i32, i32
  }
  func.func @transform_3(%arg0: i32) -> (i32, i32) {
    %c0_i32 = arith.constant 0 : i32
    %c0_i32_0 = arith.constant 0 : i32
    return %arg0, %c0_i32 : i32, i32
  }
}

module attributes {stable_mosaic.version = 11 : i64} {
  func.func @_gemm_bias_act_kernel(%arg0: i32, %arg1: memref<512x9xbf16, #tpu.memory_space<vmem>>, %arg2: memref<9x1xbf16, #tpu.memory_space<vmem>>, %arg3: memref<1x1xf32, #tpu.memory_space<vmem>>, %arg4: memref<512x1xf32, #tpu.memory_space<vmem>>) attributes {dimension_semantics = [#tpu.dimension_semantics<parallel>], iteration_bounds = array<i64: 1>, scalar_prefetch = 0 : i64, scratch_operands = 0 : i64, tpu.core_type = #tpu.core_type<tc>, window_params = [{transform_indices = @transform_0, window_bounds = array<i64: 512, 9>}, {pipeline_mode = #tpu.pipeline_mode<synchronous>, transform_indices = @transform_1, window_bounds = array<i64: 9, 1>}, {pipeline_mode = #tpu.pipeline_mode<synchronous>, transform_indices = @transform_2, window_bounds = array<i64: 1, 1>}, {transform_indices = @transform_3, window_bounds = array<i64: 512, 1>}]} {
    %c0 = arith.constant 0 : index
    %c0_0 = arith.constant 0 : index
    %0 = vector.load %arg1[%c0, %c0_0] : memref<512x9xbf16, #tpu.memory_space<vmem>>, vector<512x9xbf16>
    %c0_1 = arith.constant 0 : index
    %c0_2 = arith.constant 0 : index
    %1 = vector.load %arg2[%c0_1, %c0_2] : memref<9x1xbf16, #tpu.memory_space<vmem>>, vector<9x1xbf16>
    %cst = arith.constant dense<0.000000e+00> : vector<512x1xf32>
    %2 = tpu.matmul %0, %1, %cst {dimension_numbers = #tpu.dot_dimension_numbers<[1], [0], [0], [1], [0, 0, 1, 1], [], []>} : vector<512x9xbf16>, vector<9x1xbf16>, vector<512x1xf32> -> vector<512x1xf32>
    %c0_3 = arith.constant 0 : index
    %c0_4 = arith.constant 0 : index
    %3 = vector.load %arg3[%c0_3, %c0_4] : memref<1x1xf32, #tpu.memory_space<vmem>>, vector<1x1xf32>
    %4 = vector.broadcast %3 : vector<1x1xf32> to vector<512x1xf32>
    %5 = arith.addf %2, %4 : vector<512x1xf32>
    %c0_5 = arith.constant 0 : index
    %c0_6 = arith.constant 0 : index
    %6 = vector.load %arg4[%c0_5, %c0_6] : memref<512x1xf32, #tpu.memory_space<vmem>>, vector<512x1xf32>
    tpu.vector_store %arg4[%c0_5, %c0_6], %5 {strides = array<i32>} : memref<512x1xf32, #tpu.memory_space<vmem>>, vector<512x1xf32>,
    return
  }
  func.func @transform_0(%arg0: i32) -> (i32, i32) {
    %c0_i32 = arith.constant 0 : i32
    %c0_i32_0 = arith.constant 0 : i32
    return %arg0, %c0_i32 : i32, i32
  }
  func.func @transform_1(%arg0: i32) -> (i32, i32) {
    %c0_i32 = arith.constant 0 : i32
    %c0_i32_0 = arith.constant 0 : i32
    %c0_i32_1 = arith.constant 0 : i32
    return %c0_i32, %c0_i32_0 : i32, i32
  }
  func.func @transform_2(%arg0: i32) -> (i32, i32) {
    %c0_i32 = arith.constant 0 : i32
    %c0_i32_0 = arith.constant 0 : i32
    %c0_i32_1 = arith.constant 0 : i32
    return %c0_i32, %c0_i32_0 : i32, i32
  }
  func.func @transform_3(%arg0: i32) -> (i32, i32) {
    %c0_i32 = arith.constant 0 : i32
    %c0_i32_0 = arith.constant 0 : i32
    return %arg0, %c0_i32 : i32, i32
  }
}

</mosaic_0001>

<bundles_post_ra>
// kernel: cloudnetp_forward.26
= control target key start
LH: loop header
LB: loop body
LE: loop exit
PB: predicated region body
PF: predicated region fallthrough
CT: control target
= control target key end

     0   :  { %vm366_vm0 = vcmask 1041408   ;;  %vm269_vm1 = vcmask 293888   ;;  %vm640_vm2 = vcmask 31744   ;;  %vm1037_vm3 = vcmask 60416   ;;  %s1947_s1 = inlined_call_operand.vmem [shape: bf16[36,4], index: 1, kind: input, shape index: {}]   ;;  %s1948_s2 = inlined_call_operand.vmem [shape: f32[1,4], index: 2, kind: input, shape index: {}]   ;;  %s1949_s0 = inlined_call_operand.vmem [shape: bf16[512,36], index: 0, kind: input, shape index: {}]   ;;  %s1950_s3 = inlined_call_operand.vmem [shape: bf16[4,8], index: 3, kind: input, shape index: {}]   ;;  %s1951_s4 = inlined_call_operand.vmem [shape: f32[1,8], index: 4, kind: input, shape index: {}]   ;;  %s1952_s5 = inlined_call_operand.vmem [shape: bf16[512,8], index: 5, kind: output, shape index: {}]  }
   0x1   :  { %v89_v0 = vld [vmem:[%s1947_s1 + $0x10] sm:$0x3]  ;;  %v1339_v4 = vld [vmem:[%s1947_s1 + $0x8] sm:$0xff]  ;;  %v1338_v5 = vld [vmem:[%s1947_s1] sm:$0xff] }
   0x2   :  { %v263_v1 = vunpack.c.l.b16 %v89_v0  ;;  %v1306_v6 = vld [vmem:[%s1949_s0] sm:$0xff]  ;;  %v1307_v8 = vld [vmem:[%s1949_s0 + $0x8] sm:$0xff]  ;;  %v1308_v10 = vld [vmem:[%s1949_s0 + $0x10] sm:$0xff] }
   0x3   :  { %v1322_v7 = vld [vmem:[%s1949_s0 + $0x80] sm:$0xff]  ;;  %v1323_v9 = vld [vmem:[%s1949_s0 + $0x88] sm:$0xff]  ;;  %v1324_v11 = vld [vmem:[%s1949_s0 + $0x90] sm:$0xff] }
   0x4   :  { %v266_v2 = vpack.c.b16 %v263_v1, %v263_v1  ;;  %v1309_v12 = vld [vmem:[%s1949_s0 + $0x18] sm:$0xff]  ;;  %v1310_v14 = vld [vmem:[%s1949_s0 + $0x20] sm:$0xff]  ;;  %v1311_v16 = vld [vmem:[%s1949_s0 + $0x28] sm:$0xff] }
   0x5   :  { %v1325_v13 = vld [vmem:[%s1949_s0 + $0x98] sm:$0xff]  ;;  %v1326_v15 = vld [vmem:[%s1949_s0 + $0xa0] sm:$0xff]  ;;  %v1327_v17 = vld [vmem:[%s1949_s0 + $0xa8] sm:$0xff] }
   0x6   :  { %v368_v3 = vsel %vm366_vm0, %v266_v2, 0  ;;  %v1312_v18 = vld [vmem:[%s1949_s0 + $0x30] sm:$0xff]  ;;  %v635_v20 = vld [vmem:[%s1950_s3] sm:$0x3]  ;;  %v1313_v22 = vld [vmem:[%s1949_s0 + $0x38] sm:$0xff] }
   0x7   :  { %375 = vmatpush.bf16.msra.mxu0 %v368_v3  ;;  %1340 = vmatpush.bf16.msra.mxu2 %v368_v3  ;;  %v1328_v19 = vld [vmem:[%s1949_s0 + $0xb0] sm:$0xff]  ;;  %v738_v21 = vsel %vm366_vm0, %v635_v20, 0  ;;  %v1329_v23 = vld [vmem:[%s1949_s0 + $0xb8] sm:$0xff]  ;;  %v1314_v24 = vld [vmem:[%s1949_s0 + $0x40] sm:$0xff] }
   0x8   :  { %747 = vmatpush.bf16.msra.mxu1 %v738_v21  ;;  %1343 = vmatpush.bf16.msra.mxu3 %v738_v21  ;;  %v1330_v25 = vld [vmem:[%s1949_s0 + $0xc0] sm:$0xff]  ;;  %v1315_v38 = vld [vmem:[%s1949_s0 + $0x48] sm:$0xff]  ;;  %v1316_v54 = vld [vmem:[%s1949_s0 + $0x50] sm:$0xff] }
   0x9   :  { %v1463_v27 = vld [vmem:[%s1948_s2] ss:$0 sm:$0xff]  ;;  %v1331_v39 = vld [vmem:[%s1949_s0 + $0xc8] sm:$0xff]  ;;  %v1332_v55 = vld [vmem:[%s1949_s0 + $0xd0] sm:$0xff] }
   0xb   :  { %376 = vmatpush.bf16.msra.mxu0 %v1339_v4  ;;  %1341 = vmatpush.bf16.msra.mxu2 %v1339_v4 }
   0xf   :  { %377 = vmatpush.bf16.msra.mxu0 %v1338_v5  ;;  %1342 = vmatpush.bf16.msra.mxu2 %v1338_v5 }
  0x12   :  { %1242 = vmatmul.msk.bf16.vlgmr.msra.gmra.mxu0 %vm269_vm1, %v1306_v6  ;;  %1258 = vmatmul.msk.bf16.vlgmr.msra.gmra.mxu2 %vm269_vm1, %v1322_v7  ;;  %v1317_v6 = vld [vmem:[%s1949_s0 + $0x58] sm:$0xff] }
  0x13   :  { %v1333_v7 = vld [vmem:[%s1949_s0 + $0xd8] sm:$0xff] }
  0x22   :  { %1243 = vmatmul.msk.bf16.gmra.mxu0 %vm269_vm1, %v1307_v8  ;;  %1259 = vmatmul.msk.bf16.gmra.mxu2 %vm269_vm1, %v1323_v9 }
  0x32   :  { %1244 = vmatmul.msk.bf16.gmra.mxu0 %vm269_vm1, %v1308_v10  ;;  %1260 = vmatmul.msk.bf16.gmra.mxu2 %vm269_vm1, %v1324_v11 }
  0x42   :  { %1245 = vmatmul.msk.bf16.gmra.mxu0 %vm269_vm1, %v1309_v12  ;;  %1261 = vmatmul.msk.bf16.gmra.mxu2 %vm269_vm1, %v1325_v13 }
  0x52   :  { %1246 = vmatmul.msk.bf16.gmra.mxu0 %vm269_vm1, %v1310_v14  ;;  %1262 = vmatmul.msk.bf16.gmra.mxu2 %vm269_vm1, %v1326_v15 }
  0x62   :  { %1247 = vmatmul.msk.bf16.gmra.mxu0 %vm269_vm1, %v1311_v16  ;;  %1263 = vmatmul.msk.bf16.gmra.mxu2 %vm269_vm1, %v1327_v17 }
  0x72   :  { %1248 = vmatmul.msk.bf16.gmra.mxu0 %vm269_vm1, %v1312_v18  ;;  %1264 = vmatmul.msk.bf16.gmra.mxu2 %vm269_vm1, %v1328_v19 }
  0x82   :  { %1249 = vmatmul.msk.bf16.gmra.mxu0 %vm269_vm1, %v1313_v22  ;;  %1265 = vmatmul.msk.bf16.gmra.mxu2 %vm269_vm1, %v1329_v23  ;;  %v1318_v22 = vld [vmem:[%s1949_s0 + $0x60] sm:$0xff] }
  0x83   :  { %v1334_v23 = vld [vmem:[%s1949_s0 + $0xe0] sm:$0xff] }
  0x8f   :  { %v379_v26 = vpop.f32.mrf.mxu0 }
  0x90   :  { %v380_v29 = vadd.f32 %v1463_v27, %v379_v26 }
  0x92   :  { %1250 = vmatmul.msk.bf16.gmra.mxu0 %vm269_vm1, %v1314_v24  ;;  %1266 = vmatmul.msk.bf16.gmra.mxu2 %vm269_vm1, %v1330_v25  ;;  %v539_v32 = vmax.f32 %v380_v29, 0.0 }
  0x95   :  { %v459_v28 = vpop.f32.mrf.mxu2 }
  0x96   :  { %v460_v34 = vadd.f32 %v1463_v27, %v459_v28 }
  0x97   :  { %v381_v30 = vpop.f32.mrf.mxu0 }
  0x98   :  { %v382_v31 = vadd.f32 %v1463_v27, %v381_v30  ;;  %v571_v41 = vmax.f32 %v460_v34, 0.0 }
  0x9a   :  { %v540_v33 = vmax.f32 %v382_v31, 0.0 }
  0x9c   :  { %v603_v35 = vpack.c.bf16 %v540_v33, %v539_v32 }
  0x9d   :  { %v461_v36 = vpop.f32.mrf.mxu2 }
  0x9e   :  { %v462_v37 = vadd.f32 %v1463_v27, %v461_v36  ;;  %1274 = vmatmul.msk.bf16.vlgmr.msra.gmra.mxu1 %vm640_vm2, %v603_v35 }
  0x9f   :  { %v384_v40 = vpop.f32.mrf.mxu0 }
  0xa0   :  { %v572_v42 = vmax.f32 %v462_v37, 0.0  ;;  %v385_v45 = vadd.f32 %v1463_v27, %v384_v40  ;;  %v1335_v40 = vld [vmem:[%s1949_s0 + $0xe8] sm:$0xff] }
  0xa2   :  { %v1478_v43 = vpack.c.bf16 %v572_v42, %v571_v41  ;;  %1251 = vmatmul.msk.bf16.gmra.mxu0 %vm269_vm1, %v1315_v38  ;;  %1267 = vmatmul.msk.bf16.gmra.mxu2 %vm269_vm1, %v1331_v39  ;;  %v541_v48 = vmax.f32 %v385_v45, 0.0  ;;  %v1319_v39 = vld [vmem:[%s1949_s0 + $0x68] sm:$0xff] }
  0xa5   :  { %v464_v44 = vpop.f32.mrf.mxu2 }
  0xa6   :  { %v465_v50 = vadd.f32 %v1463_v27, %v464_v44 }
  0xa7   :  { %v386_v46 = vpop.f32.mrf.mxu0 }
  0xa8   :  { %v387_v47 = vadd.f32 %v1463_v27, %v386_v46  ;;  %v573_v57 = vmax.f32 %v465_v50, 0.0 }
  0xaa   :  { %v542_v49 = vmax.f32 %v387_v47, 0.0 }
  0xac   :  { %v604_v51 = vpack.c.bf16 %v542_v49, %v541_v48 }
  0xad   :  { %v466_v52 = vpop.f32.mrf.mxu2 }
  0xae   :  { %v467_v53 = vadd.f32 %v1463_v27, %v466_v52  ;;  %1275 = vmatmul.msk.bf16.gmra.mxu1 %vm640_vm2, %v604_v51 }
  0xaf   :  { %v389_v56 = vpop.f32.mrf.mxu0 }
  0xb0   :  { %v574_v58 = vmax.f32 %v467_v53, 0.0  ;;  %v390_v61 = vadd.f32 %v1463_v27, %v389_v56  ;;  %v1320_v56 = vld [vmem:[%s1949_s0 + $0x70] sm:$0xff] }
  0xb2   :  { %1252 = vmatmul.msk.bf16.gmra.mxu0 %vm269_vm1, %v1316_v54  ;;  %1268 = vmatmul.msk.bf16.gmra.mxu2 %vm269_vm1, %v1332_v55  ;;  %v620_v59 = vpack.c.bf16 %v574_v58, %v573_v57  ;;  %v543_v0 = vmax.f32 %v390_v61, 0.0  ;;  %v1336_v57 = vld [vmem:[%s1949_s0 + $0xf0] sm:$0xff] }
  0xb4   :  { %1291 = vmatmul.msk.bf16.vlgmr.msra.gmra.mxu3 %vm640_vm2, %v620_v59 }
  0xb5   :  { %v469_v60 = vpop.f32.mrf.mxu2 }
  0xb6   :  { %v470_v2 = vadd.f32 %v1463_v27, %v469_v60 }
  0xb7   :  { %v391_v62 = vpop.f32.mrf.mxu0 }
  0xb8   :  { %v392_v63 = vadd.f32 %v1463_v27, %v391_v62  ;;  %v575_v9 = vmax.f32 %v470_v2, 0.0 }
  0xba   :  { %v544_v1 = vmax.f32 %v392_v63, 0.0 }
  0xbc   :  { %v605_v3 = vpack.c.bf16 %v544_v1, %v543_v0 }
  0xbd   :  { %v471_v4 = vpop.f32.mrf.mxu2 }
  0xbe   :  { %v472_v5 = vadd.f32 %v1463_v27, %v471_v4  ;;  %1276 = vmatmul.msk.bf16.gmra.mxu1 %vm640_vm2, %v605_v3 }
  0xbf   :  { %v394_v8 = vpop.f32.mrf.mxu0 }
  0xc0   :  { %v576_v10 = vmax.f32 %v472_v5, 0.0  ;;  %v395_v13 = vadd.f32 %v1463_v27, %v394_v8  ;;  %v1321_v8 = vld [vmem:[%s1949_s0 + $0x78] sm:$0xff] }
  0xc2   :  { %1253 = vmatmul.msk.bf16.gmra.mxu0 %vm269_vm1, %v1317_v6  ;;  %1269 = vmatmul.msk.bf16.gmra.mxu2 %vm269_vm1, %v1333_v7  ;;  %v621_v11 = vpack.c.bf16 %v576_v10, %v575_v9  ;;  %v545_v16 = vmax.f32 %v395_v13, 0.0  ;;  %v1337_v9 = vld [vmem:[%s1949_s0 + $0xf8] sm:$0xff] }
  0xc4   :  { %1292 = vmatmul.msk.bf16.gmra.mxu3 %vm640_vm2, %v621_v11 }
  0xc5   :  { %v474_v12 = vpop.f32.mrf.mxu2 }
  0xc6   :  { %v475_v18 = vadd.f32 %v1463_v27, %v474_v12 }
  0xc7   :  { %v396_v14 = vpop.f32.mrf.mxu0 }
  0xc8   :  { %v397_v15 = vadd.f32 %v1463_v27, %v396_v14  ;;  %v577_v25 = vmax.f32 %v475_v18, 0.0 }
  0xca   :  { %v546_v17 = vmax.f32 %v397_v15, 0.0 }
  0xcc   :  { %v606_v19 = vpack.c.bf16 %v546_v17, %v545_v16 }
  0xcd   :  { %v476_v20 = vpop.f32.mrf.mxu2 }
  0xce   :  { %v477_v21 = vadd.f32 %v1463_v27, %v476_v20  ;;  %1277 = vmatmul.msk.bf16.gmra.mxu1 %vm640_vm2, %v606_v19 }
  0xcf   :  { %v399_v24 = vpop.f32.mrf.mxu0 }
  0xd0   :  { %v578_v26 = vmax.f32 %v477_v21, 0.0  ;;  %v400_v30 = vadd.f32 %v1463_v27, %v399_v24 }
  0xd2   :  { %1254 = vmatmul.msk.bf16.gmra.mxu0 %vm269_vm1, %v1318_v22  ;;  %1270 = vmatmul.msk.bf16.gmra.mxu2 %vm269_vm1, %v1334_v23  ;;  %v622_v28 = vpack.c.bf16 %v578_v26, %v577_v25  ;;  %v547_v33 = vmax.f32 %v400_v30, 0.0 }
  0xd4   :  { %1293 = vmatmul.msk.bf16.gmra.mxu3 %vm640_vm2, %v622_v28 }
  0xd5   :  { %v479_v29 = vpop.f32.mrf.mxu2 }
  0xd6   :  { %v480_v35 = vadd.f32 %v1463_v27, %v479_v29 }
  0xd7   :  { %v401_v31 = vpop.f32.mrf.mxu0 }
  0xd8   :  { %v402_v32 = vadd.f32 %v1463_v27, %v401_v31  ;;  %v579_v42 = vmax.f32 %v480_v35, 0.0 }
  0xda   :  { %v548_v34 = vmax.f32 %v402_v32, 0.0 }
  0xdc   :  { %v607_v36 = vpack.c.bf16 %v548_v34, %v547_v33  ;;  %v1577_v33 = vld [vmem:[%s1951_s4] ss:$0 sm:$0xff] }
  0xdd   :  { %v481_v37 = vpop.f32.mrf.mxu2 }
  0xde   :  { %v482_v38 = vadd.f32 %v1463_v27, %v481_v37  ;;  %1278 = vmatmul.msk.bf16.gmra.mxu1 %vm640_vm2, %v607_v36 }
  0xdf   :  { %v404_v41 = vpop.f32.mrf.mxu0 }
  0xe0   :  { %v580_v44 = vmax.f32 %v482_v38, 0.0  ;;  %v405_v47 = vadd.f32 %v1463_v27, %v404_v41 }
  0xe2   :  { %v623_v45 = vpack.c.bf16 %v580_v44, %v579_v42  ;;  %1255 = vmatmul.msk.bf16.gmra.mxu0 %vm269_vm1, %v1319_v39  ;;  %1271 = vmatmul.msk.bf16.gmra.mxu2 %vm269_vm1, %v1335_v40  ;;  %v549_v50 = vmax.f32 %v405_v47, 0.0 }
  0xe4   :  { %1294 = vmatmul.msk.bf16.gmra.mxu3 %vm640_vm2, %v623_v45 }
  0xe5   :  { %v484_v46 = vpop.f32.mrf.mxu2 }
  0xe6   :  { %v485_v52 = vadd.f32 %v1463_v27, %v484_v46 }
  0xe7   :  { %v406_v48 = vpop.f32.mrf.mxu0 }
  0xe8   :  { %v407_v49 = vadd.f32 %v1463_v27, %v406_v48  ;;  %v581_v59 = vmax.f32 %v485_v52, 0.0 }
  0xea   :  { %v550_v51 = vmax.f32 %v407_v49, 0.0 }
  0xec   :  { %v608_v53 = vpack.c.bf16 %v550_v51, %v549_v50 }
  0xed   :  { %v486_v54 = vpop.f32.mrf.mxu2 }
  0xee   :  { %v487_v55 = vadd.f32 %v1463_v27, %v486_v54  ;;  %1279 = vmatmul.msk.bf16.gmra.mxu1 %vm640_vm2, %v608_v53 }
  0xef   :  { %v409_v58 = vpop.f32.mrf.mxu0 }
  0xf0   :  { %v582_v60 = vmax.f32 %v487_v55, 0.0  ;;  %v410_v63 = vadd.f32 %v1463_v27, %v409_v58 }
  0xf2   :  { %v624_v61 = vpack.c.bf16 %v582_v60, %v581_v59  ;;  %1256 = vmatmul.msk.bf16.gmra.mxu0 %vm269_vm1, %v1320_v56  ;;  %1272 = vmatmul.msk.bf16.gmra.mxu2 %vm269_vm1, %v1336_v57  ;;  %v551_v2 = vmax.f32 %v410_v63, 0.0 }
  0xf4   :  { %1295 = vmatmul.msk.bf16.gmra.mxu3 %vm640_vm2, %v624_v61 }
  0xf5   :  { %v489_v62 = vpop.f32.mrf.mxu2 }
  0xf6   :  { %v490_v4 = vadd.f32 %v1463_v27, %v489_v62 }
  0xf7   :  { %v411_v0 = vpop.f32.mrf.mxu0 }
  0xf8   :  { %v412_v1 = vadd.f32 %v1463_v27, %v411_v0  ;;  %v583_v11 = vmax.f32 %v490_v4, 0.0 }
  0xfa   :  { %v552_v3 = vmax.f32 %v412_v1, 0.0 }
  0xfc   :  { %v609_v5 = vpack.c.bf16 %v552_v3, %v551_v2 }
  0xfd   :  { %v491_v6 = vpop.f32.mrf.mxu2 }
  0xfe   :  { %v492_v7 = vadd.f32 %v1463_v27, %v491_v6  ;;  %1280 = vmatmul.msk.bf16.gmra.mxu1 %vm640_vm2, %v609_v5 }
  0xff   :  { %v414_v10 = vpop.f32.mrf.mxu0 }
 0x100   :  { %v584_v12 = vmax.f32 %v492_v7, 0.0  ;;  %v415_v15 = vadd.f32 %v1463_v27, %v414_v10 }
 0x102   :  { %v625_v13 = vpack.c.bf16 %v584_v12, %v583_v11  ;;  %1257 = vmatmul.msk.bf16.gmra.mxu0 %vm269_vm1, %v1321_v8  ;;  %1273 = vmatmul.msk.bf16.gmra.mxu2 %vm269_vm1, %v1337_v9  ;;  %v553_v18 = vmax.f32 %v415_v15, 0.0 }
 0x104   :  { %1296 = vmatmul.msk.bf16.gmra.mxu3 %vm640_vm2, %v625_v13 }
 0x105   :  { %v494_v14 = vpop.f32.mrf.mxu2 }
 0x106   :  { %v495_v20 = vadd.f32 %v1463_v27, %v494_v14 }
 0x107   :  { %v416_v16 = vpop.f32.mrf.mxu0 }
 0x108   :  { %v417_v17 = vadd.f32 %v1463_v27, %v416_v16  ;;  %v585_v25 = vmax.f32 %v495_v20, 0.0 }
 0x10a   :  { %v554_v19 = vmax.f32 %v417_v17, 0.0 }
 0x10c   :  { %v610_v21 = vpack.c.bf16 %v554_v19, %v553_v18 }
 0x10d   :  { %v496_v22 = vpop.f32.mrf.mxu2 }
 0x10e   :  { %v497_v23 = vadd.f32 %v1463_v27, %v496_v22  ;;  %1281 = vmatmul.msk.bf16.gmra.mxu1 %vm640_vm2, %v610_v21 }
 0x10f   :  { %v419_v24 = vpop.f32.mrf.mxu0 }
 0x110   :  { %v586_v26 = vmax.f32 %v497_v23, 0.0  ;;  %v420_v30 = vadd.f32 %v1463_v27, %v419_v24 }
 0x112   :  { %v626_v28 = vpack.c.bf16 %v586_v26, %v585_v25  ;;  %v555_v34 = vmax.f32 %v420_v30, 0.0 }
 0x114   :  { %1297 = vmatmul.msk.bf16.gmra.mxu3 %vm640_vm2, %v626_v28 }
 0x115   :  { %v499_v29 = vpop.f32.mrf.mxu2 }
 0x116   :  { %v500_v37 = vadd.f32 %v1463_v27, %v499_v29 }
 0x117   :  { %v421_v31 = vpop.f32.mrf.mxu0 }
 0x118   :  { %v422_v32 = vadd.f32 %v1463_v27, %v421_v31  ;;  %v587_v45 = vmax.f32 %v500_v37, 0.0 }
 0x11a   :  { %v556_v35 = vmax.f32 %v422_v32, 0.0 }
 0x11b   :  { %v749_v36 = vpop.f32.mrf.mxu1 }
 0x11c   :  { %v611_v38 = vpack.c.bf16 %v556_v35, %v555_v34  ;;  %v750_v39 = vadd.f32 %v1577_v33, %v749_v36 }
 0x11d   :  { %v501_v40 = vpop.f32.mrf.mxu2 }
 0x11e   :  { %v909_v41 = vmax.f32 %v750_v39, 0.0  ;;  %v502_v42 = vadd.f32 %v1463_v27, %v501_v40  ;;  %1282 = vmatmul.msk.bf16.gmra.mxu1 %vm640_vm2, %v611_v38 }
 0x11f   :  { %v424_v44 = vpop.f32.mrf.mxu0 }
 0x120   :  { %v973_v46 = vpack.c.bf16 %v909_v41, %v909_v41  ;;  %v588_v47 = vmax.f32 %v502_v42, 0.0  ;;  %v425_v52 = vadd.f32 %v1463_v27, %v424_v44 }
 0x122   :  { %1038 = vst.msk [vmem:[%s1952_s5] sm:$0xf] %vm1037_vm3, %v973_v46  ;;  %v627_v48 = vpack.c.bf16 %v588_v47, %v587_v45  ;;  %v557_v57 = vmax.f32 %v425_v52, 0.0 }
 0x123   :  { %v751_v49 = vpop.f32.mrf.mxu1 }
 0x124   :  { %v752_v50 = vadd.f32 %v1577_v33, %v751_v49  ;;  %1298 = vmatmul.msk.bf16.gmra.mxu3 %vm640_vm2, %v627_v48 }
 0x125   :  { %v504_v51 = vpop.f32.mrf.mxu2 }
 0x126   :  { %v910_v53 = vmax.f32 %v752_v50, 0.0  ;;  %v505_v60 = vadd.f32 %v1463_v27, %v504_v51 }
 0x127   :  { %v426_v54 = vpop.f32.mrf.mxu0 }
 0x128   :  { %v974_v55 = vpack.c.bf16 %v910_v53, %v910_v53  ;;  %v427_v56 = vadd.f32 %v1463_v27, %v426_v54  ;;  %v589_v3 = vmax.f32 %v505_v60, 0.0 }
 0x12a   :  { %1039 = vst.msk [vmem:[%s1952_s5 + $0x4] sm:$0xf] %vm1037_vm3, %v974_v55  ;;  %v558_v58 = vmax.f32 %v427_v56, 0.0 }
 0x12b   :  { %v754_v59 = vpop.f32.mrf.mxu1 }
 0x12c   :  { %v612_v61 = vpack.c.bf16 %v558_v58, %v557_v57  ;;  %v755_v62 = vadd.f32 %v1577_v33, %v754_v59 }
 0x12d   :  { %v506_v63 = vpop.f32.mrf.mxu2 }
 0x12e   :  { %v911_v0 = vmax.f32 %v755_v62, 0.0  ;;  %v507_v1 = vadd.f32 %v1463_v27, %v506_v63  ;;  %1283 = vmatmul.msk.bf16.gmra.mxu1 %vm640_vm2, %v612_v61 }
 0x12f   :  { %v429_v2 = vpop.f32.mrf.mxu0 }
 0x130   :  { %v975_v4 = vpack.c.bf16 %v911_v0, %v911_v0  ;;  %v590_v5 = vmax.f32 %v507_v1, 0.0  ;;  %v430_v10 = vadd.f32 %v1463_v27, %v429_v2 }
 0x132   :  { %1040 = vst.msk [vmem:[%s1952_s5 + $0x8] sm:$0xf] %vm1037_vm3, %v975_v4  ;;  %v628_v6 = vpack.c.bf16 %v590_v5, %v589_v3  ;;  %v559_v17 = vmax.f32 %v430_v10, 0.0 }
 0x133   :  { %v756_v7 = vpop.f32.mrf.mxu1 }
 0x134   :  { %v757_v8 = vadd.f32 %v1577_v33, %v756_v7  ;;  %1299 = vmatmul.msk.bf16.gmra.mxu3 %vm640_vm2, %v628_v6 }
 0x135   :  { %v509_v9 = vpop.f32.mrf.mxu2 }
 0x136   :  { %v912_v11 = vmax.f32 %v757_v8, 0.0  ;;  %v510_v21 = vadd.f32 %v1463_v27, %v509_v9 }
 0x137   :  { %v431_v12 = vpop.f32.mrf.mxu0  ;;  %v834_v13 = vpop.f32.mrf.mxu3 }
 0x138   :  { %v976_v14 = vpack.c.bf16 %v912_v11, %v912_v11  ;;  %v432_v15 = vadd.f32 %v1463_v27, %v431_v12  ;;  %v835_v16 = vadd.f32 %v1577_v33, %v834_v13  ;;  %v591_v31 = vmax.f32 %v510_v21, 0.0 }
 0x13a   :  { %1041 = vst.msk [vmem:[%s1952_s5 + $0xc] sm:$0xf] %vm1037_vm3, %v976_v14  ;;  %v560_v18 = vmax.f32 %v432_v15, 0.0  ;;  %v943_v19 = vmax.f32 %v835_v16, 0.0 }
 0x13b   :  { %v759_v20 = vpop.f32.mrf.mxu1 }
 0x13c   :  { %v613_v22 = vpack.c.bf16 %v560_v18, %v559_v17  ;;  %v1007_v23 = vpack.c.bf16 %v943_v19, %v943_v19  ;;  %v760_v24 = vadd.f32 %v1577_v33, %v759_v20 }
 0x13d   :  { %v511_v25 = vpop.f32.mrf.mxu2 }
 0x13e   :  { %1072 = vst.msk [vmem:[%s1952_s5 + $0x88] sm:$0xf] %vm1037_vm3, %v1007_v23  ;;  %v913_v26 = vmax.f32 %v760_v24, 0.0  ;;  %v512_v28 = vadd.f32 %v1463_v27, %v511_v25  ;;  %1284 = vmatmul.msk.bf16.gmra.mxu1 %vm640_vm2, %v613_v22 }
 0x13f   :  { %v434_v29 = vpop.f32.mrf.mxu0  ;;  %v836_v30 = vpop.f32.mrf.mxu3 }
 0x140   :  { %v977_v32 = vpack.c.bf16 %v913_v26, %v913_v26  ;;  %v592_v34 = vmax.f32 %v512_v28, 0.0  ;;  %v837_v35 = vadd.f32 %v1577_v33, %v836_v30  ;;  %v435_v42 = vadd.f32 %v1463_v27, %v434_v29 }
 0x142   :  { %1042 = vst.msk [vmem:[%s1952_s5 + $0x10] sm:$0xf] %vm1037_vm3, %v977_v32  ;;  %v629_v36 = vpack.c.bf16 %v592_v34, %v591_v31  ;;  %v944_v37 = vmax.f32 %v837_v35, 0.0  ;;  %v561_v50 = vmax.f32 %v435_v42, 0.0 }
 0x143   :  { %v761_v38 = vpop.f32.mrf.mxu1 }
 0x144   :  { %v1008_v39 = vpack.c.bf16 %v944_v37, %v944_v37  ;;  %v762_v40 = vadd.f32 %v1577_v33, %v761_v38  ;;  %1300 = vmatmul.msk.bf16.gmra.mxu3 %vm640_vm2, %v629_v36 }
 0x145   :  { %v514_v41 = vpop.f32.mrf.mxu2 }
 0x146   :  { %1073 = vst.msk [vmem:[%s1952_s5 + $0x8c] sm:$0xf] %vm1037_vm3, %v1008_v39  ;;  %v914_v44 = vmax.f32 %v762_v40, 0.0  ;;  %v515_v54 = vadd.f32 %v1463_v27, %v514_v41 }
 0x147   :  { %v436_v45 = vpop.f32.mrf.mxu0  ;;  %v839_v46 = vpop.f32.mrf.mxu3 }
 0x148   :  { %v978_v47 = vpack.c.bf16 %v914_v44, %v914_v44  ;;  %v437_v48 = vadd.f32 %v1463_v27, %v436_v45  ;;  %v840_v49 = vadd.f32 %v1577_v33, %v839_v46  ;;  %v593_v63 = vmax.f32 %v515_v54, 0.0 }
 0x14a   :  { %1043 = vst.msk [vmem:[%s1952_s5 + $0x14] sm:$0xf] %vm1037_vm3, %v978_v47  ;;  %v562_v51 = vmax.f32 %v437_v48, 0.0  ;;  %v945_v52 = vmax.f32 %v840_v49, 0.0 }
 0x14b   :  { %v764_v53 = vpop.f32.mrf.mxu1 }
 0x14c   :  { %v614_v55 = vpack.c.bf16 %v562_v51, %v561_v50  ;;  %v1009_v56 = vpack.c.bf16 %v945_v52, %v945_v52  ;;  %v765_v57 = vadd.f32 %v1577_v33, %v764_v53 }
 0x14d   :  { %v516_v58 = vpop.f32.mrf.mxu2 }
 0x14e   :  { %1074 = vst.msk [vmem:[%s1952_s5 + $0x90] sm:$0xf] %vm1037_vm3, %v1009_v56  ;;  %v915_v59 = vmax.f32 %v765_v57, 0.0  ;;  %v517_v60 = vadd.f32 %v1463_v27, %v516_v58  ;;  %1285 = vmatmul.msk.bf16.gmra.mxu1 %vm640_vm2, %v614_v55 }
 0x14f   :  { %v439_v61 = vpop.f32.mrf.mxu0  ;;  %v841_v62 = vpop.f32.mrf.mxu3 }
 0x150   :  { %v979_v0 = vpack.c.bf16 %v915_v59, %v915_v59  ;;  %v594_v1 = vmax.f32 %v517_v60, 0.0  ;;  %v842_v2 = vadd.f32 %v1577_v33, %v841_v62  ;;  %v440_v9 = vadd.f32 %v1463_v27, %v439_v61 }
 0x152   :  { %1044 = vst.msk [vmem:[%s1952_s5 + $0x18] sm:$0xf] %vm1037_vm3, %v979_v0  ;;  %v630_v3 = vpack.c.bf16 %v594_v1, %v593_v63  ;;  %v946_v4 = vmax.f32 %v842_v2, 0.0  ;;  %v563_v16 = vmax.f32 %v440_v9, 0.0 }
 0x153   :  { %v766_v5 = vpop.f32.mrf.mxu1 }
 0x154   :  { %v1010_v6 = vpack.c.bf16 %v946_v4, %v946_v4  ;;  %v767_v7 = vadd.f32 %v1577_v33, %v766_v5  ;;  %1301 = vmatmul.msk.bf16.gmra.mxu3 %vm640_vm2, %v630_v3 }
 0x155   :  { %v519_v8 = vpop.f32.mrf.mxu2 }
 0x156   :  { %1075 = vst.msk [vmem:[%s1952_s5 + $0x94] sm:$0xf] %vm1037_vm3, %v1010_v6  ;;  %v916_v10 = vmax.f32 %v767_v7, 0.0  ;;  %v520_v20 = vadd.f32 %v1463_v27, %v519_v8 }
 0x157   :  { %v441_v11 = vpop.f32.mrf.mxu0  ;;  %v844_v12 = vpop.f32.mrf.mxu3 }
 0x158   :  { %v980_v13 = vpack.c.bf16 %v916_v10, %v916_v10  ;;  %v442_v14 = vadd.f32 %v1463_v27, %v441_v11  ;;  %v845_v15 = vadd.f32 %v1577_v33, %v844_v12  ;;  %v595_v30 = vmax.f32 %v520_v20, 0.0 }
 0x15a   :  { %1045 = vst.msk [vmem:[%s1952_s5 + $0x1c] sm:$0xf] %vm1037_vm3, %v980_v13  ;;  %v564_v17 = vmax.f32 %v442_v14, 0.0  ;;  %v947_v18 = vmax.f32 %v845_v15, 0.0 }
 0x15b   :  { %v769_v19 = vpop.f32.mrf.mxu1 }
 0x15c   :  { %v615_v21 = vpack.c.bf16 %v564_v17, %v563_v16  ;;  %v1011_v22 = vpack.c.bf16 %v947_v18, %v947_v18  ;;  %v770_v23 = vadd.f32 %v1577_v33, %v769_v19 }
 0x15d   :  { %v521_v24 = vpop.f32.mrf.mxu2 }
 0x15e   :  { %1076 = vst.msk [vmem:[%s1952_s5 + $0x98] sm:$0xf] %vm1037_vm3, %v1011_v22  ;;  %v917_v25 = vmax.f32 %v770_v23, 0.0  ;;  %v522_v26 = vadd.f32 %v1463_v27, %v521_v24  ;;  %1286 = vmatmul.msk.bf16.gmra.mxu1 %vm640_vm2, %v615_v21 }
 0x15f   :  { %v444_v28 = vpop.f32.mrf.mxu0  ;;  %v846_v29 = vpop.f32.mrf.mxu3 }
 0x160   :  { %v981_v31 = vpack.c.bf16 %v917_v25, %v917_v25  ;;  %v596_v32 = vmax.f32 %v522_v26, 0.0  ;;  %v847_v34 = vadd.f32 %v1577_v33, %v846_v29  ;;  %v445_v41 = vadd.f32 %v1463_v27, %v444_v28 }
 0x162   :  { %1046 = vst.msk [vmem:[%s1952_s5 + $0x20] sm:$0xf] %vm1037_vm3, %v981_v31  ;;  %v631_v35 = vpack.c.bf16 %v596_v32, %v595_v30  ;;  %v948_v36 = vmax.f32 %v847_v34, 0.0  ;;  %v565_v49 = vmax.f32 %v445_v41, 0.0 }
 0x163   :  { %v771_v37 = vpop.f32.mrf.mxu1 }
 0x164   :  { %v1012_v38 = vpack.c.bf16 %v948_v36, %v948_v36  ;;  %v772_v39 = vadd.f32 %v1577_v33, %v771_v37  ;;  %1302 = vmatmul.msk.bf16.gmra.mxu3 %vm640_vm2, %v631_v35 }
 0x165   :  { %v524_v40 = vpop.f32.mrf.mxu2 }
 0x166   :  { %1077 = vst.msk [vmem:[%s1952_s5 + $0x9c] sm:$0xf] %vm1037_vm3, %v1012_v38  ;;  %v918_v42 = vmax.f32 %v772_v39, 0.0  ;;  %v525_v53 = vadd.f32 %v1463_v27, %v524_v40 }
 0x167   :  { %v446_v44 = vpop.f32.mrf.mxu0  ;;  %v849_v45 = vpop.f32.mrf.mxu3 }
 0x168   :  { %v982_v46 = vpack.c.bf16 %v918_v42, %v918_v42  ;;  %v447_v47 = vadd.f32 %v1463_v27, %v446_v44  ;;  %v850_v48 = vadd.f32 %v1577_v33, %v849_v45  ;;  %v597_v62 = vmax.f32 %v525_v53, 0.0 }
 0x16a   :  { %1047 = vst.msk [vmem:[%s1952_s5 + $0x24] sm:$0xf] %vm1037_vm3, %v982_v46  ;;  %v566_v50 = vmax.f32 %v447_v47, 0.0  ;;  %v949_v51 = vmax.f32 %v850_v48, 0.0 }
 0x16b   :  { %v774_v52 = vpop.f32.mrf.mxu1 }
 0x16c   :  { %v616_v54 = vpack.c.bf16 %v566_v50, %v565_v49  ;;  %v1013_v55 = vpack.c.bf16 %v949_v51, %v949_v51  ;;  %v775_v56 = vadd.f32 %v1577_v33, %v774_v52 }
 0x16d   :  { %v526_v57 = vpop.f32.mrf.mxu2 }
 0x16e   :  { %1078 = vst.msk [vmem:[%s1952_s5 + $0xa0] sm:$0xf] %vm1037_vm3, %v1013_v55  ;;  %v919_v58 = vmax.f32 %v775_v56, 0.0  ;;  %v527_v59 = vadd.f32 %v1463_v27, %v526_v57  ;;  %1287 = vmatmul.msk.bf16.gmra.mxu1 %vm640_vm2, %v616_v54 }
 0x16f   :  { %v449_v60 = vpop.f32.mrf.mxu0  ;;  %v851_v61 = vpop.f32.mrf.mxu3 }
 0x170   :  { %v983_v63 = vpack.c.bf16 %v919_v58, %v919_v58  ;;  %v598_v0 = vmax.f32 %v527_v59, 0.0  ;;  %v852_v1 = vadd.f32 %v1577_v33, %v851_v61  ;;  %v450_v8 = vadd.f32 %v1463_v27, %v449_v60 }
 0x172   :  { %1048 = vst.msk [vmem:[%s1952_s5 + $0x28] sm:$0xf] %vm1037_vm3, %v983_v63  ;;  %v632_v2 = vpack.c.bf16 %v598_v0, %v597_v62  ;;  %v950_v3 = vmax.f32 %v852_v1, 0.0  ;;  %v567_v15 = vmax.f32 %v450_v8, 0.0 }
 0x173   :  { %v776_v4 = vpop.f32.mrf.mxu1 }
 0x174   :  { %v1014_v5 = vpack.c.bf16 %v950_v3, %v950_v3  ;;  %v777_v6 = vadd.f32 %v1577_v33, %v776_v4  ;;  %1303 = vmatmul.msk.bf16.gmra.mxu3 %vm640_vm2, %v632_v2 }
 0x175   :  { %v529_v7 = vpop.f32.mrf.mxu2 }
 0x176   :  { %1079 = vst.msk [vmem:[%s1952_s5 + $0xa4] sm:$0xf] %vm1037_vm3, %v1014_v5  ;;  %v920_v9 = vmax.f32 %v777_v6, 0.0  ;;  %v530_v19 = vadd.f32 %v1463_v27, %v529_v7 }
 0x177   :  { %v451_v10 = vpop.f32.mrf.mxu0  ;;  %v854_v11 = vpop.f32.mrf.mxu3 }
 0x178   :  { %v984_v12 = vpack.c.bf16 %v920_v9, %v920_v9  ;;  %v452_v13 = vadd.f32 %v1463_v27, %v451_v10  ;;  %v855_v14 = vadd.f32 %v1577_v33, %v854_v11  ;;  %v599_v29 = vmax.f32 %v530_v19, 0.0 }
 0x17a   :  { %1049 = vst.msk [vmem:[%s1952_s5 + $0x2c] sm:$0xf] %vm1037_vm3, %v984_v12  ;;  %v568_v16 = vmax.f32 %v452_v13, 0.0  ;;  %v951_v17 = vmax.f32 %v855_v14, 0.0 }
 0x17b   :  { %v779_v18 = vpop.f32.mrf.mxu1 }
 0x17c   :  { %v617_v20 = vpack.c.bf16 %v568_v16, %v567_v15  ;;  %v1015_v21 = vpack.c.bf16 %v951_v17, %v951_v17  ;;  %v780_v22 = vadd.f32 %v1577_v33, %v779_v18 }
 0x17d   :  { %v531_v23 = vpop.f32.mrf.mxu2 }
 0x17e   :  { %1080 = vst.msk [vmem:[%s1952_s5 + $0xa8] sm:$0xf] %vm1037_vm3, %v1015_v21  ;;  %v921_v24 = vmax.f32 %v780_v22, 0.0  ;;  %v532_v25 = vadd.f32 %v1463_v27, %v531_v23  ;;  %1288 = vmatmul.msk.bf16.gmra.mxu1 %vm640_vm2, %v617_v20 }
 0x17f   :  { %v454_v26 = vpop.f32.mrf.mxu0  ;;  %v856_v28 = vpop.f32.mrf.mxu3 }
 0x180   :  { %v985_v30 = vpack.c.bf16 %v921_v24, %v921_v24  ;;  %v600_v31 = vmax.f32 %v532_v25, 0.0  ;;  %v857_v32 = vadd.f32 %v1577_v33, %v856_v28  ;;  %v455_v40 = vadd.f32 %v1463_v27, %v454_v26 }
 0x182   :  { %1050 = vst.msk [vmem:[%s1952_s5 + $0x30] sm:$0xf] %vm1037_vm3, %v985_v30  ;;  %v633_v34 = vpack.c.bf16 %v600_v31, %v599_v29  ;;  %v952_v35 = vmax.f32 %v857_v32, 0.0  ;;  %v569_v48 = vmax.f32 %v455_v40, 0.0 }
 0x183   :  { %v781_v36 = vpop.f32.mrf.mxu1 }
 0x184   :  { %v1016_v37 = vpack.c.bf16 %v952_v35, %v952_v35  ;;  %v782_v38 = vadd.f32 %v1577_v33, %v781_v36  ;;  %1304 = vmatmul.msk.bf16.gmra.mxu3 %vm640_vm2, %v633_v34 }
 0x185   :  { %v534_v39 = vpop.f32.mrf.mxu2 }
 0x186   :  { %1081 = vst.msk [vmem:[%s1952_s5 + $0xac] sm:$0xf] %vm1037_vm3, %v1016_v37  ;;  %v922_v41 = vmax.f32 %v782_v38, 0.0  ;;  %v535_v52 = vadd.f32 %v1463_v27, %v534_v39 }
 0x187   :  { %v456_v42 = vpop.f32.mrf.mxu0  ;;  %v859_v44 = vpop.f32.mrf.mxu3 }
 0x188   :  { %v986_v45 = vpack.c.bf16 %v922_v41, %v922_v41  ;;  %v457_v46 = vadd.f32 %v1463_v27, %v456_v42  ;;  %v860_v47 = vadd.f32 %v1577_v33, %v859_v44  ;;  %v601_v60 = vmax.f32 %v535_v52, 0.0 }
 0x18a   :  { %1051 = vst.msk [vmem:[%s1952_s5 + $0x34] sm:$0xf] %vm1037_vm3, %v986_v45  ;;  %v570_v49 = vmax.f32 %v457_v46, 0.0  ;;  %v953_v50 = vmax.f32 %v860_v47, 0.0 }
 0x18b   :  { %v784_v51 = vpop.f32.mrf.mxu1 }
 0x18c   :  { %v618_v53 = vpack.c.bf16 %v570_v49, %v569_v48  ;;  %v1017_v54 = vpack.c.bf16 %v953_v50, %v953_v50  ;;  %v785_v55 = vadd.f32 %v1577_v33, %v784_v51 }
 0x18d   :  { %v536_v56 = vpop.f32.mrf.mxu2 }
 0x18e   :  { %1082 = vst.msk [vmem:[%s1952_s5 + $0xb0] sm:$0xf] %vm1037_vm3, %v1017_v54  ;;  %v923_v57 = vmax.f32 %v785_v55, 0.0  ;;  %v537_v58 = vadd.f32 %v1463_v27, %v536_v56  ;;  %1289 = vmatmul.msk.bf16.gmra.mxu1 %vm640_vm2, %v618_v53 }
 0x18f   :  { %v861_v59 = vpop.f32.mrf.mxu3 }
 0x190   :  { %v987_v61 = vpack.c.bf16 %v923_v57, %v923_v57  ;;  %v602_v62 = vmax.f32 %v537_v58, 0.0  ;;  %v862_v63 = vadd.f32 %v1577_v33, %v861_v59 }
 0x192   :  { %1052 = vst.msk [vmem:[%s1952_s5 + $0x38] sm:$0xf] %vm1037_vm3, %v987_v61  ;;  %v634_v0 = vpack.c.bf16 %v602_v62, %v601_v60  ;;  %v954_v1 = vmax.f32 %v862_v63, 0.0 }
 0x193   :  { %v786_v2 = vpop.f32.mrf.mxu1 }
 0x194   :  { %v1018_v3 = vpack.c.bf16 %v954_v1, %v954_v1  ;;  %v787_v4 = vadd.f32 %v1577_v33, %v786_v2  ;;  %1305 = vmatmul.msk.bf16.gmra.mxu3 %vm640_vm2, %v634_v0 }
 0x196   :  { %1083 = vst.msk [vmem:[%s1952_s5 + $0xb4] sm:$0xf] %vm1037_vm3, %v1018_v3  ;;  %v924_v27 = vmax.f32 %v787_v4, 0.0 }
 0x197   :  { %v864_v5 = vpop.f32.mrf.mxu3 }
 0x198   :  { %v988_v6 = vpack.c.bf16 %v924_v27, %v924_v27  ;;  %v865_v7 = vadd.f32 %v1577_v33, %v864_v5 }
 0x19a   :  { %1053 = vst.msk [vmem:[%s1952_s5 + $0x3c] sm:$0xf] %vm1037_vm3, %v988_v6  ;;  %v955_v8 = vmax.f32 %v865_v7, 0.0 }
 0x19b   :  { %v789_v9 = vpop.f32.mrf.mxu1 }
 0x19c   :  { %v1019_v10 = vpack.c.bf16 %v955_v8, %v955_v8  ;;  %v790_v11 = vadd.f32 %v1577_v33, %v789_v9 }
 0x19e   :  { %1084 = vst.msk [vmem:[%s1952_s5 + $0xb8] sm:$0xf] %vm1037_vm3, %v1019_v10  ;;  %v925_v12 = vmax.f32 %v790_v11, 0.0  ;;  %1290 = vmatmul.msk.bf16.gmra.mxu1 %vm640_vm2, %v1478_v43 }
 0x19f   :  { %v866_v13 = vpop.f32.mrf.mxu3 }
 0x1a0   :  { %v989_v14 = vpack.c.bf16 %v925_v12, %v925_v12  ;;  %v867_v15 = vadd.f32 %v1577_v33, %v866_v13 }
 0x1a2   :  { %1054 = vst.msk [vmem:[%s1952_s5 + $0x40] sm:$0xf] %vm1037_vm3, %v989_v14  ;;  %v956_v16 = vmax.f32 %v867_v15, 0.0 }
 0x1a3   :  { %v791_v17 = vpop.f32.mrf.mxu1 }
 0x1a4   :  { %v1020_v18 = vpack.c.bf16 %v956_v16, %v956_v16  ;;  %v792_v19 = vadd.f32 %v1577_v33, %v791_v17 }
 0x1a6   :  { %1085 = vst.msk [vmem:[%s1952_s5 + $0xbc] sm:$0xf] %vm1037_vm3, %v1020_v18  ;;  %v926_v43 = vmax.f32 %v792_v19, 0.0 }
 0x1a7   :  { %v869_v20 = vpop.f32.mrf.mxu3 }
 0x1a8   :  { %v990_v21 = vpack.c.bf16 %v926_v43, %v926_v43  ;;  %v870_v22 = vadd.f32 %v1577_v33, %v869_v20 }
 0x1aa   :  { %1055 = vst.msk [vmem:[%s1952_s5 + $0x44] sm:$0xf] %vm1037_vm3, %v990_v21  ;;  %v957_v23 = vmax.f32 %v870_v22, 0.0 }
 0x1ab   :  { %v794_v24 = vpop.f32.mrf.mxu1 }
 0x1ac   :  { %v1021_v25 = vpack.c.bf16 %v957_v23, %v957_v23  ;;  %v795_v26 = vadd.f32 %v1577_v33, %v794_v24 }
 0x1ae   :  { %1086 = vst.msk [vmem:[%s1952_s5 + $0xc0] sm:$0xf] %vm1037_vm3, %v1021_v25  ;;  %v927_v28 = vmax.f32 %v795_v26, 0.0 }
 0x1af   :  { %v871_v29 = vpop.f32.mrf.mxu3 }
 0x1b0   :  { %v991_v30 = vpack.c.bf16 %v927_v28, %v927_v28  ;;  %v872_v31 = vadd.f32 %v1577_v33, %v871_v29 }
 0x1b2   :  { %1056 = vst.msk [vmem:[%s1952_s5 + $0x48] sm:$0xf] %vm1037_vm3, %v991_v30  ;;  %v958_v32 = vmax.f32 %v872_v31, 0.0 }
 0x1b3   :  { %v796_v34 = vpop.f32.mrf.mxu1 }
 0x1b4   :  { %v1022_v35 = vpack.c.bf16 %v958_v32, %v958_v32  ;;  %v797_v36 = vadd.f32 %v1577_v33, %v796_v34 }
 0x1b6   :  { %1087 = vst.msk [vmem:[%s1952_s5 + $0xc4] sm:$0xf] %vm1037_vm3, %v1022_v35  ;;  %v928_v37 = vmax.f32 %v797_v36, 0.0 }
 0x1b7   :  { %v874_v38 = vpop.f32.mrf.mxu3 }
 0x1b8   :  { %v992_v39 = vpack.c.bf16 %v928_v37, %v928_v37  ;;  %v875_v40 = vadd.f32 %v1577_v33, %v874_v38 }
 0x1ba   :  { %1057 = vst.msk [vmem:[%s1952_s5 + $0x4c] sm:$0xf] %vm1037_vm3, %v992_v39  ;;  %v959_v41 = vmax.f32 %v875_v40, 0.0 }
 0x1bb   :  { %v799_v42 = vpop.f32.mrf.mxu1 }
 0x1bc   :  { %v1023_v44 = vpack.c.bf16 %v959_v41, %v959_v41  ;;  %v800_v45 = vadd.f32 %v1577_v33, %v799_v42 }
 0x1be   :  { %1088 = vst.msk [vmem:[%s1952_s5 + $0xc8] sm:$0xf] %vm1037_vm3, %v1023_v44  ;;  %v929_v46 = vmax.f32 %v800_v45, 0.0 }
 0x1bf   :  { %v876_v47 = vpop.f32.mrf.mxu3 }
 0x1c0   :  { %v993_v48 = vpack.c.bf16 %v929_v46, %v929_v46  ;;  %v877_v49 = vadd.f32 %v1577_v33, %v876_v47 }
 0x1c2   :  { %1058 = vst.msk [vmem:[%s1952_s5 + $0x50] sm:$0xf] %vm1037_vm3, %v993_v48  ;;  %v960_v50 = vmax.f32 %v877_v49, 0.0 }
 0x1c3   :  { %v801_v51 = vpop.f32.mrf.mxu1 }
 0x1c4   :  { %v1024_v52 = vpack.c.bf16 %v960_v50, %v960_v50  ;;  %v802_v53 = vadd.f32 %v1577_v33, %v801_v51 }
 0x1c6   :  { %1089 = vst.msk [vmem:[%s1952_s5 + $0xcc] sm:$0xf] %vm1037_vm3, %v1024_v52  ;;  %v930_v54 = vmax.f32 %v802_v53, 0.0 }
 0x1c7   :  { %v879_v55 = vpop.f32.mrf.mxu3 }
 0x1c8   :  { %v994_v56 = vpack.c.bf16 %v930_v54, %v930_v54  ;;  %v880_v57 = vadd.f32 %v1577_v33, %v879_v55 }
 0x1ca   :  { %1059 = vst.msk [vmem:[%s1952_s5 + $0x54] sm:$0xf] %vm1037_vm3, %v994_v56  ;;  %v961_v58 = vmax.f32 %v880_v57, 0.0 }
 0x1cb   :  { %v804_v59 = vpop.f32.mrf.mxu1 }
 0x1cc   :  { %v1025_v60 = vpack.c.bf16 %v961_v58, %v961_v58  ;;  %v805_v61 = vadd.f32 %v1577_v33, %v804_v59 }
 0x1ce   :  { %1090 = vst.msk [vmem:[%s1952_s5 + $0xd0] sm:$0xf] %vm1037_vm3, %v1025_v60  ;;  %v931_v62 = vmax.f32 %v805_v61, 0.0 }
 0x1cf   :  { %v881_v63 = vpop.f32.mrf.mxu3 }
 0x1d0   :  { %v995_v0 = vpack.c.bf16 %v931_v62, %v931_v62  ;;  %v882_v1 = vadd.f32 %v1577_v33, %v881_v63 }
 0x1d2   :  { %1060 = vst.msk [vmem:[%s1952_s5 + $0x58] sm:$0xf] %vm1037_vm3, %v995_v0  ;;  %v962_v2 = vmax.f32 %v882_v1, 0.0 }
 0x1d3   :  { %v806_v3 = vpop.f32.mrf.mxu1 }
 0x1d4   :  { %v1026_v4 = vpack.c.bf16 %v962_v2, %v962_v2  ;;  %v807_v27 = vadd.f32 %v1577_v33, %v806_v3 }
 0x1d6   :  { %1091 = vst.msk [vmem:[%s1952_s5 + $0xd4] sm:$0xf] %vm1037_vm3, %v1026_v4  ;;  %v932_v5 = vmax.f32 %v807_v27, 0.0 }
 0x1d7   :  { %v884_v6 = vpop.f32.mrf.mxu3 }
 0x1d8   :  { %v996_v7 = vpack.c.bf16 %v932_v5, %v932_v5  ;;  %v885_v8 = vadd.f32 %v1577_v33, %v884_v6 }
 0x1da   :  { %1061 = vst.msk [vmem:[%s1952_s5 + $0x5c] sm:$0xf] %vm1037_vm3, %v996_v7  ;;  %v963_v9 = vmax.f32 %v885_v8, 0.0 }
 0x1db   :  { %v809_v10 = vpop.f32.mrf.mxu1 }
 0x1dc   :  { %v1027_v11 = vpack.c.bf16 %v963_v9, %v963_v9  ;;  %v810_v12 = vadd.f32 %v1577_v33, %v809_v10 }
 0x1de   :  { %1092 = vst.msk [vmem:[%s1952_s5 + $0xd8] sm:$0xf] %vm1037_vm3, %v1027_v11  ;;  %v933_v13 = vmax.f32 %v810_v12, 0.0 }
 0x1df   :  { %v886_v14 = vpop.f32.mrf.mxu3 }
 0x1e0   :  { %v997_v15 = vpack.c.bf16 %v933_v13, %v933_v13  ;;  %v887_v16 = vadd.f32 %v1577_v33, %v886_v14 }
 0x1e2   :  { %1062 = vst.msk [vmem:[%s1952_s5 + $0x60] sm:$0xf] %vm1037_vm3, %v997_v15  ;;  %v964_v17 = vmax.f32 %v887_v16, 0.0 }
 0x1e3   :  { %v811_v18 = vpop.f32.mrf.mxu1 }
 0x1e4   :  { %v1028_v19 = vpack.c.bf16 %v964_v17, %v964_v17  ;;  %v812_v43 = vadd.f32 %v1577_v33, %v811_v18 }
 0x1e6   :  { %1093 = vst.msk [vmem:[%s1952_s5 + $0xdc] sm:$0xf] %vm1037_vm3, %v1028_v19  ;;  %v934_v20 = vmax.f32 %v812_v43, 0.0 }
 0x1e7   :  { %v889_v21 = vpop.f32.mrf.mxu3 }
 0x1e8   :  { %v998_v22 = vpack.c.bf16 %v934_v20, %v934_v20  ;;  %v890_v23 = vadd.f32 %v1577_v33, %v889_v21 }
 0x1ea   :  { %1063 = vst.msk [vmem:[%s1952_s5 + $0x64] sm:$0xf] %vm1037_vm3, %v998_v22  ;;  %v965_v24 = vmax.f32 %v890_v23, 0.0 }
 0x1eb   :  { %v814_v25 = vpop.f32.mrf.mxu1 }
 0x1ec   :  { %v1029_v26 = vpack.c.bf16 %v965_v24, %v965_v24  ;;  %v815_v28 = vadd.f32 %v1577_v33, %v814_v25 }
 0x1ee   :  { %1094 = vst.msk [vmem:[%s1952_s5 + $0xe0] sm:$0xf] %vm1037_vm3, %v1029_v26  ;;  %v935_v29 = vmax.f32 %v815_v28, 0.0 }
 0x1ef   :  { %v891_v30 = vpop.f32.mrf.mxu3 }
 0x1f0   :  { %v999_v31 = vpack.c.bf16 %v935_v29, %v935_v29  ;;  %v892_v32 = vadd.f32 %v1577_v33, %v891_v30 }
 0x1f2   :  { %1064 = vst.msk [vmem:[%s1952_s5 + $0x68] sm:$0xf] %vm1037_vm3, %v999_v31  ;;  %v966_v34 = vmax.f32 %v892_v32, 0.0 }
 0x1f3   :  { %v816_v35 = vpop.f32.mrf.mxu1 }
 0x1f4   :  { %v1030_v36 = vpack.c.bf16 %v966_v34, %v966_v34  ;;  %v817_v37 = vadd.f32 %v1577_v33, %v816_v35 }
 0x1f6   :  { %1095 = vst.msk [vmem:[%s1952_s5 + $0xe4] sm:$0xf] %vm1037_vm3, %v1030_v36  ;;  %v936_v38 = vmax.f32 %v817_v37, 0.0 }
 0x1f7   :  { %v894_v39 = vpop.f32.mrf.mxu3 }
 0x1f8   :  { %v1000_v40 = vpack.c.bf16 %v936_v38, %v936_v38  ;;  %v895_v41 = vadd.f32 %v1577_v33, %v894_v39 }
 0x1fa   :  { %1065 = vst.msk [vmem:[%s1952_s5 + $0x6c] sm:$0xf] %vm1037_vm3, %v1000_v40  ;;  %v967_v42 = vmax.f32 %v895_v41, 0.0 }
 0x1fb   :  { %v819_v44 = vpop.f32.mrf.mxu1 }
 0x1fc   :  { %v1031_v45 = vpack.c.bf16 %v967_v42, %v967_v42  ;;  %v820_v46 = vadd.f32 %v1577_v33, %v819_v44 }
 0x1fe   :  { %1096 = vst.msk [vmem:[%s1952_s5 + $0xe8] sm:$0xf] %vm1037_vm3, %v1031_v45  ;;  %v937_v47 = vmax.f32 %v820_v46, 0.0 }
 0x1ff   :  { %v896_v48 = vpop.f32.mrf.mxu3 }
 0x200   :  { %v1001_v49 = vpack.c.bf16 %v937_v47, %v937_v47  ;;  %v897_v50 = vadd.f32 %v1577_v33, %v896_v48 }
 0x202   :  { %1066 = vst.msk [vmem:[%s1952_s5 + $0x70] sm:$0xf] %vm1037_vm3, %v1001_v49  ;;  %v968_v51 = vmax.f32 %v897_v50, 0.0 }
 0x203   :  { %v821_v52 = vpop.f32.mrf.mxu1 }
 0x204   :  { %v1032_v53 = vpack.c.bf16 %v968_v51, %v968_v51  ;;  %v822_v54 = vadd.f32 %v1577_v33, %v821_v52 }
 0x206   :  { %1097 = vst.msk [vmem:[%s1952_s5 + $0xec] sm:$0xf] %vm1037_vm3, %v1032_v53  ;;  %v938_v55 = vmax.f32 %v822_v54, 0.0 }
 0x207   :  { %v899_v56 = vpop.f32.mrf.mxu3 }
 0x208   :  { %v1002_v57 = vpack.c.bf16 %v938_v55, %v938_v55  ;;  %v900_v58 = vadd.f32 %v1577_v33, %v899_v56 }
 0x20a   :  { %1067 = vst.msk [vmem:[%s1952_s5 + $0x74] sm:$0xf] %vm1037_vm3, %v1002_v57  ;;  %v969_v59 = vmax.f32 %v900_v58, 0.0 }
 0x20b   :  { %v824_v60 = vpop.f32.mrf.mxu1 }
 0x20c   :  { %v1033_v61 = vpack.c.bf16 %v969_v59, %v969_v59  ;;  %v825_v62 = vadd.f32 %v1577_v33, %v824_v60 }
 0x20e   :  { %1098 = vst.msk [vmem:[%s1952_s5 + $0xf0] sm:$0xf] %vm1037_vm3, %v1033_v61  ;;  %v939_v63 = vmax.f32 %v825_v62, 0.0 }
 0x20f   :  { %v901_v0 = vpop.f32.mrf.mxu3 }
 0x210   :  { %v1003_v1 = vpack.c.bf16 %v939_v63, %v939_v63  ;;  %v902_v2 = vadd.f32 %v1577_v33, %v901_v0 }
 0x212   :  { %1068 = vst.msk [vmem:[%s1952_s5 + $0x78] sm:$0xf] %vm1037_vm3, %v1003_v1  ;;  %v970_v3 = vmax.f32 %v902_v2, 0.0 }
 0x213   :  { %v826_v4 = vpop.f32.mrf.mxu1 }
 0x214   :  { %v1034_v27 = vpack.c.bf16 %v970_v3, %v970_v3  ;;  %v827_v5 = vadd.f32 %v1577_v33, %v826_v4 }
 0x216   :  { %1099 = vst.msk [vmem:[%s1952_s5 + $0xf4] sm:$0xf] %vm1037_vm3, %v1034_v27  ;;  %v940_v6 = vmax.f32 %v827_v5, 0.0 }
 0x217   :  { %v904_v7 = vpop.f32.mrf.mxu3 }
 0x218   :  { %v1004_v8 = vpack.c.bf16 %v940_v6, %v940_v6  ;;  %v905_v9 = vadd.f32 %v1577_v33, %v904_v7 }
 0x21a   :  { %1069 = vst.msk [vmem:[%s1952_s5 + $0x7c] sm:$0xf] %vm1037_vm3, %v1004_v8  ;;  %v971_v10 = vmax.f32 %v905_v9, 0.0 }
 0x21b   :  { %v829_v11 = vpop.f32.mrf.mxu1 }
 0x21c   :  { %v1035_v12 = vpack.c.bf16 %v971_v10, %v971_v10  ;;  %v830_v13 = vadd.f32 %v1577_v33, %v829_v11 }
 0x21e   :  { %1100 = vst.msk [vmem:[%s1952_s5 + $0xf8] sm:$0xf] %vm1037_vm3, %v1035_v12  ;;  %v941_v14 = vmax.f32 %v830_v13, 0.0 }
 0x21f   :  { %v906_v15 = vpop.f32.mrf.mxu3 }
 0x220   :  { %v1005_v16 = vpack.c.bf16 %v941_v14, %v941_v14  ;;  %v907_v17 = vadd.f32 %v1577_v33, %v906_v15 }
 0x222   :  { %1070 = vst.msk [vmem:[%s1952_s5 + $0x80] sm:$0xf] %vm1037_vm3, %v1005_v16  ;;  %v972_v18 = vmax.f32 %v907_v17, 0.0 }
 0x223   :  { %v831_v19 = vpop.f32.mrf.mxu1 }
 0x224   :  { %v1036_v43 = vpack.c.bf16 %v972_v18, %v972_v18  ;;  %v832_v20 = vadd.f32 %v1577_v33, %v831_v19 }
 0x226   :  { %1101 = vst.msk [vmem:[%s1952_s5 + $0xfc] sm:$0xf] %vm1037_vm3, %v1036_v43  ;;  %v942_v21 = vmax.f32 %v832_v20, 0.0 }
 0x228   :  { %v1006_v22 = vpack.c.bf16 %v942_v21, %v942_v21 }
 0x22a   :  { %1071 = vst.msk [vmem:[%s1952_s5 + $0x84] sm:$0xf] %vm1037_vm3, %v1006_v22 }

// kernel: cloudnetp_forward.27
= control target key start
LH: loop header
LB: loop body
LE: loop exit
PB: predicated region body
PF: predicated region fallthrough
CT: control target
= control target key end

     0   :  { %vm948_vm0 = vcmask 1041408   ;;  %vm851_vm1 = vcmask 31744   ;;  %vm385_vm2 = vcmask 1043456   ;;  %s2341_s14 = smov 4   ;;  %vm288_vm3 = vcmask 588800   ;;  %s3389_s4 = inlined_call_operand.vmem [shape: bf16[4,4], index: 4, kind: input, shape index: {}]   ;;  %s3390_s1 = inlined_call_operand.vmem [shape: bf16[512,4], index: 1, kind: input, shape index: {}]   ;;  %s3391_s2 = inlined_call_operand.vmem [shape: bf16[72,8], index: 2, kind: input, shape index: {}]   ;;  %s3392_s5 = inlined_call_operand.vmem [shape: f32[1,4], index: 5, kind: input, shape index: {}]   ;;  %s3393_s0 = inlined_call_operand.vmem [shape: bf16[512,72], index: 0, kind: input, shape index: {}]   ;;  %s3394_s3 = inlined_call_operand.vmem [shape: f32[1,8], index: 3, kind: input, shape index: {}]   ;;  %s3395_s6 = inlined_call_operand.vmem [shape: bf16[512,8], index: 6, kind: output, shape index: {}]  }
   0x1   :  { %v686_v0 = vld [vmem:[%s3389_s4] sm:$0x3]  ;;  %v2155_v7 = vld [vmem:[%s3390_s1 + $0x88] sm:$0xff]  ;;  %v2137_v12 = vld [vmem:[%s3391_s2 + $0x18] sm:$0xff]  ;;  %vm1697_vm4 = vcmask 60416  }
   0x2   :  { %v96_v1 = vld [vmem:[%s3391_s2 + $0x20] sm:$0xf]  ;;  %v950_v2 = vsel %vm948_vm0, %v686_v0, 0  ;;  %v624_v11 = vld [vmem:[%s3390_s1 + $0x8] sm:$0xff]   ;;  %v626_v15 = vld [vmem:[%s3390_s1 + $0x10] sm:$0xff]  }
   0x3   :  { %v2138_v3 = vld [vmem:[%s3390_s1] sm:$0xff]  ;;  %v278_v4 = vunpack.c.l.b16 %v96_v1  ;;  %959 = vmatpush.bf16.msra.mxu1 %v950_v2  ;;  %2175 = vmatpush.bf16.msra.mxu3 %v950_v2  ;;  %v1189_v18 = vunpack.c.l.bf16 %v626_v15  ;;  %v1187_v19 = vunpack.c.l.bf16 %v624_v11  ;;  %v1188_v20 = vunpack.c.h.bf16 %v624_v11  ;;  %v632_v23 = vld [vmem:[%s3390_s1 + $0x28] sm:$0xff]   ;;  %v628_v24 = vld [vmem:[%s3390_s1 + $0x18] sm:$0xff]  }
   0x4   :  { %v622_v6 = vld [vmem:[%s3390_s1] sm:$0xff]   ;;  %v1190_v21 = vunpack.c.h.bf16 %v626_v15  ;;  %v2136_v25 = vld [vmem:[%s3391_s2 + $0x10] sm:$0xff]  ;;  %v1195_v27 = vunpack.c.l.bf16 %v632_v23  ;;  %v1196_v28 = vunpack.c.h.bf16 %v632_v23  ;;  %v1191_v30 = vunpack.c.l.bf16 %v628_v24  ;;  %v2135_v33 = vld [vmem:[%s3391_s2 + $0x8] sm:$0xff] }
   0x5   :  { %v283_v5 = vpack.c.b16 %v278_v4, %v278_v4  ;;  %v1185_v8 = vunpack.c.l.bf16 %v622_v6  ;;  %v1186_v9 = vunpack.c.h.bf16 %v622_v6  ;;  %v630_v14 = vld [vmem:[%s3390_s1 + $0x20] sm:$0xff]   ;;  %v2182_v29 = vpack.i.bf16 %v1188_v20, %v1187_v19  ;;  %v634_v32 = vld [vmem:[%s3390_s1 + $0x30] sm:$0xff]   ;;  %v2139_v38 = vld [vmem:[%s3390_s1 + $0x8] sm:$0xff] }
   0x6   :  { %2070 = vmatmul.msk.bf16.vlgmr.msra.gmra.mxu1 %vm851_vm1, %v2138_v3  ;;  %2087 = vmatmul.msk.bf16.vlgmr.msra.gmra.mxu3 %vm851_vm1, %v2155_v7  ;;  %v1193_v16 = vunpack.c.l.bf16 %v630_v14  ;;  %v1194_v17 = vunpack.c.h.bf16 %v630_v14  ;;  %v2187_v26 = vpack.i.bf16 %v1190_v21, %v1189_v18  ;;  %v1192_v31 = vunpack.c.h.bf16 %v628_v24  ;;  %v2156_v39 = vld [vmem:[%s3390_s1 + $0x90] sm:$0xff]  ;;  %v2134_v40 = vld [vmem:[%s3391_s2] sm:$0xff]  ;;  %v640_v44 = vld [vmem:[%s3390_s1 + $0x48] sm:$0xff]  }
   0x7   :  { %v387_v10 = vsel %vm385_vm2, %v283_v5, 0  ;;  %v2177_v13 = vpack.i.bf16 %v1186_v9, %v1185_v8  ;;  %v2202_v34 = vpack.i.bf16 %v1196_v28, %v1195_v27  ;;  %v1197_v35 = vunpack.c.l.bf16 %v634_v32  ;;  %v2102_v41 = vld [vmem:[%s3393_s0] sm:$0xff]  ;;  %v636_v46 = vld [vmem:[%s3390_s1 + $0x38] sm:$0xff]   ;;  %v642_v56 = vld [vmem:[%s3390_s1 + $0x50] sm:$0xff]  }
   0x8   :  { %392 = vmatpush.bf16.msra.mxu0 %v387_v10  ;;  %2170 = vmatpush.bf16.msra.mxu2 %v387_v10  ;;  %v2197_v22 = vpack.i.bf16 %v1194_v17, %v1193_v16  ;;  %v1198_v36 = vunpack.c.h.bf16 %v634_v32  ;;  %v2192_v37 = vpack.i.bf16 %v1192_v31, %v1191_v30  ;;  %v2118_v43 = vld [vmem:[%s3393_s0 + $0x80] sm:$0xff]  ;;  %v1199_v49 = vunpack.c.l.bf16 %v636_v46  ;;  %v644_v55 = vld [vmem:[%s3390_s1 + $0x58] sm:$0xff]   ;;  %v2140_v3 = vld [vmem:[%s3390_s1 + $0x10] sm:$0xff] }
   0x9   :  { %2178 = vrot.lane.b32.xlu0 %v2177_v13, %s2341_s14  ;;  %2188 = vrot.lane.b32.xlu1 %v2187_v26, %s2341_s14  ;;  %v638_v45 = vld [vmem:[%s3390_s1 + $0x40] sm:$0xff]   ;;  %v1200_v50 = vunpack.c.h.bf16 %v636_v46  ;;  %v1203_v51 = vunpack.c.l.bf16 %v640_v44  ;;  %v1204_v52 = vunpack.c.h.bf16 %v640_v44  ;;  %v1207_v57 = vunpack.c.l.bf16 %v644_v55  ;;  %v2157_v4 = vld [vmem:[%s3390_s1 + $0x98] sm:$0xff] }
   0xa   :  { %2198 = vrot.lane.b32.xlu2 %v2197_v22, %s2341_s14  ;;  %v2207_v42 = vpack.i.bf16 %v1198_v36, %v1197_v35  ;;  %v1201_v47 = vunpack.c.l.bf16 %v638_v45  ;;  %v1202_v48 = vunpack.c.h.bf16 %v638_v45  ;;  %v1208_v58 = vunpack.c.h.bf16 %v644_v55  ;;  %v646_v62 = vld [vmem:[%s3390_s1 + $0x60] sm:$0xff]   ;;  %v2103_v6 = vld [vmem:[%s3393_s0 + $0x8] sm:$0xff]  ;;  %v652_v8 = vld [vmem:[%s3390_s1 + $0x78] sm:$0xff]  }
   0xb   :  { %v2212_v54 = vpack.i.bf16 %v1200_v50, %v1199_v49  ;;  %v2222_v59 = vpack.i.bf16 %v1204_v52, %v1203_v51  ;;  %v1205_v60 = vunpack.c.l.bf16 %v642_v56  ;;  %v1206_v61 = vunpack.c.h.bf16 %v642_v56  ;;  %v2119_v7 = vld [vmem:[%s3393_s0 + $0x88] sm:$0xff]  ;;  %v650_v9 = vld [vmem:[%s3390_s1 + $0x70] sm:$0xff]   ;;  %v654_v20 = vld [vmem:[%s3390_s1 + $0x80] sm:$0xff]  }
   0xc   :  { %393 = vmatpush.bf16.msra.mxu0 %v2137_v12  ;;  %2171 = vmatpush.bf16.msra.mxu2 %v2137_v12  ;;  %v2217_v53 = vpack.i.bf16 %v1202_v48, %v1201_v47  ;;  %v2232_v63 = vpack.i.bf16 %v1208_v58, %v1207_v57  ;;  %v1209_v0 = vunpack.c.l.bf16 %v646_v62  ;;  %v1210_v1 = vunpack.c.h.bf16 %v646_v62  ;;  %v648_v10 = vld [vmem:[%s3390_s1 + $0x68] sm:$0xff]   ;;  %v658_v26 = vld [vmem:[%s3390_s1 + $0x90] sm:$0xff]   ;;  %v2141_v31 = vld [vmem:[%s3390_s1 + $0x18] sm:$0xff] }
   0xd   :  { %v2227_v2 = vpack.i.bf16 %v1206_v61, %v1205_v60  ;;  %v1213_v11 = vunpack.c.l.bf16 %v650_v9  ;;  %v1214_v12 = vunpack.c.h.bf16 %v650_v9  ;;  %v1211_v13 = vunpack.c.l.bf16 %v648_v10  ;;  %v656_v19 = vld [vmem:[%s3390_s1 + $0x88] sm:$0xff]   ;;  %v2158_v32 = vld [vmem:[%s3390_s1 + $0xa0] sm:$0xff]  ;;  %v2120_v35 = vld [vmem:[%s3393_s0 + $0x90] sm:$0xff] }
   0xe   :  { %v2237_v5 = vpack.i.bf16 %v1210_v1, %v1209_v0  ;;  %v1212_v14 = vunpack.c.h.bf16 %v648_v10  ;;  %v1215_v15 = vunpack.c.l.bf16 %v652_v8  ;;  %v1216_v16 = vunpack.c.h.bf16 %v652_v8  ;;  %v660_v36 = vld [vmem:[%s3390_s1 + $0x98] sm:$0xff]   ;;  %v2143_v44 = vld [vmem:[%s3390_s1 + $0x28] sm:$0xff]  ;;  %v2160_v45 = vld [vmem:[%s3390_s1 + $0xb0] sm:$0xff] }
   0xf   :  { %v2247_v17 = vpack.i.bf16 %v1214_v12, %v1213_v11  ;;  %v1219_v21 = vunpack.c.l.bf16 %v656_v19  ;;  %v1220_v22 = vunpack.c.h.bf16 %v656_v19  ;;  %v1217_v24 = vunpack.c.l.bf16 %v654_v20  ;;  %v2106_v46 = vld [vmem:[%s3393_s0 + $0x20] sm:$0xff]  ;;  %v664_v48 = vld [vmem:[%s3390_s1 + $0xa8] sm:$0xff]   ;;  %v2144_v55 = vld [vmem:[%s3390_s1 + $0x30] sm:$0xff] }
  0x10   :  { %394 = vmatpush.bf16.msra.mxu0 %v2136_v25  ;;  %2172 = vmatpush.bf16.msra.mxu2 %v2136_v25  ;;  %v2242_v18 = vpack.i.bf16 %v1212_v14, %v1211_v13  ;;  %v2252_v23 = vpack.i.bf16 %v1216_v16, %v1215_v15  ;;  %v1218_v25 = vunpack.c.h.bf16 %v654_v20  ;;  %v1221_v28 = vunpack.c.l.bf16 %v658_v26  ;;  %v2122_v47 = vld [vmem:[%s3393_s0 + $0xa0] sm:$0xff]  ;;  %v2161_v56 = vld [vmem:[%s3390_s1 + $0xb8] sm:$0xff]  ;;  %v2107_v58 = vld [vmem:[%s3393_s0 + $0x28] sm:$0xff] }
  0x11   :  { %2183 = vrot.lane.b32.xlu0 %v2182_v29, %s2341_s14  ;;  %2193 = vrot.lane.b32.xlu1 %v2192_v37, %s2341_s14  ;;  %v2262_v27 = vpack.i.bf16 %v1220_v22, %v1219_v21  ;;  %v1222_v29 = vunpack.c.h.bf16 %v658_v26  ;;  %v1223_v37 = vunpack.c.l.bf16 %v660_v36  ;;  %v1227_v49 = vunpack.c.l.bf16 %v664_v48  ;;  %v662_v52 = vld [vmem:[%s3390_s1 + $0xa0] sm:$0xff]   ;;  %v666_v60 = vld [vmem:[%s3390_s1 + $0xb0] sm:$0xff]  }
  0x12   :  { %2203 = vrot.lane.b32.xlu2 %v2202_v34, %s2341_s14  ;;  %v2257_v30 = vpack.i.bf16 %v1218_v25, %v1217_v24  ;;  %v2104_v34 = vld [vmem:[%s3393_s0 + $0x10] sm:$0xff]  ;;  %v1228_v50 = vunpack.c.h.bf16 %v664_v48  ;;  %v1229_v61 = vunpack.c.l.bf16 %v666_v60  ;;  %v1230_v62 = vunpack.c.h.bf16 %v666_v60  ;;  %v2145_v0 = vld [vmem:[%s3390_s1 + $0x38] sm:$0xff]  ;;  %v2162_v1 = vld [vmem:[%s3390_s1 + $0xc0] sm:$0xff] }
  0x13   :  { %v2163_v8 = vld [vmem:[%s3390_s1 + $0xc8] sm:$0xff]  ;;  %v2109_v10 = vld [vmem:[%s3393_s0 + $0x38] sm:$0xff]  ;;  %v670_v13 = vld [vmem:[%s3390_s1 + $0xc0] sm:$0xff]  }
  0x14   :  { %395 = vmatpush.bf16.msra.mxu0 %v2135_v33  ;;  %2173 = vmatpush.bf16.msra.mxu2 %v2135_v33  ;;  %v2267_v33 = vpack.i.bf16 %v1222_v29, %v1221_v28  ;;  %v2282_v51 = vpack.i.bf16 %v1228_v50, %v1227_v49  ;;  %v2125_v11 = vld [vmem:[%s3393_s0 + $0xb8] sm:$0xff]  ;;  %v1233_v15 = vunpack.c.l.bf16 %v670_v13  ;;  %v1234_v16 = vunpack.c.h.bf16 %v670_v13  ;;  %v2644_v21 = vld [vmem:[%s3392_s5] ss:$0 sm:$0xff]  ;;  %v2164_v28 = vld [vmem:[%s3390_s1 + $0xd0] sm:$0xff] }
  0x15   :  { %v668_v22 = vld [vmem:[%s3390_s1 + $0xb8] sm:$0xff]  }
  0x16   :  { %2071 = vmatmul.msk.bf16.gmra.mxu1 %vm851_vm1, %v2139_v38  ;;  %2088 = vmatmul.msk.bf16.gmra.mxu3 %vm851_vm1, %v2156_v39  ;;  %v1224_v38 = vunpack.c.h.bf16 %v660_v36  ;;  %v2297_v19 = vpack.i.bf16 %v1234_v16, %v1233_v15  ;;  %v1231_v24 = vunpack.c.l.bf16 %v668_v22  ;;  %v1232_v25 = vunpack.c.h.bf16 %v668_v22 }
  0x18   :  { %396 = vmatpush.bf16.msra.mxu0 %v2134_v40  ;;  %2174 = vmatpush.bf16.msra.mxu2 %v2134_v40  ;;  %v2272_v39 = vpack.i.bf16 %v1224_v38, %v1223_v37  ;;  %v2142_v40 = vld [vmem:[%s3390_s1 + $0x20] sm:$0xff]  ;;  %v2292_v29 = vpack.i.bf16 %v1232_v25, %v1231_v24 }
  0x19   :  { %2208 = vrot.lane.b32.xlu0 %v2207_v42, %s2341_s14  ;;  %2213 = vrot.lane.b32.xlu1 %v2212_v54, %s2341_s14  ;;  %v2105_v42 = vld [vmem:[%s3393_s0 + $0x18] sm:$0xff]  ;;  %v1226_v54 = vunpack.c.h.bf16 %v662_v52 }
  0x1a   :  { %2218 = vrot.lane.b32.xlu2 %v2217_v53, %s2341_s14  ;;  %v1225_v53 = vunpack.c.l.bf16 %v662_v52 }
  0x1b   :  { %1910 = vmatmul.msk.bf16.vlgmr.msra.gmra.mxu0 %vm288_vm3, %v2102_v41  ;;  %1926 = vmatmul.msk.bf16.vlgmr.msra.gmra.mxu2 %vm288_vm3, %v2118_v43  ;;  %v2159_v41 = vld [vmem:[%s3390_s1 + $0xa8] sm:$0xff]  ;;  %v2121_v43 = vld [vmem:[%s3393_s0 + $0x98] sm:$0xff] }
  0x1c   :  { %v2277_v57 = vpack.i.bf16 %v1226_v54, %v1225_v53 }
  0x21   :  { %2223 = vrot.lane.b32.xlu0 %v2222_v59, %s2341_s14  ;;  %2228 = vrot.lane.b32.xlu1 %v2227_v2, %s2341_s14  ;;  %v2123_v59 = vld [vmem:[%s3393_s0 + $0xa8] sm:$0xff]  ;;  %v2108_v2 = vld [vmem:[%s3393_s0 + $0x30] sm:$0xff] }
  0x22   :  { %2233 = vrot.lane.b32.xlu2 %v2232_v63, %s2341_s14  ;;  %v2287_v63 = vpack.i.bf16 %v1230_v62, %v1229_v61  ;;  %v2148_v62 = vld [vmem:[%s3390_s1 + $0x50] sm:$0xff] }
  0x26   :  { %2072 = vmatmul.msk.bf16.gmra.mxu1 %vm851_vm1, %v2140_v3  ;;  %2089 = vmatmul.msk.bf16.gmra.mxu3 %vm851_vm1, %v2157_v4  ;;  %v2124_v3 = vld [vmem:[%s3393_s0 + $0xb0] sm:$0xff] }
  0x29   :  { %2238 = vrot.lane.b32.xlu0 %v2237_v5, %s2341_s14  ;;  %2243 = vrot.lane.b32.xlu1 %v2242_v18, %s2341_s14 }
  0x2a   :  { %2248 = vrot.lane.b32.xlu2 %v2247_v17, %s2341_s14 }
  0x2b   :  { %1911 = vmatmul.msk.bf16.gmra.mxu0 %vm288_vm3, %v2103_v6  ;;  %1927 = vmatmul.msk.bf16.gmra.mxu2 %vm288_vm3, %v2119_v7  ;;  %v2146_v7 = vld [vmem:[%s3390_s1 + $0x40] sm:$0xff] }
  0x31   :  { %2253 = vrot.lane.b32.xlu0 %v2252_v23, %s2341_s14  ;;  %2258 = vrot.lane.b32.xlu1 %v2257_v30, %s2341_s14 }
  0x32   :  { %2263 = vrot.lane.b32.xlu2 %v2262_v27, %s2341_s14  ;;  %v2147_v27 = vld [vmem:[%s3390_s1 + $0x48] sm:$0xff] }
  0x36   :  { %2073 = vmatmul.msk.bf16.gmra.mxu1 %vm851_vm1, %v2141_v31  ;;  %2090 = vmatmul.msk.bf16.gmra.mxu3 %vm851_vm1, %v2158_v32  ;;  %v2663_v32 = vld [vmem:[%s3394_s3] ss:$0 sm:$0xff] }
  0x39   :  { %2268 = vrot.lane.b32.xlu0 %v2267_v33, %s2341_s14  ;;  %2273 = vrot.lane.b32.xlu1 %v2272_v39, %s2341_s14 }
  0x3a   :  { %2278 = vrot.lane.b32.xlu2 %v2277_v57, %s2341_s14 }
  0x3b   :  { %1912 = vmatmul.msk.bf16.gmra.mxu0 %vm288_vm3, %v2104_v34  ;;  %1928 = vmatmul.msk.bf16.gmra.mxu2 %vm288_vm3, %v2120_v35  ;;  %v2110_v34 = vld [vmem:[%s3393_s0 + $0x40] sm:$0xff] }
  0x3c   :  { %v2126_v35 = vld [vmem:[%s3393_s0 + $0xc0] sm:$0xff] }
  0x41   :  { %2283 = vrot.lane.b32.xlu0 %v2282_v51, %s2341_s14  ;;  %2288 = vrot.lane.b32.xlu1 %v2287_v63, %s2341_s14  ;;  %v2165_v63 = vld [vmem:[%s3390_s1 + $0xd8] sm:$0xff] }
  0x42   :  { %2293 = vrot.lane.b32.xlu2 %v2292_v29, %s2341_s14 }
  0x46   :  { %2074 = vmatmul.msk.bf16.gmra.mxu1 %vm851_vm1, %v2142_v40  ;;  %2091 = vmatmul.msk.bf16.gmra.mxu3 %vm851_vm1, %v2159_v41  ;;  %v672_v40 = vld [vmem:[%s3390_s1 + $0xc8] sm:$0xff]  }
  0x49   :  { %2298 = vrot.lane.b32.xlu0 %v2297_v19, %s2341_s14 }
  0x4b   :  { %1913 = vmatmul.msk.bf16.gmra.mxu0 %vm288_vm3, %v2105_v42  ;;  %1929 = vmatmul.msk.bf16.gmra.mxu2 %vm288_vm3, %v2121_v43  ;;  %v1235_v42 = vunpack.c.l.bf16 %v672_v40  ;;  %v1236_v43 = vunpack.c.h.bf16 %v672_v40 }
  0x56   :  { %2075 = vmatmul.msk.bf16.gmra.mxu1 %vm851_vm1, %v2143_v44  ;;  %2092 = vmatmul.msk.bf16.gmra.mxu3 %vm851_vm1, %v2160_v45 }
  0x5b   :  { %1914 = vmatmul.msk.bf16.gmra.mxu0 %vm288_vm3, %v2106_v46  ;;  %1930 = vmatmul.msk.bf16.gmra.mxu2 %vm288_vm3, %v2122_v47  ;;  %v2302_v47 = vpack.i.bf16 %v1236_v43, %v1235_v42 }
  0x5d   :  { %2303 = vrot.lane.b32.xlu1 %v2302_v47, %s2341_s14 }
  0x64   :  { %v2604_v4 = vpop.permute.xlu2 %2198 }
  0x66   :  { %2076 = vmatmul.msk.bf16.gmra.mxu1 %vm851_vm1, %v2144_v55  ;;  %2093 = vmatmul.msk.bf16.gmra.mxu3 %vm851_vm1, %v2161_v56 }
  0x6b   :  { %1915 = vmatmul.msk.bf16.gmra.mxu0 %vm288_vm3, %v2107_v58  ;;  %1931 = vmatmul.msk.bf16.gmra.mxu2 %vm288_vm3, %v2123_v59 }
  0x6c   :  { %v2611_v6 = vpop.permute.xlu2 %2203 }
  0x74   :  { %v2636_v17 = vpop.permute.xlu2 %2218 }
  0x76   :  { %2077 = vmatmul.msk.bf16.gmra.mxu1 %vm851_vm1, %v2145_v0  ;;  %2094 = vmatmul.msk.bf16.gmra.mxu3 %vm851_vm1, %v2162_v1 }
  0x7b   :  { %1916 = vmatmul.msk.bf16.gmra.mxu0 %vm288_vm3, %v2108_v2  ;;  %1932 = vmatmul.msk.bf16.gmra.mxu2 %vm288_vm3, %v2124_v3  ;;  %v2609_v5 = vpop.permute.xlu0 %2178  ;;  %v2638_v20 = vpop.permute.xlu1 %2188 }
  0x7c   :  { %v2665_v33 = vpop.permute.xlu2 %2233  ;;  %v2180_v38 = vunpack.i.l.bf16 %v2609_v5  ;;  %v2181_v56 = vunpack.i.h.bf16 %v2609_v5 }
  0x83   :  { %v961_v9 = vpop.f32.mrf.mxu1  ;;  %v2626_v12 = vpop.permute.xlu0 %2183 }
  0x84   :  { %v962_v30 = vadd.f32 %v2644_v21, %v961_v9  ;;  %v2675_v36 = vpop.permute.xlu1 %2193  ;;  %v2694_v54 = vpop.permute.xlu2 %2248  ;;  %v2111_v9 = vld [vmem:[%s3393_s0 + $0x48] sm:$0xff]  ;;  %v2185_v13 = vunpack.i.l.bf16 %v2626_v12 }
  0x86   :  { %2078 = vmatmul.msk.bf16.gmra.mxu1 %vm851_vm1, %v2146_v7  ;;  %2095 = vmatmul.msk.bf16.gmra.mxu3 %vm851_vm1, %v2163_v8  ;;  %v1121_v37 = vmax.f32 %v962_v30, 0.0 }
  0x88   :  { %v1505_v49 = vsel %vm851_vm1, %v1121_v37, %v2180_v38 }
  0x89   :  { %v2632_v14 = vpop.f32.mrf.mxu3 }
  0x8a   :  { %v1047_v15 = vadd.f32 %v2644_v21, %v2632_v14 }
  0x8b   :  { %1917 = vmatmul.msk.bf16.gmra.mxu0 %vm288_vm3, %v2109_v10  ;;  %1933 = vmatmul.msk.bf16.gmra.mxu2 %vm288_vm3, %v2125_v11  ;;  %v963_v18 = vpop.f32.mrf.mxu1  ;;  %v2649_v23 = vpop.permute.xlu0 %2208  ;;  %v2127_v10 = vld [vmem:[%s3393_s0 + $0xc8] sm:$0xff] }
  0x8c   :  { %v964_v48 = vadd.f32 %v2644_v21, %v963_v18  ;;  %v2702_v59 = vpop.permute.xlu1 %2213  ;;  %v2264_v19 = vpop.permute.xlu2 %2263 }
  0x8d   :  { %v2265_v30 = vunpack.i.l.bf16 %v2264_v19 }
  0x8e   :  { %v1122_v55 = vmax.f32 %v964_v48, 0.0 }
  0x90   :  { %v1506_v1 = vsel %vm851_vm1, %v1122_v55, %v2181_v56 }
  0x91   :  { %v2651_v26 = vpop.f32.mrf.mxu3 }
  0x92   :  { %v1049_v47 = vadd.f32 %v2644_v21, %v2651_v26 }
  0x93   :  { %v966_v31 = vpop.f32.mrf.mxu1  ;;  %v2687_v46 = vpop.permute.xlu0 %2223 }
  0x94   :  { %v967_v0 = vadd.f32 %v2644_v21, %v966_v31  ;;  %v2738_v25 = vpop.permute.xlu1 %2228 }
  0x96   :  { %2079 = vmatmul.msk.bf16.gmra.mxu1 %vm851_vm1, %v2147_v27  ;;  %2096 = vmatmul.msk.bf16.gmra.mxu3 %vm851_vm1, %v2164_v28  ;;  %v1123_v11 = vmax.f32 %v967_v0, 0.0  ;;  %v1155_v27 = vmax.f32 %v1047_v15, 0.0 }
  0x98   :  { %v398_v39 = vpop.f32.mrf.mxu0  ;;  %v1507_v28 = vsel %vm851_vm1, %v1123_v11, %v2185_v13 }
  0x99   :  { %v399_v41 = vadd.f32 %v2663_v32, %v398_v39  ;;  %v2683_v44 = vpop.f32.mrf.mxu3  ;;  %v2186_v39 = vunpack.i.h.bf16 %v2626_v12  ;;  %v2149_v12 = vld [vmem:[%s3390_s1 + $0x58] sm:$0xff] }
  0x9b   :  { %v558_v45 = vmax.f32 %v399_v41, 0.0  ;;  %1918 = vmatmul.msk.bf16.gmra.mxu0 %vm288_vm3, %v2110_v34  ;;  %1934 = vmatmul.msk.bf16.gmra.mxu2 %vm288_vm3, %v2126_v35  ;;  %v968_v50 = vpop.f32.mrf.mxu1  ;;  %v2714_v5 = vpop.permute.xlu0 %2238  ;;  %v1539_v41 = vsel %vm851_vm1, %v1155_v27, %v2265_v30 }
  0x9c   :  { %v969_v14 = vadd.f32 %v2644_v21, %v968_v50  ;;  %v2764_v26 = vpop.permute.xlu1 %2243 }
  0x9d   :  { %v1569_v51 = vadd.f32 %v1505_v49, %v558_v45 }
  0x9e   :  { %v2692_v52 = vpop.f32.mrf.mxu2  ;;  %v1124_v40 = vmax.f32 %v969_v14, 0.0 }
  0x9f   :  { %v1633_v53 = vpack.c.bf16 %v1569_v51, %v1569_v51  ;;  %v2166_v51 = vld [vmem:[%s3390_s1 + $0xe0] sm:$0xff] }
  0xa0   :  { %v400_v57 = vpop.f32.mrf.mxu0  ;;  %v1508_v55 = vsel %vm851_vm1, %v1124_v40, %v2186_v39 }
  0xa1   :  { %1698 = vst.msk [vmem:[%s3395_s6] sm:$0xf] %vm1697_vm4, %v1633_v53  ;;  %v401_v58 = vadd.f32 %v2663_v32, %v400_v57  ;;  %v2704_v60 = vpop.f32.mrf.mxu3 }
  0xa3   :  { %v559_v61 = vmax.f32 %v401_v58, 0.0  ;;  %v971_v2 = vpop.f32.mrf.mxu1  ;;  %v2743_v38 = vpop.permute.xlu0 %2253 }
  0xa4   :  { %v972_v53 = vadd.f32 %v2644_v21, %v971_v2 }
  0xa5   :  { %v1570_v3 = vadd.f32 %v1506_v1, %v559_v61  ;;  %v1156_v61 = vmax.f32 %v1049_v47, 0.0  ;;  %v1052_v1 = vadd.f32 %v2644_v21, %v2683_v44  ;;  %v676_v44 = vld [vmem:[%s3390_s1 + $0xd8] sm:$0xff]   ;;  %v2191_v47 = vunpack.i.h.bf16 %v2638_v20 }
  0xa6   :  { %v2716_v7 = vpop.f32.mrf.mxu2  ;;  %2080 = vmatmul.msk.bf16.gmra.mxu1 %vm851_vm1, %v2148_v62  ;;  %2097 = vmatmul.msk.bf16.gmra.mxu3 %vm851_vm1, %v2165_v63  ;;  %v2266_v62 = vunpack.i.h.bf16 %v2264_v19  ;;  %v1240_v14 = vunpack.c.h.bf16 %v676_v44 }
  0xa7   :  { %v1634_v8 = vpack.c.bf16 %v1570_v3, %v1570_v3  ;;  %v2112_v3 = vld [vmem:[%s3393_s0 + $0x50] sm:$0xff]  ;;  %v1157_v27 = vmax.f32 %v1052_v1, 0.0  ;;  %v2167_v1 = vld [vmem:[%s3390_s1 + $0xe8] sm:$0xff] }
  0xa8   :  { %v403_v16 = vpop.f32.mrf.mxu0  ;;  %v1540_v19 = vsel %vm851_vm1, %v1156_v61, %v2266_v62 }
  0xa9   :  { %1699 = vst.msk [vmem:[%s3395_s6 + $0x4] sm:$0xf] %vm1697_vm4, %v1634_v8  ;;  %v404_v18 = vadd.f32 %v2663_v32, %v403_v16  ;;  %v2734_v22 = vpop.f32.mrf.mxu3  ;;  %v2128_v8 = vld [vmem:[%s3393_s0 + $0xd0] sm:$0xff] }
  0xab   :  { %v560_v24 = vmax.f32 %v404_v18, 0.0  ;;  %1919 = vmatmul.msk.bf16.gmra.mxu0 %vm288_vm3, %v2111_v9  ;;  %1935 = vmatmul.msk.bf16.gmra.mxu2 %vm288_vm3, %v2127_v10  ;;  %v973_v29 = vpop.f32.mrf.mxu1  ;;  %v2190_v9 = vunpack.i.l.bf16 %v2638_v20  ;;  %v1125_v10 = vmax.f32 %v972_v53, 0.0  ;;  %v2790_v16 = vpop.permute.xlu0 %2268  ;;  %v1239_v18 = vunpack.c.l.bf16 %v676_v44 }
  0xac   :  { %v1054_v20 = vadd.f32 %v2644_v21, %v2704_v60  ;;  %v2271_v44 = vunpack.i.h.bf16 %v2790_v16 }
  0xad   :  { %v1571_v31 = vadd.f32 %v1507_v28, %v560_v24  ;;  %v2312_v39 = vpack.i.bf16 %v1240_v14, %v1239_v18  ;;  %v2195_v14 = vunpack.i.l.bf16 %v2675_v36 }
  0xae   :  { %v483_v34 = vpop.f32.mrf.mxu2 }
  0xaf   :  { %v1635_v35 = vpack.c.bf16 %v1571_v31, %v1571_v31  ;;  %v484_v37 = vadd.f32 %v2663_v32, %v483_v34  ;;  %v974_v31 = vadd.f32 %v2644_v21, %v973_v29  ;;  %v1509_v34 = vsel %vm851_vm1, %v1125_v10, %v2190_v9  ;;  %2313 = vrot.lane.b32.xlu0 %v2312_v39, %s2341_s14  ;;  %v2806_v29 = vpop.permute.xlu1 %2258 }
  0xb0   :  { %v405_v42 = vpop.f32.mrf.mxu0 }
  0xb1   :  { %1700 = vst.msk [vmem:[%s3395_s6 + $0x8] sm:$0xf] %vm1697_vm4, %v1635_v35  ;;  %v592_v43 = vmax.f32 %v484_v37, 0.0  ;;  %v406_v45 = vadd.f32 %v2663_v32, %v405_v42  ;;  %v2754_v48 = vpop.f32.mrf.mxu3  ;;  %v2270_v37 = vunpack.i.l.bf16 %v2790_v16  ;;  %v2113_v16 = vld [vmem:[%s3393_s0 + $0x58] sm:$0xff] }
  0xb3   :  { %v1603_v49 = vadd.f32 %v1539_v41, %v592_v43  ;;  %v561_v50 = vmax.f32 %v406_v45, 0.0  ;;  %v976_v56 = vpop.f32.mrf.mxu1 }
  0xb5   :  { %v1667_v57 = vpack.c.bf16 %v1603_v49, %v1603_v49  ;;  %v1572_v58 = vadd.f32 %v1508_v55, %v561_v50  ;;  %v1126_v49 = vmax.f32 %v974_v31, 0.0  ;;  %v1541_v50 = vsel %vm851_vm1, %v1157_v27, %v2270_v37 }
  0xb6   :  { %v485_v63 = vpop.f32.mrf.mxu2  ;;  %2081 = vmatmul.msk.bf16.gmra.mxu1 %vm851_vm1, %v2149_v12  ;;  %2098 = vmatmul.msk.bf16.gmra.mxu3 %vm851_vm1, %v2166_v51  ;;  %v674_v51 = vld [vmem:[%s3390_s1 + $0xd0] sm:$0xff]  }
  0xb7   :  { %1732 = vst.msk [vmem:[%s3395_s6 + $0x88] sm:$0xf] %vm1697_vm4, %v1667_v57  ;;  %v1636_v0 = vpack.c.bf16 %v1572_v58, %v1572_v58  ;;  %v486_v2 = vadd.f32 %v2663_v32, %v485_v63  ;;  %v1237_v57 = vunpack.c.l.bf16 %v674_v51  ;;  %v1238_v61 = vunpack.c.h.bf16 %v674_v51 }
  0xb8   :  { %v408_v11 = vpop.f32.mrf.mxu0 }
  0xb9   :  { %1701 = vst.msk [vmem:[%s3395_s6 + $0xc] sm:$0xf] %vm1697_vm4, %v1636_v0  ;;  %v593_v13 = vmax.f32 %v486_v2, 0.0  ;;  %v409_v15 = vadd.f32 %v2663_v32, %v408_v11  ;;  %v2793_v24 = vpop.f32.mrf.mxu3  ;;  %v2150_v0 = vld [vmem:[%s3390_s1 + $0x60] sm:$0xff]  ;;  %v977_v2 = vadd.f32 %v2644_v21, %v976_v56  ;;  %v2307_v9 = vpack.i.bf16 %v1238_v61, %v1237_v57 }
  0xba   :  { %v1158_v11 = vmax.f32 %v1054_v20, 0.0  ;;  %v1057_v56 = vadd.f32 %v2644_v21, %v2734_v22  ;;  %v678_v22 = vld [vmem:[%s3390_s1 + $0xe0] sm:$0xff]  }
  0xbb   :  { %v1604_v28 = vadd.f32 %v1540_v19, %v593_v13  ;;  %v562_v30 = vmax.f32 %v409_v15, 0.0  ;;  %1920 = vmatmul.msk.bf16.gmra.mxu0 %vm288_vm3, %v2112_v3  ;;  %1936 = vmatmul.msk.bf16.gmra.mxu2 %vm288_vm3, %v2128_v8  ;;  %v978_v35 = vpop.f32.mrf.mxu1  ;;  %v1510_v3 = vsel %vm851_vm1, %v1126_v49, %v2191_v47  ;;  %v2129_v19 = vld [vmem:[%s3393_s0 + $0xd8] sm:$0xff]  ;;  %v1127_v27 = vmax.f32 %v977_v2, 0.0 }
  0xbc   :  { %2308 = vrot.lane.b32.xlu2 %v2307_v9, %s2341_s14  ;;  %v1241_v37 = vunpack.c.l.bf16 %v678_v22  ;;  %v1542_v39 = vsel %vm851_vm1, %v1158_v11, %v2271_v44  ;;  %v979_v47 = vadd.f32 %v2644_v21, %v978_v35  ;;  %v2196_v35 = vunpack.i.h.bf16 %v2675_v36  ;;  %v2151_v36 = vld [vmem:[%s3390_s1 + $0x68] sm:$0xff]  ;;  %v2168_v11 = vld [vmem:[%s3390_s1 + $0xf0] sm:$0xff] }
  0xbd   :  { %v1668_v40 = vpack.c.bf16 %v1604_v28, %v1604_v28  ;;  %v1573_v41 = vadd.f32 %v1509_v34, %v562_v30  ;;  %v2274_v34 = vpop.permute.xlu1 %2273  ;;  %v1511_v49 = vsel %vm851_vm1, %v1127_v27, %v2195_v14 }
  0xbe   :  { %v488_v42 = vpop.f32.mrf.mxu2 }
  0xbf   :  { %1733 = vst.msk [vmem:[%s3395_s6 + $0x8c] sm:$0xf] %vm1697_vm4, %v1668_v40  ;;  %v1637_v43 = vpack.c.bf16 %v1573_v41, %v1573_v41  ;;  %v489_v45 = vadd.f32 %v2663_v32, %v488_v42  ;;  %v1242_v41 = vunpack.c.h.bf16 %v678_v22  ;;  %v1159_v42 = vmax.f32 %v1057_v56, 0.0 }
  0xc0   :  { %v410_v12 = vpop.f32.mrf.mxu0  ;;  %v2200_v22 = vunpack.i.l.bf16 %v2604_v4 }
  0xc1   :  { %1702 = vst.msk [vmem:[%s3395_s6 + $0x10] sm:$0xf] %vm1697_vm4, %v1637_v43  ;;  %v594_v53 = vmax.f32 %v489_v45, 0.0  ;;  %v411_v55 = vadd.f32 %v2663_v32, %v410_v12  ;;  %v2820_v58 = vpop.f32.mrf.mxu3  ;;  %v2275_v12 = vunpack.i.l.bf16 %v2274_v34  ;;  %v2317_v51 = vpack.i.bf16 %v1242_v41, %v1241_v37  ;;  %v2279_v41 = vpop.permute.xlu2 %2278 }
  0xc3   :  { %v1605_v62 = vadd.f32 %v1541_v50, %v594_v53  ;;  %v563_v63 = vmax.f32 %v411_v55, 0.0  ;;  %v981_v8 = vpop.f32.mrf.mxu1  ;;  %2318 = vrot.lane.b32.xlu1 %v2317_v51, %s2341_s14 }
  0xc4   :  { %v982_v44 = vadd.f32 %v2644_v21, %v981_v8  ;;  %v2114_v8 = vld [vmem:[%s3393_s0 + $0x60] sm:$0xff] }
  0xc5   :  { %v1669_v60 = vpack.c.bf16 %v1605_v62, %v1605_v62  ;;  %v1574_v10 = vadd.f32 %v1510_v3, %v563_v63  ;;  %v1128_v62 = vmax.f32 %v979_v47, 0.0  ;;  %v1543_v63 = vsel %vm851_vm1, %v1159_v42, %v2275_v12 }
  0xc6   :  { %v490_v13 = vpop.f32.mrf.mxu2  ;;  %2082 = vmatmul.msk.bf16.gmra.mxu1 %vm851_vm1, %v2150_v0  ;;  %2099 = vmatmul.msk.bf16.gmra.mxu3 %vm851_vm1, %v2167_v1  ;;  %v1059_v3 = vadd.f32 %v2644_v21, %v2754_v48 }
  0xc7   :  { %1734 = vst.msk [vmem:[%s3395_s6 + $0x90] sm:$0xf] %vm1697_vm4, %v1669_v60  ;;  %v1638_v15 = vpack.c.bf16 %v1574_v10, %v1574_v10  ;;  %v491_v18 = vadd.f32 %v2663_v32, %v490_v13  ;;  %v1512_v13 = vsel %vm851_vm1, %v1128_v62, %v2196_v35  ;;  %v2201_v62 = vunpack.i.h.bf16 %v2604_v4  ;;  %v2152_v4 = vld [vmem:[%s3390_s1 + $0x70] sm:$0xff] }
  0xc8   :  { %v413_v28 = vpop.f32.mrf.mxu0  ;;  %v1160_v48 = vmax.f32 %v1059_v3, 0.0  ;;  %v1064_v3 = vadd.f32 %v2644_v21, %v2820_v58 }
  0xc9   :  { %1703 = vst.msk [vmem:[%s3395_s6 + $0x14] sm:$0xf] %vm1697_vm4, %v1638_v15  ;;  %v595_v30 = vmax.f32 %v491_v18, 0.0  ;;  %v414_v31 = vadd.f32 %v2663_v32, %v413_v28  ;;  %v2857_v40 = vpop.f32.mrf.mxu3  ;;  %v2130_v28 = vld [vmem:[%s3393_s0 + $0xe0] sm:$0xff] }
  0xca   :  { %v1162_v58 = vmax.f32 %v1064_v3, 0.0 }
  0xcb   :  { %v1606_v43 = vadd.f32 %v1542_v39, %v595_v30  ;;  %v564_v45 = vmax.f32 %v414_v31, 0.0  ;;  %1921 = vmatmul.msk.bf16.gmra.mxu0 %vm288_vm3, %v2113_v16  ;;  %1937 = vmatmul.msk.bf16.gmra.mxu2 %vm288_vm3, %v2129_v19  ;;  %v983_v50 = vpop.f32.mrf.mxu1  ;;  %v2276_v16 = vunpack.i.h.bf16 %v2274_v34  ;;  %v1129_v30 = vmax.f32 %v982_v44, 0.0 }
  0xcc   :  { %v1062_v31 = vadd.f32 %v2644_v21, %v2793_v24  ;;  %v984_v24 = vadd.f32 %v2644_v21, %v983_v50 }
  0xcd   :  { %v1670_v53 = vpack.c.bf16 %v1606_v43, %v1606_v43  ;;  %v1575_v55 = vadd.f32 %v1511_v49, %v564_v45  ;;  %v1544_v42 = vsel %vm851_vm1, %v1160_v48, %v2276_v16  ;;  %v1513_v12 = vsel %vm851_vm1, %v1129_v30, %v2200_v22 }
  0xce   :  { %v493_v57 = vpop.f32.mrf.mxu2  ;;  %v1161_v49 = vmax.f32 %v1062_v31, 0.0  ;;  %v2281_v16 = vunpack.i.h.bf16 %v2279_v41  ;;  %v2205_v22 = vunpack.i.l.bf16 %v2611_v6 }
  0xcf   :  { %1735 = vst.msk [vmem:[%s3395_s6 + $0x94] sm:$0xf] %vm1697_vm4, %v1670_v53  ;;  %v1639_v20 = vpack.c.bf16 %v1575_v55, %v1575_v55  ;;  %v494_v61 = vadd.f32 %v2663_v32, %v493_v57  ;;  %v2280_v53 = vunpack.i.l.bf16 %v2279_v41 }
  0xd0   :  { %v415_v0 = vpop.f32.mrf.mxu0 }
  0xd1   :  { %1704 = vst.msk [vmem:[%s3395_s6 + $0x18] sm:$0xf] %vm1697_vm4, %v1639_v20  ;;  %v596_v1 = vmax.f32 %v494_v61, 0.0  ;;  %v416_v2 = vadd.f32 %v2663_v32, %v415_v0  ;;  %v2878_v9 = vpop.f32.mrf.mxu3  ;;  %v1545_v50 = vsel %vm851_vm1, %v1161_v49, %v2280_v53 }
  0xd3   :  { %v1607_v60 = vadd.f32 %v1543_v63, %v596_v1  ;;  %v565_v10 = vmax.f32 %v416_v2, 0.0  ;;  %v986_v15 = vpop.f32.mrf.mxu1  ;;  %v1130_v63 = vmax.f32 %v984_v24, 0.0 }
  0xd4   :  { %v987_v44 = vadd.f32 %v2644_v21, %v986_v15  ;;  %v2115_v15 = vld [vmem:[%s3393_s0 + $0x68] sm:$0xff] }
  0xd5   :  { %v1671_v56 = vpack.c.bf16 %v1607_v60, %v1607_v60  ;;  %v1576_v18 = vadd.f32 %v1512_v13, %v565_v10  ;;  %v1514_v13 = vsel %vm851_vm1, %v1130_v63, %v2201_v62 }
  0xd6   :  { %v495_v19 = vpop.f32.mrf.mxu2  ;;  %2083 = vmatmul.msk.bf16.gmra.mxu1 %vm851_vm1, %v2151_v36  ;;  %2100 = vmatmul.msk.bf16.gmra.mxu3 %vm851_vm1, %v2168_v11  ;;  %v2169_v11 = vld [vmem:[%s3390_s1 + $0xf8] sm:$0xff]  ;;  %v1131_v30 = vmax.f32 %v987_v44, 0.0 }
  0xd7   :  { %1736 = vst.msk [vmem:[%s3395_s6 + $0x98] sm:$0xf] %vm1697_vm4, %v1671_v56  ;;  %v1640_v14 = vpack.c.bf16 %v1576_v18, %v1576_v18  ;;  %v496_v27 = vadd.f32 %v2663_v32, %v495_v19 }
  0xd8   :  { %v418_v34 = vpop.f32.mrf.mxu0 }
  0xd9   :  { %1705 = vst.msk [vmem:[%s3395_s6 + $0x1c] sm:$0xf] %vm1697_vm4, %v1640_v14  ;;  %v597_v37 = vmax.f32 %v496_v27, 0.0  ;;  %v419_v39 = vadd.f32 %v2663_v32, %v418_v34  ;;  %v2910_v43 = vpop.f32.mrf.mxu3  ;;  %v1067_v27 = vadd.f32 %v2644_v21, %v2857_v40  ;;  %v682_v40 = vld [vmem:[%s3390_s1 + $0xf0] sm:$0xff]  }
  0xda   :  { %v1245_v41 = vunpack.c.l.bf16 %v682_v40 }
  0xdb   :  { %v1608_v45 = vadd.f32 %v1544_v42, %v597_v37  ;;  %v566_v47 = vmax.f32 %v419_v39, 0.0  ;;  %1922 = vmatmul.msk.bf16.gmra.mxu0 %vm288_vm3, %v2114_v8  ;;  %1938 = vmatmul.msk.bf16.gmra.mxu2 %vm288_vm3, %v2130_v28  ;;  %v988_v51 = vpop.f32.mrf.mxu1  ;;  %v2131_v28 = vld [vmem:[%s3393_s0 + $0xe8] sm:$0xff]  ;;  %v2964_v39 = vpop.permute.xlu0 %2283  ;;  %v1546_v42 = vsel %vm851_vm1, %v1162_v58, %v2281_v16  ;;  %v1163_v24 = vmax.f32 %v1067_v27, 0.0  ;;  %v2153_v58 = vld [vmem:[%s3390_s1 + $0x78] sm:$0xff] }
  0xdc   :  { %v989_v53 = vadd.f32 %v2644_v21, %v988_v51  ;;  %v2206_v51 = vunpack.i.h.bf16 %v2611_v6  ;;  %v1069_v6 = vadd.f32 %v2644_v21, %v2878_v9  ;;  %v2286_v9 = vunpack.i.h.bf16 %v2964_v39 }
  0xdd   :  { %v1672_v55 = vpack.c.bf16 %v1608_v45, %v1608_v45  ;;  %v1577_v57 = vadd.f32 %v1513_v12, %v566_v47  ;;  %v1246_v47 = vunpack.c.h.bf16 %v682_v40  ;;  %v2116_v40 = vld [vmem:[%s3393_s0 + $0x70] sm:$0xff] }
  0xde   :  { %v498_v20 = vpop.f32.mrf.mxu2 }
  0xdf   :  { %1737 = vst.msk [vmem:[%s3395_s6 + $0x9c] sm:$0xf] %vm1697_vm4, %v1672_v55  ;;  %v1641_v61 = vpack.c.bf16 %v1577_v57, %v1577_v57  ;;  %v499_v35 = vadd.f32 %v2663_v32, %v498_v20  ;;  %v1515_v55 = vsel %vm851_vm1, %v1131_v30, %v2205_v22  ;;  %v2285_v20 = vunpack.i.l.bf16 %v2964_v39 }
  0xe0   :  { %v420_v0 = vpop.f32.mrf.mxu0 }
  0xe1   :  { %1706 = vst.msk [vmem:[%s3395_s6 + $0x20] sm:$0xf] %vm1697_vm4, %v1641_v61  ;;  %v598_v1 = vmax.f32 %v499_v35, 0.0  ;;  %v421_v2 = vadd.f32 %v2663_v32, %v420_v0  ;;  %v2930_v60 = vpop.f32.mrf.mxu3  ;;  %v2327_v61 = vpack.i.bf16 %v1246_v47, %v1245_v41 }
  0xe3   :  { %v1609_v10 = vadd.f32 %v1545_v50, %v598_v1  ;;  %v567_v36 = vmax.f32 %v421_v2, 0.0  ;;  %v991_v56 = vpop.f32.mrf.mxu1  ;;  %2328 = vrot.lane.b32.xlu0 %v2327_v61, %s2341_s14  ;;  %v1132_v1 = vmax.f32 %v989_v53, 0.0  ;;  %v1547_v2 = vsel %vm851_vm1, %v1163_v24, %v2285_v20  ;;  %v2289_v24 = vpop.permute.xlu1 %2288 }
  0xe4   :  { %v992_v16 = vadd.f32 %v2644_v21, %v991_v56  ;;  %v1072_v56 = vadd.f32 %v2644_v21, %v2910_v43  ;;  %v684_v43 = vld [vmem:[%s3390_s1 + $0xf8] sm:$0xff]  }
  0xe5   :  { %v1673_v18 = vpack.c.bf16 %v1609_v10, %v1609_v10  ;;  %v1578_v48 = vadd.f32 %v1514_v13, %v567_v36  ;;  %v680_v10 = vld [vmem:[%s3390_s1 + $0xe8] sm:$0xff]  }
  0xe6   :  { %v500_v19 = vpop.f32.mrf.mxu2  ;;  %2084 = vmatmul.msk.bf16.gmra.mxu1 %vm851_vm1, %v2152_v4  ;;  %2101 = vmatmul.msk.bf16.gmra.mxu3 %vm851_vm1, %v2169_v11  ;;  %v1243_v11 = vunpack.c.l.bf16 %v680_v10  ;;  %v1244_v13 = vunpack.c.h.bf16 %v680_v10  ;;  %v1133_v39 = vmax.f32 %v992_v16, 0.0  ;;  %v1165_v20 = vmax.f32 %v1072_v56, 0.0 }
  0xe7   :  { %1738 = vst.msk [vmem:[%s3395_s6 + $0xa0] sm:$0xf] %vm1697_vm4, %v1673_v18  ;;  %v1642_v14 = vpack.c.bf16 %v1578_v48, %v1578_v48  ;;  %v501_v8 = vadd.f32 %v2663_v32, %v500_v19  ;;  %v1516_v19 = vsel %vm851_vm1, %v1132_v1, %v2206_v51 }
  0xe8   :  { %v423_v31 = vpop.f32.mrf.mxu0  ;;  %v2322_v27 = vpack.i.bf16 %v1244_v13, %v1243_v11 }
  0xe9   :  { %1707 = vst.msk [vmem:[%s3395_s6 + $0x24] sm:$0xf] %vm1697_vm4, %v1642_v14  ;;  %v599_v34 = vmax.f32 %v501_v8, 0.0  ;;  %v424_v37 = vadd.f32 %v2663_v32, %v423_v31  ;;  %v2967_v45 = vpop.f32.mrf.mxu3 }
  0xea   :  { %2323 = vrot.lane.b32.xlu2 %v2322_v27, %s2341_s14 }
  0xeb   :  { %v1610_v49 = vadd.f32 %v1546_v42, %v599_v34  ;;  %v568_v12 = vmax.f32 %v424_v37, 0.0  ;;  %1923 = vmatmul.msk.bf16.gmra.mxu0 %vm288_vm3, %v2115_v15  ;;  %1939 = vmatmul.msk.bf16.gmra.mxu2 %vm288_vm3, %v2131_v28  ;;  %v993_v57 = vpop.f32.mrf.mxu1  ;;  %v1164_v28 = vmax.f32 %v1069_v6, 0.0  ;;  %v2132_v34 = vld [vmem:[%s3393_s0 + $0xf0] sm:$0xff]  ;;  %v2210_v37 = vunpack.i.l.bf16 %v2649_v23 }
  0xed   :  { %v1674_v35 = vpack.c.bf16 %v1610_v49, %v1610_v49  ;;  %v1579_v62 = vadd.f32 %v1515_v55, %v568_v12  ;;  %v1247_v49 = vunpack.c.l.bf16 %v684_v43  ;;  %v1548_v12 = vsel %vm851_vm1, %v1164_v28, %v2286_v9 }
  0xee   :  { %v503_v63 = vpop.f32.mrf.mxu2  ;;  %v1248_v55 = vunpack.c.h.bf16 %v684_v43 }
  0xef   :  { %1739 = vst.msk [vmem:[%s3395_s6 + $0xa4] sm:$0xf] %vm1697_vm4, %v1674_v35  ;;  %v1643_v50 = vpack.c.bf16 %v1579_v62, %v1579_v62  ;;  %v504_v0 = vadd.f32 %v2663_v32, %v503_v63  ;;  %v994_v62 = vadd.f32 %v2644_v21, %v993_v57  ;;  %v1517_v63 = vsel %vm851_vm1, %v1133_v39, %v2210_v37 }
  0xf0   :  { %v425_v3 = vpop.f32.mrf.mxu0  ;;  %v2332_v51 = vpack.i.bf16 %v1248_v55, %v1247_v49  ;;  %v2211_v57 = vunpack.i.h.bf16 %v2649_v23  ;;  %v2154_v23 = vld [vmem:[%s3390_s1 + $0x80] sm:$0xff]  ;;  %v1077_v39 = vadd.f32 %v2644_v21, %v2967_v45 }
  0xf1   :  { %1708 = vst.msk [vmem:[%s3395_s6 + $0x28] sm:$0xf] %vm1697_vm4, %v1643_v50  ;;  %v600_v36 = vmax.f32 %v504_v0, 0.0  ;;  %v426_v4 = vadd.f32 %v2663_v32, %v425_v3  ;;  %v2992_v44 = vpop.f32.mrf.mxu3  ;;  %v2290_v0 = vunpack.i.l.bf16 %v2289_v24 }
  0xf2   :  { %2333 = vrot.lane.b32.xlu1 %v2332_v51, %s2341_s14  ;;  %v1167_v55 = vmax.f32 %v1077_v39, 0.0 }
  0xf3   :  { %v1611_v18 = vadd.f32 %v1547_v2, %v600_v36  ;;  %v569_v48 = vmax.f32 %v426_v4, 0.0  ;;  %v996_v14 = vpop.f32.mrf.mxu1  ;;  %v1134_v4 = vmax.f32 %v994_v62, 0.0  ;;  %v1549_v11 = vsel %vm851_vm1, %v1165_v20, %v2290_v0 }
  0xf4   :  { %v997_v27 = vadd.f32 %v2644_v21, %v996_v14  ;;  %v2117_v14 = vld [vmem:[%s3393_s0 + $0x78] sm:$0xff] }
  0xf5   :  { %v1675_v8 = vpack.c.bf16 %v1611_v18, %v1611_v18  ;;  %v1580_v15 = vadd.f32 %v1516_v19, %v569_v48  ;;  %v1074_v48 = vadd.f32 %v2644_v21, %v2930_v60 }
  0xf6   :  { %v505_v22 = vpop.f32.mrf.mxu2  ;;  %2085 = vmatmul.msk.bf16.gmra.mxu1 %vm851_vm1, %v2153_v58  ;;  %v1135_v37 = vmax.f32 %v997_v27, 0.0 }
  0xf7   :  { %1740 = vst.msk [vmem:[%s3395_s6 + $0xa8] sm:$0xf] %vm1697_vm4, %v1675_v8  ;;  %v1644_v30 = vpack.c.bf16 %v1580_v15, %v1580_v15  ;;  %v506_v31 = vadd.f32 %v2663_v32, %v505_v22  ;;  %v1518_v8 = vsel %vm851_vm1, %v1134_v4, %v2211_v57  ;;  %v1166_v22 = vmax.f32 %v1074_v48, 0.0 }
  0xf8   :  { %v428_v41 = vpop.f32.mrf.mxu0 }
  0xf9   :  { %1709 = vst.msk [vmem:[%s3395_s6 + $0x2c] sm:$0xf] %vm1697_vm4, %v1644_v30  ;;  %v601_v42 = vmax.f32 %v506_v31, 0.0  ;;  %v429_v47 = vadd.f32 %v2663_v32, %v428_v41  ;;  %v3025_v53 = vpop.f32.mrf.mxu3  ;;  %v2291_v30 = vunpack.i.h.bf16 %v2289_v24 }
  0xfb   :  { %v1612_v61 = vadd.f32 %v1548_v12, %v601_v42  ;;  %v570_v35 = vmax.f32 %v429_v47, 0.0  ;;  %1924 = vmatmul.msk.bf16.gmra.mxu0 %vm288_vm3, %v2116_v40  ;;  %1940 = vmatmul.msk.bf16.gmra.mxu2 %vm288_vm3, %v2132_v34  ;;  %v998_v50 = vpop.f32.mrf.mxu1  ;;  %v2133_v40 = vld [vmem:[%s3393_s0 + $0xf8] sm:$0xff]  ;;  %v2215_v34 = vunpack.i.l.bf16 %v2702_v59  ;;  %v2294_v47 = vpop.permute.xlu2 %2293  ;;  %v1550_v24 = vsel %vm851_vm1, %v1166_v22, %v2291_v30 }
  0xfc   :  { %v999_v45 = vadd.f32 %v2644_v21, %v998_v50  ;;  %v2216_v50 = vunpack.i.h.bf16 %v2702_v59  ;;  %v2296_v27 = vunpack.i.h.bf16 %v2294_v47  ;;  %v1082_v30 = vadd.f32 %v2644_v21, %v3025_v53 }
  0xfd   :  { %v1676_v1 = vpack.c.bf16 %v1612_v61, %v1612_v61  ;;  %v1581_v2 = vadd.f32 %v1517_v63, %v570_v35  ;;  %v1519_v20 = vsel %vm851_vm1, %v1135_v37, %v2215_v34  ;;  %v2295_v35 = vunpack.i.l.bf16 %v2294_v47 }
  0xfe   :  { %v508_v3 = vpop.f32.mrf.mxu2 }
  0xff   :  { %1741 = vst.msk [vmem:[%s3395_s6 + $0xac] sm:$0xf] %vm1697_vm4, %v1676_v1  ;;  %v1645_v10 = vpack.c.bf16 %v1581_v2, %v1581_v2  ;;  %v509_v36 = vadd.f32 %v2663_v32, %v508_v3  ;;  %v1136_v3 = vmax.f32 %v999_v45, 0.0 }
 0x100   :  { %v430_v6 = vpop.f32.mrf.mxu0 }
 0x101   :  { %1710 = vst.msk [vmem:[%s3395_s6 + $0x30] sm:$0xf] %vm1697_vm4, %v1645_v10  ;;  %v602_v13 = vmax.f32 %v509_v36, 0.0  ;;  %v431_v18 = vadd.f32 %v2663_v32, %v430_v6  ;;  %v3049_v19 = vpop.f32.mrf.mxu3  ;;  %v1551_v10 = vsel %vm851_vm1, %v1167_v55, %v2295_v35  ;;  %v1520_v59 = vsel %vm851_vm1, %v1136_v3, %v2216_v50 }
 0x102   :  { %v2221_v55 = vunpack.i.h.bf16 %v2636_v17 }
 0x103   :  { %v1613_v58 = vadd.f32 %v1549_v11, %v602_v13  ;;  %v571_v16 = vmax.f32 %v431_v18, 0.0  ;;  %v1001_v15 = vpop.f32.mrf.mxu1  ;;  %v1079_v11 = vadd.f32 %v2644_v21, %v2992_v44 }
 0x104   :  { %v1002_v18 = vadd.f32 %v2644_v21, %v1001_v15  ;;  %v2220_v15 = vunpack.i.l.bf16 %v2636_v17 }
 0x105   :  { %v1677_v28 = vpack.c.bf16 %v1613_v58, %v1613_v58  ;;  %v1582_v9 = vadd.f32 %v1518_v8, %v571_v16 }
 0x106   :  { %v510_v56 = vpop.f32.mrf.mxu2  ;;  %2086 = vmatmul.msk.bf16.gmra.mxu1 %vm851_vm1, %v2154_v23  ;;  %v1168_v23 = vmax.f32 %v1079_v11, 0.0  ;;  %v1137_v22 = vmax.f32 %v1002_v18, 0.0  ;;  %v2225_v18 = vunpack.i.l.bf16 %v2687_v46 }
 0x107   :  { %1742 = vst.msk [vmem:[%s3395_s6 + $0xb0] sm:$0xf] %vm1697_vm4, %v1677_v28  ;;  %v1646_v60 = vpack.c.bf16 %v1582_v9, %v1582_v9  ;;  %v511_v31 = vadd.f32 %v2663_v32, %v510_v56 }
 0x108   :  { %v433_v41 = vpop.f32.mrf.mxu0 }
 0x109   :  { %1711 = vst.msk [vmem:[%s3395_s6 + $0x34] sm:$0xf] %vm1697_vm4, %v1646_v60  ;;  %v603_v43 = vmax.f32 %v511_v31, 0.0  ;;  %v434_v42 = vadd.f32 %v2663_v32, %v433_v41  ;;  %v3078_v0 = vpop.f32.mrf.mxu3  ;;  %v1169_v41 = vmax.f32 %v1082_v30, 0.0 }
 0x10b   :  { %v1614_v49 = vadd.f32 %v1550_v24, %v603_v43  ;;  %v572_v12 = vmax.f32 %v434_v42, 0.0  ;;  %1925 = vmatmul.msk.bf16.gmra.mxu0 %vm288_vm3, %v2117_v14  ;;  %1941 = vmatmul.msk.bf16.gmra.mxu2 %vm288_vm3, %v2133_v40  ;;  %v1003_v61 = vpop.f32.mrf.mxu1  ;;  %v2299_v14 = vpop.permute.xlu0 %2298  ;;  %v1552_v40 = vsel %vm851_vm1, %v1168_v23, %v2296_v27  ;;  %v1521_v43 = vsel %vm851_vm1, %v1137_v22, %v2220_v15 }
 0x10c   :  { %v1004_v39 = vadd.f32 %v2644_v21, %v1003_v61  ;;  %v2300_v42 = vunpack.i.l.bf16 %v2299_v14  ;;  %v2301_v11 = vunpack.i.h.bf16 %v2299_v14  ;;  %v2304_v27 = vpop.permute.xlu1 %2303 }
 0x10d   :  { %v1678_v62 = vpack.c.bf16 %v1614_v49, %v1614_v49  ;;  %v1583_v63 = vadd.f32 %v1519_v20, %v572_v12 }
 0x10e   :  { %v513_v51 = vpop.f32.mrf.mxu2  ;;  %v1138_v20 = vmax.f32 %v1004_v39, 0.0  ;;  %v1553_v61 = vsel %vm851_vm1, %v1169_v41, %v2300_v42  ;;  %v2226_v39 = vunpack.i.h.bf16 %v2687_v46  ;;  %v3164_v42 = vld [vmem:[%s3394_s3] ss:$0 sm:$0xff] }
 0x10f   :  { %1743 = vst.msk [vmem:[%s3395_s6 + $0xb4] sm:$0xf] %vm1697_vm4, %v1678_v62  ;;  %v1647_v1 = vpack.c.bf16 %v1583_v63, %v1583_v63  ;;  %v514_v2 = vadd.f32 %v2663_v32, %v513_v51 }
 0x110   :  { %v435_v36 = vpop.f32.mrf.mxu0  ;;  %v1522_v3 = vsel %vm851_vm1, %v1138_v20, %v2221_v55 }
 0x111   :  { %1712 = vst.msk [vmem:[%s3395_s6 + $0x38] sm:$0xf] %vm1697_vm4, %v1647_v1  ;;  %v604_v57 = vmax.f32 %v514_v2, 0.0  ;;  %v436_v4 = vadd.f32 %v2663_v32, %v435_v36  ;;  %v3101_v9 = vpop.f32.mrf.mxu3  ;;  %v1084_v1 = vadd.f32 %v2644_v21, %v3049_v19 }
 0x113   :  { %v1615_v6 = vadd.f32 %v1551_v10, %v604_v57  ;;  %v573_v13 = vmax.f32 %v436_v4, 0.0  ;;  %v1006_v48 = vpop.f32.mrf.mxu1  ;;  %v1170_v4 = vmax.f32 %v1084_v1, 0.0 }
 0x114   :  { %v1007_v17 = vadd.f32 %v2644_v21, %v1006_v48  ;;  %v1087_v48 = vadd.f32 %v2644_v21, %v3078_v0 }
 0x115   :  { %v1679_v58 = vpack.c.bf16 %v1615_v6, %v1615_v6  ;;  %v1584_v16 = vadd.f32 %v1520_v59, %v573_v13 }
 0x116   :  { %v515_v8 = vpop.f32.mrf.mxu2  ;;  %v1139_v59 = vmax.f32 %v1007_v17, 0.0  ;;  %v1171_v30 = vmax.f32 %v1087_v48, 0.0 }
 0x117   :  { %1744 = vst.msk [vmem:[%s3395_s6 + $0xb8] sm:$0xf] %vm1697_vm4, %v1679_v58  ;;  %v1648_v28 = vpack.c.bf16 %v1584_v16, %v1584_v16  ;;  %v516_v44 = vadd.f32 %v2663_v32, %v515_v8  ;;  %v1554_v8 = vsel %vm851_vm1, %v1170_v4, %v2301_v11  ;;  %v2309_v4 = vpop.permute.xlu2 %2308 }
 0x118   :  { %v438_v56 = vpop.f32.mrf.mxu0  ;;  %v1523_v0 = vsel %vm851_vm1, %v1139_v59, %v2225_v18  ;;  %v2310_v48 = vunpack.i.l.bf16 %v2309_v4 }
 0x119   :  { %1713 = vst.msk [vmem:[%s3395_s6 + $0x3c] sm:$0xf] %vm1697_vm4, %v1648_v28  ;;  %v605_v60 = vmax.f32 %v516_v44, 0.0  ;;  %v439_v31 = vadd.f32 %v2663_v32, %v438_v56  ;;  %v3126_v51 = vpop.f32.mrf.mxu3 }
 0x11b   :  { %v1616_v34 = vadd.f32 %v1552_v40, %v605_v60  ;;  %v574_v37 = vmax.f32 %v439_v31, 0.0  ;;  %v1008_v53 = vpop.f32.mrf.mxu1  ;;  %v2305_v60 = vunpack.i.l.bf16 %v2304_v27 }
 0x11c   :  { %v1009_v22 = vadd.f32 %v2644_v21, %v1008_v53 }
 0x11d   :  { %v1680_v47 = vpack.c.bf16 %v1616_v34, %v1616_v34  ;;  %v1585_v24 = vadd.f32 %v1521_v43, %v574_v37  ;;  %v1555_v21 = vsel %vm851_vm1, %v1171_v30, %v2305_v60 }
 0x11e   :  { %v518_v49 = vpop.f32.mrf.mxu2  ;;  %v1140_v41 = vmax.f32 %v1009_v22, 0.0 }
 0x11f   :  { %1745 = vst.msk [vmem:[%s3395_s6 + $0xbc] sm:$0xf] %vm1697_vm4, %v1680_v47  ;;  %v1649_v12 = vpack.c.bf16 %v1585_v24, %v1585_v24  ;;  %v519_v45 = vadd.f32 %v2663_v32, %v518_v49 }
 0x120   :  { %v440_v35 = vpop.f32.mrf.mxu0 }
 0x121   :  { %1714 = vst.msk [vmem:[%s3395_s6 + $0x40] sm:$0xf] %vm1697_vm4, %v1649_v12  ;;  %v606_v62 = vmax.f32 %v519_v45, 0.0  ;;  %v441_v63 = vadd.f32 %v2663_v32, %v440_v35  ;;  %v3146_v15 = vpop.f32.mrf.mxu3  ;;  %v1524_v45 = vsel %vm851_vm1, %v1140_v41, %v2226_v39 }
 0x123   :  { %v1617_v2 = vadd.f32 %v1553_v61, %v606_v62  ;;  %v575_v50 = vmax.f32 %v441_v63, 0.0  ;;  %v1011_v10 = vpop.f32.mrf.mxu1  ;;  %v2306_v63 = vunpack.i.h.bf16 %v2304_v27 }
 0x125   :  { %v1681_v36 = vpack.c.bf16 %v1617_v2, %v1617_v2  ;;  %v1586_v57 = vadd.f32 %v1522_v3, %v575_v50  ;;  %v2230_v50 = vunpack.i.l.bf16 %v2738_v25 }
 0x126   :  { %v520_v6 = vpop.f32.mrf.mxu2 }
 0x127   :  { %1746 = vst.msk [vmem:[%s3395_s6 + $0xc0] sm:$0xf] %vm1697_vm4, %v1681_v36  ;;  %v1650_v13 = vpack.c.bf16 %v1586_v57, %v1586_v57  ;;  %v521_v19 = vadd.f32 %v2663_v32, %v520_v6 }
 0x128   :  { %v443_v58 = vpop.f32.mrf.mxu0 }
 0x129   :  { %1715 = vst.msk [vmem:[%s3395_s6 + $0x44] sm:$0xf] %vm1697_vm4, %v1650_v13  ;;  %v607_v16 = vmax.f32 %v521_v19, 0.0  ;;  %v444_v23 = vadd.f32 %v2663_v32, %v443_v58  ;;  %v1096_v35 = vpop.f32.mrf.mxu3 }
 0x12b   :  { %v1618_v28 = vadd.f32 %v1554_v8, %v607_v16  ;;  %v576_v44 = vmax.f32 %v444_v23, 0.0  ;;  %v1013_v56 = vpop.f32.mrf.mxu1 }
 0x12d   :  { %v1682_v31 = vpack.c.bf16 %v1618_v28, %v1618_v28  ;;  %v1587_v14 = vadd.f32 %v1523_v0, %v576_v44  ;;  %v2231_v44 = vunpack.i.h.bf16 %v2738_v25 }
 0x12e   :  { %v523_v40 = vpop.f32.mrf.mxu2 }
 0x12f   :  { %1747 = vst.msk [vmem:[%s3395_s6 + $0xc4] sm:$0xf] %vm1697_vm4, %v1682_v31  ;;  %v1651_v34 = vpack.c.bf16 %v1587_v14, %v1587_v14  ;;  %v524_v37 = vadd.f32 %v2663_v32, %v523_v40  ;;  %v3170_v32 = vld [vmem:[%s3392_s5] ss:$0 sm:$0xff] }
 0x130   :  { %v445_v43 = vpop.f32.mrf.mxu0  ;;  %v1089_v46 = vadd.f32 %v3170_v32, %v3101_v9  ;;  %v1012_v12 = vadd.f32 %v3170_v32, %v1011_v10  ;;  %v1092_v3 = vadd.f32 %v3170_v32, %v3126_v51  ;;  %v1014_v19 = vadd.f32 %v3170_v32, %v1013_v56 }
 0x131   :  { %1716 = vst.msk [vmem:[%s3395_s6 + $0x48] sm:$0xf] %vm1697_vm4, %v1651_v34  ;;  %v608_v53 = vmax.f32 %v524_v37, 0.0  ;;  %v446_v47 = vadd.f32 %v3164_v42, %v445_v43  ;;  %v1098_v28 = vpop.f32.mrf.mxu3  ;;  %v1094_v31 = vadd.f32 %v3170_v32, %v3146_v15  ;;  %v2311_v43 = vunpack.i.h.bf16 %v2309_v4 }
 0x132   :  { %v1172_v62 = vmax.f32 %v1089_v46, 0.0  ;;  %v1141_v17 = vmax.f32 %v1012_v12, 0.0  ;;  %v1173_v18 = vmax.f32 %v1092_v3, 0.0  ;;  %v1142_v22 = vmax.f32 %v1014_v19, 0.0 }
 0x133   :  { %v1619_v24 = vadd.f32 %v1555_v21, %v608_v53  ;;  %v577_v49 = vmax.f32 %v446_v47, 0.0  ;;  %v1016_v55 = vpop.f32.mrf.mxu1  ;;  %v1174_v21 = vmax.f32 %v1094_v31, 0.0  ;;  %v2235_v46 = vunpack.i.l.bf16 %v2665_v33 }
 0x134   :  { %v1556_v11 = vsel %vm851_vm1, %v1172_v62, %v2306_v63  ;;  %v1525_v59 = vsel %vm851_vm1, %v1141_v17, %v2230_v50  ;;  %v1557_v30 = vsel %vm851_vm1, %v1173_v18, %v2310_v48  ;;  %v1017_v34 = vadd.f32 %v3170_v32, %v1016_v55 }
 0x135   :  { %v1683_v20 = vpack.c.bf16 %v1619_v24, %v1619_v24  ;;  %v1588_v61 = vadd.f32 %v1524_v45, %v577_v49  ;;  %v1526_v25 = vsel %vm851_vm1, %v1142_v22, %v2231_v44  ;;  %v1097_v49 = vadd.f32 %v3170_v32, %v1096_v35 }
 0x136   :  { %v525_v1 = vpop.f32.mrf.mxu2  ;;  %v1143_v24 = vmax.f32 %v1017_v34, 0.0  ;;  %v1558_v62 = vsel %vm851_vm1, %v1174_v21, %v2311_v43 }
 0x137   :  { %1748 = vst.msk [vmem:[%s3395_s6 + $0xc8] sm:$0xf] %vm1697_vm4, %v1683_v20  ;;  %v1652_v2 = vpack.c.bf16 %v1588_v61, %v1588_v61  ;;  %v526_v9 = vadd.f32 %v3164_v42, %v525_v1  ;;  %v2314_v20 = vpop.permute.xlu0 %2313 }
 0x138   :  { %v448_v10 = vpop.f32.mrf.mxu0  ;;  %v1527_v35 = vsel %vm851_vm1, %v1143_v24, %v2235_v46  ;;  %v2315_v17 = vunpack.i.l.bf16 %v2314_v20 }
 0x139   :  { %1717 = vst.msk [vmem:[%s3395_s6 + $0x4c] sm:$0xf] %vm1697_vm4, %v1652_v2  ;;  %v609_v36 = vmax.f32 %v526_v9, 0.0  ;;  %v449_v57 = vadd.f32 %v3164_v42, %v448_v10  ;;  %v1101_v61 = vpop.f32.mrf.mxu3  ;;  %v1175_v9 = vmax.f32 %v1097_v49, 0.0 }
 0x13b   :  { %v1620_v6 = vadd.f32 %v1556_v11, %v609_v36  ;;  %v578_v13 = vmax.f32 %v449_v57, 0.0  ;;  %v1018_v51 = vpop.f32.mrf.mxu1  ;;  %v2236_v11 = vunpack.i.h.bf16 %v2665_v33 }
 0x13c   :  { %v1019_v2 = vadd.f32 %v3170_v32, %v1018_v51  ;;  %v1099_v51 = vadd.f32 %v3170_v32, %v1098_v28 }
 0x13d   :  { %v1684_v58 = vpack.c.bf16 %v1620_v6, %v1620_v6  ;;  %v1589_v16 = vadd.f32 %v1525_v59, %v578_v13  ;;  %v1559_v13 = vsel %vm851_vm1, %v1175_v9, %v2315_v17 }
 0x13e   :  { %v528_v23 = vpop.f32.mrf.mxu2  ;;  %v1144_v6 = vmax.f32 %v1019_v2, 0.0  ;;  %v1176_v22 = vmax.f32 %v1099_v51, 0.0 }
 0x13f   :  { %1749 = vst.msk [vmem:[%s3395_s6 + $0xcc] sm:$0xf] %vm1697_vm4, %v1684_v58  ;;  %v1653_v27 = vpack.c.bf16 %v1589_v16, %v1589_v16  ;;  %v529_v8 = vadd.f32 %v3164_v42, %v528_v23 }
 0x140   :  { %v450_v0 = vpop.f32.mrf.mxu0  ;;  %v1528_v33 = vsel %vm851_vm1, %v1144_v6, %v2236_v11 }
 0x141   :  { %1718 = vst.msk [vmem:[%s3395_s6 + $0x50] sm:$0xf] %vm1697_vm4, %v1653_v27  ;;  %v610_v56 = vmax.f32 %v529_v8, 0.0  ;;  %v451_v60 = vadd.f32 %v3164_v42, %v450_v0  ;;  %v1103_v16 = vpop.f32.mrf.mxu3 }
 0x143   :  { %v1621_v14 = vadd.f32 %v1557_v30, %v610_v56  ;;  %v579_v40 = vmax.f32 %v451_v60, 0.0  ;;  %v1021_v37 = vpop.f32.mrf.mxu1  ;;  %v2316_v30 = vunpack.i.h.bf16 %v2314_v20  ;;  %v2240_v60 = vunpack.i.l.bf16 %v2714_v5 }
 0x144   :  { %v1022_v23 = vadd.f32 %v3170_v32, %v1021_v37  ;;  %v2319_v37 = vpop.permute.xlu1 %2318 }
 0x145   :  { %v1685_v39 = vpack.c.bf16 %v1621_v14, %v1621_v14  ;;  %v1590_v41 = vadd.f32 %v1526_v25, %v579_v40  ;;  %v1102_v14 = vadd.f32 %v3170_v32, %v1101_v61  ;;  %v2320_v46 = vunpack.i.l.bf16 %v2319_v37 }
 0x146   :  { %v530_v53 = vpop.f32.mrf.mxu2  ;;  %v1145_v31 = vmax.f32 %v1022_v23, 0.0  ;;  %v2241_v61 = vunpack.i.h.bf16 %v2714_v5  ;;  %v2321_v11 = vunpack.i.h.bf16 %v2319_v37 }
 0x147   :  { %1750 = vst.msk [vmem:[%s3395_s6 + $0xd0] sm:$0xf] %vm1697_vm4, %v1685_v39  ;;  %v1654_v47 = vpack.c.bf16 %v1590_v41, %v1590_v41  ;;  %v531_v15 = vadd.f32 %v3164_v42, %v530_v53  ;;  %v1560_v39 = vsel %vm851_vm1, %v1176_v22, %v2316_v30  ;;  %v1177_v53 = vmax.f32 %v1102_v14, 0.0 }
 0x148   :  { %v453_v12 = vpop.f32.mrf.mxu0 }
 0x149   :  { %1719 = vst.msk [vmem:[%s3395_s6 + $0x54] sm:$0xf] %vm1697_vm4, %v1654_v47  ;;  %v611_v45 = vmax.f32 %v531_v15, 0.0  ;;  %v454_v55 = vadd.f32 %v3164_v42, %v453_v12  ;;  %v1529_v47 = vsel %vm851_vm1, %v1145_v31, %v2240_v60  ;;  %v1106_v12 = vpop.f32.mrf.mxu3 }
 0x14b   :  { %v1622_v63 = vadd.f32 %v1558_v62, %v611_v45  ;;  %v580_v1 = vmax.f32 %v454_v55, 0.0  ;;  %v1023_v50 = vpop.f32.mrf.mxu1 }
 0x14c   :  { %v1024_v43 = vadd.f32 %v3170_v32, %v1023_v50 }
 0x14d   :  { %v1686_v3 = vpack.c.bf16 %v1622_v63, %v1622_v63  ;;  %v1591_v10 = vadd.f32 %v1527_v35, %v580_v1  ;;  %v1561_v63 = vsel %vm851_vm1, %v1177_v53, %v2320_v46  ;;  %v1104_v35 = vadd.f32 %v3170_v32, %v1103_v16 }
 0x14e   :  { %v533_v36 = vpop.f32.mrf.mxu2  ;;  %v1146_v62 = vmax.f32 %v1024_v43, 0.0 }
 0x14f   :  { %1751 = vst.msk [vmem:[%s3395_s6 + $0xd4] sm:$0xf] %vm1697_vm4, %v1686_v3  ;;  %v1655_v57 = vpack.c.bf16 %v1591_v10, %v1591_v10  ;;  %v534_v4 = vadd.f32 %v3164_v42, %v533_v36 }
 0x150   :  { %v455_v19 = vpop.f32.mrf.mxu0  ;;  %v1530_v5 = vsel %vm851_vm1, %v1146_v62, %v2241_v61 }
 0x151   :  { %1720 = vst.msk [vmem:[%s3395_s6 + $0x58] sm:$0xf] %vm1697_vm4, %v1655_v57  ;;  %v612_v18 = vmax.f32 %v534_v4, 0.0  ;;  %v456_v59 = vadd.f32 %v3164_v42, %v455_v19  ;;  %v1178_v4 = vmax.f32 %v1104_v35, 0.0 }
 0x153   :  { %v1623_v48 = vadd.f32 %v1559_v13, %v612_v18  ;;  %v581_v58 = vmax.f32 %v456_v59, 0.0  ;;  %v1026_v27 = vpop.f32.mrf.mxu1  ;;  %v1108_v18 = vpop.f32.mrf.mxu3  ;;  %v2245_v59 = vunpack.i.l.bf16 %v2764_v26 }
 0x154   :  { %v1027_v3 = vadd.f32 %v3170_v32, %v1026_v27  ;;  %v1562_v27 = vsel %vm851_vm1, %v1178_v4, %v2321_v11 }
 0x155   :  { %v1687_v8 = vpack.c.bf16 %v1623_v48, %v1623_v48  ;;  %v1592_v44 = vadd.f32 %v1528_v33, %v581_v58  ;;  %v1107_v48 = vadd.f32 %v3170_v32, %v1106_v12  ;;  %v2324_v33 = vpop.permute.xlu2 %2323 }
 0x156   :  { %v535_v0 = vpop.f32.mrf.mxu2  ;;  %v1147_v51 = vmax.f32 %v1027_v3, 0.0  ;;  %v2329_v3 = vpop.permute.xlu0 %2328 }
 0x157   :  { %1752 = vst.msk [vmem:[%s3395_s6 + $0xd8] sm:$0xf] %vm1697_vm4, %v1687_v8  ;;  %v1656_v56 = vpack.c.bf16 %v1592_v44, %v1592_v44  ;;  %v536_v28 = vadd.f32 %v3164_v42, %v535_v0  ;;  %v1179_v30 = vmax.f32 %v1107_v48, 0.0 }
 0x158   :  { %v458_v40 = vpop.f32.mrf.mxu0  ;;  %v1531_v0 = vsel %vm851_vm1, %v1147_v51, %v2245_v59 }
 0x159   :  { %1721 = vst.msk [vmem:[%s3395_s6 + $0x5c] sm:$0xf] %vm1697_vm4, %v1656_v56  ;;  %v613_v34 = vmax.f32 %v536_v28, 0.0  ;;  %v459_v25 = vadd.f32 %v3164_v42, %v458_v40  ;;  %v2325_v28 = vunpack.i.l.bf16 %v2324_v33 }
 0x15b   :  { %v1624_v41 = vadd.f32 %v1560_v39, %v613_v34  ;;  %v582_v21 = vmax.f32 %v459_v25, 0.0  ;;  %v1028_v15 = vpop.f32.mrf.mxu1  ;;  %v2246_v25 = vunpack.i.h.bf16 %v2764_v26  ;;  %v1563_v39 = vsel %vm851_vm1, %v1179_v30, %v2325_v28  ;;  %v1111_v53 = vpop.f32.mrf.mxu3 }
 0x15c   :  { %v1029_v22 = vadd.f32 %v3170_v32, %v1028_v15 }
 0x15d   :  { %v1688_v24 = vpack.c.bf16 %v1624_v41, %v1624_v41  ;;  %v1593_v49 = vadd.f32 %v1529_v47, %v582_v21  ;;  %v1109_v47 = vadd.f32 %v3170_v32, %v1108_v18 }
 0x15e   :  { %v538_v45 = vpop.f32.mrf.mxu2  ;;  %v1148_v37 = vmax.f32 %v1029_v22, 0.0 }
 0x15f   :  { %1753 = vst.msk [vmem:[%s3395_s6 + $0xdc] sm:$0xf] %vm1697_vm4, %v1688_v24  ;;  %v1657_v55 = vpack.c.bf16 %v1593_v49, %v1593_v49  ;;  %v539_v20 = vadd.f32 %v3164_v42, %v538_v45 }
 0x160   :  { %v460_v1 = vpop.f32.mrf.mxu0  ;;  %v1532_v26 = vsel %vm851_vm1, %v1148_v37, %v2246_v25  ;;  %v2260_v25 = vunpack.i.l.bf16 %v2806_v29 }
 0x161   :  { %1722 = vst.msk [vmem:[%s3395_s6 + $0x60] sm:$0xf] %vm1697_vm4, %v1657_v55  ;;  %v614_v2 = vmax.f32 %v539_v20, 0.0  ;;  %v461_v9 = vadd.f32 %v3164_v42, %v460_v1  ;;  %v1180_v55 = vmax.f32 %v1109_v47, 0.0  ;;  %v2326_v20 = vunpack.i.h.bf16 %v2324_v33 }
 0x162   :  { %v2250_v1 = vunpack.i.l.bf16 %v2694_v54 }
 0x163   :  { %v1625_v50 = vadd.f32 %v1561_v63, %v614_v2  ;;  %v583_v17 = vmax.f32 %v461_v9, 0.0  ;;  %v1031_v10 = vpop.f32.mrf.mxu1  ;;  %v1112_v9 = vadd.f32 %v3170_v32, %v1111_v53 }
 0x164   :  { %v1032_v24 = vadd.f32 %v3170_v32, %v1031_v10 }
 0x165   :  { %v1689_v36 = vpack.c.bf16 %v1625_v50, %v1625_v50  ;;  %v1594_v57 = vadd.f32 %v1530_v5, %v583_v17  ;;  %v1564_v5 = vsel %vm851_vm1, %v1180_v55, %v2326_v20  ;;  %v1181_v11 = vmax.f32 %v1112_v9, 0.0 }
 0x166   :  { %v540_v6 = vpop.f32.mrf.mxu2  ;;  %v1149_v2 = vmax.f32 %v1032_v24, 0.0 }
 0x167   :  { %1754 = vst.msk [vmem:[%s3395_s6 + $0xe0] sm:$0xf] %vm1697_vm4, %v1689_v36  ;;  %v1658_v13 = vpack.c.bf16 %v1594_v57, %v1594_v57  ;;  %v541_v19 = vadd.f32 %v3164_v42, %v540_v6  ;;  %v1113_v57 = vpop.f32.mrf.mxu3 }
 0x168   :  { %v463_v58 = vpop.f32.mrf.mxu0  ;;  %v1533_v6 = vsel %vm851_vm1, %v1149_v2, %v2250_v1  ;;  %v1114_v22 = vadd.f32 %v3170_v32, %v1113_v57 }
 0x169   :  { %1723 = vst.msk [vmem:[%s3395_s6 + $0x64] sm:$0xf] %vm1697_vm4, %v1658_v13  ;;  %v615_v16 = vmax.f32 %v541_v19, 0.0  ;;  %v464_v23 = vadd.f32 %v3164_v42, %v463_v58  ;;  %v2330_v19 = vunpack.i.l.bf16 %v2329_v3 }
 0x16a   :  { %v1182_v37 = vmax.f32 %v1114_v22, 0.0 }
 0x16b   :  { %v1626_v8 = vadd.f32 %v1562_v27, %v615_v16  ;;  %v584_v44 = vmax.f32 %v464_v23, 0.0  ;;  %v1033_v56 = vpop.f32.mrf.mxu1  ;;  %v2251_v16 = vunpack.i.h.bf16 %v2694_v54  ;;  %v1565_v33 = vsel %vm851_vm1, %v1181_v11, %v2330_v19 }
 0x16c   :  { %v1034_v4 = vadd.f32 %v3170_v32, %v1033_v56  ;;  %v479_v56 = vadd.f32 %v3164_v42, %v2692_v52 }
 0x16d   :  { %v1690_v60 = vpack.c.bf16 %v1626_v8, %v1626_v8  ;;  %v1595_v31 = vadd.f32 %v1531_v0, %v584_v44 }
 0x16e   :  { %v543_v14 = vpop.f32.mrf.mxu2  ;;  %v1150_v23 = vmax.f32 %v1034_v4, 0.0  ;;  %v590_v47 = vmax.f32 %v479_v56, 0.0 }
 0x16f   :  { %1755 = vst.msk [vmem:[%s3395_s6 + $0xe4] sm:$0xf] %vm1697_vm4, %v1690_v60  ;;  %v1659_v40 = vpack.c.bf16 %v1595_v31, %v1595_v31  ;;  %v544_v34 = vadd.f32 %v3164_v42, %v543_v14 }
 0x170   :  { %v465_v41 = vpop.f32.mrf.mxu0  ;;  %v1534_v28 = vsel %vm851_vm1, %v1150_v23, %v2251_v16 }
 0x171   :  { %1724 = vst.msk [vmem:[%s3395_s6 + $0x68] sm:$0xf] %vm1697_vm4, %v1659_v40  ;;  %v616_v21 = vmax.f32 %v544_v34, 0.0  ;;  %v466_v43 = vadd.f32 %v3164_v42, %v465_v41  ;;  %v1116_v34 = vpop.f32.mrf.mxu3 }
 0x173   :  { %v1627_v15 = vadd.f32 %v1563_v39, %v616_v21  ;;  %v585_v46 = vmax.f32 %v466_v43, 0.0  ;;  %v1036_v49 = vpop.f32.mrf.mxu1  ;;  %v2331_v39 = vunpack.i.h.bf16 %v2329_v3  ;;  %v1117_v43 = vadd.f32 %v3170_v32, %v1116_v34 }
 0x174   :  { %v1037_v54 = vadd.f32 %v3170_v32, %v1036_v49 }
 0x175   :  { %v1691_v12 = vpack.c.bf16 %v1627_v15, %v1627_v15  ;;  %v1596_v45 = vadd.f32 %v1532_v26, %v585_v46  ;;  %v1566_v20 = vsel %vm851_vm1, %v1182_v37, %v2331_v39 }
 0x176   :  { %v545_v61 = vpop.f32.mrf.mxu2  ;;  %v1151_v15 = vmax.f32 %v1037_v54, 0.0 }
 0x177   :  { %1756 = vst.msk [vmem:[%s3395_s6 + $0xe8] sm:$0xf] %vm1697_vm4, %v1691_v12  ;;  %v1660_v62 = vpack.c.bf16 %v1596_v45, %v1596_v45  ;;  %v546_v63 = vadd.f32 %v3164_v42, %v545_v61  ;;  %v2334_v12 = vpop.permute.xlu1 %2333  ;;  %v2255_v45 = vunpack.i.l.bf16 %v2743_v38  ;;  %v481_v61 = vadd.f32 %v3164_v42, %v2716_v7 }
 0x178   :  { %v468_v35 = vpop.f32.mrf.mxu0  ;;  %v2336_v56 = vunpack.i.h.bf16 %v2334_v12 }
 0x179   :  { %1725 = vst.msk [vmem:[%s3395_s6 + $0x6c] sm:$0xf] %vm1697_vm4, %v1660_v62  ;;  %v617_v50 = vmax.f32 %v546_v63, 0.0  ;;  %v469_v17 = vadd.f32 %v3164_v42, %v468_v35  ;;  %v1183_v62 = vmax.f32 %v1117_v43, 0.0  ;;  %v1535_v35 = vsel %vm851_vm1, %v1151_v15, %v2255_v45  ;;  %v1118_v11 = vpop.f32.mrf.mxu3 }
 0x17a   :  { %v1119_v23 = vadd.f32 %v3170_v32, %v1118_v11 }
 0x17b   :  { %v1628_v10 = vadd.f32 %v1564_v5, %v617_v50  ;;  %v586_v36 = vmax.f32 %v469_v17, 0.0  ;;  %v1038_v13 = vpop.f32.mrf.mxu1  ;;  %v2335_v17 = vunpack.i.l.bf16 %v2334_v12 }
 0x17c   :  { %v1039_v2 = vadd.f32 %v3170_v32, %v1038_v13  ;;  %v591_v13 = vmax.f32 %v481_v61, 0.0 }
 0x17d   :  { %v1692_v18 = vpack.c.bf16 %v1628_v10, %v1628_v10  ;;  %v1597_v59 = vadd.f32 %v1533_v6, %v586_v36  ;;  %v2261_v36 = vunpack.i.h.bf16 %v2806_v29 }
 0x17e   :  { %v548_v51 = vpop.f32.mrf.mxu2  ;;  %v1152_v19 = vmax.f32 %v1039_v2, 0.0 }
 0x17f   :  { %1757 = vst.msk [vmem:[%s3395_s6 + $0xec] sm:$0xf] %vm1697_vm4, %v1692_v18  ;;  %v1661_v48 = vpack.c.bf16 %v1597_v59, %v1597_v59  ;;  %v549_v58 = vadd.f32 %v3164_v42, %v548_v51  ;;  %v1567_v18 = vsel %vm851_vm1, %v1183_v62, %v2335_v17 }
 0x180   :  { %v470_v27 = vpop.f32.mrf.mxu0 }
 0x181   :  { %1726 = vst.msk [vmem:[%s3395_s6 + $0x70] sm:$0xf] %vm1697_vm4, %v1661_v48  ;;  %v618_v8 = vmax.f32 %v549_v58, 0.0  ;;  %v471_v44 = vadd.f32 %v3164_v42, %v470_v27  ;;  %v2256_v58 = vunpack.i.h.bf16 %v2743_v38 }
 0x183   :  { %v1629_v30 = vadd.f32 %v1565_v33, %v618_v8  ;;  %v587_v0 = vmax.f32 %v471_v44, 0.0  ;;  %v1041_v60 = vpop.f32.mrf.mxu1  ;;  %v1536_v44 = vsel %vm851_vm1, %v1152_v19, %v2256_v58 }
 0x184   :  { %v1042_v40 = vadd.f32 %v3170_v32, %v1041_v60 }
 0x185   :  { %v1693_v31 = vpack.c.bf16 %v1629_v30, %v1629_v30  ;;  %v1598_v14 = vadd.f32 %v1534_v28, %v587_v0  ;;  %v1184_v0 = vmax.f32 %v1119_v23, 0.0 }
 0x186   :  { %v550_v41 = vpop.f32.mrf.mxu2  ;;  %v1153_v21 = vmax.f32 %v1042_v40, 0.0 }
 0x187   :  { %1758 = vst.msk [vmem:[%s3395_s6 + $0xf0] sm:$0xf] %vm1697_vm4, %v1693_v31  ;;  %v1662_v52 = vpack.c.bf16 %v1598_v14, %v1598_v14  ;;  %v551_v53 = vadd.f32 %v3164_v42, %v550_v41  ;;  %v1568_v60 = vsel %vm851_vm1, %v1184_v0, %v2336_v56 }
 0x188   :  { %v473_v46 = vpop.f32.mrf.mxu0  ;;  %v1537_v24 = vsel %vm851_vm1, %v1153_v21, %v2260_v25 }
 0x189   :  { %1727 = vst.msk [vmem:[%s3395_s6 + $0x74] sm:$0xf] %vm1697_vm4, %v1662_v52  ;;  %v619_v26 = vmax.f32 %v551_v53, 0.0  ;;  %v474_v49 = vadd.f32 %v3164_v42, %v473_v46  ;;  %v1601_v55 = vadd.f32 %v1537_v24, %v590_v47 }
 0x18b   :  { %v1630_v63 = vadd.f32 %v1566_v20, %v619_v26  ;;  %v588_v1 = vmax.f32 %v474_v49, 0.0  ;;  %v1665_v9 = vpack.c.bf16 %v1601_v55, %v1601_v55  ;;  %v1043_v50 = vpop.f32.mrf.mxu1 }
 0x18c   :  { %v1044_v10 = vadd.f32 %v3170_v32, %v1043_v50 }
 0x18d   :  { %v1694_v3 = vpack.c.bf16 %v1630_v63, %v1630_v63  ;;  %v1599_v5 = vadd.f32 %v1535_v35, %v588_v1  ;;  %1730 = vst.msk [vmem:[%s3395_s6 + $0x80] sm:$0xf] %vm1697_vm4, %v1665_v9 }
 0x18e   :  { %v553_v7 = vpop.f32.mrf.mxu2  ;;  %v1154_v4 = vmax.f32 %v1044_v10, 0.0 }
 0x18f   :  { %1759 = vst.msk [vmem:[%s3395_s6 + $0xf4] sm:$0xf] %vm1697_vm4, %v1694_v3  ;;  %v1663_v57 = vpack.c.bf16 %v1599_v5, %v1599_v5  ;;  %v554_v6 = vadd.f32 %v3164_v42, %v553_v7 }
 0x190   :  { %v475_v59 = vpop.f32.mrf.mxu0  ;;  %v1538_v29 = vsel %vm851_vm1, %v1154_v4, %v2261_v36 }
 0x191   :  { %1728 = vst.msk [vmem:[%s3395_s6 + $0x78] sm:$0xf] %vm1697_vm4, %v1663_v57  ;;  %v620_v51 = vmax.f32 %v554_v6, 0.0  ;;  %v476_v48 = vadd.f32 %v3164_v42, %v475_v59  ;;  %v1602_v16 = vadd.f32 %v1538_v29, %v591_v13 }
 0x193   :  { %v1631_v33 = vadd.f32 %v1567_v18, %v620_v51  ;;  %v589_v27 = vmax.f32 %v476_v48, 0.0  ;;  %v1666_v8 = vpack.c.bf16 %v1602_v16, %v1602_v16 }
 0x195   :  { %v1695_v22 = vpack.c.bf16 %v1631_v33, %v1631_v33  ;;  %v1600_v30 = vadd.f32 %v1536_v44, %v589_v27  ;;  %1731 = vst.msk [vmem:[%s3395_s6 + $0x84] sm:$0xf] %vm1697_vm4, %v1666_v8 }
 0x196   :  { %v555_v54 = vpop.f32.mrf.mxu2 }
 0x197   :  { %1760 = vst.msk [vmem:[%s3395_s6 + $0xf8] sm:$0xf] %vm1697_vm4, %v1695_v22  ;;  %v1664_v38 = vpack.c.bf16 %v1600_v30, %v1600_v30  ;;  %v556_v32 = vadd.f32 %v3164_v42, %v555_v54 }
 0x199   :  { %1729 = vst.msk [vmem:[%s3395_s6 + $0x7c] sm:$0xf] %vm1697_vm4, %v1664_v38  ;;  %v621_v28 = vmax.f32 %v556_v32, 0.0 }
 0x19b   :  { %v1632_v31 = vadd.f32 %v1568_v60, %v621_v28 }
 0x19d   :  { %v1696_v14 = vpack.c.bf16 %v1632_v31, %v1632_v31 }
 0x19f   :  { %1761 = vst.msk [vmem:[%s3395_s6 + $0xfc] sm:$0xf] %vm1697_vm4, %v1696_v14 }

// kernel: cloudnetp_forward.28
= control target key start
LH: loop header
LB: loop body
LE: loop exit
PB: predicated region body
PF: predicated region fallthrough
CT: control target
= control target key end

     0   :  { %vm672_vm0 = vcmask 60416   ;;  %s1546_s0 = inlined_call_operand.vmem [shape: bf16[9,128,8], index: 0, kind: input, shape index: {}]   ;;  %s1547_s1 = inlined_call_operand.vmem [shape: bf16[128,8], index: 1, kind: output, shape index: {}]  }
   0x1   :  { %v822_v0 = vld [vmem:[%s1546_s0] sm:$0xff]   ;;  %v1109_v17 = vld [vmem:[%s1546_s0 + $0x8] sm:$0xff]   ;;  %v1110_v54 = vld [vmem:[%s1546_s0 + $0x10] sm:$0xff]  }
   0x2   :  { %v1116_v1 = vld [vmem:[%s1546_s0 + $0x40] sm:$0xff]   ;;  %v823_v3 = vunpack.c.l.bf16 %v822_v0  ;;  %v824_v9 = vunpack.c.h.bf16 %v822_v0  ;;  %v1117_v18 = vld [vmem:[%s1546_s0 + $0x48] sm:$0xff]   ;;  %v827_v31 = vunpack.c.l.bf16 %v1109_v17  ;;  %v828_v48 = vunpack.c.h.bf16 %v1109_v17  ;;  %v1118_v59 = vld [vmem:[%s1546_s0 + $0x50] sm:$0xff]  }
   0x3   :  { %v1124_v2 = vld [vmem:[%s1546_s0 + $0x80] sm:$0xff]   ;;  %v855_v4 = vunpack.c.l.bf16 %v1116_v1  ;;  %v856_v13 = vunpack.c.h.bf16 %v1116_v1  ;;  %v1125_v23 = vld [vmem:[%s1546_s0 + $0x88] sm:$0xff]   ;;  %v859_v32 = vunpack.c.l.bf16 %v1117_v18  ;;  %v860_v52 = vunpack.c.h.bf16 %v1117_v18  ;;  %v1126_v0 = vld [vmem:[%s1546_s0 + $0x90] sm:$0xff]  }
   0x4   :  { %v887_v5 = vunpack.c.l.bf16 %v1124_v2  ;;  %v1132_v6 = vld [vmem:[%s1546_s0 + $0xc0] sm:$0xff]   ;;  %v888_v21 = vunpack.c.h.bf16 %v1124_v2  ;;  %v1133_v28 = vld [vmem:[%s1546_s0 + $0xc8] sm:$0xff]   ;;  %v891_v37 = vunpack.c.l.bf16 %v1125_v23  ;;  %v892_v53 = vunpack.c.h.bf16 %v1125_v23  ;;  %v1134_v1 = vld [vmem:[%s1546_s0 + $0xd0] sm:$0xff]  }
   0x5   :  { %v1140_v7 = vld [vmem:[%s1546_s0 + $0x100] sm:$0xff]   ;;  %v73_v14 = vmax.f32 %v823_v3, %v855_v4  ;;  %v919_v15 = vunpack.c.l.bf16 %v1132_v6  ;;  %v74_v20 = vmax.f32 %v824_v9, %v856_v13  ;;  %v920_v22 = vunpack.c.h.bf16 %v1132_v6  ;;  %v1141_v33 = vld [vmem:[%s1546_s0 + $0x108] sm:$0xff]  }
   0x6   :  { %v1148_v8 = vld [vmem:[%s1546_s0 + $0x140] sm:$0xff]   ;;  %v951_v16 = vunpack.c.l.bf16 %v1140_v7  ;;  %v952_v30 = vunpack.c.h.bf16 %v1140_v7  ;;  %v75_v40 = vmax.f32 %v827_v31, %v859_v32  ;;  %v923_v41 = vunpack.c.l.bf16 %v1133_v28  ;;  %v1149_v42 = vld [vmem:[%s1546_s0 + $0x148] sm:$0xff]   ;;  %v1287_v31 = vld [vmem:[%s1546_s0 + $0x190] sm:$0xff]  }
   0x7   :  { %v1156_v10 = vld [vmem:[%s1546_s0 + $0x180] sm:$0xff]   ;;  %v983_v19 = vunpack.c.l.bf16 %v1148_v8  ;;  %v154_v24 = vmax.f32 %v73_v14, %v887_v5  ;;  %v155_v29 = vmax.f32 %v74_v20, %v888_v21  ;;  %v984_v35 = vunpack.c.h.bf16 %v1148_v8  ;;  %v1245_v43 = vld [vmem:[%s1546_s0 + $0x188] sm:$0xff]  }
   0x8   :  { %v1214_v11 = vld [vmem:[%s1546_s0 + $0x1c0] sm:$0xff]   ;;  %v1015_v25 = vunpack.c.l.bf16 %v1156_v10  ;;  %v1016_v36 = vunpack.c.h.bf16 %v1156_v10  ;;  %v1250_v44 = vld [vmem:[%s1546_s0 + $0x1c8] sm:$0xff]   ;;  %v955_v47 = vunpack.c.l.bf16 %v1141_v33  ;;  %v156_v50 = vmax.f32 %v75_v40, %v891_v37  ;;  %v1142_v10 = vld [vmem:[%s1546_s0 + $0x110] sm:$0xff]  }
   0x9   :  { %v1219_v12 = vld [vmem:[%s1546_s0 + $0x200] sm:$0xff]   ;;  %v1047_v26 = vunpack.c.l.bf16 %v1214_v11  ;;  %v235_v34 = vmax.f32 %v154_v24, %v919_v15  ;;  %v236_v38 = vmax.f32 %v155_v29, %v920_v22  ;;  %v1048_v39 = vunpack.c.h.bf16 %v1214_v11  ;;  %v1256_v51 = vld [vmem:[%s1546_s0 + $0x208] sm:$0xff]   ;;  %v1292_v37 = vld [vmem:[%s1546_s0 + $0x1d0] sm:$0xff]  }
   0xa   :  { %v1079_v27 = vunpack.c.l.bf16 %v1219_v12  ;;  %v1080_v46 = vunpack.c.h.bf16 %v1219_v12  ;;  %v987_v56 = vunpack.c.l.bf16 %v1149_v42  ;;  %v1019_v57 = vunpack.c.l.bf16 %v1245_v43 }
   0xb   :  { %v316_v45 = vmax.f32 %v235_v34, %v951_v16  ;;  %v317_v49 = vmax.f32 %v236_v38, %v952_v30  ;;  %v1051_v58 = vunpack.c.l.bf16 %v1250_v44  ;;  %v237_v61 = vmax.f32 %v156_v50, %v923_v41  ;;  %v1174_v50 = vld [vmem:[%s1546_s0 + $0x210] sm:$0xff]  }
   0xc   :  { %v76_v62 = vmax.f32 %v828_v48, %v860_v52  ;;  %v924_v63 = vunpack.c.h.bf16 %v1133_v28  ;;  %v1083_v3 = vunpack.c.l.bf16 %v1256_v51  ;;  %v956_v4 = vunpack.c.h.bf16 %v1141_v33  ;;  %v1127_v48 = vld [vmem:[%s1546_s0 + $0x98] sm:$0xff]  }
   0xd   :  { %v397_v55 = vmax.f32 %v316_v45, %v983_v19  ;;  %v398_v60 = vmax.f32 %v317_v49, %v984_v35  ;;  %v831_v5 = vunpack.c.l.bf16 %v1110_v54  ;;  %v318_v7 = vmax.f32 %v237_v61, %v955_v47  ;;  %v1279_v19 = vld [vmem:[%s1546_s0 + $0x150] sm:$0xff]   ;;  %v1119_v47 = vld [vmem:[%s1546_s0 + $0x58] sm:$0xff]  }
   0xe   :  { %v157_v8 = vmax.f32 %v76_v62, %v892_v53  ;;  %v863_v9 = vunpack.c.l.bf16 %v1118_v59  ;;  %v988_v12 = vunpack.c.h.bf16 %v1149_v42  ;;  %v895_v13 = vunpack.c.l.bf16 %v1126_v0  ;;  %v1111_v42 = vld [vmem:[%s1546_s0 + $0x18] sm:$0xff]  }
   0xf   :  { %v478_v2 = vmax.f32 %v397_v55, %v1015_v25  ;;  %v479_v6 = vmax.f32 %v398_v60, %v1016_v36  ;;  %v927_v14 = vunpack.c.l.bf16 %v1134_v1  ;;  %v399_v16 = vmax.f32 %v318_v7, %v987_v56  ;;  %v1143_v62 = vld [vmem:[%s1546_s0 + $0x118] sm:$0xff]  }
  0x10   :  { %v238_v17 = vmax.f32 %v157_v8, %v924_v63  ;;  %v77_v18 = vmax.f32 %v831_v5, %v863_v9  ;;  %v1020_v21 = vunpack.c.h.bf16 %v1245_v43  ;;  %v1052_v22 = vunpack.c.h.bf16 %v1250_v44  ;;  %v1333_v7 = vld [vmem:[%s1546_s0 + $0x158] sm:$0xff]  }
  0x11   :  { %v559_v11 = vmax.f32 %v478_v2, %v1047_v26  ;;  %v560_v15 = vmax.f32 %v479_v6, %v1048_v39  ;;  %v959_v23 = vunpack.c.l.bf16 %v1142_v10  ;;  %v480_v25 = vmax.f32 %v399_v16, %v1019_v57  ;;  %v1135_v57 = vld [vmem:[%s1546_s0 + $0xd8] sm:$0xff]  }
  0x12   :  { %v319_v26 = vmax.f32 %v238_v17, %v956_v4  ;;  %v158_v28 = vmax.f32 %v77_v18, %v895_v13  ;;  %v991_v30 = vunpack.c.l.bf16 %v1279_v19  ;;  %v832_v32 = vunpack.c.h.bf16 %v1110_v54  ;;  %v1338_v8 = vld [vmem:[%s1546_s0 + $0x198] sm:$0xff]   ;;  %v1112_v18 = vld [vmem:[%s1546_s0 + $0x20] sm:$0xff]  }
  0x13   :  { %v640_v20 = vmax.f32 %v559_v11, %v1079_v27  ;;  %v641_v24 = vmax.f32 %v560_v15, %v1080_v46  ;;  %v864_v33 = vunpack.c.h.bf16 %v1118_v59  ;;  %v561_v34 = vmax.f32 %v480_v25, %v1051_v58  ;;  %v1343_v15 = vld [vmem:[%s1546_s0 + $0x1d8] sm:$0xff]  }
  0x14   :  { %v400_v35 = vmax.f32 %v319_v26, %v988_v12  ;;  %v239_v36 = vmax.f32 %v158_v28, %v927_v14  ;;  %v1084_v38 = vunpack.c.h.bf16 %v1256_v51  ;;  %v896_v40 = vunpack.c.h.bf16 %v1126_v0  ;;  %v1360_v26 = vld [vmem:[%s1546_s0 + $0x218] sm:$0xff]  }
  0x15   :  { %v656_v29 = vpack.c.bf16 %v640_v20, %v640_v20  ;;  %v657_v27 = vpack.c.bf16 %v641_v24, %v641_v24  ;;  %v78_v39 = vmax.f32 %v832_v32, %v864_v33  ;;  %v928_v41 = vunpack.c.h.bf16 %v1134_v1 }
  0x16   :  { %v642_v43 = vmax.f32 %v561_v34, %v1083_v3  ;;  %v481_v44 = vmax.f32 %v400_v35, %v1020_v21  ;;  %v320_v45 = vmax.f32 %v239_v36, %v959_v23  ;;  %v1023_v46 = vunpack.c.l.bf16 %v1287_v31  ;;  %v1120_v23 = vld [vmem:[%s1546_s0 + $0x60] sm:$0xff]  }
  0x17   :  { %673 = vst.msk [vmem:[%s1547_s1] sm:$0xf] %vm672_vm0, %v656_v29  ;;  %v1055_v49 = vunpack.c.l.bf16 %v1292_v37  ;;  %v159_v51 = vmax.f32 %v78_v39, %v896_v40  ;;  %v960_v52 = vunpack.c.h.bf16 %v1142_v10  ;;  %v835_v56 = vunpack.c.l.bf16 %v1111_v42  ;;  %v1372_v39 = vld [vmem:[%s1546_s0 + $0x120] sm:$0xff]  }
  0x18   :  { %674 = vst.msk [vmem:[%s1547_s1 + $0x4] sm:$0xf] %vm672_vm0, %v657_v27  ;;  %v658_v53 = vpack.c.bf16 %v642_v43, %v642_v43  ;;  %v562_v54 = vmax.f32 %v481_v44, %v1052_v22  ;;  %v401_v55 = vmax.f32 %v320_v45, %v991_v30  ;;  %v992_v59 = vunpack.c.h.bf16 %v1279_v19  ;;  %v1128_v30 = vld [vmem:[%s1546_s0 + $0xa0] sm:$0xff]  }
  0x19   :  { %v240_v58 = vmax.f32 %v159_v51, %v928_v41  ;;  %v867_v60 = vunpack.c.l.bf16 %v1119_v47  ;;  %v899_v61 = vunpack.c.l.bf16 %v1127_v48  ;;  %v1087_v1 = vunpack.c.l.bf16 %v1174_v50 }
  0x1a   :  { %675 = vst.msk [vmem:[%s1547_s1 + $0x8] sm:$0xf] %vm672_vm0, %v658_v53  ;;  %v643_v63 = vmax.f32 %v562_v54, %v1084_v38  ;;  %v482_v0 = vmax.f32 %v401_v55, %v1023_v46  ;;  %v1024_v2 = vunpack.c.h.bf16 %v1287_v31  ;;  %v1056_v4 = vunpack.c.h.bf16 %v1292_v37  ;;  %v1136_v31 = vld [vmem:[%s1546_s0 + $0xe0] sm:$0xff]  }
  0x1b   :  { %v321_v3 = vmax.f32 %v240_v58, %v960_v52  ;;  %v79_v5 = vmax.f32 %v835_v56, %v867_v60  ;;  %v931_v6 = vunpack.c.l.bf16 %v1135_v57  ;;  %v963_v11 = vunpack.c.l.bf16 %v1143_v62  ;;  %v1391_v52 = vld [vmem:[%s1546_s0 + $0x1a0] sm:$0xff]  }
  0x1c   :  { %v659_v9 = vpack.c.bf16 %v643_v63, %v643_v63  ;;  %v563_v10 = vmax.f32 %v482_v0, %v1055_v49  ;;  %v836_v12 = vunpack.c.h.bf16 %v1111_v42  ;;  %v868_v16 = vunpack.c.h.bf16 %v1119_v47  ;;  %v1396_v58 = vld [vmem:[%s1546_s0 + $0x1e0] sm:$0xff]   ;;  %v1113_v0 = vld [vmem:[%s1546_s0 + $0x28] sm:$0xff]  }
  0x1d   :  { %v402_v13 = vmax.f32 %v321_v3, %v992_v59  ;;  %v160_v14 = vmax.f32 %v79_v5, %v899_v61  ;;  %v900_v17 = vunpack.c.h.bf16 %v1127_v48  ;;  %v1088_v20 = vunpack.c.h.bf16 %v1174_v50  ;;  %v1383_v48 = vld [vmem:[%s1546_s0 + $0x160] sm:$0xff]   ;;  %v1121_v5 = vld [vmem:[%s1546_s0 + $0x68] sm:$0xff]  }
  0x1e   :  { %676 = vst.msk [vmem:[%s1547_s1 + $0xc] sm:$0xf] %vm672_vm0, %v659_v9  ;;  %v644_v19 = vmax.f32 %v563_v10, %v1087_v1  ;;  %v995_v21 = vunpack.c.l.bf16 %v1333_v7  ;;  %v1027_v22 = vunpack.c.l.bf16 %v1338_v8  ;;  %v80_v28 = vmax.f32 %v836_v12, %v868_v16  ;;  %v1401_v59 = vld [vmem:[%s1546_s0 + $0x220] sm:$0xff]  }
  0x1f   :  { %v483_v24 = vmax.f32 %v402_v13, %v1024_v2  ;;  %v241_v25 = vmax.f32 %v160_v14, %v931_v6  ;;  %v932_v29 = vunpack.c.h.bf16 %v1135_v57  ;;  %v1059_v33 = vunpack.c.l.bf16 %v1343_v15  ;;  %v1129_v6 = vld [vmem:[%s1546_s0 + $0xa8] sm:$0xff]  }
  0x20   :  { %v660_v32 = vpack.c.bf16 %v644_v19, %v644_v19  ;;  %v964_v27 = vunpack.c.h.bf16 %v1143_v62  ;;  %v839_v34 = vunpack.c.l.bf16 %v1112_v18  ;;  %v161_v37 = vmax.f32 %v80_v28, %v900_v17 }
  0x21   :  { %v564_v35 = vmax.f32 %v483_v24, %v1056_v4  ;;  %v322_v36 = vmax.f32 %v241_v25, %v963_v11  ;;  %v871_v38 = vunpack.c.l.bf16 %v1120_v23  ;;  %v1091_v40 = vunpack.c.l.bf16 %v1360_v26 }
  0x22   :  { %677 = vst.msk [vmem:[%s1547_s1 + $0x10] sm:$0xf] %vm672_vm0, %v660_v32  ;;  %v996_v41 = vunpack.c.h.bf16 %v1333_v7  ;;  %v903_v42 = vunpack.c.l.bf16 %v1128_v30  ;;  %v935_v43 = vunpack.c.l.bf16 %v1136_v31  ;;  %v242_v46 = vmax.f32 %v161_v37, %v932_v29  ;;  %v1446_v37 = vld [vmem:[%s1546_s0 + $0x1e8] sm:$0xff]  }
  0x23   :  { %v645_v44 = vmax.f32 %v564_v35, %v1088_v20  ;;  %v403_v45 = vmax.f32 %v322_v36, %v995_v21  ;;  %v81_v47 = vmax.f32 %v839_v34, %v871_v38  ;;  %v1028_v49 = vunpack.c.h.bf16 %v1338_v8  ;;  %v1145_v20 = vld [vmem:[%s1546_s0 + $0x128] sm:$0xff]  }
  0x24   :  { %v1060_v50 = vunpack.c.h.bf16 %v1343_v15  ;;  %v967_v51 = vunpack.c.l.bf16 %v1372_v39  ;;  %v840_v53 = vunpack.c.h.bf16 %v1112_v18  ;;  %v323_v56 = vmax.f32 %v242_v46, %v964_v27  ;;  %v1137_v15 = vld [vmem:[%s1546_s0 + $0xe8] sm:$0xff]  }
  0x25   :  { %v661_v54 = vpack.c.bf16 %v645_v44, %v645_v44  ;;  %v484_v55 = vmax.f32 %v403_v45, %v1027_v22  ;;  %v162_v57 = vmax.f32 %v81_v47, %v903_v42  ;;  %v1092_v60 = vunpack.c.h.bf16 %v1360_v26  ;;  %v1441_v36 = vld [vmem:[%s1546_s0 + $0x1a8] sm:$0xff]  }
  0x26   :  { %v999_v61 = vunpack.c.l.bf16 %v1383_v48  ;;  %v872_v62 = vunpack.c.h.bf16 %v1120_v23  ;;  %v904_v63 = vunpack.c.h.bf16 %v1128_v30  ;;  %v404_v2 = vmax.f32 %v323_v56, %v996_v41  ;;  %v1153_v30 = vld [vmem:[%s1546_s0 + $0x168] sm:$0xff]  }
  0x27   :  { %678 = vst.msk [vmem:[%s1547_s1 + $0x14] sm:$0xf] %vm672_vm0, %v661_v54  ;;  %v565_v1 = vmax.f32 %v484_v55, %v1059_v33  ;;  %v243_v3 = vmax.f32 %v162_v57, %v935_v43  ;;  %v1031_v4 = vunpack.c.l.bf16 %v1391_v52  ;;  %v1063_v7 = vunpack.c.l.bf16 %v1396_v58  ;;  %v1177_v57 = vld [vmem:[%s1546_s0 + $0x228] sm:$0xff]  }
  0x28   :  { %v1095_v8 = vunpack.c.l.bf16 %v1401_v59  ;;  %v82_v9 = vmax.f32 %v840_v53, %v872_v62  ;;  %v936_v10 = vunpack.c.h.bf16 %v1136_v31  ;;  %v485_v12 = vmax.f32 %v404_v2, %v1028_v49  ;;  %v1122_v49 = vld [vmem:[%s1546_s0 + $0x70] sm:$0xff]  }
  0x29   :  { %v646_v11 = vmax.f32 %v565_v1, %v1091_v40  ;;  %v324_v13 = vmax.f32 %v243_v3, %v967_v51  ;;  %v843_v14 = vunpack.c.l.bf16 %v1113_v0  ;;  %v968_v17 = vunpack.c.h.bf16 %v1372_v39 }
  0x2a   :  { %v163_v16 = vmax.f32 %v82_v9, %v904_v63  ;;  %v875_v18 = vunpack.c.l.bf16 %v1121_v5  ;;  %v907_v19 = vunpack.c.l.bf16 %v1129_v6  ;;  %v566_v22 = vmax.f32 %v485_v12, %v1060_v50  ;;  %v1130_v50 = vld [vmem:[%s1546_s0 + $0xb0] sm:$0xff]  }
  0x2b   :  { %v662_v21 = vpack.c.bf16 %v646_v11, %v646_v11  ;;  %v405_v23 = vmax.f32 %v324_v13, %v999_v61  ;;  %v1000_v24 = vunpack.c.h.bf16 %v1383_v48  ;;  %v1032_v26 = vunpack.c.h.bf16 %v1391_v52  ;;  %v1114_v48 = vld [vmem:[%s1546_s0 + $0x30] sm:$0xff]  }
  0x2c   :  { %v244_v25 = vmax.f32 %v163_v16, %v936_v10  ;;  %v83_v28 = vmax.f32 %v843_v14, %v875_v18  ;;  %v939_v29 = vunpack.c.l.bf16 %v1137_v15  ;;  %v647_v31 = vmax.f32 %v566_v22, %v1092_v60  ;;  %v1138_v61 = vld [vmem:[%s1546_s0 + $0xf0] sm:$0xff]  }
  0x2d   :  { %679 = vst.msk [vmem:[%s1547_s1 + $0x18] sm:$0xf] %vm672_vm0, %v662_v21  ;;  %v486_v32 = vmax.f32 %v405_v23, %v1031_v4  ;;  %v1064_v33 = vunpack.c.h.bf16 %v1396_v58  ;;  %v971_v27 = vunpack.c.l.bf16 %v1145_v20  ;;  %v844_v38 = vunpack.c.h.bf16 %v1113_v0  ;;  %v1154_v14 = vld [vmem:[%s1546_s0 + $0x170] sm:$0xff]  }
  0x2e   :  { %v325_v34 = vmax.f32 %v244_v25, %v968_v17  ;;  %v164_v35 = vmax.f32 %v83_v28, %v907_v19  ;;  %v876_v39 = vunpack.c.h.bf16 %v1121_v5  ;;  %v663_v40 = vpack.c.bf16 %v647_v31, %v647_v31  ;;  %v1146_v5 = vld [vmem:[%s1546_s0 + $0x130] sm:$0xff]   ;;  %v1123_v31 = vld [vmem:[%s1546_s0 + $0x78] sm:$0xff]  }
  0x2f   :  { %v567_v41 = vmax.f32 %v486_v32, %v1063_v7  ;;  %v1003_v42 = vunpack.c.l.bf16 %v1153_v30  ;;  %v908_v43 = vunpack.c.h.bf16 %v1129_v6  ;;  %v940_v47 = vunpack.c.h.bf16 %v1137_v15  ;;  %v1162_v17 = vld [vmem:[%s1546_s0 + $0x1b0] sm:$0xff]  }
  0x30   :  { %v406_v44 = vmax.f32 %v325_v34, %v1000_v24  ;;  %v245_v45 = vmax.f32 %v164_v35, %v939_v29  ;;  %v84_v46 = vmax.f32 %v844_v38, %v876_v39  ;;  %680 = vst.msk [vmem:[%s1547_s1 + $0x1c] sm:$0xf] %vm672_vm0, %v663_v40  ;;  %v1096_v52 = vunpack.c.h.bf16 %v1401_v59  ;;  %v1170_v23 = vld [vmem:[%s1546_s0 + $0x1f0] sm:$0xff]   ;;  %v1131_v35 = vld [vmem:[%s1546_s0 + $0xb8] sm:$0xff]  }
  0x31   :  { %v648_v51 = vmax.f32 %v567_v41, %v1095_v8  ;;  %v1035_v53 = vunpack.c.l.bf16 %v1441_v36  ;;  %v1067_v54 = vunpack.c.l.bf16 %v1446_v37  ;;  %v972_v60 = vunpack.c.h.bf16 %v1145_v20  ;;  %v1178_v38 = vld [vmem:[%s1546_s0 + $0x230] sm:$0xff]   ;;  %v1139_v41 = vld [vmem:[%s1546_s0 + $0xf8] sm:$0xff]  }
  0x32   :  { %v487_v55 = vmax.f32 %v406_v44, %v1032_v26  ;;  %v326_v56 = vmax.f32 %v245_v45, %v971_v27  ;;  %v165_v58 = vmax.f32 %v84_v46, %v908_v43  ;;  %v847_v63 = vunpack.c.l.bf16 %v1114_v48 }
  0x33   :  { %v664_v62 = vpack.c.bf16 %v648_v51, %v648_v51  ;;  %v879_v0 = vunpack.c.l.bf16 %v1122_v49  ;;  %v911_v59 = vunpack.c.l.bf16 %v1130_v50  ;;  %v1004_v4 = vunpack.c.h.bf16 %v1153_v30  ;;  %v1115_v30 = vld [vmem:[%s1546_s0 + $0x38] sm:$0xff]  }
  0x34   :  { %v568_v1 = vmax.f32 %v487_v55, %v1064_v33  ;;  %v407_v2 = vmax.f32 %v326_v56, %v1003_v42  ;;  %v246_v3 = vmax.f32 %v165_v58, %v940_v47  ;;  %v1099_v6 = vunpack.c.l.bf16 %v1177_v57 }
  0x35   :  { %681 = vst.msk [vmem:[%s1547_s1 + $0x20] sm:$0xf] %vm672_vm0, %v664_v62  ;;  %v1036_v7 = vunpack.c.h.bf16 %v1441_v36  ;;  %v85_v8 = vmax.f32 %v847_v63, %v879_v0  ;;  %v943_v9 = vunpack.c.l.bf16 %v1138_v61  ;;  %v1068_v13 = vunpack.c.h.bf16 %v1446_v37 }
  0x36   :  { %v649_v10 = vmax.f32 %v568_v1, %v1096_v52  ;;  %v488_v11 = vmax.f32 %v407_v2, %v1035_v53  ;;  %v327_v12 = vmax.f32 %v246_v3, %v972_v60  ;;  %v975_v16 = vunpack.c.l.bf16 %v1146_v5  ;;  %v1155_v60 = vld [vmem:[%s1546_s0 + $0x178] sm:$0xff]  }
  0x37   :  { %v166_v15 = vmax.f32 %v85_v8, %v911_v59  ;;  %v848_v18 = vunpack.c.h.bf16 %v1114_v48  ;;  %v880_v19 = vunpack.c.h.bf16 %v1122_v49  ;;  %v912_v24 = vunpack.c.h.bf16 %v1130_v50  ;;  %v1147_v50 = vld [vmem:[%s1546_s0 + $0x138] sm:$0xff]  }
  0x38   :  { %v665_v20 = vpack.c.bf16 %v649_v10, %v649_v10  ;;  %v569_v21 = vmax.f32 %v488_v11, %v1067_v54  ;;  %v408_v22 = vmax.f32 %v327_v12, %v1004_v4  ;;  %v1007_v26 = vunpack.c.l.bf16 %v1154_v14  ;;  %v1163_v2 = vld [vmem:[%s1546_s0 + $0x1b8] sm:$0xff]  }
  0x39   :  { %v247_v25 = vmax.f32 %v166_v15, %v943_v9  ;;  %v86_v28 = vmax.f32 %v848_v18, %v880_v19  ;;  %v944_v29 = vunpack.c.h.bf16 %v1138_v61  ;;  %v1100_v27 = vunpack.c.h.bf16 %v1177_v57  ;;  %v1171_v10 = vld [vmem:[%s1546_s0 + $0x1f8] sm:$0xff]  }
  0x3a   :  { %682 = vst.msk [vmem:[%s1547_s1 + $0x24] sm:$0xf] %vm672_vm0, %v665_v20  ;;  %v650_v32 = vmax.f32 %v569_v21, %v1099_v6  ;;  %v489_v33 = vmax.f32 %v408_v22, %v1036_v7  ;;  %v1039_v34 = vunpack.c.l.bf16 %v1162_v17  ;;  %v1071_v37 = vunpack.c.l.bf16 %v1170_v23 }
  0x3b   :  { %v328_v36 = vmax.f32 %v247_v25, %v975_v16  ;;  %v167_v39 = vmax.f32 %v86_v28, %v912_v24  ;;  %v976_v40 = vunpack.c.h.bf16 %v1146_v5  ;;  %v851_v44 = vunpack.c.l.bf16 %v1115_v30 }
  0x3c   :  { %v666_v42 = vpack.c.bf16 %v650_v32, %v650_v32  ;;  %v570_v43 = vmax.f32 %v489_v33, %v1068_v13  ;;  %v883_v45 = vunpack.c.l.bf16 %v1123_v31  ;;  %v1008_v48 = vunpack.c.h.bf16 %v1154_v14 }
  0x3d   :  { %v409_v46 = vmax.f32 %v328_v36, %v1007_v26  ;;  %v248_v47 = vmax.f32 %v167_v39, %v944_v29  ;;  %v915_v49 = vunpack.c.l.bf16 %v1131_v35  ;;  %v1103_v52 = vunpack.c.l.bf16 %v1178_v38 }
  0x3e   :  { %683 = vst.msk [vmem:[%s1547_s1 + $0x28] sm:$0xf] %vm672_vm0, %v666_v42  ;;  %v651_v51 = vmax.f32 %v570_v43, %v1100_v27  ;;  %v87_v53 = vmax.f32 %v851_v44, %v883_v45  ;;  %v947_v54 = vunpack.c.l.bf16 %v1139_v41  ;;  %v1040_v57 = vunpack.c.h.bf16 %v1162_v17  ;;  %v1179_v17 = vld [vmem:[%s1546_s0 + $0x238] sm:$0xff]  }
  0x3f   :  { %v490_v55 = vmax.f32 %v409_v46, %v1039_v34  ;;  %v329_v56 = vmax.f32 %v248_v47, %v976_v40  ;;  %v1072_v58 = vunpack.c.h.bf16 %v1170_v23  ;;  %v979_v63 = vunpack.c.l.bf16 %v1147_v50 }
  0x40   :  { %v667_v61 = vpack.c.bf16 %v651_v51, %v651_v51  ;;  %v168_v62 = vmax.f32 %v87_v53, %v915_v49  ;;  %v852_v0 = vunpack.c.h.bf16 %v1115_v30  ;;  %v884_v3 = vunpack.c.h.bf16 %v1123_v31 }
  0x41   :  { %v571_v59 = vmax.f32 %v490_v55, %v1071_v37  ;;  %v410_v1 = vmax.f32 %v329_v56, %v1008_v48  ;;  %v916_v4 = vunpack.c.h.bf16 %v1131_v35  ;;  %v1104_v5 = vunpack.c.h.bf16 %v1178_v38 }
  0x42   :  { %684 = vst.msk [vmem:[%s1547_s1 + $0x2c] sm:$0xf] %vm672_vm0, %v667_v61  ;;  %v249_v6 = vmax.f32 %v168_v62, %v947_v54  ;;  %v1011_v7 = vunpack.c.l.bf16 %v1155_v60  ;;  %v88_v11 = vmax.f32 %v852_v0, %v884_v3  ;;  %v948_v12 = vunpack.c.h.bf16 %v1139_v41 }
  0x43   :  { %v652_v8 = vmax.f32 %v571_v59, %v1103_v52  ;;  %v491_v9 = vmax.f32 %v410_v1, %v1040_v57  ;;  %v1043_v14 = vunpack.c.l.bf16 %v1163_v2  ;;  %v980_v19 = vunpack.c.h.bf16 %v1147_v50 }
  0x44   :  { %v330_v13 = vmax.f32 %v249_v6, %v979_v63  ;;  %v169_v18 = vmax.f32 %v88_v11, %v916_v4  ;;  %v1075_v21 = vunpack.c.l.bf16 %v1171_v10  ;;  %v1012_v24 = vunpack.c.h.bf16 %v1155_v60 }
  0x45   :  { %v668_v15 = vpack.c.bf16 %v652_v8, %v652_v8  ;;  %v572_v16 = vmax.f32 %v491_v9, %v1072_v58  ;;  %v1107_v26 = vunpack.c.l.bf16 %v1179_v17  ;;  %v1044_v30 = vunpack.c.h.bf16 %v1163_v2 }
  0x46   :  { %v411_v20 = vmax.f32 %v330_v13, %v1011_v7  ;;  %v250_v23 = vmax.f32 %v169_v18, %v948_v12  ;;  %v1076_v33 = vunpack.c.h.bf16 %v1171_v10  ;;  %v1108_v35 = vunpack.c.h.bf16 %v1179_v17 }
  0x47   :  { %685 = vst.msk [vmem:[%s1547_s1 + $0x30] sm:$0xf] %vm672_vm0, %v668_v15  ;;  %v653_v22 = vmax.f32 %v572_v16, %v1104_v5 }
  0x48   :  { %v492_v25 = vmax.f32 %v411_v20, %v1043_v14  ;;  %v331_v29 = vmax.f32 %v250_v23, %v980_v19 }
  0x49   :  { %v669_v28 = vpack.c.bf16 %v653_v22, %v653_v22 }
  0x4a   :  { %v573_v31 = vmax.f32 %v492_v25, %v1075_v21  ;;  %v412_v32 = vmax.f32 %v331_v29, %v1012_v24 }
  0x4b   :  { %686 = vst.msk [vmem:[%s1547_s1 + $0x34] sm:$0xf] %vm672_vm0, %v669_v28 }
  0x4c   :  { %v654_v27 = vmax.f32 %v573_v31, %v1107_v26  ;;  %v493_v34 = vmax.f32 %v412_v32, %v1044_v30 }
  0x4e   :  { %v670_v36 = vpack.c.bf16 %v654_v27, %v654_v27  ;;  %v574_v37 = vmax.f32 %v493_v34, %v1076_v33 }
  0x50   :  { %687 = vst.msk [vmem:[%s1547_s1 + $0x38] sm:$0xf] %vm672_vm0, %v670_v36  ;;  %v655_v38 = vmax.f32 %v574_v37, %v1108_v35 }
  0x52   :  { %v671_v39 = vpack.c.bf16 %v655_v38, %v655_v38 }
  0x54   :  { %688 = vst.msk [vmem:[%s1547_s1 + $0x3c] sm:$0xf] %vm672_vm0, %v671_v39 }

// kernel: cloudnetp_forward.29
= control target key start
LH: loop header
LB: loop body
LE: loop exit
PB: predicated region body
PF: predicated region fallthrough
CT: control target
= control target key end

     0   :  { %vm142_vm0 = vcmask 1043456   ;;  %vm117_vm1 = vcmask 588800   ;;  %vm224_vm2 = vcmask 64512   ;;  %vm333_vm3 = vcmask 125952   ;;  %s608_s1 = inlined_call_operand.vmem [shape: bf16[72,8], index: 1, kind: input, shape index: {}]   ;;  %s609_s2 = inlined_call_operand.vmem [shape: f32[1,8], index: 2, kind: input, shape index: {}]   ;;  %s610_s0 = inlined_call_operand.vmem [shape: bf16[128,72], index: 0, kind: input, shape index: {}]   ;;  %s611_s4 = inlined_call_operand.vmem [shape: f32[1,16], index: 4, kind: input, shape index: {}]   ;;  %s612_s3 = inlined_call_operand.vmem [shape: bf16[8,16], index: 3, kind: input, shape index: {}]   ;;  %s613_s5 = inlined_call_operand.vmem [shape: bf16[128,16], index: 5, kind: output, shape index: {}]  }
   0x1   :  { %v45_v0 = vld [vmem:[%s608_s1 + $0x20] sm:$0xf]  ;;  %v429_v4 = vld [vmem:[%s608_s1 + $0x18] sm:$0xff]  ;;  %v428_v5 = vld [vmem:[%s608_s1 + $0x10] sm:$0xff] }
   0x2   :  { %v107_v1 = vunpack.c.l.b16 %v45_v0  ;;  %v427_v6 = vld [vmem:[%s608_s1 + $0x8] sm:$0xff]  ;;  %v426_v7 = vld [vmem:[%s608_s1] sm:$0xff]  ;;  %v420_v12 = vld [vmem:[%s610_s0 + $0x10] sm:$0xff] }
   0x3   :  { %v418_v8 = vld [vmem:[%s610_s0] sm:$0xff]  ;;  %v419_v10 = vld [vmem:[%s610_s0 + $0x8] sm:$0xff]  ;;  %v424_v13 = vld [vmem:[%s610_s0 + $0x30] sm:$0xff] }
   0x4   :  { %v112_v2 = vpack.c.b16 %v107_v1, %v107_v1  ;;  %v422_v9 = vld [vmem:[%s610_s0 + $0x20] sm:$0xff]  ;;  %v423_v11 = vld [vmem:[%s610_s0 + $0x28] sm:$0xff]  ;;  %v421_v14 = vld [vmem:[%s610_s0 + $0x18] sm:$0xff] }
   0x5   :  { %v425_v15 = vld [vmem:[%s610_s0 + $0x38] sm:$0xff]  ;;  %v219_v16 = vld [vmem:[%s612_s3] sm:$0xf] }
   0x6   :  { %v144_v3 = vsel %vm142_vm0, %v112_v2, 0  ;;  %v250_v17 = vsel %vm142_vm0, %v219_v16, 0  ;;  %v436_v19 = vld [vmem:[%s609_s2] ss:$0 sm:$0xff] }
   0x7   :  { %149 = vmatpush.bf16.msra.mxu0 %v144_v3  ;;  %430 = vmatpush.bf16.msra.mxu2 %v144_v3 }
   0x8   :  { %259 = vmatpush.bf16.msra.mxu1 %v250_v17  ;;  %435 = vmatpush.bf16.msra.mxu3 %v250_v17 }
   0xb   :  { %150 = vmatpush.bf16.msra.mxu0 %v429_v4  ;;  %431 = vmatpush.bf16.msra.mxu2 %v429_v4 }
   0xf   :  { %151 = vmatpush.bf16.msra.mxu0 %v428_v5  ;;  %432 = vmatpush.bf16.msra.mxu2 %v428_v5 }
  0x13   :  { %152 = vmatpush.bf16.msra.mxu0 %v427_v6  ;;  %433 = vmatpush.bf16.msra.mxu2 %v427_v6 }
  0x17   :  { %153 = vmatpush.bf16.msra.mxu0 %v426_v7  ;;  %434 = vmatpush.bf16.msra.mxu2 %v426_v7 }
  0x1a   :  { %402 = vmatmul.msk.bf16.vlgmr.msra.gmra.mxu0 %vm117_vm1, %v418_v8  ;;  %406 = vmatmul.msk.bf16.vlgmr.msra.gmra.mxu2 %vm117_vm1, %v422_v9 }
  0x2a   :  { %403 = vmatmul.msk.bf16.gmra.mxu0 %vm117_vm1, %v419_v10  ;;  %407 = vmatmul.msk.bf16.gmra.mxu2 %vm117_vm1, %v423_v11  ;;  %v526_v11 = vld [vmem:[%s611_s4] ss:$0 sm:$0xff] }
  0x3a   :  { %404 = vmatmul.msk.bf16.gmra.mxu0 %vm117_vm1, %v420_v12  ;;  %408 = vmatmul.msk.bf16.gmra.mxu2 %vm117_vm1, %v424_v13 }
  0x4a   :  { %405 = vmatmul.msk.bf16.gmra.mxu0 %vm117_vm1, %v421_v14  ;;  %409 = vmatmul.msk.bf16.gmra.mxu2 %vm117_vm1, %v425_v15 }
  0x97   :  { %v155_v18 = vpop.f32.mrf.mxu0 }
  0x98   :  { %v156_v21 = vadd.f32 %v436_v19, %v155_v18 }
  0x9a   :  { %v195_v25 = vmax.f32 %v156_v21, 0.0 }
  0x9d   :  { %v175_v20 = vpop.f32.mrf.mxu2 }
  0x9e   :  { %v176_v22 = vadd.f32 %v436_v19, %v175_v20 }
  0x9f   :  { %v157_v23 = vpop.f32.mrf.mxu0 }
  0xa0   :  { %v158_v24 = vadd.f32 %v436_v19, %v157_v23  ;;  %v203_v31 = vmax.f32 %v176_v22, 0.0 }
  0xa2   :  { %v196_v26 = vmax.f32 %v158_v24, 0.0 }
  0xa4   :  { %v211_v27 = vpack.c.bf16 %v196_v26, %v195_v25 }
  0xa5   :  { %v177_v28 = vpop.f32.mrf.mxu2 }
  0xa6   :  { %v178_v29 = vadd.f32 %v436_v19, %v177_v28  ;;  %410 = vmatmul.msk.bf16.vlgmr.msra.gmra.mxu1 %vm224_vm2, %v211_v27 }
  0xa7   :  { %v160_v30 = vpop.f32.mrf.mxu0 }
  0xa8   :  { %v204_v32 = vmax.f32 %v178_v29, 0.0  ;;  %v161_v35 = vadd.f32 %v436_v19, %v160_v30 }
  0xaa   :  { %v215_v33 = vpack.c.bf16 %v204_v32, %v203_v31  ;;  %v197_v38 = vmax.f32 %v161_v35, 0.0 }
  0xad   :  { %v180_v34 = vpop.f32.mrf.mxu2 }
  0xae   :  { %v181_v40 = vadd.f32 %v436_v19, %v180_v34 }
  0xaf   :  { %v162_v36 = vpop.f32.mrf.mxu0 }
  0xb0   :  { %v163_v37 = vadd.f32 %v436_v19, %v162_v36  ;;  %v205_v45 = vmax.f32 %v181_v40, 0.0 }
  0xb2   :  { %v198_v39 = vmax.f32 %v163_v37, 0.0 }
  0xb4   :  { %v212_v41 = vpack.c.bf16 %v198_v39, %v197_v38 }
  0xb5   :  { %v182_v42 = vpop.f32.mrf.mxu2 }
  0xb6   :  { %v183_v43 = vadd.f32 %v436_v19, %v182_v42  ;;  %411 = vmatmul.msk.bf16.gmra.mxu1 %vm224_vm2, %v212_v41 }
  0xb7   :  { %v165_v44 = vpop.f32.mrf.mxu0 }
  0xb8   :  { %v206_v46 = vmax.f32 %v183_v43, 0.0  ;;  %v166_v49 = vadd.f32 %v436_v19, %v165_v44 }
  0xba   :  { %v216_v47 = vpack.c.bf16 %v206_v46, %v205_v45  ;;  %v199_v52 = vmax.f32 %v166_v49, 0.0 }
  0xbc   :  { %415 = vmatmul.msk.bf16.vlgmr.msra.gmra.mxu3 %vm224_vm2, %v216_v47 }
  0xbd   :  { %v185_v48 = vpop.f32.mrf.mxu2 }
  0xbe   :  { %v186_v54 = vadd.f32 %v436_v19, %v185_v48 }
  0xbf   :  { %v167_v50 = vpop.f32.mrf.mxu0 }
  0xc0   :  { %v168_v51 = vadd.f32 %v436_v19, %v167_v50  ;;  %v207_v59 = vmax.f32 %v186_v54, 0.0 }
  0xc2   :  { %v200_v53 = vmax.f32 %v168_v51, 0.0 }
  0xc4   :  { %v213_v55 = vpack.c.bf16 %v200_v53, %v199_v52 }
  0xc5   :  { %v187_v56 = vpop.f32.mrf.mxu2 }
  0xc6   :  { %v188_v57 = vadd.f32 %v436_v19, %v187_v56  ;;  %412 = vmatmul.msk.bf16.gmra.mxu1 %vm224_vm2, %v213_v55 }
  0xc7   :  { %v170_v58 = vpop.f32.mrf.mxu0 }
  0xc8   :  { %v208_v60 = vmax.f32 %v188_v57, 0.0  ;;  %v171_v63 = vadd.f32 %v436_v19, %v170_v58 }
  0xca   :  { %v217_v61 = vpack.c.bf16 %v208_v60, %v207_v59  ;;  %v201_v2 = vmax.f32 %v171_v63, 0.0 }
  0xcc   :  { %416 = vmatmul.msk.bf16.gmra.mxu3 %vm224_vm2, %v217_v61 }
  0xcd   :  { %v190_v62 = vpop.f32.mrf.mxu2 }
  0xce   :  { %v191_v4 = vadd.f32 %v436_v19, %v190_v62 }
  0xcf   :  { %v172_v0 = vpop.f32.mrf.mxu0 }
  0xd0   :  { %v173_v1 = vadd.f32 %v436_v19, %v172_v0  ;;  %v209_v8 = vmax.f32 %v191_v4, 0.0 }
  0xd2   :  { %v202_v3 = vmax.f32 %v173_v1, 0.0 }
  0xd4   :  { %v214_v5 = vpack.c.bf16 %v202_v3, %v201_v2 }
  0xd5   :  { %v192_v6 = vpop.f32.mrf.mxu2 }
  0xd6   :  { %v193_v7 = vadd.f32 %v436_v19, %v192_v6  ;;  %413 = vmatmul.msk.bf16.gmra.mxu1 %vm224_vm2, %v214_v5 }
  0xd8   :  { %v210_v9 = vmax.f32 %v193_v7, 0.0 }
  0xda   :  { %v218_v10 = vpack.c.bf16 %v210_v9, %v209_v8 }
  0xdc   :  { %417 = vmatmul.msk.bf16.gmra.mxu3 %vm224_vm2, %v218_v10 }
  0xe6   :  { %414 = vmatmul.msk.bf16.gmra.mxu1 %vm224_vm2, %v215_v33 }
 0x123   :  { %v261_v12 = vpop.f32.mrf.mxu1 }
 0x124   :  { %v262_v13 = vadd.f32 %v526_v11, %v261_v12 }
 0x126   :  { %v301_v14 = vmax.f32 %v262_v13, 0.0 }
 0x128   :  { %v317_v15 = vpack.c.bf16 %v301_v14, %v301_v14 }
 0x12a   :  { %334 = vst.msk [vmem:[%s613_s5] sm:$0xf] %vm333_vm3, %v317_v15 }
 0x12b   :  { %v263_v16 = vpop.f32.mrf.mxu1 }
 0x12c   :  { %v264_v17 = vadd.f32 %v526_v11, %v263_v16 }
 0x12e   :  { %v302_v18 = vmax.f32 %v264_v17, 0.0 }
 0x130   :  { %v318_v19 = vpack.c.bf16 %v302_v18, %v302_v18 }
 0x132   :  { %335 = vst.msk [vmem:[%s613_s5 + $0x4] sm:$0xf] %vm333_vm3, %v318_v19 }
 0x133   :  { %v266_v20 = vpop.f32.mrf.mxu1 }
 0x134   :  { %v267_v21 = vadd.f32 %v526_v11, %v266_v20 }
 0x136   :  { %v303_v22 = vmax.f32 %v267_v21, 0.0 }
 0x138   :  { %v319_v23 = vpack.c.bf16 %v303_v22, %v303_v22 }
 0x13a   :  { %336 = vst.msk [vmem:[%s613_s5 + $0x8] sm:$0xf] %vm333_vm3, %v319_v23 }
 0x13b   :  { %v268_v24 = vpop.f32.mrf.mxu1 }
 0x13c   :  { %v269_v25 = vadd.f32 %v526_v11, %v268_v24 }
 0x13e   :  { %v304_v26 = vmax.f32 %v269_v25, 0.0 }
 0x13f   :  { %v286_v27 = vpop.f32.mrf.mxu3 }
 0x140   :  { %v320_v28 = vpack.c.bf16 %v304_v26, %v304_v26  ;;  %v287_v29 = vadd.f32 %v526_v11, %v286_v27 }
 0x142   :  { %337 = vst.msk [vmem:[%s613_s5 + $0xc] sm:$0xf] %vm333_vm3, %v320_v28  ;;  %v311_v30 = vmax.f32 %v287_v29, 0.0 }
 0x143   :  { %v271_v31 = vpop.f32.mrf.mxu1 }
 0x144   :  { %v327_v32 = vpack.c.bf16 %v311_v30, %v311_v30  ;;  %v272_v33 = vadd.f32 %v526_v11, %v271_v31 }
 0x146   :  { %344 = vst.msk [vmem:[%s613_s5 + $0x28] sm:$0xf] %vm333_vm3, %v327_v32  ;;  %v305_v34 = vmax.f32 %v272_v33, 0.0 }
 0x147   :  { %v288_v35 = vpop.f32.mrf.mxu3 }
 0x148   :  { %v321_v36 = vpack.c.bf16 %v305_v34, %v305_v34  ;;  %v289_v37 = vadd.f32 %v526_v11, %v288_v35 }
 0x14a   :  { %338 = vst.msk [vmem:[%s613_s5 + $0x10] sm:$0xf] %vm333_vm3, %v321_v36  ;;  %v312_v38 = vmax.f32 %v289_v37, 0.0 }
 0x14b   :  { %v273_v39 = vpop.f32.mrf.mxu1 }
 0x14c   :  { %v328_v40 = vpack.c.bf16 %v312_v38, %v312_v38  ;;  %v274_v41 = vadd.f32 %v526_v11, %v273_v39 }
 0x14e   :  { %345 = vst.msk [vmem:[%s613_s5 + $0x2c] sm:$0xf] %vm333_vm3, %v328_v40  ;;  %v306_v42 = vmax.f32 %v274_v41, 0.0 }
 0x14f   :  { %v291_v43 = vpop.f32.mrf.mxu3 }
 0x150   :  { %v322_v44 = vpack.c.bf16 %v306_v42, %v306_v42  ;;  %v292_v45 = vadd.f32 %v526_v11, %v291_v43 }
 0x152   :  { %339 = vst.msk [vmem:[%s613_s5 + $0x14] sm:$0xf] %vm333_vm3, %v322_v44  ;;  %v313_v46 = vmax.f32 %v292_v45, 0.0 }
 0x153   :  { %v276_v47 = vpop.f32.mrf.mxu1 }
 0x154   :  { %v329_v48 = vpack.c.bf16 %v313_v46, %v313_v46  ;;  %v277_v49 = vadd.f32 %v526_v11, %v276_v47 }
 0x156   :  { %346 = vst.msk [vmem:[%s613_s5 + $0x30] sm:$0xf] %vm333_vm3, %v329_v48  ;;  %v307_v50 = vmax.f32 %v277_v49, 0.0 }
 0x157   :  { %v293_v51 = vpop.f32.mrf.mxu3 }
 0x158   :  { %v323_v52 = vpack.c.bf16 %v307_v50, %v307_v50  ;;  %v294_v53 = vadd.f32 %v526_v11, %v293_v51 }
 0x15a   :  { %340 = vst.msk [vmem:[%s613_s5 + $0x18] sm:$0xf] %vm333_vm3, %v323_v52  ;;  %v314_v54 = vmax.f32 %v294_v53, 0.0 }
 0x15b   :  { %v278_v55 = vpop.f32.mrf.mxu1 }
 0x15c   :  { %v330_v56 = vpack.c.bf16 %v314_v54, %v314_v54  ;;  %v279_v57 = vadd.f32 %v526_v11, %v278_v55 }
 0x15e   :  { %347 = vst.msk [vmem:[%s613_s5 + $0x34] sm:$0xf] %vm333_vm3, %v330_v56  ;;  %v308_v58 = vmax.f32 %v279_v57, 0.0 }
 0x15f   :  { %v296_v59 = vpop.f32.mrf.mxu3 }
 0x160   :  { %v324_v60 = vpack.c.bf16 %v308_v58, %v308_v58  ;;  %v297_v61 = vadd.f32 %v526_v11, %v296_v59 }
 0x162   :  { %341 = vst.msk [vmem:[%s613_s5 + $0x1c] sm:$0xf] %vm333_vm3, %v324_v60  ;;  %v315_v62 = vmax.f32 %v297_v61, 0.0 }
 0x163   :  { %v281_v63 = vpop.f32.mrf.mxu1 }
 0x164   :  { %v331_v0 = vpack.c.bf16 %v315_v62, %v315_v62  ;;  %v282_v1 = vadd.f32 %v526_v11, %v281_v63 }
 0x166   :  { %348 = vst.msk [vmem:[%s613_s5 + $0x38] sm:$0xf] %vm333_vm3, %v331_v0  ;;  %v309_v2 = vmax.f32 %v282_v1, 0.0 }
 0x167   :  { %v298_v3 = vpop.f32.mrf.mxu3 }
 0x168   :  { %v325_v4 = vpack.c.bf16 %v309_v2, %v309_v2  ;;  %v299_v5 = vadd.f32 %v526_v11, %v298_v3 }
 0x16a   :  { %342 = vst.msk [vmem:[%s613_s5 + $0x20] sm:$0xf] %vm333_vm3, %v325_v4  ;;  %v316_v6 = vmax.f32 %v299_v5, 0.0 }
 0x16b   :  { %v283_v7 = vpop.f32.mrf.mxu1 }
 0x16c   :  { %v332_v8 = vpack.c.bf16 %v316_v6, %v316_v6  ;;  %v284_v9 = vadd.f32 %v526_v11, %v283_v7 }
 0x16e   :  { %349 = vst.msk [vmem:[%s613_s5 + $0x3c] sm:$0xf] %vm333_vm3, %v332_v8  ;;  %v310_v10 = vmax.f32 %v284_v9, 0.0 }
 0x170   :  { %v326_v12 = vpack.c.bf16 %v310_v10, %v310_v10 }
 0x172   :  { %343 = vst.msk [vmem:[%s613_s5 + $0x24] sm:$0xf] %vm333_vm3, %v326_v12 }

// kernel: cloudnetp_forward.30
= control target key start
LH: loop header
LB: loop body
LE: loop exit
PB: predicated region body
PF: predicated region fallthrough
CT: control target
= control target key end

     0   :  { %vm413_vm0 = vcmask 1043456   ;;  %vm388_vm1 = vcmask 64512   ;;  %vm188_vm2 = vcmask 130048   ;;  %s865_s18 = smov 8   ;;  %vm610_vm3 = vcmask 125952   ;;  %s1250_s4 = inlined_call_operand.vmem [shape: bf16[8,8], index: 4, kind: input, shape index: {}]   ;;  %s1251_s2 = inlined_call_operand.vmem [shape: bf16[144,16], index: 2, kind: input, shape index: {}]   ;;  %s1252_s1 = inlined_call_operand.vmem [shape: bf16[128,8], index: 1, kind: input, shape index: {}]   ;;  %s1253_s0 = inlined_call_operand.vmem [shape: bf16[128,144], index: 0, kind: input, shape index: {}]   ;;  %s1254_s5 = inlined_call_operand.vmem [shape: f32[1,8], index: 5, kind: input, shape index: {}]   ;;  %s1255_s3 = inlined_call_operand.vmem [shape: f32[1,16], index: 3, kind: input, shape index: {}]   ;;  %s1256_s6 = inlined_call_operand.vmem [shape: bf16[128,16], index: 6, kind: output, shape index: {}]  }
   0x1   :  { %v343_v0 = vld [vmem:[%s1250_s4] sm:$0xf]  ;;  %v802_v1 = vld [vmem:[%s1251_s2 + $0x38] sm:$0xff]  ;;  %v779_v5 = vld [vmem:[%s1253_s0 + $0x4] sm:$0xf] }
   0x2   :  { %v910_v2 = vld [vmem:[%s1251_s2 + $0x40] sm:$0xff]  ;;  %v912_v3 = vsel %vm413_vm0, %v343_v0, 0  ;;  %v635_v6 = vld [vmem:[%s1253_s0 + $0x8] sm:$0xf0]  ;;  %213 = vmatpush.bf16.msra.mxu0 %v802_v1  ;;  %v801_v8 = vld [vmem:[%s1251_s2 + $0x30] sm:$0xff]  ;;  %812 = vmatpush.bf16.msra.mxu3 %v802_v1 }
   0x3   :  { %v804_v4 = vld [vmem:[%s1252_s1] sm:$0xff]  ;;  %424 = vmatpush.bf16.msra.mxu2 %v912_v3  ;;  %v638_v7 = vor.u32 %v779_v5, %v635_v6  ;;  %269 = vmatpush.bf16.msra.mxu1 %v910_v2  ;;  %v800_v10 = vld [vmem:[%s1251_s2 + $0x28] sm:$0xff]  ;;  %v798_v18 = vld [vmem:[%s1251_s2 + $0x18] sm:$0xff] }
   0x4   :  { %v327_v9 = vld [vmem:[%s1252_s1] sm:$0xff]   ;;  %v329_v14 = vld [vmem:[%s1252_s1 + $0x8] sm:$0xff]   ;;  %v781_v20 = vld [vmem:[%s1253_s0 + $0x14] sm:$0xf] }
   0x5   :  { %v482_v11 = vunpack.c.l.bf16 %v327_v9  ;;  %v483_v12 = vunpack.c.h.bf16 %v327_v9  ;;  %v799_v15 = vld [vmem:[%s1251_s2 + $0x20] sm:$0xff]  ;;  %v484_v16 = vunpack.c.l.bf16 %v329_v14  ;;  %v485_v17 = vunpack.c.h.bf16 %v329_v14  ;;  %v643_v21 = vld [vmem:[%s1253_s0 + $0x18] sm:$0xf0]  ;;  %v805_v22 = vld [vmem:[%s1252_s1 + $0x8] sm:$0xff] }
   0x6   :  { %771 = vmatmul.msk.bf16.vlgmr.msra.gmra.mxu2 %vm388_vm1, %v804_v4  ;;  %731 = vmatmul.msk.bf16.vlgmr.msra.gmra.mxu1 %vm188_vm2, %v638_v7  ;;  %v646_v23 = vor.u32 %v781_v20, %v643_v21  ;;  %v797_v24 = vld [vmem:[%s1251_s2 + $0x10] sm:$0xff]  ;;  %v796_v25 = vld [vmem:[%s1251_s2 + $0x8] sm:$0xff]  ;;  %v795_v30 = vld [vmem:[%s1251_s2] sm:$0xff] }
   0x7   :  { %214 = vmatpush.bf16.msra.mxu0 %v801_v8  ;;  %813 = vmatpush.bf16.msra.mxu3 %v801_v8  ;;  %v823_v13 = vpack.i.bf16 %v483_v12, %v482_v11  ;;  %v828_v19 = vpack.i.bf16 %v485_v17, %v484_v16  ;;  %v331_v26 = vld [vmem:[%s1252_s1 + $0x10] sm:$0xff]   ;;  %v633_v31 = vld [vmem:[%s1253_s0] sm:$0xf]  ;;  %v780_v32 = vld [vmem:[%s1253_s0 + $0x4] sm:$0xf0] }
   0x8   :  { %v486_v27 = vunpack.c.l.bf16 %v331_v26  ;;  %v487_v28 = vunpack.c.h.bf16 %v331_v26  ;;  %v681_v33 = vld [vmem:[%s1253_s0 + $0x60] sm:$0xf]  ;;  %v792_v34 = vld [vmem:[%s1253_s0 + $0x64] sm:$0xf0]  ;;  %v634_v35 = vor.u32 %v780_v32, %v633_v31  ;;  %v783_v37 = vld [vmem:[%s1253_s0 + $0x24] sm:$0xf] }
   0x9   :  { %824 = vrot.lane.b32.xlu0 %v823_v13, %s865_s18  ;;  %v682_v36 = vor.u32 %v792_v34, %v681_v33  ;;  %v651_v38 = vld [vmem:[%s1253_s0 + $0x28] sm:$0xf0]  ;;  %v806_v39 = vld [vmem:[%s1252_s1 + $0x10] sm:$0xff]  ;;  %v333_v41 = vld [vmem:[%s1252_s1 + $0x18] sm:$0xff]  }
   0xa   :  { %v833_v29 = vpack.i.bf16 %v487_v28, %v486_v27  ;;  %v654_v40 = vor.u32 %v783_v37, %v651_v38  ;;  %v488_v42 = vunpack.c.l.bf16 %v333_v41  ;;  %v489_v43 = vunpack.c.h.bf16 %v333_v41  ;;  %v641_v45 = vld [vmem:[%s1253_s0 + $0x10] sm:$0xf]  ;;  %v782_v46 = vld [vmem:[%s1253_s0 + $0x14] sm:$0xf0]  ;;  %v785_v51 = vld [vmem:[%s1253_s0 + $0x34] sm:$0xf] }
   0xb   :  { %215 = vmatpush.bf16.msra.mxu0 %v800_v10  ;;  %814 = vmatpush.bf16.msra.mxu3 %v800_v10  ;;  %v689_v47 = vld [vmem:[%s1253_s0 + $0x70] sm:$0xf]  ;;  %v794_v48 = vld [vmem:[%s1253_s0 + $0x74] sm:$0xf0]  ;;  %v642_v49 = vor.u32 %v782_v46, %v641_v45  ;;  %v659_v52 = vld [vmem:[%s1253_s0 + $0x38] sm:$0xf0] }
   0xc   :  { %834 = vrot.lane.b32.xlu1 %v833_v29, %s865_s18  ;;  %v838_v44 = vpack.i.bf16 %v489_v43, %v488_v42  ;;  %v690_v50 = vor.u32 %v794_v48, %v689_v47  ;;  %v807_v53 = vld [vmem:[%s1252_s1 + $0x18] sm:$0xff]  ;;  %v662_v54 = vor.u32 %v785_v51, %v659_v52  ;;  %v649_v55 = vld [vmem:[%s1253_s0 + $0x20] sm:$0xf]  ;;  %v784_v56 = vld [vmem:[%s1253_s0 + $0x24] sm:$0xf0] }
   0xd   :  { %v793_v57 = vld [vmem:[%s1253_s0 + $0x74] sm:$0xf]  ;;  %v691_v58 = vld [vmem:[%s1253_s0 + $0x78] sm:$0xf0]  ;;  %v650_v59 = vor.u32 %v784_v56, %v649_v55  ;;  %v787_v61 = vld [vmem:[%s1253_s0 + $0x44] sm:$0xf] }
   0xe   :  { %v694_v60 = vor.u32 %v793_v57, %v691_v58  ;;  %v667_v62 = vld [vmem:[%s1253_s0 + $0x48] sm:$0xf0]  ;;  %v341_v63 = vld [vmem:[%s1252_s1 + $0x38] sm:$0xff]   ;;  %v808_v0 = vld [vmem:[%s1252_s1 + $0x20] sm:$0xff] }
   0xf   :  { %216 = vmatpush.bf16.msra.mxu0 %v799_v15  ;;  %815 = vmatpush.bf16.msra.mxu3 %v799_v15  ;;  %v496_v1 = vunpack.c.l.bf16 %v341_v63  ;;  %v657_v5 = vld [vmem:[%s1253_s0 + $0x30] sm:$0xf]  ;;  %v786_v6 = vld [vmem:[%s1253_s0 + $0x34] sm:$0xf0]  ;;  %v789_v9 = vld [vmem:[%s1253_s0 + $0x54] sm:$0xf] }
  0x10   :  { %v658_v7 = vor.u32 %v786_v6, %v657_v5  ;;  %v811_v8 = vld [vmem:[%s1252_s1 + $0x38] sm:$0xff]  ;;  %v809_v11 = vld [vmem:[%s1252_s1 + $0x28] sm:$0xff]  ;;  %v335_v13 = vld [vmem:[%s1252_s1 + $0x20] sm:$0xff]  }
  0x11   :  { %829 = vrot.lane.b32.xlu0 %v828_v19, %s865_s18  ;;  %v675_v10 = vld [vmem:[%s1253_s0 + $0x58] sm:$0xf0]  ;;  %v339_v14 = vld [vmem:[%s1252_s1 + $0x30] sm:$0xff]   ;;  %v490_v15 = vunpack.c.l.bf16 %v335_v13  ;;  %v491_v16 = vunpack.c.h.bf16 %v335_v13  ;;  %v665_v21 = vld [vmem:[%s1253_s0 + $0x40] sm:$0xf] }
  0x12   :  { %v678_v12 = vor.u32 %v789_v9, %v675_v10  ;;  %v494_v17 = vunpack.c.l.bf16 %v339_v14  ;;  %v810_v26 = vld [vmem:[%s1252_s1 + $0x30] sm:$0xff]  ;;  %v337_v28 = vld [vmem:[%s1252_s1 + $0x28] sm:$0xff]   ;;  %v790_v33 = vld [vmem:[%s1253_s0 + $0x54] sm:$0xf0] }
  0x13   :  { %217 = vmatpush.bf16.msra.mxu0 %v798_v18  ;;  %816 = vmatpush.bf16.msra.mxu3 %v798_v18  ;;  %v495_v18 = vunpack.c.h.bf16 %v339_v14  ;;  %v843_v19 = vpack.i.bf16 %v491_v16, %v490_v15  ;;  %v492_v29 = vunpack.c.l.bf16 %v337_v28  ;;  %v673_v32 = vld [vmem:[%s1253_s0 + $0x50] sm:$0xf]  ;;  %v1115_v43 = vld [vmem:[%s1255_s3] ss:$0 sm:$0xff] }
  0x14   :  { %839 = vrot.lane.b32.xlu1 %v838_v44, %s865_s18  ;;  %v674_v34 = vor.u32 %v790_v33, %v673_v32 }
  0x15   :  { %v853_v20 = vpack.i.bf16 %v495_v18, %v494_v17  ;;  %844 = vrot.lane.b32.xlu2 %v843_v19, %s865_s18 }
  0x16   :  { %772 = vmatmul.msk.bf16.gmra.mxu2 %vm388_vm1, %v805_v22  ;;  %732 = vmatmul.msk.bf16.gmra.mxu1 %vm188_vm2, %v646_v23  ;;  %v788_v22 = vld [vmem:[%s1253_s0 + $0x44] sm:$0xf0] }
  0x17   :  { %218 = vmatpush.bf16.msra.mxu0 %v797_v24  ;;  %817 = vmatpush.bf16.msra.mxu3 %v797_v24  ;;  %v666_v23 = vor.u32 %v788_v22, %v665_v21  ;;  %v791_v24 = vld [vmem:[%s1253_s0 + $0x64] sm:$0xf] }
  0x19   :  { %854 = vrot.lane.b32.xlu0 %v853_v20, %s865_s18 }
  0x1b   :  { %219 = vmatpush.bf16.msra.mxu0 %v796_v25  ;;  %818 = vmatpush.bf16.msra.mxu3 %v796_v25  ;;  %v683_v25 = vld [vmem:[%s1253_s0 + $0x68] sm:$0xf0] }
  0x1c   :  { %v686_v27 = vor.u32 %v791_v24, %v683_v25 }
  0x1f   :  { %220 = vmatpush.bf16.msra.mxu0 %v795_v30  ;;  %819 = vmatpush.bf16.msra.mxu3 %v795_v30  ;;  %v493_v30 = vunpack.c.h.bf16 %v337_v28 }
  0x21   :  { %v848_v31 = vpack.i.bf16 %v493_v30, %v492_v29 }
  0x22   :  { %221 = vmatmul.bf16.vlgmr.msra.gmra.mxu0 %v634_v35  ;;  %251 = vmatmul.bf16.vlgmr.msra.gmra.mxu3 %v682_v36 }
  0x23   :  { %820 = vmatpush.bf16.msrb.mxu3 %v910_v2  ;;  %v497_v2 = vunpack.c.h.bf16 %v341_v63  ;;  %849 = vrot.lane.b32.xlu2 %v848_v31, %s865_s18 }
  0x25   :  { %v858_v4 = vpack.i.bf16 %v497_v2, %v496_v1 }
  0x26   :  { %773 = vmatmul.msk.bf16.gmra.mxu2 %vm388_vm1, %v806_v39  ;;  %733 = vmatmul.msk.bf16.gmra.mxu1 %vm188_vm2, %v654_v40  ;;  %v1110_v40 = vld [vmem:[%s1254_s5] ss:$0 sm:$0xff] }
  0x27   :  { %821 = vmatpush.bf16.msra.mxu3 %v912_v3  ;;  %v670_v3 = vor.u32 %v787_v61, %v667_v62  ;;  %859 = vrot.lane.b32.xlu1 %v858_v4, %s865_s18 }
  0x32   :  { %226 = vmatmul.bf16.gmra.mxu0 %v642_v49  ;;  %256 = vmatmul.bf16.gmra.mxu3 %v690_v50 }
  0x36   :  { %774 = vmatmul.msk.bf16.gmra.mxu2 %vm388_vm1, %v807_v53  ;;  %734 = vmatmul.msk.bf16.gmra.mxu1 %vm188_vm2, %v662_v54 }
  0x42   :  { %231 = vmatmul.bf16.gmra.mxu0 %v650_v59  ;;  %738 = vmatmul.msk.bf16.vlgmr.msrb.gmra.mxu3 %vm188_vm2, %v694_v60 }
  0x46   :  { %775 = vmatmul.msk.bf16.gmra.mxu2 %vm388_vm1, %v808_v0  ;;  %735 = vmatmul.msk.bf16.gmra.mxu1 %vm188_vm2, %v670_v3 }
  0x52   :  { %236 = vmatmul.bf16.gmra.mxu0 %v658_v7  ;;  %778 = vmatmul.msk.bf16.vlgmr.msra.gmra.mxu3 %vm388_vm1, %v811_v8 }
  0x56   :  { %776 = vmatmul.msk.bf16.gmra.mxu2 %vm388_vm1, %v809_v11  ;;  %736 = vmatmul.msk.bf16.gmra.mxu1 %vm188_vm2, %v678_v12 }
  0x62   :  { %241 = vmatmul.bf16.gmra.mxu0 %v666_v23 }
  0x66   :  { %777 = vmatmul.msk.bf16.gmra.mxu2 %vm388_vm1, %v810_v26  ;;  %737 = vmatmul.msk.bf16.gmra.mxu1 %vm188_vm2, %v686_v27 }
  0x72   :  { %246 = vmatmul.bf16.gmra.mxu0 %v674_v34 }
  0x7b   :  { %v825_v45 = vpop.permute.xlu0 %824 }
  0x7c   :  { %v826_v49 = vunpack.i.l.bf16 %v825_v45  ;;  %v827_v62 = vunpack.i.h.bf16 %v825_v45 }
  0x7e   :  { %v835_v32 = vpop.permute.xlu1 %834 }
  0x83   :  { %v271_v35 = vpop.f32.mrf.mxu1  ;;  %v830_v5 = vpop.permute.xlu0 %829 }
  0x84   :  { %v831_v12 = vunpack.i.l.bf16 %v830_v5  ;;  %v832_v25 = vunpack.i.h.bf16 %v830_v5 }
  0x89   :  { %v426_v36 = vpop.f32.mrf.mxu2 }
  0x8a   :  { %v427_v44 = vadd.f32 %v1110_v40, %v426_v36 }
  0x8b   :  { %v273_v37 = vpop.f32.mrf.mxu1 }
  0x8c   :  { %v466_v48 = vmax.f32 %v427_v44, 0.0 }
  0x8e   :  { %v562_v55 = vsel %vm388_vm1, %v466_v48, %v826_v49 }
  0x91   :  { %v428_v38 = vpop.f32.mrf.mxu2 }
  0x92   :  { %v429_v54 = vadd.f32 %v1110_v40, %v428_v38 }
  0x93   :  { %v276_v39 = vpop.f32.mrf.mxu1 }
  0x94   :  { %v467_v61 = vmax.f32 %v429_v54, 0.0 }
  0x96   :  { %v563_v4 = vsel %vm388_vm1, %v467_v61, %v827_v62 }
  0x99   :  { %v431_v41 = vpop.f32.mrf.mxu2 }
  0x9a   :  { %v432_v3 = vadd.f32 %v1110_v40, %v431_v41 }
  0x9b   :  { %v278_v42 = vpop.f32.mrf.mxu1 }
  0x9c   :  { %v468_v11 = vmax.f32 %v432_v3, 0.0 }
  0x9e   :  { %v564_v18 = vsel %vm388_vm1, %v468_v11, %v831_v12 }
  0x9f   :  { %v222_v46 = vpop.f32.mrf.mxu0 }
  0xa0   :  { %v223_v47 = vadd.f32 %v1115_v43, %v222_v46 }
  0xa1   :  { %v433_v50 = vpop.f32.mrf.mxu2 }
  0xa2   :  { %v272_v51 = vadd.f32 %v271_v35, %v223_v47  ;;  %v434_v17 = vadd.f32 %v1110_v40, %v433_v50 }
  0xa3   :  { %v281_v53 = vpop.f32.mrf.mxu1 }
  0xa4   :  { %v311_v52 = vmax.f32 %v272_v51, 0.0  ;;  %v469_v24 = vmax.f32 %v434_v17, 0.0 }
  0xa5   :  { %v1121_v57 = vpop.f32.mrf.mxu3 }
  0xa6   :  { %v578_v56 = vadd.f32 %v562_v55, %v311_v52  ;;  %v565_v31 = vsel %vm388_vm1, %v469_v24, %v832_v25  ;;  %v837_v55 = vunpack.i.h.bf16 %v835_v32 }
  0xa7   :  { %v224_v58 = vpop.f32.mrf.mxu0 }
  0xa8   :  { %v594_v59 = vpack.c.bf16 %v578_v56, %v578_v56  ;;  %v225_v60 = vadd.f32 %v1115_v43, %v224_v58  ;;  %v840_v58 = vpop.permute.xlu1 %839 }
  0xa9   :  { %v436_v63 = vpop.f32.mrf.mxu2 }
  0xaa   :  { %611 = vst.msk [vmem:[%s1256_s6] sm:$0xf] %vm610_vm3, %v594_v59  ;;  %v274_v0 = vadd.f32 %v273_v37, %v225_v60  ;;  %v437_v30 = vadd.f32 %v1110_v40, %v436_v63 }
  0xab   :  { %v283_v2 = vpop.f32.mrf.mxu1 }
  0xac   :  { %v312_v1 = vmax.f32 %v274_v0, 0.0  ;;  %v470_v38 = vmax.f32 %v437_v30, 0.0 }
  0xad   :  { %v1130_v7 = vpop.f32.mrf.mxu3 }
  0xae   :  { %v579_v6 = vadd.f32 %v563_v4, %v312_v1 }
  0xaf   :  { %v227_v8 = vpop.f32.mrf.mxu0 }
  0xb0   :  { %v595_v9 = vpack.c.bf16 %v579_v6, %v579_v6  ;;  %v228_v10 = vadd.f32 %v1115_v43, %v227_v8  ;;  %v841_v6 = vunpack.i.l.bf16 %v840_v58  ;;  %v860_v12 = vpop.permute.xlu1 %859 }
  0xb1   :  { %v438_v13 = vpop.f32.mrf.mxu2 }
  0xb2   :  { %612 = vst.msk [vmem:[%s1256_s6 + $0x4] sm:$0xf] %vm610_vm3, %v595_v9  ;;  %v277_v14 = vadd.f32 %v276_v39, %v228_v10  ;;  %v836_v39 = vunpack.i.l.bf16 %v835_v32  ;;  %v439_v46 = vadd.f32 %v1110_v40, %v438_v13 }
  0xb3   :  { %v286_v16 = vpop.f32.mrf.mxu1 }
  0xb4   :  { %v313_v15 = vmax.f32 %v277_v14, 0.0  ;;  %v566_v47 = vsel %vm388_vm1, %v470_v38, %v836_v39  ;;  %v471_v54 = vmax.f32 %v439_v46, 0.0 }
  0xb5   :  { %v257_v20 = vpop.f32.mrf.mxu3 }
  0xb6   :  { %v580_v19 = vadd.f32 %v564_v18, %v313_v15  ;;  %v567_v62 = vsel %vm388_vm1, %v471_v54, %v837_v55  ;;  %v258_v9 = vadd.f32 %v1115_v43, %v257_v20  ;;  %v861_v20 = vunpack.i.l.bf16 %v860_v12 }
  0xb7   :  { %v229_v21 = vpop.f32.mrf.mxu0 }
  0xb8   :  { %v596_v22 = vpack.c.bf16 %v580_v19, %v580_v19  ;;  %v230_v23 = vadd.f32 %v1115_v43, %v229_v21 }
  0xb9   :  { %v441_v26 = vpop.f32.mrf.mxu2 }
  0xba   :  { %613 = vst.msk [vmem:[%s1256_s6 + $0x8] sm:$0xf] %vm610_vm3, %v596_v22  ;;  %v279_v27 = vadd.f32 %v278_v42, %v230_v23  ;;  %v442_v61 = vadd.f32 %v1110_v40, %v441_v26 }
  0xbb   :  { %v1144_v29 = vpop.f32.mrf.mxu1 }
  0xbc   :  { %v314_v28 = vmax.f32 %v279_v27, 0.0  ;;  %v472_v5 = vmax.f32 %v442_v61, 0.0 }
  0xbd   :  { %v259_v34 = vpop.f32.mrf.mxu3 }
  0xbe   :  { %v581_v33 = vadd.f32 %v565_v31, %v314_v28  ;;  %v568_v14 = vsel %vm388_vm1, %v472_v5, %v841_v6  ;;  %v260_v27 = vadd.f32 %v1115_v43, %v259_v34  ;;  %v845_v34 = vpop.permute.xlu2 %844 }
  0xbf   :  { %v232_v35 = vpop.f32.mrf.mxu0 }
  0xc0   :  { %v597_v36 = vpack.c.bf16 %v581_v33, %v581_v33  ;;  %v233_v37 = vadd.f32 %v1115_v43, %v232_v35 }
  0xc1   :  { %v443_v41 = vpop.f32.mrf.mxu2 }
  0xc2   :  { %614 = vst.msk [vmem:[%s1256_s6 + $0xc] sm:$0xf] %vm610_vm3, %v597_v36  ;;  %v282_v42 = vadd.f32 %v281_v53, %v233_v37  ;;  %v444_v13 = vadd.f32 %v1110_v40, %v443_v41 }
  0xc3   :  { %v1153_v45 = vpop.f32.mrf.mxu1 }
  0xc4   :  { %v315_v44 = vmax.f32 %v282_v42, 0.0  ;;  %v473_v24 = vmax.f32 %v444_v13, 0.0 }
  0xc5   :  { %v306_v49 = vpop.f32.mrf.mxu3 }
  0xc6   :  { %v582_v48 = vadd.f32 %v566_v47, %v315_v44  ;;  %v307_v15 = vadd.f32 %v306_v49, %v258_v9  ;;  %v862_v44 = vunpack.i.h.bf16 %v860_v12  ;;  %v847_v9 = vunpack.i.h.bf16 %v845_v34 }
  0xc7   :  { %v234_v50 = vpop.f32.mrf.mxu0 }
  0xc8   :  { %v598_v51 = vpack.c.bf16 %v582_v48, %v582_v48  ;;  %v235_v52 = vadd.f32 %v1115_v43, %v234_v50  ;;  %v325_v28 = vmax.f32 %v307_v15, 0.0  ;;  %v846_v50 = vunpack.i.l.bf16 %v845_v34 }
  0xc9   :  { %v446_v56 = vpop.f32.mrf.mxu2 }
  0xca   :  { %615 = vst.msk [vmem:[%s1256_s6 + $0x10] sm:$0xf] %vm610_vm3, %v598_v51  ;;  %v284_v53 = vadd.f32 %v283_v2, %v235_v52  ;;  %v447_v36 = vadd.f32 %v1110_v40, %v446_v56 }
  0xcb   :  { %v1162_v60 = vpop.f32.mrf.mxu1 }
  0xcc   :  { %v316_v59 = vmax.f32 %v284_v53, 0.0  ;;  %v474_v49 = vmax.f32 %v447_v36, 0.0 }
  0xcd   :  { %v308_v0 = vpop.f32.mrf.mxu3 }
  0xce   :  { %v583_v63 = vadd.f32 %v567_v62, %v316_v59  ;;  %v309_v38 = vadd.f32 %v308_v0, %v260_v27  ;;  %v570_v62 = vsel %vm388_vm1, %v474_v49, %v846_v50 }
  0xcf   :  { %v237_v1 = vpop.f32.mrf.mxu0 }
  0xd0   :  { %v599_v3 = vpack.c.bf16 %v583_v63, %v583_v63  ;;  %v238_v4 = vadd.f32 %v1115_v43, %v237_v1  ;;  %v326_v54 = vmax.f32 %v309_v38, 0.0  ;;  %v253_v1 = vadd.f32 %v1115_v43, %v1121_v57 }
  0xd1   :  { %v448_v8 = vpop.f32.mrf.mxu2 }
  0xd2   :  { %616 = vst.msk [vmem:[%s1256_s6 + $0x14] sm:$0xf] %vm610_vm3, %v599_v3  ;;  %v287_v2 = vadd.f32 %v286_v16, %v238_v4  ;;  %v842_v16 = vunpack.i.h.bf16 %v840_v58  ;;  %v449_v61 = vadd.f32 %v1110_v40, %v448_v8  ;;  %v855_v4 = vpop.permute.xlu0 %854 }
  0xd3   :  { %v1172_v11 = vpop.f32.mrf.mxu1  ;;  %v856_v12 = vunpack.i.l.bf16 %v855_v4 }
  0xd4   :  { %v317_v10 = vmax.f32 %v287_v2, 0.0  ;;  %v569_v37 = vsel %vm388_vm1, %v473_v24, %v842_v16  ;;  %v475_v6 = vmax.f32 %v449_v61, 0.0 }
  0xd5   :  { %v461_v18 = vpop.f32.mrf.mxu3 }
  0xd6   :  { %v584_v17 = vadd.f32 %v568_v14, %v317_v10  ;;  %v462_v19 = vadd.f32 %v1110_v40, %v461_v18  ;;  %v571_v18 = vsel %vm388_vm1, %v475_v6, %v847_v9 }
  0xd7   :  { %v239_v21 = vpop.f32.mrf.mxu0 }
  0xd8   :  { %v600_v22 = vpack.c.bf16 %v584_v17, %v584_v17  ;;  %v240_v23 = vadd.f32 %v1115_v43, %v239_v21  ;;  %v480_v25 = vmax.f32 %v462_v19, 0.0  ;;  %v850_v19 = vpop.permute.xlu2 %849 }
  0xd9   :  { %v451_v26 = vpop.f32.mrf.mxu2 }
  0xda   :  { %617 = vst.msk [vmem:[%s1256_s6 + $0x18] sm:$0xf] %vm610_vm3, %v600_v22  ;;  %v289_v30 = vadd.f32 %v1144_v29, %v240_v23  ;;  %v576_v31 = vsel %vm388_vm1, %v480_v25, %v861_v20  ;;  %v452_v15 = vadd.f32 %v1110_v40, %v451_v26  ;;  %v255_v23 = vadd.f32 %v1115_v43, %v1130_v7 }
  0xdb   :  { %v592_v32 = vadd.f32 %v576_v31, %v325_v28  ;;  %v1185_v35 = vpop.f32.mrf.mxu1  ;;  %v851_v28 = vunpack.i.l.bf16 %v850_v19 }
  0xdc   :  { %v318_v33 = vmax.f32 %v289_v30, 0.0  ;;  %v476_v27 = vmax.f32 %v452_v15, 0.0 }
  0xdd   :  { %v608_v39 = vpack.c.bf16 %v592_v32, %v592_v32  ;;  %v463_v42 = vpop.f32.mrf.mxu3  ;;  %v857_v32 = vunpack.i.h.bf16 %v855_v4 }
  0xde   :  { %v585_v41 = vadd.f32 %v569_v37, %v318_v33  ;;  %v464_v46 = vadd.f32 %v1110_v40, %v463_v42  ;;  %v572_v34 = vsel %vm388_vm1, %v476_v27, %v851_v28 }
  0xdf   :  { %v242_v47 = vpop.f32.mrf.mxu0  ;;  %625 = vst.msk [vmem:[%s1256_s6 + $0x38] sm:$0xf] %vm610_vm3, %v608_v39 }
  0xe0   :  { %v601_v29 = vpack.c.bf16 %v585_v41, %v585_v41  ;;  %v243_v48 = vadd.f32 %v1115_v43, %v242_v47  ;;  %v481_v51 = vmax.f32 %v464_v46, 0.0 }
  0xe1   :  { %v453_v52 = vpop.f32.mrf.mxu2 }
  0xe2   :  { %618 = vst.msk [vmem:[%s1256_s6 + $0x1c] sm:$0xf] %vm610_vm3, %v601_v29  ;;  %v292_v55 = vadd.f32 %v1153_v45, %v243_v48  ;;  %v577_v56 = vsel %vm388_vm1, %v481_v51, %v862_v44  ;;  %v454_v38 = vadd.f32 %v1110_v40, %v453_v52  ;;  %v852_v48 = vunpack.i.h.bf16 %v850_v19 }
  0xe3   :  { %v593_v53 = vadd.f32 %v577_v56, %v326_v54  ;;  %v301_v59 = vpop.f32.mrf.mxu1 }
  0xe4   :  { %v319_v58 = vmax.f32 %v292_v55, 0.0  ;;  %v302_v8 = vadd.f32 %v301_v59, %v253_v1  ;;  %v477_v29 = vmax.f32 %v454_v38, 0.0 }
  0xe5   :  { %v609_v63 = vpack.c.bf16 %v593_v53, %v593_v53 }
  0xe6   :  { %v586_v0 = vadd.f32 %v570_v62, %v319_v58  ;;  %v323_v17 = vmax.f32 %v302_v8, 0.0  ;;  %v573_v51 = vsel %vm388_vm1, %v477_v29, %v852_v48 }
  0xe7   :  { %v244_v3 = vpop.f32.mrf.mxu0  ;;  %626 = vst.msk [vmem:[%s1256_s6 + $0x3c] sm:$0xf] %vm610_vm3, %v609_v63 }
  0xe8   :  { %v602_v45 = vpack.c.bf16 %v586_v0, %v586_v0  ;;  %v245_v5 = vadd.f32 %v1115_v43, %v244_v3 }
  0xe9   :  { %v456_v2 = vpop.f32.mrf.mxu2 }
  0xea   :  { %619 = vst.msk [vmem:[%s1256_s6 + $0x20] sm:$0xf] %vm610_vm3, %v602_v45  ;;  %v294_v57 = vadd.f32 %v1162_v60, %v245_v5  ;;  %v457_v10 = vadd.f32 %v1110_v40, %v456_v2 }
  0xeb   :  { %v303_v22 = vpop.f32.mrf.mxu1 }
  0xec   :  { %v320_v13 = vmax.f32 %v294_v57, 0.0  ;;  %v478_v14 = vmax.f32 %v457_v10, 0.0  ;;  %v304_v26 = vadd.f32 %v303_v22, %v255_v23 }
  0xee   :  { %v587_v20 = vadd.f32 %v571_v18, %v320_v13  ;;  %v574_v21 = vsel %vm388_vm1, %v478_v14, %v856_v12  ;;  %v324_v39 = vmax.f32 %v304_v26, 0.0 }
  0xef   :  { %v590_v24 = vadd.f32 %v574_v21, %v323_v17  ;;  %v247_v60 = vpop.f32.mrf.mxu0 }
  0xf0   :  { %v603_v16 = vpack.c.bf16 %v587_v20, %v587_v20  ;;  %v248_v25 = vadd.f32 %v1115_v43, %v247_v60 }
  0xf1   :  { %v606_v30 = vpack.c.bf16 %v590_v24, %v590_v24  ;;  %v458_v31 = vpop.f32.mrf.mxu2 }
  0xf2   :  { %620 = vst.msk [vmem:[%s1256_s6 + $0x24] sm:$0xf] %vm610_vm3, %v603_v16  ;;  %v297_v33 = vadd.f32 %v1172_v11, %v248_v25  ;;  %v459_v7 = vadd.f32 %v1110_v40, %v458_v31 }
  0xf3   :  { %623 = vst.msk [vmem:[%s1256_s6 + $0x30] sm:$0xf] %vm610_vm3, %v606_v30 }
  0xf4   :  { %v321_v36 = vmax.f32 %v297_v33, 0.0  ;;  %v479_v37 = vmax.f32 %v459_v7, 0.0 }
  0xf6   :  { %v588_v41 = vadd.f32 %v572_v34, %v321_v36  ;;  %v575_v42 = vsel %vm388_vm1, %v479_v37, %v857_v32 }
  0xf7   :  { %v591_v44 = vadd.f32 %v575_v42, %v324_v39  ;;  %v249_v46 = vpop.f32.mrf.mxu0 }
  0xf8   :  { %v604_v11 = vpack.c.bf16 %v588_v41, %v588_v41  ;;  %v250_v47 = vadd.f32 %v1115_v43, %v249_v46 }
  0xf9   :  { %v607_v49 = vpack.c.bf16 %v591_v44, %v591_v44 }
  0xfa   :  { %621 = vst.msk [vmem:[%s1256_s6 + $0x28] sm:$0xf] %vm610_vm3, %v604_v11  ;;  %v299_v40 = vadd.f32 %v1185_v35, %v250_v47 }
  0xfb   :  { %624 = vst.msk [vmem:[%s1256_s6 + $0x34] sm:$0xf] %vm610_vm3, %v607_v49 }
  0xfc   :  { %v322_v50 = vmax.f32 %v299_v40, 0.0 }
  0xfe   :  { %v589_v52 = vadd.f32 %v573_v51, %v322_v50 }
 0x100   :  { %v605_v43 = vpack.c.bf16 %v589_v52, %v589_v52 }
 0x102   :  { %622 = vst.msk [vmem:[%s1256_s6 + $0x2c] sm:$0xf] %vm610_vm3, %v605_v43 }

// kernel: cloudnetp_forward.35
= control target key start
LH: loop header
LB: loop body
LE: loop exit
PB: predicated region body
PF: predicated region fallthrough
CT: control target
= control target key end

     0   :  { %vm197_vm0 = vcmask 64512   ;;  %vm226_vm1 = vcmask 125952   ;;  %s460_s0 = inlined_call_operand.vmem [shape: bf16[9,32,8], index: 0, kind: input, shape index: {}]   ;;  %s461_s1 = inlined_call_operand.vmem [shape: bf16[32,16], index: 1, kind: input, shape index: {}]   ;;  %s462_s2 = inlined_call_operand.vmem [shape: bf16[32,16], index: 2, kind: output, shape index: {}]  }
   0x1   :  { %v268_v0 = vld [vmem:[%s460_s0] sm:$0xff]   ;;  %v348_v1 = vld [vmem:[%s460_s0 + $0x10] sm:$0xff]   ;;  %v347_v17 = vld [vmem:[%s460_s0 + $0x8] sm:$0xff]  }
   0x2   :  { %v350_v2 = vld [vmem:[%s460_s0 + $0x20] sm:$0xff]   ;;  %v269_v3 = vunpack.c.l.bf16 %v268_v0  ;;  %v270_v4 = vunpack.c.h.bf16 %v268_v0  ;;  %v277_v5 = vunpack.c.l.bf16 %v348_v1  ;;  %v278_v6 = vunpack.c.h.bf16 %v348_v1  ;;  %v352_v7 = vld [vmem:[%s460_s0 + $0x30] sm:$0xff]   ;;  %v349_v20 = vld [vmem:[%s460_s0 + $0x18] sm:$0xff]  }
   0x3   :  { %v354_v8 = vld [vmem:[%s460_s0 + $0x40] sm:$0xff]   ;;  %v285_v9 = vunpack.c.l.bf16 %v350_v2  ;;  %v286_v10 = vunpack.c.h.bf16 %v350_v2  ;;  %v356_v11 = vld [vmem:[%s460_s0 + $0x50] sm:$0xff]   ;;  %v293_v14 = vunpack.c.l.bf16 %v352_v7  ;;  %v294_v15 = vunpack.c.h.bf16 %v352_v7  ;;  %v351_v25 = vld [vmem:[%s460_s0 + $0x28] sm:$0xff]  }
   0x4   :  { %v28_v12 = vmax.f32 %v269_v3, %v277_v5  ;;  %v29_v13 = vmax.f32 %v270_v4, %v278_v6  ;;  %v358_v16 = vld [vmem:[%s460_s0 + $0x60] sm:$0xff]   ;;  %v301_v18 = vunpack.c.l.bf16 %v354_v8  ;;  %v302_v19 = vunpack.c.h.bf16 %v354_v8  ;;  %v353_v26 = vld [vmem:[%s460_s0 + $0x38] sm:$0xff]   ;;  %v360_v33 = vld [vmem:[%s460_s0 + $0x70] sm:$0xff]  }
   0x5   :  { %v309_v23 = vunpack.c.l.bf16 %v356_v11  ;;  %v310_v24 = vunpack.c.h.bf16 %v356_v11  ;;  %v317_v27 = vunpack.c.l.bf16 %v358_v16  ;;  %v318_v28 = vunpack.c.h.bf16 %v358_v16  ;;  %v355_v36 = vld [vmem:[%s460_s0 + $0x48] sm:$0xff]   ;;  %v362_v43 = vld [vmem:[%s460_s0 + $0x80] sm:$0xff]   ;;  %v357_v46 = vld [vmem:[%s460_s0 + $0x58] sm:$0xff]  }
   0x6   :  { %v49_v21 = vmax.f32 %v28_v12, %v285_v9  ;;  %v50_v22 = vmax.f32 %v29_v13, %v286_v10  ;;  %v273_v29 = vunpack.c.l.bf16 %v347_v17  ;;  %v274_v30 = vunpack.c.h.bf16 %v347_v17  ;;  %v359_v55 = vld [vmem:[%s460_s0 + $0x68] sm:$0xff]   ;;  %v361_v0 = vld [vmem:[%s460_s0 + $0x78] sm:$0xff]  }
   0x7   :  { %v281_v34 = vunpack.c.l.bf16 %v349_v20  ;;  %v282_v35 = vunpack.c.h.bf16 %v349_v20  ;;  %v289_v37 = vunpack.c.l.bf16 %v351_v25  ;;  %v290_v38 = vunpack.c.h.bf16 %v351_v25  ;;  %v363_v7 = vld [vmem:[%s460_s0 + $0x88] sm:$0xff]   ;;  %s366_s0 = smov 8  }
   0x8   :  { %v70_v31 = vmax.f32 %v49_v21, %v293_v14  ;;  %v71_v32 = vmax.f32 %v50_v22, %v294_v15  ;;  %v297_v39 = vunpack.c.l.bf16 %v353_v26  ;;  %v298_v40 = vunpack.c.h.bf16 %v353_v26 }
   0x9   :  { %v30_v44 = vmax.f32 %v273_v29, %v281_v34  ;;  %v31_v45 = vmax.f32 %v274_v30, %v282_v35  ;;  %v325_v47 = vunpack.c.l.bf16 %v360_v33  ;;  %v326_v48 = vunpack.c.h.bf16 %v360_v33 }
   0xa   :  { %v91_v41 = vmax.f32 %v70_v31, %v301_v18  ;;  %v92_v42 = vmax.f32 %v71_v32, %v302_v19  ;;  %v305_v49 = vunpack.c.l.bf16 %v355_v36  ;;  %v306_v50 = vunpack.c.h.bf16 %v355_v36  ;;  %v340_v32 = vld [vmem:[%s461_s1] sm:$0xff]  }
   0xb   :  { %v51_v53 = vmax.f32 %v30_v44, %v289_v37  ;;  %v52_v54 = vmax.f32 %v31_v45, %v290_v38  ;;  %v333_v56 = vunpack.c.l.bf16 %v362_v43  ;;  %v334_v57 = vunpack.c.h.bf16 %v362_v43 }
   0xc   :  { %v112_v51 = vmax.f32 %v91_v41, %v309_v23  ;;  %v113_v52 = vmax.f32 %v92_v42, %v310_v24  ;;  %v313_v58 = vunpack.c.l.bf16 %v357_v46  ;;  %v314_v59 = vunpack.c.h.bf16 %v357_v46  ;;  %v364_v41 = vld [vmem:[%s461_s1 + $0x8] sm:$0xff]  }
   0xd   :  { %v72_v62 = vmax.f32 %v51_v53, %v297_v39  ;;  %v73_v63 = vmax.f32 %v52_v54, %v298_v40  ;;  %v321_v1 = vunpack.c.l.bf16 %v359_v55  ;;  %v322_v2 = vunpack.c.h.bf16 %v359_v55 }
   0xe   :  { %v133_v60 = vmax.f32 %v112_v51, %v317_v27  ;;  %v134_v61 = vmax.f32 %v113_v52, %v318_v28  ;;  %v329_v8 = vunpack.c.l.bf16 %v361_v0  ;;  %v330_v9 = vunpack.c.h.bf16 %v361_v0 }
   0xf   :  { %v93_v5 = vmax.f32 %v72_v62, %v305_v49  ;;  %v94_v6 = vmax.f32 %v73_v63, %v306_v50  ;;  %v337_v14 = vunpack.c.l.bf16 %v363_v7  ;;  %v338_v15 = vunpack.c.h.bf16 %v363_v7 }
  0x10   :  { %v154_v3 = vmax.f32 %v133_v60, %v325_v47  ;;  %v155_v4 = vmax.f32 %v134_v61, %v326_v48  ;;  %v341_v33 = vunpack.c.l.bf16 %v340_v32  ;;  %v342_v34 = vunpack.c.h.bf16 %v340_v32 }
  0x11   :  { %v114_v12 = vmax.f32 %v93_v5, %v313_v58  ;;  %v115_v13 = vmax.f32 %v94_v6, %v314_v59  ;;  %v345_v44 = vunpack.c.l.bf16 %v364_v41  ;;  %v346_v45 = vunpack.c.h.bf16 %v364_v41 }
  0x12   :  { %v175_v10 = vmax.f32 %v154_v3, %v333_v56  ;;  %v176_v11 = vmax.f32 %v155_v4, %v334_v57 }
  0x13   :  { %v135_v18 = vmax.f32 %v114_v12, %v321_v1  ;;  %v136_v19 = vmax.f32 %v115_v13, %v322_v2 }
  0x14   :  { %v179_v16 = vpack.c.bf16 %v175_v10, %v175_v10  ;;  %v180_v17 = vpack.c.bf16 %v176_v11, %v176_v11 }
  0x15   :  { %v156_v22 = vmax.f32 %v135_v18, %v329_v8  ;;  %v157_v23 = vmax.f32 %v136_v19, %v330_v9 }
  0x16   :  { %v187_v20 = vunpack.c.l.b16 %v179_v16  ;;  %v188_v21 = vunpack.c.l.b16 %v180_v17 }
  0x17   :  { %v177_v25 = vmax.f32 %v156_v22, %v337_v14  ;;  %v178_v26 = vmax.f32 %v157_v23, %v338_v15 }
  0x18   :  { %v191_v24 = vpack.c.b16 %v188_v21, %v187_v20 }
  0x19   :  { %v181_v27 = vpack.c.bf16 %v177_v25, %v177_v25  ;;  %v182_v28 = vpack.c.bf16 %v178_v26, %v178_v26 }
  0x1a   :  { %193 = vrot.lane.b32.xlu0 %v191_v24, %s366_s0 }
  0x1b   :  { %v189_v29 = vunpack.c.l.b16 %v181_v27  ;;  %v190_v30 = vunpack.c.l.b16 %v182_v28 }
  0x1d   :  { %v192_v31 = vpack.c.b16 %v190_v30, %v189_v29 }
  0x22   :  { %195 = vrot.lane.b32.xlu0 %v192_v31, %s366_s0 }
  0x8c   :  { %v194_v35 = vpop.permute.xlu0 %193 }
  0x8d   :  { %v200_v36 = vsel %vm197_vm0, %v191_v24, %v194_v35 }
  0x8e   :  { %v214_v37 = vunpack.c.l.bf16 %v200_v36  ;;  %v215_v38 = vunpack.c.h.bf16 %v200_v36 }
  0x90   :  { %v218_v39 = vadd.f32 %v341_v33, %v214_v37  ;;  %v219_v40 = vadd.f32 %v342_v34, %v215_v38 }
  0x92   :  { %v222_v42 = vpack.c.bf16 %v218_v39, %v218_v39  ;;  %v223_v43 = vpack.c.bf16 %v219_v40, %v219_v40 }
  0x94   :  { %227 = vst.msk [vmem:[%s462_s2] sm:$0xf] %vm226_vm1, %v222_v42  ;;  %v196_v46 = vpop.permute.xlu0 %195 }
  0x95   :  { %228 = vst.msk [vmem:[%s462_s2 + $0x4] sm:$0xf] %vm226_vm1, %v223_v43  ;;  %v204_v47 = vsel %vm197_vm0, %v192_v31, %v196_v46 }
  0x96   :  { %v216_v48 = vunpack.c.l.bf16 %v204_v47  ;;  %v217_v49 = vunpack.c.h.bf16 %v204_v47 }
  0x98   :  { %v220_v50 = vadd.f32 %v345_v44, %v216_v48  ;;  %v221_v51 = vadd.f32 %v346_v45, %v217_v49 }
  0x9a   :  { %v224_v52 = vpack.c.bf16 %v220_v50, %v220_v50  ;;  %v225_v53 = vpack.c.bf16 %v221_v51, %v221_v51 }
  0x9c   :  { %229 = vst.msk [vmem:[%s462_s2 + $0x8] sm:$0xf] %vm226_vm1, %v224_v52 }
  0x9d   :  { %230 = vst.msk [vmem:[%s462_s2 + $0xc] sm:$0xf] %vm226_vm1, %v225_v53 }

// kernel: cloudnetp_forward.31
= control target key start
LH: loop header
LB: loop body
LE: loop exit
PB: predicated region body
PF: predicated region fallthrough
CT: control target
= control target key end

     0   :  { %vm180_vm0 = vcmask 125952   ;;  %s390_s0 = inlined_call_operand.vmem [shape: bf16[9,32,16], index: 0, kind: input, shape index: {}]   ;;  %s391_s1 = inlined_call_operand.vmem [shape: bf16[32,16], index: 1, kind: output, shape index: {}]  }
   0x1   :  { %v222_v0 = vld [vmem:[%s390_s0] sm:$0xff]   ;;  %v294_v1 = vld [vmem:[%s390_s0 + $0x10] sm:$0xff]   ;;  %v293_v12 = vld [vmem:[%s390_s0 + $0x8] sm:$0xff]  }
   0x2   :  { %v296_v2 = vld [vmem:[%s390_s0 + $0x20] sm:$0xff]   ;;  %v223_v3 = vunpack.c.l.bf16 %v222_v0  ;;  %v231_v4 = vunpack.c.l.bf16 %v294_v1  ;;  %v298_v6 = vld [vmem:[%s390_s0 + $0x30] sm:$0xff]   ;;  %v224_v7 = vunpack.c.h.bf16 %v222_v0  ;;  %v232_v9 = vunpack.c.h.bf16 %v294_v1  ;;  %v295_v13 = vld [vmem:[%s390_s0 + $0x18] sm:$0xff]  }
   0x3   :  { %v239_v5 = vunpack.c.l.bf16 %v296_v2  ;;  %v300_v8 = vld [vmem:[%s390_s0 + $0x40] sm:$0xff]   ;;  %v247_v11 = vunpack.c.l.bf16 %v298_v6  ;;  %v302_v14 = vld [vmem:[%s390_s0 + $0x50] sm:$0xff]   ;;  %v240_v17 = vunpack.c.h.bf16 %v296_v2  ;;  %v248_v18 = vunpack.c.h.bf16 %v298_v6  ;;  %v297_v19 = vld [vmem:[%s390_s0 + $0x28] sm:$0xff]  }
   0x4   :  { %v25_v10 = vmax.f32 %v223_v3, %v231_v4  ;;  %v304_v15 = vld [vmem:[%s390_s0 + $0x60] sm:$0xff]   ;;  %v26_v16 = vmax.f32 %v224_v7, %v232_v9  ;;  %v255_v21 = vunpack.c.l.bf16 %v300_v8  ;;  %v299_v22 = vld [vmem:[%s390_s0 + $0x38] sm:$0xff]   ;;  %v256_v24 = vunpack.c.h.bf16 %v300_v8  ;;  %v301_v27 = vld [vmem:[%s390_s0 + $0x48] sm:$0xff]  }
   0x5   :  { %v227_v25 = vunpack.c.l.bf16 %v293_v12  ;;  %v235_v26 = vunpack.c.l.bf16 %v295_v13  ;;  %v263_v29 = vunpack.c.l.bf16 %v302_v14  ;;  %v271_v30 = vunpack.c.l.bf16 %v304_v15  ;;  %v306_v32 = vld [vmem:[%s390_s0 + $0x70] sm:$0xff]   ;;  %v303_v37 = vld [vmem:[%s390_s0 + $0x58] sm:$0xff]   ;;  %v308_v42 = vld [vmem:[%s390_s0 + $0x80] sm:$0xff]  }
   0x6   :  { %v46_v20 = vmax.f32 %v25_v10, %v239_v5  ;;  %v47_v23 = vmax.f32 %v26_v16, %v240_v17  ;;  %v243_v31 = vunpack.c.l.bf16 %v297_v19  ;;  %v264_v34 = vunpack.c.h.bf16 %v302_v14  ;;  %v305_v45 = vld [vmem:[%s390_s0 + $0x68] sm:$0xff]   ;;  %v307_v54 = vld [vmem:[%s390_s0 + $0x78] sm:$0xff]  }
   0x7   :  { %v27_v35 = vmax.f32 %v227_v25, %v235_v26  ;;  %v251_v36 = vunpack.c.l.bf16 %v299_v22  ;;  %v272_v39 = vunpack.c.h.bf16 %v304_v15  ;;  %v259_v40 = vunpack.c.l.bf16 %v301_v27  ;;  %v309_v63 = vld [vmem:[%s390_s0 + $0x88] sm:$0xff]  }
   0x8   :  { %v67_v28 = vmax.f32 %v46_v20, %v247_v11  ;;  %v68_v33 = vmax.f32 %v47_v23, %v248_v18  ;;  %v228_v41 = vunpack.c.h.bf16 %v293_v12  ;;  %v236_v46 = vunpack.c.h.bf16 %v295_v13 }
   0x9   :  { %v48_v44 = vmax.f32 %v27_v35, %v243_v31  ;;  %v244_v47 = vunpack.c.h.bf16 %v297_v19  ;;  %v279_v49 = vunpack.c.l.bf16 %v306_v32  ;;  %v280_v50 = vunpack.c.h.bf16 %v306_v32 }
   0xa   :  { %v88_v38 = vmax.f32 %v67_v28, %v255_v21  ;;  %v89_v43 = vmax.f32 %v68_v33, %v256_v24  ;;  %v267_v51 = vunpack.c.l.bf16 %v303_v37  ;;  %v28_v55 = vmax.f32 %v228_v41, %v236_v46 }
   0xb   :  { %v69_v53 = vmax.f32 %v48_v44, %v251_v36  ;;  %v252_v56 = vunpack.c.h.bf16 %v299_v22  ;;  %v287_v58 = vunpack.c.l.bf16 %v308_v42  ;;  %v288_v59 = vunpack.c.h.bf16 %v308_v42 }
   0xc   :  { %v109_v48 = vmax.f32 %v88_v38, %v263_v29  ;;  %v110_v52 = vmax.f32 %v89_v43, %v264_v34  ;;  %v275_v60 = vunpack.c.l.bf16 %v305_v45  ;;  %v49_v0 = vmax.f32 %v28_v55, %v244_v47 }
   0xd   :  { %v90_v62 = vmax.f32 %v69_v53, %v259_v40  ;;  %v260_v1 = vunpack.c.h.bf16 %v301_v27  ;;  %v283_v3 = vunpack.c.l.bf16 %v307_v54  ;;  %v268_v7 = vunpack.c.h.bf16 %v303_v37 }
   0xe   :  { %v130_v57 = vmax.f32 %v109_v48, %v271_v30  ;;  %v131_v61 = vmax.f32 %v110_v52, %v272_v39  ;;  %v70_v6 = vmax.f32 %v49_v0, %v252_v56  ;;  %v291_v9 = vunpack.c.l.bf16 %v309_v63 }
   0xf   :  { %v111_v5 = vmax.f32 %v90_v62, %v267_v51  ;;  %v276_v13 = vunpack.c.h.bf16 %v305_v45  ;;  %v284_v18 = vunpack.c.h.bf16 %v307_v54  ;;  %v292_v21 = vunpack.c.h.bf16 %v309_v63 }
  0x10   :  { %v151_v2 = vmax.f32 %v130_v57, %v279_v49  ;;  %v152_v4 = vmax.f32 %v131_v61, %v280_v50  ;;  %v91_v12 = vmax.f32 %v70_v6, %v260_v1 }
  0x11   :  { %v132_v11 = vmax.f32 %v111_v5, %v275_v60 }
  0x12   :  { %v172_v8 = vmax.f32 %v151_v2, %v287_v58  ;;  %v173_v10 = vmax.f32 %v152_v4, %v288_v59  ;;  %v112_v17 = vmax.f32 %v91_v12, %v268_v7 }
  0x13   :  { %v153_v16 = vmax.f32 %v132_v11, %v283_v3 }
  0x14   :  { %v176_v14 = vpack.c.bf16 %v172_v8, %v172_v8  ;;  %v177_v15 = vpack.c.bf16 %v173_v10, %v173_v10  ;;  %v133_v20 = vmax.f32 %v112_v17, %v276_v13 }
  0x15   :  { %v174_v19 = vmax.f32 %v153_v16, %v291_v9 }
  0x16   :  { %181 = vst.msk [vmem:[%s391_s1] sm:$0xf] %vm180_vm0, %v176_v14  ;;  %v154_v23 = vmax.f32 %v133_v20, %v284_v18 }
  0x17   :  { %182 = vst.msk [vmem:[%s391_s1 + $0x4] sm:$0xf] %vm180_vm0, %v177_v15  ;;  %v178_v22 = vpack.c.bf16 %v174_v19, %v174_v19 }
  0x18   :  { %v175_v24 = vmax.f32 %v154_v23, %v292_v21 }
  0x19   :  { %183 = vst.msk [vmem:[%s391_s1 + $0x8] sm:$0xf] %vm180_vm0, %v178_v22 }
  0x1a   :  { %v179_v25 = vpack.c.bf16 %v175_v24, %v175_v24 }
  0x1c   :  { %184 = vst.msk [vmem:[%s391_s1 + $0xc] sm:$0xf] %vm180_vm0, %v179_v25 }

// kernel: cloudnetp_forward.36
= control target key start
LH: loop header
LB: loop body
LE: loop exit
PB: predicated region body
PF: predicated region fallthrough
CT: control target
= control target key end

     0   :  { %vm113_vm0 = vcmask 130048   ;;  %vm166_vm1 = vcmask 125952   ;;  %s343_s1 = inlined_call_operand.vmem [shape: bf16[144,16], index: 1, kind: input, shape index: {}]   ;;  %s344_s0 = inlined_call_operand.vmem [shape: bf16[32,144], index: 0, kind: input, shape index: {}]   ;;  %s345_s2 = inlined_call_operand.vmem [shape: f32[1,16], index: 2, kind: input, shape index: {}]   ;;  %s346_s3 = inlined_call_operand.vmem [shape: bf16[32,16], index: 3, kind: output, shape index: {}]  }
   0x1   :  { %v240_v0 = vld [vmem:[%s343_s1 + $0x38] sm:$0xff]  ;;  %v241_v1 = vld [vmem:[%s343_s1 + $0x40] sm:$0xff]  ;;  %v239_v3 = vld [vmem:[%s343_s1 + $0x30] sm:$0xff] }
   0x2   :  { %v229_v2 = vld [vmem:[%s344_s0 + $0x4] sm:$0xf]  ;;  %120 = vmatpush.bf16.msra.mxu0 %v240_v0  ;;  %242 = vmatpush.bf16.msra.mxu2 %v240_v0  ;;  %v179_v4 = vld [vmem:[%s344_s0 + $0x8] sm:$0xf0]  ;;  %v236_v8 = vld [vmem:[%s343_s1 + $0x18] sm:$0xff] }
   0x3   :  { %146 = vmatpush.bf16.msra.mxu1 %v241_v1  ;;  %v182_v5 = vor.u32 %v229_v2, %v179_v4  ;;  %v238_v6 = vld [vmem:[%s343_s1 + $0x28] sm:$0xff]  ;;  %v237_v7 = vld [vmem:[%s343_s1 + $0x20] sm:$0xff]  ;;  %v231_v9 = vld [vmem:[%s344_s0 + $0x14] sm:$0xf] }
   0x4   :  { %v187_v10 = vld [vmem:[%s344_s0 + $0x18] sm:$0xf0]  ;;  %v235_v11 = vld [vmem:[%s343_s1 + $0x10] sm:$0xff]  ;;  %v234_v13 = vld [vmem:[%s343_s1 + $0x8] sm:$0xff] }
   0x5   :  { %v190_v12 = vor.u32 %v231_v9, %v187_v10  ;;  %v233_v14 = vld [vmem:[%s343_s1] sm:$0xff]  ;;  %v230_v16 = vld [vmem:[%s344_s0 + $0x4] sm:$0xf0]  ;;  %v185_v17 = vld [vmem:[%s344_s0 + $0x10] sm:$0xf] }
   0x6   :  { %121 = vmatpush.bf16.msra.mxu0 %v239_v3  ;;  %243 = vmatpush.bf16.msra.mxu2 %v239_v3  ;;  %v177_v15 = vld [vmem:[%s344_s0] sm:$0xf]  ;;  %v232_v18 = vld [vmem:[%s344_s0 + $0x14] sm:$0xf0] }
   0x7   :  { %227 = vmatmul.msk.bf16.vlgmr.msra.gmra.mxu1 %vm113_vm0, %v182_v5  ;;  %v178_v19 = vor.u32 %v230_v16, %v177_v15  ;;  %v186_v20 = vor.u32 %v232_v18, %v185_v17  ;;  %v250_v23 = vld [vmem:[%s345_s2] ss:$0 sm:$0xff] }
   0xa   :  { %122 = vmatpush.bf16.msra.mxu0 %v238_v6  ;;  %244 = vmatpush.bf16.msra.mxu2 %v238_v6 }
   0xe   :  { %123 = vmatpush.bf16.msra.mxu0 %v237_v7  ;;  %245 = vmatpush.bf16.msra.mxu2 %v237_v7 }
  0x12   :  { %124 = vmatpush.bf16.msra.mxu0 %v236_v8  ;;  %246 = vmatpush.bf16.msra.mxu2 %v236_v8 }
  0x16   :  { %125 = vmatpush.bf16.msra.mxu0 %v235_v11  ;;  %247 = vmatpush.bf16.msra.mxu2 %v235_v11 }
  0x17   :  { %228 = vmatmul.msk.bf16.gmra.mxu1 %vm113_vm0, %v190_v12 }
  0x1a   :  { %126 = vmatpush.bf16.msra.mxu0 %v234_v13  ;;  %248 = vmatpush.bf16.msra.mxu2 %v234_v13 }
  0x1e   :  { %127 = vmatpush.bf16.msra.mxu0 %v233_v14  ;;  %249 = vmatpush.bf16.msra.mxu2 %v233_v14 }
  0x21   :  { %128 = vmatmul.bf16.vlgmr.msra.gmra.mxu0 %v178_v19  ;;  %133 = vmatmul.bf16.vlgmr.msra.gmra.mxu2 %v186_v20 }
  0x84   :  { %v148_v21 = vpop.f32.mrf.mxu1 }
  0x8c   :  { %v150_v22 = vpop.f32.mrf.mxu1 }
  0x94   :  { %v153_v28 = vpop.f32.mrf.mxu1 }
  0x9c   :  { %v155_v42 = vpop.f32.mrf.mxu1 }
  0x9e   :  { %v129_v24 = vpop.f32.mrf.mxu0 }
  0x9f   :  { %v130_v25 = vadd.f32 %v250_v23, %v129_v24 }
  0xa1   :  { %v149_v26 = vadd.f32 %v148_v21, %v130_v25 }
  0xa3   :  { %v158_v27 = vmax.f32 %v149_v26, 0.0 }
  0xa4   :  { %v134_v29 = vpop.f32.mrf.mxu2 }
  0xa5   :  { %v162_v30 = vpack.c.bf16 %v158_v27, %v158_v27  ;;  %v135_v31 = vadd.f32 %v250_v23, %v134_v29 }
  0xa6   :  { %v131_v32 = vpop.f32.mrf.mxu0 }
  0xa7   :  { %167 = vst.msk [vmem:[%s346_s3] sm:$0xf] %vm166_vm1, %v162_v30  ;;  %v154_v33 = vadd.f32 %v153_v28, %v135_v31  ;;  %v132_v34 = vadd.f32 %v250_v23, %v131_v32 }
  0xa9   :  { %v160_v35 = vmax.f32 %v154_v33, 0.0  ;;  %v151_v36 = vadd.f32 %v150_v22, %v132_v34 }
  0xab   :  { %v164_v37 = vpack.c.bf16 %v160_v35, %v160_v35  ;;  %v159_v38 = vmax.f32 %v151_v36, 0.0 }
  0xac   :  { %v136_v39 = vpop.f32.mrf.mxu2 }
  0xad   :  { %169 = vst.msk [vmem:[%s346_s3 + $0x8] sm:$0xf] %vm166_vm1, %v164_v37  ;;  %v163_v40 = vpack.c.bf16 %v159_v38, %v159_v38  ;;  %v137_v41 = vadd.f32 %v250_v23, %v136_v39 }
  0xaf   :  { %168 = vst.msk [vmem:[%s346_s3 + $0x4] sm:$0xf] %vm166_vm1, %v163_v40  ;;  %v156_v43 = vadd.f32 %v155_v42, %v137_v41 }
  0xb1   :  { %v161_v44 = vmax.f32 %v156_v43, 0.0 }
  0xb3   :  { %v165_v45 = vpack.c.bf16 %v161_v44, %v161_v44 }
  0xb5   :  { %170 = vst.msk [vmem:[%s346_s3 + $0xc] sm:$0xf] %vm166_vm1, %v165_v45 }

// kernel: cloudnetp_forward.32
= control target key start
LH: loop header
LB: loop body
LE: loop exit
PB: predicated region body
PF: predicated region fallthrough
CT: control target
= control target key end

     0   :  { %vm119_vm0 = vcmask 130048   ;;  %vm215_vm1 = vcmask 257024   ;;  %s418_s1 = inlined_call_operand.vmem [shape: bf16[144,16], index: 1, kind: input, shape index: {}]   ;;  %s419_s0 = inlined_call_operand.vmem [shape: bf16[32,144], index: 0, kind: input, shape index: {}]   ;;  %s420_s2 = inlined_call_operand.vmem [shape: f32[1,16], index: 2, kind: input, shape index: {}]   ;;  %s421_s4 = inlined_call_operand.vmem [shape: f32[1,32], index: 4, kind: input, shape index: {}]   ;;  %s422_s3 = inlined_call_operand.vmem [shape: bf16[16,32], index: 3, kind: input, shape index: {}]   ;;  %s423_s5 = inlined_call_operand.vmem [shape: bf16[32,32], index: 5, kind: output, shape index: {}]  }
   0x1   :  { %v295_v0 = vld [vmem:[%s418_s1 + $0x38] sm:$0xff]  ;;  %v294_v1 = vld [vmem:[%s418_s1 + $0x30] sm:$0xff]  ;;  %v296_v2 = vld [vmem:[%s418_s1 + $0x40] sm:$0xff] }
   0x2   :  { %126 = vmatpush.bf16.msra.mxu0 %v295_v0  ;;  %298 = vmatpush.bf16.msra.mxu3 %v295_v0  ;;  %v284_v3 = vld [vmem:[%s419_s0 + $0x4] sm:$0xf]  ;;  %v228_v4 = vld [vmem:[%s419_s0 + $0x8] sm:$0xf0]  ;;  %v291_v8 = vld [vmem:[%s418_s1 + $0x18] sm:$0xff] }
   0x3   :  { %152 = vmatpush.bf16.msra.mxu1 %v296_v2  ;;  %v231_v5 = vor.u32 %v284_v3, %v228_v4  ;;  %v293_v6 = vld [vmem:[%s418_s1 + $0x28] sm:$0xff]  ;;  %v292_v7 = vld [vmem:[%s418_s1 + $0x20] sm:$0xff]  ;;  %v286_v9 = vld [vmem:[%s419_s0 + $0x14] sm:$0xf] }
   0x4   :  { %v236_v10 = vld [vmem:[%s419_s0 + $0x18] sm:$0xf0]  ;;  %v290_v11 = vld [vmem:[%s418_s1 + $0x10] sm:$0xff]  ;;  %v289_v13 = vld [vmem:[%s418_s1 + $0x8] sm:$0xff] }
   0x5   :  { %v239_v12 = vor.u32 %v286_v9, %v236_v10  ;;  %v288_v14 = vld [vmem:[%s418_s1] sm:$0xff]  ;;  %v285_v16 = vld [vmem:[%s419_s0 + $0x4] sm:$0xf0]  ;;  %v234_v17 = vld [vmem:[%s419_s0 + $0x10] sm:$0xf] }
   0x6   :  { %127 = vmatpush.bf16.msra.mxu0 %v294_v1  ;;  %299 = vmatpush.bf16.msra.mxu3 %v294_v1  ;;  %v226_v15 = vld [vmem:[%s419_s0] sm:$0xf]  ;;  %v287_v18 = vld [vmem:[%s419_s0 + $0x14] sm:$0xf0] }
   0x7   :  { %276 = vmatmul.msk.bf16.vlgmr.msra.gmra.mxu1 %vm119_vm0, %v231_v5  ;;  %v227_v19 = vor.u32 %v285_v16, %v226_v15  ;;  %v235_v20 = vor.u32 %v287_v18, %v234_v17  ;;  %v297_v21 = vld [vmem:[%s422_s3] sm:$0xff] }
   0x8   :  { %195 = vmatpush.bf16.msra.mxu2 %v297_v21  ;;  %v306_v25 = vld [vmem:[%s420_s2] ss:$0 sm:$0xff] }
   0x9   :  { %v307_v45 = vld [vmem:[%s421_s4] ss:$0 sm:$0xff] }
   0xa   :  { %128 = vmatpush.bf16.msra.mxu0 %v293_v6  ;;  %300 = vmatpush.bf16.msra.mxu3 %v293_v6 }
   0xe   :  { %129 = vmatpush.bf16.msra.mxu0 %v292_v7  ;;  %301 = vmatpush.bf16.msra.mxu3 %v292_v7 }
  0x12   :  { %130 = vmatpush.bf16.msra.mxu0 %v291_v8  ;;  %302 = vmatpush.bf16.msra.mxu3 %v291_v8 }
  0x16   :  { %131 = vmatpush.bf16.msra.mxu0 %v290_v11  ;;  %303 = vmatpush.bf16.msra.mxu3 %v290_v11 }
  0x17   :  { %277 = vmatmul.msk.bf16.gmra.mxu1 %vm119_vm0, %v239_v12 }
  0x1a   :  { %132 = vmatpush.bf16.msra.mxu0 %v289_v13  ;;  %304 = vmatpush.bf16.msra.mxu3 %v289_v13 }
  0x1e   :  { %133 = vmatpush.bf16.msra.mxu0 %v288_v14  ;;  %305 = vmatpush.bf16.msra.mxu3 %v288_v14 }
  0x21   :  { %134 = vmatmul.bf16.vlgmr.msra.gmra.mxu0 %v227_v19  ;;  %139 = vmatmul.bf16.vlgmr.msra.gmra.mxu3 %v235_v20 }
  0x84   :  { %v154_v22 = vpop.f32.mrf.mxu1 }
  0x8c   :  { %v156_v24 = vpop.f32.mrf.mxu1 }
  0x94   :  { %v159_v31 = vpop.f32.mrf.mxu1 }
  0x9c   :  { %v161_v39 = vpop.f32.mrf.mxu1 }
  0x9e   :  { %v135_v23 = vpop.f32.mrf.mxu0 }
  0x9f   :  { %v136_v26 = vadd.f32 %v306_v25, %v135_v23 }
  0xa1   :  { %v155_v29 = vadd.f32 %v154_v22, %v136_v26 }
  0xa3   :  { %v164_v33 = vmax.f32 %v155_v29, 0.0 }
  0xa4   :  { %v140_v27 = vpop.f32.mrf.mxu3 }
  0xa5   :  { %v141_v37 = vadd.f32 %v306_v25, %v140_v27 }
  0xa6   :  { %v137_v28 = vpop.f32.mrf.mxu0 }
  0xa7   :  { %v138_v30 = vadd.f32 %v306_v25, %v137_v28  ;;  %v160_v40 = vadd.f32 %v159_v31, %v141_v37 }
  0xa9   :  { %v157_v32 = vadd.f32 %v156_v24, %v138_v30  ;;  %v166_v42 = vmax.f32 %v160_v40, 0.0 }
  0xab   :  { %v165_v34 = vmax.f32 %v157_v32, 0.0 }
  0xac   :  { %v142_v36 = vpop.f32.mrf.mxu3 }
  0xad   :  { %v168_v35 = vpack.c.bf16 %v165_v34, %v164_v33  ;;  %v143_v38 = vadd.f32 %v306_v25, %v142_v36 }
  0xaf   :  { %282 = vmatmul.msk.bf16.vlgmr.msra.gmra.mxu2 %vm119_vm0, %v168_v35  ;;  %v162_v41 = vadd.f32 %v161_v39, %v143_v38 }
  0xb1   :  { %v167_v43 = vmax.f32 %v162_v41, 0.0 }
  0xb3   :  { %v169_v44 = vpack.c.bf16 %v167_v43, %v166_v42 }
  0xbf   :  { %283 = vmatmul.msk.bf16.gmra.mxu2 %vm119_vm0, %v169_v44 }
 0x132   :  { %v197_v46 = vpop.f32.mrf.mxu2 }
 0x133   :  { %v198_v47 = vadd.f32 %v307_v45, %v197_v46 }
 0x135   :  { %v207_v48 = vmax.f32 %v198_v47, 0.0 }
 0x137   :  { %v211_v49 = vpack.c.bf16 %v207_v48, %v207_v48 }
 0x139   :  { %216 = vst.msk [vmem:[%s423_s5] sm:$0xf] %vm215_vm1, %v211_v49 }
 0x13a   :  { %v199_v50 = vpop.f32.mrf.mxu2 }
 0x13b   :  { %v200_v51 = vadd.f32 %v307_v45, %v199_v50 }
 0x13d   :  { %v208_v52 = vmax.f32 %v200_v51, 0.0 }
 0x13f   :  { %v212_v53 = vpack.c.bf16 %v208_v52, %v208_v52 }
 0x141   :  { %217 = vst.msk [vmem:[%s423_s5 + $0x4] sm:$0xf] %vm215_vm1, %v212_v53 }
 0x142   :  { %v202_v54 = vpop.f32.mrf.mxu2 }
 0x143   :  { %v203_v55 = vadd.f32 %v307_v45, %v202_v54 }
 0x145   :  { %v209_v56 = vmax.f32 %v203_v55, 0.0 }
 0x147   :  { %v213_v57 = vpack.c.bf16 %v209_v56, %v209_v56 }
 0x149   :  { %218 = vst.msk [vmem:[%s423_s5 + $0x8] sm:$0xf] %vm215_vm1, %v213_v57 }
 0x14a   :  { %v204_v58 = vpop.f32.mrf.mxu2 }
 0x14b   :  { %v205_v59 = vadd.f32 %v307_v45, %v204_v58 }
 0x14d   :  { %v210_v60 = vmax.f32 %v205_v59, 0.0 }
 0x14f   :  { %v214_v61 = vpack.c.bf16 %v210_v60, %v210_v60 }
 0x151   :  { %219 = vst.msk [vmem:[%s423_s5 + $0xc] sm:$0xf] %vm215_vm1, %v214_v61 }

// kernel: cloudnetp_forward.33
= control target key start
LH: loop header
LB: loop body
LE: loop exit
PB: predicated region body
PF: predicated region fallthrough
CT: control target
= control target key end

     0   :  { %vm304_vm0 = vcmask 130048   ;;  %vm210_vm1 = vcmask 261120   ;;  %s527_s30 = smov 16   ;;  %vm366_vm2 = vcmask 257024   ;;  %s698_s2 = inlined_call_operand.vmem [shape: bf16[288,32], index: 2, kind: input, shape index: {}]   ;;  %s699_s4 = inlined_call_operand.vmem [shape: bf16[16,16], index: 4, kind: input, shape index: {}]   ;;  %s700_s1 = inlined_call_operand.vmem [shape: bf16[32,16], index: 1, kind: input, shape index: {}]   ;;  %s701_s0 = inlined_call_operand.vmem [shape: bf16[32,288], index: 0, kind: input, shape index: {}]   ;;  %s702_s5 = inlined_call_operand.vmem [shape: f32[1,16], index: 5, kind: input, shape index: {}]   ;;  %s703_s3 = inlined_call_operand.vmem [shape: f32[1,32], index: 3, kind: input, shape index: {}]   ;;  %s704_s6 = inlined_call_operand.vmem [shape: bf16[32,32], index: 6, kind: output, shape index: {}]  }
   0x1   :  { %v500_v0 = vld [vmem:[%s698_s2 + $0x38] sm:$0xff]  ;;  %v499_v2 = vld [vmem:[%s698_s2 + $0x30] sm:$0xff]  ;;  %v510_v4 = vld [vmem:[%s698_s2 + $0x88] sm:$0xff] }
   0x2   :  { %v508_v1 = vld [vmem:[%s698_s2 + $0x78] sm:$0xff]  ;;  %217 = vmatpush.bf16.msra.mxu0 %v500_v0  ;;  %v507_v3 = vld [vmem:[%s698_s2 + $0x70] sm:$0xff]  ;;  %v513_v5 = vld [vmem:[%s699_s4] sm:$0xff]  ;;  %261 = vmatpush.bf16.msra.mxu2 %v510_v4 }
   0x3   :  { %236 = vmatpush.bf16.msra.mxu1 %v508_v1  ;;  %v509_v6 = vld [vmem:[%s698_s2 + $0x80] sm:$0xff]  ;;  %318 = vmatpush.bf16.msra.mxu3 %v513_v5  ;;  %v385_v8 = vld [vmem:[%s701_s0 + $0x8] sm:$0xf]  ;;  %v489_v9 = vld [vmem:[%s701_s0 + $0x10] sm:$0xf0] }
   0x4   :  { %v511_v7 = vld [vmem:[%s700_s1] sm:$0xff]  ;;  %v498_v10 = vld [vmem:[%s698_s2 + $0x28] sm:$0xff]  ;;  %v386_v12 = vor.u32 %v489_v9, %v385_v8  ;;  %v496_v19 = vld [vmem:[%s698_s2 + $0x18] sm:$0xff] }
   0x5   :  { %v506_v11 = vld [vmem:[%s698_s2 + $0x68] sm:$0xff]  ;;  %v278_v13 = vld [vmem:[%s700_s1] sm:$0xff]   ;;  %v504_v20 = vld [vmem:[%s698_s2 + $0x58] sm:$0xff] }
   0x6   :  { %218 = vmatpush.bf16.msra.mxu0 %v499_v2  ;;  %262 = vmatpush.bf16.msra.mxu2 %v509_v6  ;;  %v497_v14 = vld [vmem:[%s698_s2 + $0x20] sm:$0xff]  ;;  %v334_v16 = vunpack.c.l.bf16 %v278_v13  ;;  %v335_v17 = vunpack.c.h.bf16 %v278_v13  ;;  %v280_v21 = vld [vmem:[%s700_s1 + $0x8] sm:$0xff]   ;;  %v495_v22 = vld [vmem:[%s698_s2 + $0x10] sm:$0xff] }
   0x7   :  { %237 = vmatpush.bf16.msra.mxu1 %v507_v3  ;;  %485 = vmatmul.msk.bf16.vlgmr.msra.gmra.mxu3 %vm304_vm0, %v511_v7  ;;  %v505_v15 = vld [vmem:[%s698_s2 + $0x60] sm:$0xff]  ;;  %v503_v23 = vld [vmem:[%s698_s2 + $0x50] sm:$0xff]  ;;  %v336_v24 = vunpack.c.l.bf16 %v280_v21  ;;  %v337_v25 = vunpack.c.h.bf16 %v280_v21  ;;  %v512_v26 = vld [vmem:[%s700_s1 + $0x8] sm:$0xff] }
   0x8   :  { %v515_v18 = vpack.i.bf16 %v335_v17, %v334_v16  ;;  %v397_v27 = vld [vmem:[%s701_s0 + $0x20] sm:$0xf]  ;;  %v492_v28 = vld [vmem:[%s701_s0 + $0x28] sm:$0xf0]  ;;  %v487_v37 = vld [vmem:[%s701_s0 + $0x4] sm:$0xf] }
   0x9   :  { %471 = vmatmul.msk.bf16.vlgmr.msra.gmra.mxu2 %vm210_vm1, %v386_v12  ;;  %v520_v29 = vpack.i.bf16 %v337_v25, %v336_v24  ;;  %v494_v30 = vld [vmem:[%s698_s2 + $0x8] sm:$0xff]  ;;  %v398_v32 = vor.u32 %v492_v28, %v397_v27  ;;  %v493_v33 = vld [vmem:[%s698_s2] sm:$0xff]  ;;  %v379_v38 = vld [vmem:[%s701_s0 + $0xc] sm:$0xf0] }
   0xa   :  { %219 = vmatpush.bf16.msra.mxu0 %v498_v10  ;;  %516 = vrot.lane.b32.xlu0 %v515_v18, %s527_s30  ;;  %v502_v31 = vld [vmem:[%s698_s2 + $0x48] sm:$0xff]  ;;  %v501_v34 = vld [vmem:[%s698_s2 + $0x40] sm:$0xff]  ;;  %v382_v40 = vor.u32 %v487_v37, %v379_v38  ;;  %v389_v41 = vld [vmem:[%s701_s0 + $0x18] sm:$0xf] }
   0xb   :  { %238 = vmatpush.bf16.msra.mxu1 %v506_v11  ;;  %v377_v35 = vld [vmem:[%s701_s0] sm:$0xf]  ;;  %v488_v36 = vld [vmem:[%s701_s0 + $0x8] sm:$0xf0]  ;;  %v491_v42 = vld [vmem:[%s701_s0 + $0x20] sm:$0xf0] }
   0xc   :  { %v378_v39 = vor.u32 %v488_v36, %v377_v35  ;;  %v490_v43 = vld [vmem:[%s701_s0 + $0x1c] sm:$0xf]  ;;  %v391_v44 = vld [vmem:[%s701_s0 + $0x24] sm:$0xf0]  ;;  %v390_v45 = vor.u32 %v491_v42, %v389_v41  ;;  %v525_v48 = vld [vmem:[%s702_s5] ss:$0 sm:$0xff] }
   0xd   :  { %v394_v46 = vor.u32 %v490_v43, %v391_v44  ;;  %v526_v50 = vld [vmem:[%s703_s3] ss:$0 sm:$0xff] }
   0xe   :  { %220 = vmatpush.bf16.msra.mxu0 %v497_v14 }
   0xf   :  { %239 = vmatpush.bf16.msra.mxu1 %v505_v15 }
  0x12   :  { %221 = vmatpush.bf16.msra.mxu0 %v496_v19  ;;  %521 = vrot.lane.b32.xlu0 %v520_v29, %s527_s30 }
  0x13   :  { %240 = vmatpush.bf16.msra.mxu1 %v504_v20 }
  0x16   :  { %222 = vmatpush.bf16.msra.mxu0 %v495_v22 }
  0x17   :  { %241 = vmatpush.bf16.msra.mxu1 %v503_v23  ;;  %486 = vmatmul.msk.bf16.gmra.mxu3 %vm304_vm0, %v512_v26 }
  0x19   :  { %472 = vmatmul.msk.bf16.gmra.mxu2 %vm210_vm1, %v398_v32 }
  0x1a   :  { %223 = vmatpush.bf16.msra.mxu0 %v494_v30 }
  0x1b   :  { %242 = vmatpush.bf16.msra.mxu1 %v502_v31 }
  0x1e   :  { %224 = vmatpush.bf16.msra.mxu0 %v493_v33 }
  0x1f   :  { %243 = vmatpush.bf16.msra.mxu1 %v501_v34 }
  0x21   :  { %225 = vmatmul.bf16.vlgmr.msra.gmra.mxu0 %v378_v39 }
  0x22   :  { %244 = vmatmul.bf16.vlgmr.msra.gmra.mxu1 %v382_v40 }
  0x31   :  { %230 = vmatmul.bf16.gmra.mxu0 %v390_v45 }
  0x32   :  { %249 = vmatmul.bf16.gmra.mxu1 %v394_v46 }
  0x7c   :  { %v517_v52 = vpop.permute.xlu0 %516 }
  0x7d   :  { %v518_v58 = vunpack.i.l.bf16 %v517_v52  ;;  %v519_v9 = vunpack.i.h.bf16 %v517_v52 }
  0x84   :  { %v522_v13 = vpop.permute.xlu0 %521 }
  0x85   :  { %v523_v21 = vunpack.i.l.bf16 %v522_v13  ;;  %v524_v37 = vunpack.i.h.bf16 %v522_v13 }
  0x8a   :  { %v320_v47 = vpop.f32.mrf.mxu3 }
  0x8b   :  { %v321_v51 = vadd.f32 %v525_v48, %v320_v47 }
  0x8c   :  { %v264_v49 = vpop.f32.mrf.mxu2 }
  0x8d   :  { %v330_v57 = vmax.f32 %v321_v51, 0.0 }
  0x8f   :  { %v354_v61 = vsel %vm304_vm0, %v330_v57, %v518_v58 }
  0x92   :  { %v322_v56 = vpop.f32.mrf.mxu3 }
  0x93   :  { %v323_v0 = vadd.f32 %v525_v48, %v322_v56 }
  0x94   :  { %v266_v63 = vpop.f32.mrf.mxu2 }
  0x95   :  { %v331_v8 = vmax.f32 %v323_v0, 0.0 }
  0x97   :  { %v355_v14 = vsel %vm304_vm0, %v331_v8, %v519_v9 }
  0x9a   :  { %v325_v7 = vpop.f32.mrf.mxu3 }
  0x9b   :  { %v326_v11 = vadd.f32 %v525_v48, %v325_v7 }
  0x9c   :  { %v269_v20 = vpop.f32.mrf.mxu2 }
  0x9d   :  { %v332_v19 = vmax.f32 %v326_v11, 0.0 }
  0x9e   :  { %v226_v53 = vpop.f32.mrf.mxu0 }
  0x9f   :  { %v245_v54 = vpop.f32.mrf.mxu1  ;;  %v227_v55 = vadd.f32 %v526_v50, %v226_v53  ;;  %v356_v26 = vsel %vm304_vm0, %v332_v19, %v523_v21 }
  0xa1   :  { %v246_v59 = vadd.f32 %v245_v54, %v227_v55 }
  0xa2   :  { %v327_v25 = vpop.f32.mrf.mxu3 }
  0xa3   :  { %v265_v60 = vadd.f32 %v264_v49, %v246_v59  ;;  %v328_v28 = vadd.f32 %v525_v48, %v327_v25 }
  0xa4   :  { %v271_v36 = vpop.f32.mrf.mxu2 }
  0xa5   :  { %v274_v62 = vmax.f32 %v265_v60, 0.0  ;;  %v333_v35 = vmax.f32 %v328_v28, 0.0 }
  0xa6   :  { %v228_v1 = vpop.f32.mrf.mxu0 }
  0xa7   :  { %v247_v2 = vpop.f32.mrf.mxu1  ;;  %v358_v3 = vadd.f32 %v354_v61, %v274_v62  ;;  %v229_v4 = vadd.f32 %v526_v50, %v228_v1  ;;  %v357_v40 = vsel %vm304_vm0, %v333_v35, %v524_v37 }
  0xa9   :  { %v362_v5 = vpack.c.bf16 %v358_v3, %v358_v3  ;;  %v248_v6 = vadd.f32 %v247_v2, %v229_v4 }
  0xab   :  { %367 = vst.msk [vmem:[%s704_s6] sm:$0xf] %vm366_vm2, %v362_v5  ;;  %v267_v10 = vadd.f32 %v266_v63, %v248_v6 }
  0xad   :  { %v275_v12 = vmax.f32 %v267_v10, 0.0 }
  0xae   :  { %v231_v15 = vpop.f32.mrf.mxu0 }
  0xaf   :  { %v250_v16 = vpop.f32.mrf.mxu1  ;;  %v359_v17 = vadd.f32 %v355_v14, %v275_v12  ;;  %v232_v18 = vadd.f32 %v526_v50, %v231_v15 }
  0xb1   :  { %v363_v22 = vpack.c.bf16 %v359_v17, %v359_v17  ;;  %v251_v23 = vadd.f32 %v250_v16, %v232_v18 }
  0xb3   :  { %368 = vst.msk [vmem:[%s704_s6 + $0x4] sm:$0xf] %vm366_vm2, %v363_v22  ;;  %v270_v24 = vadd.f32 %v269_v20, %v251_v23 }
  0xb5   :  { %v276_v27 = vmax.f32 %v270_v24, 0.0 }
  0xb6   :  { %v233_v29 = vpop.f32.mrf.mxu0 }
  0xb7   :  { %v360_v30 = vadd.f32 %v356_v26, %v276_v27  ;;  %v234_v31 = vadd.f32 %v526_v50, %v233_v29  ;;  %v252_v32 = vpop.f32.mrf.mxu1 }
  0xb9   :  { %v364_v33 = vpack.c.bf16 %v360_v30, %v360_v30  ;;  %v253_v34 = vadd.f32 %v252_v32, %v234_v31 }
  0xbb   :  { %369 = vst.msk [vmem:[%s704_s6 + $0x8] sm:$0xf] %vm366_vm2, %v364_v33  ;;  %v272_v38 = vadd.f32 %v271_v36, %v253_v34 }
  0xbd   :  { %v277_v39 = vmax.f32 %v272_v38, 0.0 }
  0xbf   :  { %v361_v41 = vadd.f32 %v357_v40, %v277_v39 }
  0xc1   :  { %v365_v42 = vpack.c.bf16 %v361_v41, %v361_v41 }
  0xc3   :  { %370 = vst.msk [vmem:[%s704_s6 + $0xc] sm:$0xf] %vm366_vm2, %v365_v42 }

// kernel: cloudnetp_forward.34
= control target key start
LH: loop header
LB: loop body
LE: loop exit
PB: predicated region body
PF: predicated region fallthrough
CT: control target
= control target key end

     0   :  { %vm98_vm0 = vcmask 257024   ;;  %s208_s0 = inlined_call_operand.vmem [shape: bf16[9,16,32], index: 0, kind: input, shape index: {}]   ;;  %s209_s1 = inlined_call_operand.vmem [shape: bf16[16,32], index: 1, kind: output, shape index: {}]  }
   0x1   :  { %v122_v0 = vld [vmem:[%s208_s0] sm:$0xff]   ;;  %v157_v1 = vld [vmem:[%s208_s0 + $0x8] sm:$0xff]   ;;  %v158_v2 = vld [vmem:[%s208_s0 + $0x10] sm:$0xff]  }
   0x2   :  { %v123_v3 = vunpack.c.l.bf16 %v122_v0  ;;  %v127_v4 = vunpack.c.l.bf16 %v157_v1  ;;  %v131_v5 = vunpack.c.l.bf16 %v158_v2  ;;  %v159_v6 = vld [vmem:[%s208_s0 + $0x18] sm:$0xff]   ;;  %v124_v7 = vunpack.c.h.bf16 %v122_v0  ;;  %v160_v8 = vld [vmem:[%s208_s0 + $0x20] sm:$0xff]   ;;  %v161_v12 = vld [vmem:[%s208_s0 + $0x28] sm:$0xff]  }
   0x3   :  { %v128_v9 = vunpack.c.h.bf16 %v157_v1  ;;  %v135_v11 = vunpack.c.l.bf16 %v159_v6  ;;  %v132_v14 = vunpack.c.h.bf16 %v158_v2  ;;  %v136_v15 = vunpack.c.h.bf16 %v159_v6  ;;  %v162_v18 = vld [vmem:[%s208_s0 + $0x30] sm:$0xff]   ;;  %v163_v23 = vld [vmem:[%s208_s0 + $0x38] sm:$0xff]   ;;  %v164_v28 = vld [vmem:[%s208_s0 + $0x40] sm:$0xff]  }
   0x4   :  { %v17_v10 = vmax.f32 %v123_v3, %v127_v4  ;;  %v139_v17 = vunpack.c.l.bf16 %v160_v8  ;;  %v140_v20 = vunpack.c.h.bf16 %v160_v8  ;;  %v143_v22 = vunpack.c.l.bf16 %v161_v12 }
   0x5   :  { %v18_v13 = vmax.f32 %v124_v7, %v128_v9  ;;  %v144_v25 = vunpack.c.h.bf16 %v161_v12  ;;  %v147_v27 = vunpack.c.l.bf16 %v162_v18  ;;  %v148_v30 = vunpack.c.h.bf16 %v162_v18 }
   0x6   :  { %v28_v16 = vmax.f32 %v17_v10, %v131_v5  ;;  %v151_v32 = vunpack.c.l.bf16 %v163_v23  ;;  %v152_v34 = vunpack.c.h.bf16 %v163_v23  ;;  %v155_v36 = vunpack.c.l.bf16 %v164_v28 }
   0x7   :  { %v29_v19 = vmax.f32 %v18_v13, %v132_v14  ;;  %v156_v38 = vunpack.c.h.bf16 %v164_v28 }
   0x8   :  { %v39_v21 = vmax.f32 %v28_v16, %v135_v11 }
   0x9   :  { %v40_v24 = vmax.f32 %v29_v19, %v136_v15 }
   0xa   :  { %v50_v26 = vmax.f32 %v39_v21, %v139_v17 }
   0xb   :  { %v51_v29 = vmax.f32 %v40_v24, %v140_v20 }
   0xc   :  { %v61_v31 = vmax.f32 %v50_v26, %v143_v22 }
   0xd   :  { %v62_v33 = vmax.f32 %v51_v29, %v144_v25 }
   0xe   :  { %v72_v35 = vmax.f32 %v61_v31, %v147_v27 }
   0xf   :  { %v73_v37 = vmax.f32 %v62_v33, %v148_v30 }
  0x10   :  { %v83_v39 = vmax.f32 %v72_v35, %v151_v32 }
  0x11   :  { %v84_v40 = vmax.f32 %v73_v37, %v152_v34 }
  0x12   :  { %v94_v41 = vmax.f32 %v83_v39, %v155_v36 }
  0x13   :  { %v95_v42 = vmax.f32 %v84_v40, %v156_v38 }
  0x14   :  { %v96_v43 = vpack.c.bf16 %v94_v41, %v94_v41 }
  0x15   :  { %v97_v44 = vpack.c.bf16 %v95_v42, %v95_v42 }
  0x16   :  { %99 = vst.msk [vmem:[%s209_s1] sm:$0xf] %vm98_vm0, %v96_v43 }
  0x17   :  { %100 = vst.msk [vmem:[%s209_s1 + $0x4] sm:$0xf] %vm98_vm0, %v97_v44 }

// kernel: cloudnetp_forward.37
= control target key start
LH: loop header
LB: loop body
LE: loop exit
PB: predicated region body
PF: predicated region fallthrough
CT: control target
= control target key end

     0   :  { %s195_s27 = smov 16   ;;  %vm108_vm0 = vcmask 130048   ;;  %vm123_vm1 = vcmask 257024   ;;  %s247_s0 = inlined_call_operand.vmem [shape: bf16[9,16,16], index: 0, kind: input, shape index: {}]   ;;  %s248_s1 = inlined_call_operand.vmem [shape: bf16[16,32], index: 1, kind: input, shape index: {}]   ;;  %s249_s2 = inlined_call_operand.vmem [shape: bf16[16,32], index: 2, kind: output, shape index: {}]  }
   0x1   :  { %v147_v0 = vld [vmem:[%s247_s0] sm:$0xff]   ;;  %v186_v1 = vld [vmem:[%s247_s0 + $0x8] sm:$0xff]   ;;  %v187_v2 = vld [vmem:[%s247_s0 + $0x10] sm:$0xff]  }
   0x2   :  { %v148_v3 = vunpack.c.l.bf16 %v147_v0  ;;  %v149_v4 = vunpack.c.h.bf16 %v147_v0  ;;  %v152_v5 = vunpack.c.l.bf16 %v186_v1  ;;  %v153_v6 = vunpack.c.h.bf16 %v186_v1  ;;  %v188_v7 = vld [vmem:[%s247_s0 + $0x18] sm:$0xff]   ;;  %v189_v10 = vld [vmem:[%s247_s0 + $0x20] sm:$0xff]   ;;  %v190_v15 = vld [vmem:[%s247_s0 + $0x28] sm:$0xff]  }
   0x3   :  { %v156_v8 = vunpack.c.l.bf16 %v187_v2  ;;  %v157_v9 = vunpack.c.h.bf16 %v187_v2  ;;  %v160_v13 = vunpack.c.l.bf16 %v188_v7  ;;  %v161_v14 = vunpack.c.h.bf16 %v188_v7  ;;  %v191_v20 = vld [vmem:[%s247_s0 + $0x30] sm:$0xff]   ;;  %v192_v25 = vld [vmem:[%s247_s0 + $0x38] sm:$0xff]   ;;  %v193_v30 = vld [vmem:[%s247_s0 + $0x40] sm:$0xff]  }
   0x4   :  { %v20_v11 = vmax.f32 %v148_v3, %v152_v5  ;;  %v21_v12 = vmax.f32 %v149_v4, %v153_v6  ;;  %v164_v18 = vunpack.c.l.bf16 %v189_v10  ;;  %v165_v19 = vunpack.c.h.bf16 %v189_v10  ;;  %v183_v48 = vld [vmem:[%s248_s1] sm:$0xff]  }
   0x5   :  { %v168_v23 = vunpack.c.l.bf16 %v190_v15  ;;  %v169_v24 = vunpack.c.h.bf16 %v190_v15  ;;  %v172_v28 = vunpack.c.l.bf16 %v191_v20  ;;  %v173_v29 = vunpack.c.h.bf16 %v191_v20 }
   0x6   :  { %v31_v16 = vmax.f32 %v20_v11, %v156_v8  ;;  %v32_v17 = vmax.f32 %v21_v12, %v157_v9  ;;  %v176_v33 = vunpack.c.l.bf16 %v192_v25  ;;  %v177_v34 = vunpack.c.h.bf16 %v192_v25 }
   0x7   :  { %v180_v37 = vunpack.c.l.bf16 %v193_v30  ;;  %v181_v38 = vunpack.c.h.bf16 %v193_v30  ;;  %v184_v50 = vunpack.c.l.bf16 %v183_v48  ;;  %v185_v51 = vunpack.c.h.bf16 %v183_v48 }
   0x8   :  { %v42_v21 = vmax.f32 %v31_v16, %v160_v13  ;;  %v43_v22 = vmax.f32 %v32_v17, %v161_v14 }
   0xa   :  { %v53_v26 = vmax.f32 %v42_v21, %v164_v18  ;;  %v54_v27 = vmax.f32 %v43_v22, %v165_v19 }
   0xc   :  { %v64_v31 = vmax.f32 %v53_v26, %v168_v23  ;;  %v65_v32 = vmax.f32 %v54_v27, %v169_v24 }
   0xe   :  { %v75_v35 = vmax.f32 %v64_v31, %v172_v28  ;;  %v76_v36 = vmax.f32 %v65_v32, %v173_v29 }
  0x10   :  { %v86_v39 = vmax.f32 %v75_v35, %v176_v33  ;;  %v87_v40 = vmax.f32 %v76_v36, %v177_v34 }
  0x12   :  { %v97_v41 = vmax.f32 %v86_v39, %v180_v37  ;;  %v98_v42 = vmax.f32 %v87_v40, %v181_v38 }
  0x14   :  { %v99_v43 = vpack.c.bf16 %v97_v41, %v97_v41  ;;  %v100_v44 = vpack.c.bf16 %v98_v42, %v98_v42 }
  0x16   :  { %v103_v45 = vunpack.c.l.b16 %v99_v43  ;;  %v104_v46 = vunpack.c.l.b16 %v100_v44 }
  0x18   :  { %v105_v47 = vpack.c.b16 %v104_v46, %v103_v45 }
  0x1a   :  { %106 = vrot.lane.b32.xlu0 %v105_v47, %s195_s27 }
  0x8c   :  { %v107_v49 = vpop.permute.xlu0 %106 }
  0x8d   :  { %v111_v52 = vsel %vm108_vm0, %v105_v47, %v107_v49 }
  0x8e   :  { %v117_v53 = vunpack.c.l.bf16 %v111_v52  ;;  %v118_v54 = vunpack.c.h.bf16 %v111_v52 }
  0x90   :  { %v119_v55 = vadd.f32 %v184_v50, %v117_v53  ;;  %v120_v56 = vadd.f32 %v185_v51, %v118_v54 }
  0x92   :  { %v121_v57 = vpack.c.bf16 %v119_v55, %v119_v55  ;;  %v122_v58 = vpack.c.bf16 %v120_v56, %v120_v56 }
  0x94   :  { %124 = vst.msk [vmem:[%s249_s2] sm:$0xf] %vm123_vm1, %v121_v57 }
  0x95   :  { %125 = vst.msk [vmem:[%s249_s2 + $0x4] sm:$0xf] %vm123_vm1, %v122_v58 }

// kernel: cloudnetp_forward.38
= control target key start
LH: loop header
LB: loop body
LE: loop exit
PB: predicated region body
PF: predicated region fallthrough
CT: control target
= control target key end

     0   :  { %s207_s27 = smov 8   ;;  %s209_s28 = smov 16   ;;  %vm112_vm0 = vcmask 64512   ;;  %vm116_vm1 = vcmask 130048   ;;  %vm119_vm2 = vcmask 195584   ;;  %vm133_vm3 = vcmask 257024   ;;  %s261_s0 = inlined_call_operand.vmem [shape: bf16[9,16,8], index: 0, kind: input, shape index: {}]   ;;  %s262_s1 = inlined_call_operand.vmem [shape: bf16[16,32], index: 1, kind: input, shape index: {}]   ;;  %s263_s2 = inlined_call_operand.vmem [shape: bf16[16,32], index: 2, kind: output, shape index: {}]  }
   0x1   :  { %v157_v0 = vld [vmem:[%s261_s0] sm:$0xff]   ;;  %v196_v1 = vld [vmem:[%s261_s0 + $0x8] sm:$0xff]   ;;  %v197_v2 = vld [vmem:[%s261_s0 + $0x10] sm:$0xff]  }
   0x2   :  { %v158_v3 = vunpack.c.l.bf16 %v157_v0  ;;  %v159_v4 = vunpack.c.h.bf16 %v157_v0  ;;  %v162_v5 = vunpack.c.l.bf16 %v196_v1  ;;  %v163_v6 = vunpack.c.h.bf16 %v196_v1  ;;  %v198_v7 = vld [vmem:[%s261_s0 + $0x18] sm:$0xff]   ;;  %v199_v10 = vld [vmem:[%s261_s0 + $0x20] sm:$0xff]   ;;  %v200_v15 = vld [vmem:[%s261_s0 + $0x28] sm:$0xff]  }
   0x3   :  { %v166_v8 = vunpack.c.l.bf16 %v197_v2  ;;  %v167_v9 = vunpack.c.h.bf16 %v197_v2  ;;  %v170_v13 = vunpack.c.l.bf16 %v198_v7  ;;  %v171_v14 = vunpack.c.h.bf16 %v198_v7  ;;  %v201_v20 = vld [vmem:[%s261_s0 + $0x30] sm:$0xff]   ;;  %v202_v25 = vld [vmem:[%s261_s0 + $0x38] sm:$0xff]   ;;  %v203_v30 = vld [vmem:[%s261_s0 + $0x40] sm:$0xff]   ;;  %s208_s0 = smov 24  }
   0x4   :  { %v20_v11 = vmax.f32 %v158_v3, %v162_v5  ;;  %v21_v12 = vmax.f32 %v159_v4, %v163_v6  ;;  %v174_v18 = vunpack.c.l.bf16 %v199_v10  ;;  %v175_v19 = vunpack.c.h.bf16 %v199_v10  ;;  %v193_v49 = vld [vmem:[%s262_s1] sm:$0xff]  }
   0x5   :  { %v178_v23 = vunpack.c.l.bf16 %v200_v15  ;;  %v179_v24 = vunpack.c.h.bf16 %v200_v15  ;;  %v182_v28 = vunpack.c.l.bf16 %v201_v20  ;;  %v183_v29 = vunpack.c.h.bf16 %v201_v20 }
   0x6   :  { %v31_v16 = vmax.f32 %v20_v11, %v166_v8  ;;  %v32_v17 = vmax.f32 %v21_v12, %v167_v9  ;;  %v186_v33 = vunpack.c.l.bf16 %v202_v25  ;;  %v187_v34 = vunpack.c.h.bf16 %v202_v25 }
   0x7   :  { %v190_v37 = vunpack.c.l.bf16 %v203_v30  ;;  %v191_v38 = vunpack.c.h.bf16 %v203_v30  ;;  %v194_v54 = vunpack.c.l.bf16 %v193_v49  ;;  %v195_v55 = vunpack.c.h.bf16 %v193_v49 }
   0x8   :  { %v42_v21 = vmax.f32 %v31_v16, %v170_v13  ;;  %v43_v22 = vmax.f32 %v32_v17, %v171_v14 }
   0xa   :  { %v53_v26 = vmax.f32 %v42_v21, %v174_v18  ;;  %v54_v27 = vmax.f32 %v43_v22, %v175_v19 }
   0xc   :  { %v64_v31 = vmax.f32 %v53_v26, %v178_v23  ;;  %v65_v32 = vmax.f32 %v54_v27, %v179_v24 }
   0xe   :  { %v75_v35 = vmax.f32 %v64_v31, %v182_v28  ;;  %v76_v36 = vmax.f32 %v65_v32, %v183_v29 }
  0x10   :  { %v86_v39 = vmax.f32 %v75_v35, %v186_v33  ;;  %v87_v40 = vmax.f32 %v76_v36, %v187_v34 }
  0x12   :  { %v97_v41 = vmax.f32 %v86_v39, %v190_v37  ;;  %v98_v42 = vmax.f32 %v87_v40, %v191_v38 }
  0x14   :  { %v99_v43 = vpack.c.bf16 %v97_v41, %v97_v41  ;;  %v100_v44 = vpack.c.bf16 %v98_v42, %v98_v42 }
  0x16   :  { %v103_v45 = vunpack.c.l.b16 %v99_v43  ;;  %v104_v46 = vunpack.c.l.b16 %v100_v44 }
  0x18   :  { %v105_v47 = vpack.c.b16 %v104_v46, %v103_v45 }
  0x1a   :  { %106 = vrot.lane.b32.xlu0 %v105_v47, %s207_s27  ;;  %110 = vrot.lane.b32.xlu1 %v105_v47, %s208_s0 }
  0x22   :  { %108 = vrot.lane.b32.xlu0 %v105_v47, %s209_s28 }
  0x8c   :  { %v107_v48 = vpop.permute.xlu0 %106  ;;  %v111_v50 = vpop.permute.xlu1 %110 }
  0x8d   :  { %v115_v51 = vsel %vm112_vm0, %v105_v47, %v107_v48 }
  0x94   :  { %v109_v52 = vpop.permute.xlu0 %108 }
  0x95   :  { %v118_v53 = vsel %vm116_vm1, %v115_v51, %v109_v52 }
  0x96   :  { %v121_v56 = vsel %vm119_vm2, %v118_v53, %v111_v50 }
  0x97   :  { %v127_v57 = vunpack.c.l.bf16 %v121_v56  ;;  %v128_v58 = vunpack.c.h.bf16 %v121_v56 }
  0x99   :  { %v129_v59 = vadd.f32 %v194_v54, %v127_v57  ;;  %v130_v60 = vadd.f32 %v195_v55, %v128_v58 }
  0x9b   :  { %v131_v61 = vpack.c.bf16 %v129_v59, %v129_v59  ;;  %v132_v62 = vpack.c.bf16 %v130_v60, %v130_v60 }
  0x9d   :  { %134 = vst.msk [vmem:[%s263_s2] sm:$0xf] %vm133_vm3, %v131_v61 }
  0x9e   :  { %135 = vst.msk [vmem:[%s263_s2 + $0x4] sm:$0xf] %vm133_vm3, %v132_v62 }

// kernel: cloudnetp_forward.39
= control target key start
LH: loop header
LB: loop body
LE: loop exit
PB: predicated region body
PF: predicated region fallthrough
CT: control target
= control target key end

     0   :  { %vm182_vm0 = vcmask 261120   ;;  %vm232_vm1 = vcmask 257024   ;;  %s447_s1 = inlined_call_operand.vmem [shape: bf16[288,32], index: 1, kind: input, shape index: {}]   ;;  %s448_s0 = inlined_call_operand.vmem [shape: bf16[16,288], index: 0, kind: input, shape index: {}]   ;;  %s449_s2 = inlined_call_operand.vmem [shape: f32[1,32], index: 2, kind: input, shape index: {}]   ;;  %s450_s3 = inlined_call_operand.vmem [shape: bf16[16,32], index: 3, kind: output, shape index: {}]  }
   0x1   :  { %v334_v0 = vld [vmem:[%s447_s1 + $0x38] sm:$0xff]  ;;  %v333_v2 = vld [vmem:[%s447_s1 + $0x30] sm:$0xff]  ;;  %v344_v4 = vld [vmem:[%s447_s1 + $0x88] sm:$0xff] }
   0x2   :  { %v342_v1 = vld [vmem:[%s447_s1 + $0x78] sm:$0xff]  ;;  %186 = vmatpush.bf16.msra.mxu0 %v334_v0  ;;  %v341_v3 = vld [vmem:[%s447_s1 + $0x70] sm:$0xff]  ;;  %220 = vmatpush.bf16.msra.mxu2 %v344_v4  ;;  %v343_v5 = vld [vmem:[%s447_s1 + $0x80] sm:$0xff] }
   0x3   :  { %200 = vmatpush.bf16.msra.mxu1 %v342_v1  ;;  %v249_v6 = vld [vmem:[%s448_s0 + $0x8] sm:$0xf]  ;;  %v326_v7 = vld [vmem:[%s448_s0 + $0x10] sm:$0xf0]  ;;  %v331_v11 = vld [vmem:[%s447_s1 + $0x20] sm:$0xff] }
   0x4   :  { %v332_v8 = vld [vmem:[%s447_s1 + $0x28] sm:$0xff]  ;;  %v250_v10 = vor.u32 %v326_v7, %v249_v6  ;;  %v339_v12 = vld [vmem:[%s447_s1 + $0x60] sm:$0xff]  ;;  %v330_v13 = vld [vmem:[%s447_s1 + $0x18] sm:$0xff] }
   0x5   :  { %v340_v9 = vld [vmem:[%s447_s1 + $0x68] sm:$0xff]  ;;  %v338_v14 = vld [vmem:[%s447_s1 + $0x58] sm:$0xff]  ;;  %v329_v15 = vld [vmem:[%s447_s1 + $0x10] sm:$0xff] }
   0x6   :  { %187 = vmatpush.bf16.msra.mxu0 %v333_v2  ;;  %221 = vmatpush.bf16.msra.mxu2 %v343_v5  ;;  %v337_v16 = vld [vmem:[%s447_s1 + $0x50] sm:$0xff]  ;;  %v328_v17 = vld [vmem:[%s447_s1 + $0x8] sm:$0xff]  ;;  %v327_v19 = vld [vmem:[%s447_s1] sm:$0xff] }
   0x7   :  { %201 = vmatpush.bf16.msra.mxu1 %v341_v3  ;;  %v336_v18 = vld [vmem:[%s447_s1 + $0x48] sm:$0xff]  ;;  %v335_v20 = vld [vmem:[%s447_s1 + $0x40] sm:$0xff]  ;;  %v243_v24 = vld [vmem:[%s448_s0 + $0xc] sm:$0xf0] }
   0x8   :  { %v241_v21 = vld [vmem:[%s448_s0] sm:$0xf]  ;;  %v325_v22 = vld [vmem:[%s448_s0 + $0x8] sm:$0xf0]  ;;  %v324_v23 = vld [vmem:[%s448_s0 + $0x4] sm:$0xf] }
   0x9   :  { %323 = vmatmul.msk.bf16.vlgmr.msra.gmra.mxu2 %vm182_vm0, %v250_v10  ;;  %v242_v25 = vor.u32 %v325_v22, %v241_v21  ;;  %v246_v26 = vor.u32 %v324_v23, %v243_v24  ;;  %v345_v27 = vld [vmem:[%s449_s2] ss:$0 sm:$0xff] }
   0xa   :  { %188 = vmatpush.bf16.msra.mxu0 %v332_v8 }
   0xb   :  { %202 = vmatpush.bf16.msra.mxu1 %v340_v9 }
   0xe   :  { %189 = vmatpush.bf16.msra.mxu0 %v331_v11 }
   0xf   :  { %203 = vmatpush.bf16.msra.mxu1 %v339_v12 }
  0x12   :  { %190 = vmatpush.bf16.msra.mxu0 %v330_v13 }
  0x13   :  { %204 = vmatpush.bf16.msra.mxu1 %v338_v14 }
  0x16   :  { %191 = vmatpush.bf16.msra.mxu0 %v329_v15 }
  0x17   :  { %205 = vmatpush.bf16.msra.mxu1 %v337_v16 }
  0x1a   :  { %192 = vmatpush.bf16.msra.mxu0 %v328_v17 }
  0x1b   :  { %206 = vmatpush.bf16.msra.mxu1 %v336_v18 }
  0x1e   :  { %193 = vmatpush.bf16.msra.mxu0 %v327_v19 }
  0x1f   :  { %207 = vmatpush.bf16.msra.mxu1 %v335_v20 }
  0x21   :  { %194 = vmatmul.bf16.vlgmr.msra.gmra.mxu0 %v242_v25 }
  0x22   :  { %208 = vmatmul.bf16.vlgmr.msra.gmra.mxu1 %v246_v26 }
  0x8c   :  { %v223_v31 = vpop.f32.mrf.mxu2 }
  0x94   :  { %v225_v40 = vpop.f32.mrf.mxu2 }
  0x9e   :  { %v195_v28 = vpop.f32.mrf.mxu0 }
  0x9f   :  { %v209_v29 = vpop.f32.mrf.mxu1  ;;  %v196_v30 = vadd.f32 %v345_v27, %v195_v28 }
  0xa1   :  { %v210_v32 = vadd.f32 %v209_v29, %v196_v30 }
  0xa3   :  { %v224_v33 = vadd.f32 %v223_v31, %v210_v32 }
  0xa5   :  { %v228_v34 = vmax.f32 %v224_v33, 0.0 }
  0xa6   :  { %v197_v35 = vpop.f32.mrf.mxu0 }
  0xa7   :  { %v230_v36 = vpack.c.bf16 %v228_v34, %v228_v34  ;;  %v198_v37 = vadd.f32 %v345_v27, %v197_v35  ;;  %v211_v38 = vpop.f32.mrf.mxu1 }
  0xa9   :  { %233 = vst.msk [vmem:[%s450_s3] sm:$0xf] %vm232_vm1, %v230_v36  ;;  %v212_v39 = vadd.f32 %v211_v38, %v198_v37 }
  0xab   :  { %v226_v41 = vadd.f32 %v225_v40, %v212_v39 }
  0xad   :  { %v229_v42 = vmax.f32 %v226_v41, 0.0 }
  0xaf   :  { %v231_v43 = vpack.c.bf16 %v229_v42, %v229_v42 }
  0xb1   :  { %234 = vst.msk [vmem:[%s450_s3 + $0x4] sm:$0xf] %vm232_vm1, %v231_v43 }

// kernel: tile.6
= control target key start
LH: loop header
LB: loop body
LE: loop exit
PB: predicated region body
PF: predicated region fallthrough
CT: control target
= control target key end

     0   :  { %s22_s0 = inlined_call_operand.vmem [shape: f32[16], index: 0, kind: input, shape index: {}]   ;;  %s23_s1 = inlined_call_operand.vmem [shape: f32[4,16], index: 1, kind: output, shape index: {}]  }
   0x1   :  { %v4_v0 = vld [vmem:[%s22_s0] ss:$0 sm:$0xff] }
   0x2   :  { %5 = vst [vmem:[%s23_s1] sm:$0xf] %v4_v0 }

// kernel: tile.7
= control target key start
LH: loop header
LB: loop body
LE: loop exit
PB: predicated region body
PF: predicated region fallthrough
CT: control target
= control target key end

     0   :  { %s37_s8 = smov 16   ;;  %s38_s9 = smov 32   ;;  %vm7_vm0 = vcmask 130048   ;;  %vm13_vm1 = vcmask 523648   ;;  %vm19_vm2 = vcmask 392448   ;;  %vm25_vm3 = vcmask 261248   ;;  %s55_s0 = inlined_call_operand.vmem [shape: f32[4,16], index: 0, kind: input, shape index: {}]   ;;  %s56_s1 = inlined_call_operand.vmem [shape: f32[1,64], index: 1, kind: output, shape index: {}]  }
   0x1   :  { %v4_v0 = vld [vmem:[%s55_s0] sm:$0xf]  ;;  %s36_s0 = smov 48  }
   0x2   :  { %5 = vst [vmem:[#allocation1] sm:$0xf] %v4_v0 }
   0x9   :  { %v10_v1 = vld [vmem:[#allocation1 + $0x3] sm:$0x1]   ;;  %v22_v2 = vld [vmem:[#allocation1 + $0x1] sm:$0x1]   ;;  %v16_v3 = vld [vmem:[#allocation1 + $0x2] sm:$0x1]  }
   0xa   :  { %11 = vrot.lane.b32.xlu0 %v10_v1, %s36_s0  ;;  %23 = vrot.lane.b32.xlu1 %v22_v2, %s37_s8  ;;  %v6_v4 = vld [vmem:[#allocation1] sm:$0x1]  }
   0xb   :  { %8 = vst.msk [vmem:[#allocation0] sm:$0x1] %vm7_vm0, %v6_v4  }
  0x12   :  { %17 = vrot.lane.b32.xlu0 %v16_v3, %s38_s9 }
  0x7c   :  { %v12_v5 = vpop.permute.xlu0 %11   ;;  %v24_v6 = vpop.permute.xlu1 %23  }
  0x7d   :  { %14 = vst.msk [vmem:[#allocation0] sm:$0x1] %vm13_vm1, %v12_v5  }
  0x84   :  { %v18_v7 = vpop.permute.xlu0 %17  }
  0x85   :  { %20 = vst.msk [vmem:[#allocation0] sm:$0x1] %vm19_vm2, %v18_v7  }
  0x86   :  { %26 = vst.msk [vmem:[#allocation0] sm:$0x1] %vm25_vm3, %v24_v6  }
  0x8d   :  { %v29_v8 = vld [vmem:[#allocation0] sm:$0x1] }
  0x8e   :  { %32 = vst [vmem:[%s56_s1] sm:$0x1] %v29_v8 }

// kernel: cloudnetp_forward.41
= control target key start
LH: loop header
LB: loop body
LE: loop exit
PB: predicated region body
PF: predicated region fallthrough
CT: control target
= control target key end

     0   :  { %vm188_vm0 = vcmask 261120   ;;  %vm250_vm1 = vcmask 257024   ;;  %s489_s1 = inlined_call_operand.vmem [shape: bf16[288,32], index: 1, kind: input, shape index: {}]   ;;  %s490_s0 = inlined_call_operand.vmem [shape: bf16[16,288], index: 0, kind: input, shape index: {}]   ;;  %s491_s2 = inlined_call_operand.vmem [shape: f32[1,32], index: 2, kind: input, shape index: {}]   ;;  %s492_s3 = inlined_call_operand.vmem [shape: bf16[16,32], index: 3, kind: input, shape index: {}]   ;;  %s493_s4 = inlined_call_operand.vmem [shape: bf16[16,32], index: 4, kind: input, shape index: {}]   ;;  %s494_s5 = inlined_call_operand.vmem [shape: bf16[16,32], index: 5, kind: output, shape index: {}]  }
   0x1   :  { %v352_v0 = vld [vmem:[%s489_s1 + $0x38] sm:$0xff]  ;;  %v351_v2 = vld [vmem:[%s489_s1 + $0x30] sm:$0xff]  ;;  %v362_v4 = vld [vmem:[%s489_s1 + $0x88] sm:$0xff] }
   0x2   :  { %v360_v1 = vld [vmem:[%s489_s1 + $0x78] sm:$0xff]  ;;  %192 = vmatpush.bf16.msra.mxu0 %v352_v0  ;;  %v359_v3 = vld [vmem:[%s489_s1 + $0x70] sm:$0xff]  ;;  %226 = vmatpush.bf16.msra.mxu2 %v362_v4  ;;  %v361_v5 = vld [vmem:[%s489_s1 + $0x80] sm:$0xff] }
   0x3   :  { %206 = vmatpush.bf16.msra.mxu1 %v360_v1  ;;  %v267_v6 = vld [vmem:[%s490_s0 + $0x8] sm:$0xf]  ;;  %v344_v7 = vld [vmem:[%s490_s0 + $0x10] sm:$0xf0]  ;;  %v349_v11 = vld [vmem:[%s489_s1 + $0x20] sm:$0xff] }
   0x4   :  { %v350_v8 = vld [vmem:[%s489_s1 + $0x28] sm:$0xff]  ;;  %v268_v10 = vor.u32 %v344_v7, %v267_v6  ;;  %v357_v12 = vld [vmem:[%s489_s1 + $0x60] sm:$0xff]  ;;  %v348_v13 = vld [vmem:[%s489_s1 + $0x18] sm:$0xff] }
   0x5   :  { %v358_v9 = vld [vmem:[%s489_s1 + $0x68] sm:$0xff]  ;;  %v356_v14 = vld [vmem:[%s489_s1 + $0x58] sm:$0xff]  ;;  %v347_v15 = vld [vmem:[%s489_s1 + $0x10] sm:$0xff] }
   0x6   :  { %193 = vmatpush.bf16.msra.mxu0 %v351_v2  ;;  %227 = vmatpush.bf16.msra.mxu2 %v361_v5  ;;  %v355_v16 = vld [vmem:[%s489_s1 + $0x50] sm:$0xff]  ;;  %v346_v17 = vld [vmem:[%s489_s1 + $0x8] sm:$0xff]  ;;  %v345_v19 = vld [vmem:[%s489_s1] sm:$0xff] }
   0x7   :  { %207 = vmatpush.bf16.msra.mxu1 %v359_v3  ;;  %v354_v18 = vld [vmem:[%s489_s1 + $0x48] sm:$0xff]  ;;  %v353_v20 = vld [vmem:[%s489_s1 + $0x40] sm:$0xff]  ;;  %v261_v24 = vld [vmem:[%s490_s0 + $0xc] sm:$0xf0] }
   0x8   :  { %v259_v21 = vld [vmem:[%s490_s0] sm:$0xf]  ;;  %v343_v22 = vld [vmem:[%s490_s0 + $0x8] sm:$0xf0]  ;;  %v342_v23 = vld [vmem:[%s490_s0 + $0x4] sm:$0xf] }
   0x9   :  { %341 = vmatmul.msk.bf16.vlgmr.msra.gmra.mxu2 %vm188_vm0, %v268_v10  ;;  %v260_v25 = vor.u32 %v343_v22, %v259_v21  ;;  %v264_v26 = vor.u32 %v342_v23, %v261_v24  ;;  %v371_v27 = vld [vmem:[%s491_s2] ss:$0 sm:$0xff] }
   0xa   :  { %194 = vmatpush.bf16.msra.mxu0 %v350_v8  ;;  %v364_v32 = vld [vmem:[%s492_s3] sm:$0xff]  }
   0xb   :  { %208 = vmatpush.bf16.msra.mxu1 %v358_v9  ;;  %v368_v34 = vld [vmem:[%s493_s4] sm:$0xff]   ;;  %v365_v36 = vunpack.c.l.bf16 %v364_v32  ;;  %v366_v48 = vunpack.c.h.bf16 %v364_v32 }
   0xc   :  { %v369_v38 = vunpack.c.l.bf16 %v368_v34  ;;  %v370_v50 = vunpack.c.h.bf16 %v368_v34 }
   0xe   :  { %195 = vmatpush.bf16.msra.mxu0 %v349_v11 }
   0xf   :  { %209 = vmatpush.bf16.msra.mxu1 %v357_v12 }
  0x12   :  { %196 = vmatpush.bf16.msra.mxu0 %v348_v13 }
  0x13   :  { %210 = vmatpush.bf16.msra.mxu1 %v356_v14 }
  0x16   :  { %197 = vmatpush.bf16.msra.mxu0 %v347_v15 }
  0x17   :  { %211 = vmatpush.bf16.msra.mxu1 %v355_v16 }
  0x1a   :  { %198 = vmatpush.bf16.msra.mxu0 %v346_v17 }
  0x1b   :  { %212 = vmatpush.bf16.msra.mxu1 %v354_v18 }
  0x1e   :  { %199 = vmatpush.bf16.msra.mxu0 %v345_v19 }
  0x1f   :  { %213 = vmatpush.bf16.msra.mxu1 %v353_v20 }
  0x21   :  { %200 = vmatmul.bf16.vlgmr.msra.gmra.mxu0 %v260_v25 }
  0x22   :  { %214 = vmatmul.bf16.vlgmr.msra.gmra.mxu1 %v264_v26 }
  0x8c   :  { %v229_v31 = vpop.f32.mrf.mxu2 }
  0x94   :  { %v231_v45 = vpop.f32.mrf.mxu2 }
  0x9e   :  { %v201_v28 = vpop.f32.mrf.mxu0 }
  0x9f   :  { %v215_v29 = vpop.f32.mrf.mxu1  ;;  %v202_v30 = vadd.f32 %v371_v27, %v201_v28 }
  0xa1   :  { %v216_v33 = vadd.f32 %v215_v29, %v202_v30 }
  0xa3   :  { %v230_v35 = vadd.f32 %v229_v31, %v216_v33 }
  0xa5   :  { %v234_v37 = vmax.f32 %v230_v35, 0.0 }
  0xa6   :  { %v203_v39 = vpop.f32.mrf.mxu0 }
  0xa7   :  { %v240_v40 = vadd.f32 %v365_v36, %v234_v37  ;;  %v204_v41 = vadd.f32 %v371_v27, %v203_v39  ;;  %v217_v42 = vpop.f32.mrf.mxu1 }
  0xa9   :  { %v246_v43 = vadd.f32 %v369_v38, %v240_v40  ;;  %v218_v44 = vadd.f32 %v217_v42, %v204_v41 }
  0xab   :  { %v248_v46 = vpack.c.bf16 %v246_v43, %v246_v43  ;;  %v232_v47 = vadd.f32 %v231_v45, %v218_v44 }
  0xad   :  { %251 = vst.msk [vmem:[%s494_s5] sm:$0xf] %vm250_vm1, %v248_v46  ;;  %v235_v49 = vmax.f32 %v232_v47, 0.0 }
  0xaf   :  { %v241_v51 = vadd.f32 %v366_v48, %v235_v49 }
  0xb1   :  { %v247_v52 = vadd.f32 %v370_v50, %v241_v51 }
  0xb3   :  { %v249_v53 = vpack.c.bf16 %v247_v52, %v247_v52 }
  0xb5   :  { %252 = vst.msk [vmem:[%s494_s5 + $0x4] sm:$0xf] %vm250_vm1, %v249_v53 }

// kernel: cloudnetp_forward.40
= control target key start
LH: loop header
LB: loop body
LE: loop exit
PB: predicated region body
PF: predicated region fallthrough
CT: control target
= control target key end

     0   :  { %vm338_vm0 = vcmask 523264   ;;  %vm416_vm1 = vcmask 257024   ;;  %s797_s1 = inlined_call_operand.vmem [shape: bf16[576,32], index: 1, kind: input, shape index: {}]   ;;  %s798_s2 = inlined_call_operand.vmem [shape: f32[1,32], index: 2, kind: input, shape index: {}]   ;;  %s799_s0 = inlined_call_operand.vmem [shape: bf16[16,576], index: 0, kind: input, shape index: {}]   ;;  %s800_s3 = inlined_call_operand.vmem [shape: bf16[16,32], index: 3, kind: output, shape index: {}]  }
   0x1   :  { %v600_v0 = vld [vmem:[%s797_s1 + $0x38] sm:$0xff]  ;;  %v599_v4 = vld [vmem:[%s797_s1 + $0x30] sm:$0xff]  ;;  %v598_v8 = vld [vmem:[%s797_s1 + $0x28] sm:$0xff] }
   0x2   :  { %v616_v1 = vld [vmem:[%s797_s1 + $0xb8] sm:$0xff]  ;;  %342 = vmatpush.bf16.msra.mxu0 %v600_v0  ;;  %v615_v5 = vld [vmem:[%s797_s1 + $0xb0] sm:$0xff]  ;;  %v614_v9 = vld [vmem:[%s797_s1 + $0xa8] sm:$0xff] }
   0x3   :  { %v624_v2 = vld [vmem:[%s797_s1 + $0xf8] sm:$0xff]  ;;  %370 = vmatpush.bf16.msra.mxu2 %v616_v1  ;;  %v623_v6 = vld [vmem:[%s797_s1 + $0xf0] sm:$0xff]  ;;  %v622_v10 = vld [vmem:[%s797_s1 + $0xe8] sm:$0xff] }
   0x4   :  { %v608_v3 = vld [vmem:[%s797_s1 + $0x78] sm:$0xff]  ;;  %384 = vmatpush.bf16.msra.mxu3 %v624_v2  ;;  %v607_v7 = vld [vmem:[%s797_s1 + $0x70] sm:$0xff]  ;;  %v606_v11 = vld [vmem:[%s797_s1 + $0x68] sm:$0xff] }
   0x5   :  { %356 = vmatpush.bf16.msra.mxu1 %v608_v3  ;;  %v597_v12 = vld [vmem:[%s797_s1 + $0x20] sm:$0xff]  ;;  %v596_v16 = vld [vmem:[%s797_s1 + $0x18] sm:$0xff]  ;;  %v595_v20 = vld [vmem:[%s797_s1 + $0x10] sm:$0xff] }
   0x6   :  { %343 = vmatpush.bf16.msra.mxu0 %v599_v4  ;;  %v613_v13 = vld [vmem:[%s797_s1 + $0xa0] sm:$0xff]  ;;  %v612_v17 = vld [vmem:[%s797_s1 + $0x98] sm:$0xff]  ;;  %v611_v21 = vld [vmem:[%s797_s1 + $0x90] sm:$0xff] }
   0x7   :  { %371 = vmatpush.bf16.msra.mxu2 %v615_v5  ;;  %v621_v14 = vld [vmem:[%s797_s1 + $0xe0] sm:$0xff]  ;;  %v620_v18 = vld [vmem:[%s797_s1 + $0xd8] sm:$0xff]  ;;  %v619_v22 = vld [vmem:[%s797_s1 + $0xd0] sm:$0xff] }
   0x8   :  { %385 = vmatpush.bf16.msra.mxu3 %v623_v6  ;;  %v605_v15 = vld [vmem:[%s797_s1 + $0x60] sm:$0xff]  ;;  %v604_v19 = vld [vmem:[%s797_s1 + $0x58] sm:$0xff]  ;;  %v603_v23 = vld [vmem:[%s797_s1 + $0x50] sm:$0xff] }
   0x9   :  { %357 = vmatpush.bf16.msra.mxu1 %v607_v7  ;;  %v594_v24 = vld [vmem:[%s797_s1 + $0x8] sm:$0xff]  ;;  %v593_v28 = vld [vmem:[%s797_s1] sm:$0xff]  ;;  %v590_v33 = vld [vmem:[%s799_s0 + $0x10] sm:$0xf0] }
   0xa   :  { %344 = vmatpush.bf16.msra.mxu0 %v598_v8  ;;  %v610_v25 = vld [vmem:[%s797_s1 + $0x88] sm:$0xff]  ;;  %v609_v29 = vld [vmem:[%s797_s1 + $0x80] sm:$0xff]  ;;  %v591_v35 = vld [vmem:[%s799_s0 + $0x18] sm:$0xf0] }
   0xb   :  { %372 = vmatpush.bf16.msra.mxu2 %v614_v9  ;;  %v618_v26 = vld [vmem:[%s797_s1 + $0xc8] sm:$0xff]  ;;  %v617_v30 = vld [vmem:[%s797_s1 + $0xc0] sm:$0xff]  ;;  %v427_v39 = vld [vmem:[%s799_s0 + $0x14] sm:$0xf0] }
   0xc   :  { %386 = vmatpush.bf16.msra.mxu3 %v622_v10  ;;  %v602_v27 = vld [vmem:[%s797_s1 + $0x48] sm:$0xff]  ;;  %v601_v31 = vld [vmem:[%s797_s1 + $0x40] sm:$0xff]  ;;  %v628_v40 = vld [vmem:[%s797_s1 + $0x118] sm:$0xff] }
   0xd   :  { %358 = vmatpush.bf16.msra.mxu1 %v606_v11  ;;  %v425_v32 = vld [vmem:[%s799_s0] sm:$0xf]  ;;  %v433_v34 = vld [vmem:[%s799_s0 + $0x8] sm:$0xf]  ;;  %v589_v36 = vld [vmem:[%s799_s0 + $0xc] sm:$0xf] }
   0xe   :  { %345 = vmatpush.bf16.msra.mxu0 %v597_v12  ;;  %v435_v37 = vld [vmem:[%s799_s0 + $0x1c] sm:$0xf0]  ;;  %v588_v38 = vld [vmem:[%s799_s0 + $0x4] sm:$0xf]  ;;  %v426_v41 = vor.u32 %v590_v33, %v425_v32  ;;  %v434_v42 = vor.u32 %v591_v35, %v433_v34  ;;  %v627_v45 = vld [vmem:[%s797_s1 + $0x110] sm:$0xff] }
   0xf   :  { %373 = vmatpush.bf16.msra.mxu2 %v613_v13  ;;  %v438_v43 = vor.u32 %v589_v36, %v435_v37  ;;  %v430_v44 = vor.u32 %v588_v38, %v427_v39  ;;  %v626_v46 = vld [vmem:[%s797_s1 + $0x108] sm:$0xff]  ;;  %v625_v47 = vld [vmem:[%s797_s1 + $0x100] sm:$0xff]  ;;  %v441_v48 = vld [vmem:[%s799_s0 + $0x10] sm:$0xf] }
  0x10   :  { %387 = vmatpush.bf16.msra.mxu3 %v621_v14  ;;  %v592_v49 = vld [vmem:[%s799_s0 + $0x20] sm:$0xf0]  ;;  %v629_v52 = vld [vmem:[%s798_s2] ss:$0 sm:$0xff] }
  0x11   :  { %359 = vmatpush.bf16.msra.mxu1 %v605_v15  ;;  %v442_v50 = vor.u32 %v592_v49, %v441_v48 }
  0x12   :  { %346 = vmatpush.bf16.msra.mxu0 %v596_v16 }
  0x13   :  { %374 = vmatpush.bf16.msra.mxu2 %v612_v17 }
  0x14   :  { %388 = vmatpush.bf16.msra.mxu3 %v620_v18 }
  0x15   :  { %360 = vmatpush.bf16.msra.mxu1 %v604_v19 }
  0x16   :  { %347 = vmatpush.bf16.msra.mxu0 %v595_v20 }
  0x17   :  { %375 = vmatpush.bf16.msra.mxu2 %v611_v21 }
  0x18   :  { %389 = vmatpush.bf16.msra.mxu3 %v619_v22 }
  0x19   :  { %361 = vmatpush.bf16.msra.mxu1 %v603_v23 }
  0x1a   :  { %348 = vmatpush.bf16.msra.mxu0 %v594_v24 }
  0x1b   :  { %376 = vmatpush.bf16.msra.mxu2 %v610_v25 }
  0x1c   :  { %390 = vmatpush.bf16.msra.mxu3 %v618_v26 }
  0x1d   :  { %362 = vmatpush.bf16.msra.mxu1 %v602_v27 }
  0x1e   :  { %349 = vmatpush.bf16.msra.mxu0 %v593_v28 }
  0x1f   :  { %377 = vmatpush.bf16.msra.mxu2 %v609_v29 }
  0x20   :  { %391 = vmatpush.bf16.msra.mxu3 %v617_v30 }
  0x21   :  { %363 = vmatpush.bf16.msra.mxu1 %v601_v31  ;;  %350 = vmatmul.bf16.vlgmr.msra.gmra.mxu0 %v426_v41 }
  0x22   :  { %402 = vmatpush.bf16.msrb.mxu0 %v628_v40  ;;  %378 = vmatmul.bf16.vlgmr.msra.gmra.mxu2 %v434_v42 }
  0x23   :  { %392 = vmatmul.bf16.vlgmr.msra.gmra.mxu3 %v438_v43 }
  0x24   :  { %364 = vmatmul.bf16.vlgmr.msra.gmra.mxu1 %v430_v44 }
  0x26   :  { %403 = vmatpush.bf16.msrb.mxu0 %v627_v45 }
  0x2a   :  { %404 = vmatpush.bf16.msrb.mxu0 %v626_v46 }
  0x2e   :  { %405 = vmatpush.bf16.msrb.mxu0 %v625_v47 }
  0x31   :  { %587 = vmatmul.msk.bf16.vlgmr.msrb.gmra.mxu0 %vm338_vm0, %v442_v50 }
  0x9e   :  { %v351_v51 = vpop.f32.mrf.mxu0 }
  0x9f   :  { %v352_v54 = vadd.f32 %v629_v52, %v351_v51 }
  0xa1   :  { %v365_v53 = vpop.f32.mrf.mxu1 }
  0xa2   :  { %v366_v57 = vadd.f32 %v365_v53, %v352_v54 }
  0xa5   :  { %v379_v55 = vpop.f32.mrf.mxu2 }
  0xa6   :  { %v353_v56 = vpop.f32.mrf.mxu0  ;;  %v380_v58 = vadd.f32 %v379_v55, %v366_v57  ;;  %v393_v59 = vpop.f32.mrf.mxu3 }
  0xa7   :  { %v354_v60 = vadd.f32 %v629_v52, %v353_v56 }
  0xa8   :  { %v394_v62 = vadd.f32 %v393_v59, %v380_v58 }
  0xa9   :  { %v367_v61 = vpop.f32.mrf.mxu1 }
  0xaa   :  { %v368_v1 = vadd.f32 %v367_v61, %v354_v60 }
  0xad   :  { %v381_v63 = vpop.f32.mrf.mxu2 }
  0xae   :  { %v407_v0 = vpop.f32.mrf.mxu0  ;;  %v382_v3 = vadd.f32 %v381_v63, %v368_v1  ;;  %v395_v6 = vpop.f32.mrf.mxu3 }
  0xaf   :  { %v408_v2 = vadd.f32 %v407_v0, %v394_v62 }
  0xb0   :  { %v396_v7 = vadd.f32 %v395_v6, %v382_v3 }
  0xb1   :  { %v412_v4 = vmax.f32 %v408_v2, 0.0 }
  0xb3   :  { %v414_v5 = vpack.c.bf16 %v412_v4, %v412_v4 }
  0xb5   :  { %417 = vst.msk [vmem:[%s800_s3] sm:$0xf] %vm416_vm1, %v414_v5 }
  0xb6   :  { %v409_v8 = vpop.f32.mrf.mxu0 }
  0xb7   :  { %v410_v9 = vadd.f32 %v409_v8, %v396_v7 }
  0xb9   :  { %v413_v10 = vmax.f32 %v410_v9, 0.0 }
  0xbb   :  { %v415_v11 = vpack.c.bf16 %v413_v10, %v413_v10 }
  0xbd   :  { %418 = vst.msk [vmem:[%s800_s3 + $0x4] sm:$0xf] %vm416_vm1, %v415_v11 }

// kernel: cloudnetp_forward.43
= control target key start
LH: loop header
LB: loop body
LE: loop exit
PB: predicated region body
PF: predicated region fallthrough
CT: control target
= control target key end

     0   :  { %vm106_vm0 = vcmask 519168   ;;  %s215_s1 = inlined_call_operand.vmem [shape: bf16[128,64], index: 1, kind: input, shape index: {}]   ;;  %s216_s2 = inlined_call_operand.vmem [shape: f32[1,64], index: 2, kind: input, shape index: {}]   ;;  %s217_s0 = inlined_call_operand.vmem [shape: bf16[16,128], index: 0, kind: input, shape index: {}]   ;;  %s218_s3 = inlined_call_operand.vmem [shape: bf16[16,64], index: 3, kind: output, shape index: {}]  }
   0x1   :  { %v157_v0 = vld [vmem:[%s215_s1 + $0x38] sm:$0xff]  ;;  %v156_v1 = vld [vmem:[%s215_s1 + $0x30] sm:$0xff]  ;;  %v155_v2 = vld [vmem:[%s215_s1 + $0x28] sm:$0xff] }
   0x2   :  { %90 = vmatpush.bf16.msra.mxu0 %v157_v0  ;;  %v154_v3 = vld [vmem:[%s215_s1 + $0x20] sm:$0xff]  ;;  %v153_v4 = vld [vmem:[%s215_s1 + $0x18] sm:$0xff]  ;;  %v152_v5 = vld [vmem:[%s215_s1 + $0x10] sm:$0xff] }
   0x3   :  { %v151_v6 = vld [vmem:[%s215_s1 + $0x8] sm:$0xff]  ;;  %v150_v7 = vld [vmem:[%s215_s1] sm:$0xff] }
   0x4   :  { %v149_v8 = vld [vmem:[%s217_s0] sm:$0xff] }
   0x5   :  { %v158_v9 = vld [vmem:[%s216_s2] ss:$0 sm:$0xff] }
   0x6   :  { %91 = vmatpush.bf16.msra.mxu0 %v156_v1 }
   0xa   :  { %92 = vmatpush.bf16.msra.mxu0 %v155_v2 }
   0xe   :  { %93 = vmatpush.bf16.msra.mxu0 %v154_v3 }
  0x12   :  { %94 = vmatpush.bf16.msra.mxu0 %v153_v4 }
  0x16   :  { %95 = vmatpush.bf16.msra.mxu0 %v152_v5 }
  0x1a   :  { %96 = vmatpush.bf16.msra.mxu0 %v151_v6 }
  0x1e   :  { %97 = vmatpush.bf16.msra.mxu0 %v150_v7 }
  0x21   :  { %98 = vmatmul.bf16.vlgmr.msra.gmra.mxu0 %v149_v8 }
  0x9e   :  { %v99_v10 = vpop.f32.mrf.mxu0 }
  0x9f   :  { %v100_v11 = vadd.f32 %v158_v9, %v99_v10 }
  0xa1   :  { %v104_v12 = vpack.c.bf16 %v100_v11, %v100_v11 }
  0xa3   :  { %107 = vst.msk [vmem:[%s218_s3] sm:$0xf] %vm106_vm0, %v104_v12 }
  0xa6   :  { %v101_v13 = vpop.f32.mrf.mxu0 }
  0xa7   :  { %v102_v14 = vadd.f32 %v158_v9, %v101_v13 }
  0xa9   :  { %v105_v15 = vpack.c.bf16 %v102_v14, %v102_v14 }
  0xab   :  { %108 = vst.msk [vmem:[%s218_s3 + $0x4] sm:$0xf] %vm106_vm0, %v105_v15 }

// kernel: cloudnetp_forward.48
= control target key start
LH: loop header
LB: loop body
LE: loop exit
PB: predicated region body
PF: predicated region fallthrough
CT: control target
= control target key end

     0   :  { %vm43_vm0 = vcmask 130048   ;;  %vm77_vm1 = vcmask 3072   ;;  %s149_s1 = inlined_call_operand.vmem [shape: bf16[16,1], index: 1, kind: input, shape index: {}]   ;;  %s150_s0 = inlined_call_operand.vmem [shape: bf16[32,16], index: 0, kind: input, shape index: {}]   ;;  %s151_s2 = inlined_call_operand.<no memory space> [shape: f32[1,1], index: 2, kind: input, shape index: {}]   ;;  %s152_s3 = inlined_call_operand.vmem [shape: bf16[32,1], index: 3, kind: output, shape index: {}]  }
   0x1   :  { %v102_v0 = vld [vmem:[%s149_s1] sm:$0xff]  ;;  %v8_v1 = vstv %s151_s2  ;;  %v101_v3 = vld [vmem:[%s150_s0 + $0x8] sm:$0xff] }
   0x2   :  { %v100_v2 = vld [vmem:[%s150_s0] sm:$0xff]  ;;  %9 = vst [vmem:[#allocation2] sm:$0x1] %v8_v1  ;;  %57 = vmatpush.bf16.msra.mxu0 %v102_v0  ;;  %103 = vmatpush.bf16.msra.mxu1 %v102_v0 }
   0x5   :  { %98 = vmatmul.msk.bf16.vlgmr.msra.gmra.mxu0 %vm43_vm0, %v100_v2  ;;  %99 = vmatmul.msk.bf16.vlgmr.msra.gmra.mxu1 %vm43_vm0, %v101_v3 }
   0x9   :  { %v104_v4 = vld [vmem:[#allocation2] ss:$0 sm:$0xff] }
  0x82   :  { %v59_v5 = vpop.f32.mrf.mxu0  ;;  %v64_v6 = vpop.f32.mrf.mxu1 }
  0x83   :  { %v60_v7 = vadd.f32 %v104_v4, %v59_v5  ;;  %v65_v8 = vadd.f32 %v104_v4, %v64_v6 }
  0x85   :  { %v69_v9 = vmax.f32 %v60_v7, 0.0  ;;  %v71_v10 = vmax.f32 %v65_v8, 0.0 }
  0x87   :  { %v73_v11 = vpack.c.bf16 %v69_v9, %v69_v9  ;;  %v75_v12 = vpack.c.bf16 %v71_v10, %v71_v10 }
  0x89   :  { %78 = vst.msk [vmem:[%s152_s3] sm:$0xf] %vm77_vm1, %v73_v11 }
  0x8a   :  { %80 = vst.msk [vmem:[%s152_s3 + $0x8] sm:$0xf] %vm77_vm1, %v75_v12  ;;  %v61_v13 = vpop.f32.mrf.mxu0  ;;  %v66_v14 = vpop.f32.mrf.mxu1 }
  0x8b   :  { %v62_v15 = vadd.f32 %v104_v4, %v61_v13  ;;  %v67_v16 = vadd.f32 %v104_v4, %v66_v14 }
  0x8d   :  { %v70_v17 = vmax.f32 %v62_v15, 0.0  ;;  %v72_v18 = vmax.f32 %v67_v16, 0.0 }
  0x8f   :  { %v74_v19 = vpack.c.bf16 %v70_v17, %v70_v17  ;;  %v76_v20 = vpack.c.bf16 %v72_v18, %v72_v18 }
  0x91   :  { %79 = vst.msk [vmem:[%s152_s3 + $0x4] sm:$0xf] %vm77_vm1, %v74_v19 }
  0x92   :  { %81 = vst.msk [vmem:[%s152_s3 + $0xc] sm:$0xf] %vm77_vm1, %v76_v20 }

// kernel: cloudnetp_forward.45
= control target key start
LH: loop header
LB: loop body
LE: loop exit
PB: predicated region body
PF: predicated region fallthrough
CT: control target
= control target key end

     0   :  { %vm119_vm0 = vcmask 130048   ;;  %vm196_vm1 = vcmask 125952   ;;  %s413_s1 = inlined_call_operand.vmem [shape: bf16[144,16], index: 1, kind: input, shape index: {}]   ;;  %s414_s0 = inlined_call_operand.vmem [shape: bf16[32,144], index: 0, kind: input, shape index: {}]   ;;  %s415_s2 = inlined_call_operand.vmem [shape: f32[1,16], index: 2, kind: input, shape index: {}]   ;;  %s416_s3 = inlined_call_operand.vmem [shape: bf16[32,16], index: 3, kind: input, shape index: {}]   ;;  %s417_s4 = inlined_call_operand.vmem [shape: bf16[32,16], index: 4, kind: input, shape index: {}]   ;;  %s418_s5 = inlined_call_operand.vmem [shape: bf16[32,16], index: 5, kind: output, shape index: {}]  }
   0x1   :  { %v270_v0 = vld [vmem:[%s413_s1 + $0x38] sm:$0xff]  ;;  %v271_v1 = vld [vmem:[%s413_s1 + $0x40] sm:$0xff]  ;;  %v269_v3 = vld [vmem:[%s413_s1 + $0x30] sm:$0xff] }
   0x2   :  { %v259_v2 = vld [vmem:[%s414_s0 + $0x4] sm:$0xf]  ;;  %126 = vmatpush.bf16.msra.mxu0 %v270_v0  ;;  %290 = vmatpush.bf16.msra.mxu2 %v270_v0  ;;  %v209_v4 = vld [vmem:[%s414_s0 + $0x8] sm:$0xf0]  ;;  %v266_v8 = vld [vmem:[%s413_s1 + $0x18] sm:$0xff] }
   0x3   :  { %152 = vmatpush.bf16.msra.mxu1 %v271_v1  ;;  %v212_v5 = vor.u32 %v259_v2, %v209_v4  ;;  %v268_v6 = vld [vmem:[%s413_s1 + $0x28] sm:$0xff]  ;;  %v267_v7 = vld [vmem:[%s413_s1 + $0x20] sm:$0xff]  ;;  %v261_v9 = vld [vmem:[%s414_s0 + $0x14] sm:$0xf] }
   0x4   :  { %v217_v10 = vld [vmem:[%s414_s0 + $0x18] sm:$0xf0]  ;;  %v265_v11 = vld [vmem:[%s413_s1 + $0x10] sm:$0xff]  ;;  %v264_v13 = vld [vmem:[%s413_s1 + $0x8] sm:$0xff] }
   0x5   :  { %v220_v12 = vor.u32 %v261_v9, %v217_v10  ;;  %v263_v14 = vld [vmem:[%s413_s1] sm:$0xff]  ;;  %v260_v16 = vld [vmem:[%s414_s0 + $0x4] sm:$0xf0]  ;;  %v215_v17 = vld [vmem:[%s414_s0 + $0x10] sm:$0xf] }
   0x6   :  { %127 = vmatpush.bf16.msra.mxu0 %v269_v3  ;;  %291 = vmatpush.bf16.msra.mxu2 %v269_v3  ;;  %v207_v15 = vld [vmem:[%s414_s0] sm:$0xf]  ;;  %v262_v18 = vld [vmem:[%s414_s0 + $0x14] sm:$0xf0]  ;;  %v288_v34 = vld [vmem:[%s416_s3 + $0x8] sm:$0xff]  }
   0x7   :  { %257 = vmatmul.msk.bf16.vlgmr.msra.gmra.mxu1 %vm119_vm0, %v212_v5  ;;  %v208_v19 = vor.u32 %v260_v16, %v207_v15  ;;  %v216_v20 = vor.u32 %v262_v18, %v215_v17  ;;  %v298_v23 = vld [vmem:[%s415_s2] ss:$0 sm:$0xff]  ;;  %v289_v37 = vld [vmem:[%s417_s4 + $0x8] sm:$0xff]   ;;  %v278_v41 = vunpack.c.l.bf16 %v288_v34  ;;  %v279_v59 = vunpack.c.h.bf16 %v288_v34 }
   0x8   :  { %v273_v25 = vld [vmem:[%s416_s3] sm:$0xff]   ;;  %v286_v43 = vunpack.c.l.bf16 %v289_v37  ;;  %v287_v62 = vunpack.c.h.bf16 %v289_v37 }
   0x9   :  { %v281_v27 = vld [vmem:[%s417_s4] sm:$0xff]   ;;  %v274_v29 = vunpack.c.l.bf16 %v273_v25  ;;  %v275_v47 = vunpack.c.h.bf16 %v273_v25 }
   0xa   :  { %128 = vmatpush.bf16.msra.mxu0 %v268_v6  ;;  %292 = vmatpush.bf16.msra.mxu2 %v268_v6  ;;  %v282_v31 = vunpack.c.l.bf16 %v281_v27  ;;  %v283_v50 = vunpack.c.h.bf16 %v281_v27 }
   0xe   :  { %129 = vmatpush.bf16.msra.mxu0 %v267_v7  ;;  %293 = vmatpush.bf16.msra.mxu2 %v267_v7 }
  0x12   :  { %130 = vmatpush.bf16.msra.mxu0 %v266_v8  ;;  %294 = vmatpush.bf16.msra.mxu2 %v266_v8 }
  0x16   :  { %131 = vmatpush.bf16.msra.mxu0 %v265_v11  ;;  %295 = vmatpush.bf16.msra.mxu2 %v265_v11 }
  0x17   :  { %258 = vmatmul.msk.bf16.gmra.mxu1 %vm119_vm0, %v220_v12 }
  0x1a   :  { %132 = vmatpush.bf16.msra.mxu0 %v264_v13  ;;  %296 = vmatpush.bf16.msra.mxu2 %v264_v13 }
  0x1e   :  { %133 = vmatpush.bf16.msra.mxu0 %v263_v14  ;;  %297 = vmatpush.bf16.msra.mxu2 %v263_v14 }
  0x21   :  { %134 = vmatmul.bf16.vlgmr.msra.gmra.mxu0 %v208_v19  ;;  %139 = vmatmul.bf16.vlgmr.msra.gmra.mxu2 %v216_v20 }
  0x84   :  { %v154_v21 = vpop.f32.mrf.mxu1 }
  0x8c   :  { %v156_v22 = vpop.f32.mrf.mxu1 }
  0x94   :  { %v159_v32 = vpop.f32.mrf.mxu1 }
  0x9c   :  { %v161_v55 = vpop.f32.mrf.mxu1 }
  0x9e   :  { %v135_v24 = vpop.f32.mrf.mxu0 }
  0x9f   :  { %v136_v26 = vadd.f32 %v298_v23, %v135_v24 }
  0xa1   :  { %v155_v28 = vadd.f32 %v154_v21, %v136_v26 }
  0xa3   :  { %v164_v30 = vmax.f32 %v155_v28, 0.0 }
  0xa4   :  { %v140_v33 = vpop.f32.mrf.mxu2 }
  0xa5   :  { %v176_v35 = vadd.f32 %v274_v29, %v164_v30  ;;  %v141_v36 = vadd.f32 %v298_v23, %v140_v33 }
  0xa6   :  { %v137_v38 = vpop.f32.mrf.mxu0 }
  0xa7   :  { %v188_v39 = vadd.f32 %v282_v31, %v176_v35  ;;  %v160_v40 = vadd.f32 %v159_v32, %v141_v36  ;;  %v138_v42 = vadd.f32 %v298_v23, %v137_v38 }
  0xa9   :  { %v192_v44 = vpack.c.bf16 %v188_v39, %v188_v39  ;;  %v166_v45 = vmax.f32 %v160_v40, 0.0  ;;  %v157_v46 = vadd.f32 %v156_v22, %v138_v42 }
  0xab   :  { %197 = vst.msk [vmem:[%s418_s5] sm:$0xf] %vm196_vm1, %v192_v44  ;;  %v178_v48 = vadd.f32 %v278_v41, %v166_v45  ;;  %v165_v49 = vmax.f32 %v157_v46, 0.0 }
  0xac   :  { %v142_v51 = vpop.f32.mrf.mxu2 }
  0xad   :  { %v190_v52 = vadd.f32 %v286_v43, %v178_v48  ;;  %v177_v53 = vadd.f32 %v275_v47, %v165_v49  ;;  %v143_v54 = vadd.f32 %v298_v23, %v142_v51 }
  0xaf   :  { %v194_v56 = vpack.c.bf16 %v190_v52, %v190_v52  ;;  %v189_v57 = vadd.f32 %v283_v50, %v177_v53  ;;  %v162_v58 = vadd.f32 %v161_v55, %v143_v54 }
  0xb1   :  { %199 = vst.msk [vmem:[%s418_s5 + $0x8] sm:$0xf] %vm196_vm1, %v194_v56  ;;  %v193_v60 = vpack.c.bf16 %v189_v57, %v189_v57  ;;  %v167_v61 = vmax.f32 %v162_v58, 0.0 }
  0xb3   :  { %198 = vst.msk [vmem:[%s418_s5 + $0x4] sm:$0xf] %vm196_vm1, %v193_v60  ;;  %v179_v63 = vadd.f32 %v279_v59, %v167_v61 }
  0xb5   :  { %v191_v0 = vadd.f32 %v287_v62, %v179_v63 }
  0xb7   :  { %v195_v1 = vpack.c.bf16 %v191_v0, %v191_v0 }
  0xb9   :  { %200 = vst.msk [vmem:[%s418_s5 + $0xc] sm:$0xf] %vm196_vm1, %v195_v1 }

// kernel: cloudnetp_forward.44
= control target key start
LH: loop header
LB: loop body
LE: loop exit
PB: predicated region body
PF: predicated region fallthrough
CT: control target
= control target key end

     0   :  { %vm201_vm0 = vcmask 261120   ;;  %vm273_vm1 = vcmask 125952   ;;  %s544_s1 = inlined_call_operand.vmem [shape: bf16[288,16], index: 1, kind: input, shape index: {}]   ;;  %s545_s0 = inlined_call_operand.vmem [shape: bf16[32,288], index: 0, kind: input, shape index: {}]   ;;  %s546_s2 = inlined_call_operand.vmem [shape: f32[1,16], index: 2, kind: input, shape index: {}]   ;;  %s547_s3 = inlined_call_operand.vmem [shape: bf16[32,16], index: 3, kind: output, shape index: {}]  }
   0x1   :  { %v393_v0 = vld [vmem:[%s544_s1 + $0x38] sm:$0xff]  ;;  %v392_v2 = vld [vmem:[%s544_s1 + $0x30] sm:$0xff]  ;;  %v403_v3 = vld [vmem:[%s544_s1 + $0x88] sm:$0xff] }
   0x2   :  { %v401_v1 = vld [vmem:[%s544_s1 + $0x78] sm:$0xff]  ;;  %208 = vmatpush.bf16.msra.mxu0 %v393_v0  ;;  %404 = vmatpush.bf16.msra.mxu3 %v393_v0  ;;  %v400_v4 = vld [vmem:[%s544_s1 + $0x70] sm:$0xff]  ;;  %v402_v5 = vld [vmem:[%s544_s1 + $0x80] sm:$0xff] }
   0x3   :  { %227 = vmatpush.bf16.msra.mxu1 %v401_v1  ;;  %252 = vmatpush.bf16.msra.mxu2 %v403_v3  ;;  %v292_v6 = vld [vmem:[%s545_s0 + $0x8] sm:$0xf]  ;;  %v382_v7 = vld [vmem:[%s545_s0 + $0x10] sm:$0xf0]  ;;  %v390_v11 = vld [vmem:[%s544_s1 + $0x20] sm:$0xff] }
   0x4   :  { %v391_v8 = vld [vmem:[%s544_s1 + $0x28] sm:$0xff]  ;;  %v293_v10 = vor.u32 %v382_v7, %v292_v6  ;;  %v398_v12 = vld [vmem:[%s544_s1 + $0x60] sm:$0xff]  ;;  %v389_v13 = vld [vmem:[%s544_s1 + $0x18] sm:$0xff] }
   0x5   :  { %v399_v9 = vld [vmem:[%s544_s1 + $0x68] sm:$0xff]  ;;  %v397_v14 = vld [vmem:[%s544_s1 + $0x58] sm:$0xff]  ;;  %v388_v15 = vld [vmem:[%s544_s1 + $0x10] sm:$0xff] }
   0x6   :  { %209 = vmatpush.bf16.msra.mxu0 %v392_v2  ;;  %405 = vmatpush.bf16.msra.mxu3 %v392_v2  ;;  %v396_v16 = vld [vmem:[%s544_s1 + $0x50] sm:$0xff]  ;;  %v304_v17 = vld [vmem:[%s545_s0 + $0x20] sm:$0xf]  ;;  %v385_v18 = vld [vmem:[%s545_s0 + $0x28] sm:$0xf0] }
   0x7   :  { %228 = vmatpush.bf16.msra.mxu1 %v400_v4  ;;  %253 = vmatpush.bf16.msra.mxu2 %v402_v5  ;;  %v387_v19 = vld [vmem:[%s544_s1 + $0x8] sm:$0xff]  ;;  %v305_v21 = vor.u32 %v385_v18, %v304_v17  ;;  %v386_v22 = vld [vmem:[%s544_s1] sm:$0xff]  ;;  %v296_v25 = vld [vmem:[%s545_s0 + $0x18] sm:$0xf] }
   0x8   :  { %v395_v20 = vld [vmem:[%s544_s1 + $0x48] sm:$0xff]  ;;  %v284_v23 = vld [vmem:[%s545_s0] sm:$0xf]  ;;  %v384_v26 = vld [vmem:[%s545_s0 + $0x20] sm:$0xf0] }
   0x9   :  { %v381_v24 = vld [vmem:[%s545_s0 + $0x8] sm:$0xf0]  ;;  %v394_v27 = vld [vmem:[%s544_s1 + $0x40] sm:$0xff]  ;;  %v286_v29 = vld [vmem:[%s545_s0 + $0xc] sm:$0xf0]  ;;  %v297_v31 = vor.u32 %v384_v26, %v296_v25 }
   0xa   :  { %210 = vmatpush.bf16.msra.mxu0 %v391_v8  ;;  %406 = vmatpush.bf16.msra.mxu3 %v391_v8  ;;  %v380_v28 = vld [vmem:[%s545_s0 + $0x4] sm:$0xf]  ;;  %v285_v30 = vor.u32 %v381_v24, %v284_v23  ;;  %v383_v33 = vld [vmem:[%s545_s0 + $0x1c] sm:$0xf]  ;;  %v298_v34 = vld [vmem:[%s545_s0 + $0x24] sm:$0xf0] }
   0xb   :  { %229 = vmatpush.bf16.msra.mxu1 %v399_v9  ;;  %378 = vmatmul.msk.bf16.vlgmr.msra.gmra.mxu2 %vm201_vm0, %v293_v10  ;;  %v289_v32 = vor.u32 %v380_v28, %v286_v29  ;;  %v301_v35 = vor.u32 %v383_v33, %v298_v34  ;;  %v412_v37 = vld [vmem:[%s546_s2] ss:$0 sm:$0xff] }
   0xe   :  { %211 = vmatpush.bf16.msra.mxu0 %v390_v11  ;;  %407 = vmatpush.bf16.msra.mxu3 %v390_v11 }
   0xf   :  { %230 = vmatpush.bf16.msra.mxu1 %v398_v12 }
  0x12   :  { %212 = vmatpush.bf16.msra.mxu0 %v389_v13  ;;  %408 = vmatpush.bf16.msra.mxu3 %v389_v13 }
  0x13   :  { %231 = vmatpush.bf16.msra.mxu1 %v397_v14 }
  0x16   :  { %213 = vmatpush.bf16.msra.mxu0 %v388_v15  ;;  %409 = vmatpush.bf16.msra.mxu3 %v388_v15 }
  0x17   :  { %232 = vmatpush.bf16.msra.mxu1 %v396_v16 }
  0x1a   :  { %214 = vmatpush.bf16.msra.mxu0 %v387_v19  ;;  %410 = vmatpush.bf16.msra.mxu3 %v387_v19 }
  0x1b   :  { %233 = vmatpush.bf16.msra.mxu1 %v395_v20  ;;  %379 = vmatmul.msk.bf16.gmra.mxu2 %vm201_vm0, %v305_v21 }
  0x1e   :  { %215 = vmatpush.bf16.msra.mxu0 %v386_v22  ;;  %411 = vmatpush.bf16.msra.mxu3 %v386_v22 }
  0x1f   :  { %234 = vmatpush.bf16.msra.mxu1 %v394_v27 }
  0x21   :  { %216 = vmatmul.bf16.vlgmr.msra.gmra.mxu0 %v285_v30  ;;  %221 = vmatmul.bf16.vlgmr.msra.gmra.mxu3 %v297_v31 }
  0x22   :  { %235 = vmatmul.bf16.vlgmr.msra.gmra.mxu1 %v289_v32 }
  0x32   :  { %240 = vmatmul.bf16.gmra.mxu1 %v301_v35 }
  0x8e   :  { %v255_v36 = vpop.f32.mrf.mxu2 }
  0x96   :  { %v257_v44 = vpop.f32.mrf.mxu2 }
  0x9e   :  { %v217_v38 = vpop.f32.mrf.mxu0  ;;  %v260_v55 = vpop.f32.mrf.mxu2 }
  0x9f   :  { %v218_v39 = vadd.f32 %v412_v37, %v217_v38  ;;  %v236_v40 = vpop.f32.mrf.mxu1 }
  0xa1   :  { %v237_v41 = vadd.f32 %v236_v40, %v218_v39 }
  0xa3   :  { %v256_v42 = vadd.f32 %v255_v36, %v237_v41 }
  0xa4   :  { %v222_v49 = vpop.f32.mrf.mxu3 }
  0xa5   :  { %v265_v43 = vmax.f32 %v256_v42, 0.0  ;;  %v223_v52 = vadd.f32 %v412_v37, %v222_v49 }
  0xa6   :  { %v219_v45 = vpop.f32.mrf.mxu0  ;;  %v262_v1 = vpop.f32.mrf.mxu2 }
  0xa7   :  { %v269_v46 = vpack.c.bf16 %v265_v43, %v265_v43  ;;  %v220_v47 = vadd.f32 %v412_v37, %v219_v45  ;;  %v238_v48 = vpop.f32.mrf.mxu1 }
  0xa9   :  { %274 = vst.msk [vmem:[%s547_s3] sm:$0xf] %vm273_vm1, %v269_v46  ;;  %v239_v50 = vadd.f32 %v238_v48, %v220_v47 }
  0xab   :  { %v258_v51 = vadd.f32 %v257_v44, %v239_v50 }
  0xac   :  { %v224_v59 = vpop.f32.mrf.mxu3 }
  0xad   :  { %v266_v53 = vmax.f32 %v258_v51, 0.0  ;;  %v225_v61 = vadd.f32 %v412_v37, %v224_v59 }
  0xaf   :  { %v270_v54 = vpack.c.bf16 %v266_v53, %v266_v53  ;;  %v241_v56 = vpop.f32.mrf.mxu1 }
  0xb0   :  { %v242_v57 = vadd.f32 %v241_v56, %v223_v52 }
  0xb1   :  { %275 = vst.msk [vmem:[%s547_s3 + $0x4] sm:$0xf] %vm273_vm1, %v270_v54 }
  0xb2   :  { %v261_v58 = vadd.f32 %v260_v55, %v242_v57 }
  0xb4   :  { %v267_v60 = vmax.f32 %v261_v58, 0.0 }
  0xb6   :  { %v271_v62 = vpack.c.bf16 %v267_v60, %v267_v60 }
  0xb7   :  { %v243_v63 = vpop.f32.mrf.mxu1 }
  0xb8   :  { %276 = vst.msk [vmem:[%s547_s3 + $0x8] sm:$0xf] %vm273_vm1, %v271_v62  ;;  %v244_v0 = vadd.f32 %v243_v63, %v225_v61 }
  0xba   :  { %v263_v2 = vadd.f32 %v262_v1, %v244_v0 }
  0xbc   :  { %v268_v3 = vmax.f32 %v263_v2, 0.0 }
  0xbe   :  { %v272_v4 = vpack.c.bf16 %v268_v3, %v268_v3 }
  0xc0   :  { %277 = vst.msk [vmem:[%s547_s3 + $0xc] sm:$0xf] %vm273_vm1, %v272_v4 }

// kernel: cloudnetp_forward.50
= control target key start
LH: loop header
LB: loop body
LE: loop exit
PB: predicated region body
PF: predicated region fallthrough
CT: control target
= control target key end

     0   :  { %vm50_vm0 = vcmask 125952   ;;  %s136_s0 = inlined_call_operand.vmem [shape: bf16[32,16], index: 0, kind: input, shape index: {}]   ;;  %s137_s1 = inlined_call_operand.vmem [shape: bf16[32,16], index: 1, kind: input, shape index: {}]   ;;  %s138_s2 = inlined_call_operand.vmem [shape: bf16[32,16], index: 2, kind: input, shape index: {}]   ;;  %s139_s3 = inlined_call_operand.vmem [shape: bf16[32,16], index: 3, kind: output, shape index: {}]  }
   0x1   :  { %v60_v0 = vld [vmem:[%s136_s0] sm:$0xff]   ;;  %v83_v7 = vld [vmem:[%s136_s0 + $0x8] sm:$0xff]  }
   0x2   :  { %v68_v1 = vld [vmem:[%s137_s1] sm:$0xff]   ;;  %v61_v3 = vunpack.c.l.bf16 %v60_v0  ;;  %v62_v6 = vunpack.c.h.bf16 %v60_v0  ;;  %v84_v8 = vld [vmem:[%s137_s1 + $0x8] sm:$0xff]   ;;  %v65_v12 = vunpack.c.l.bf16 %v83_v7  ;;  %v66_v16 = vunpack.c.h.bf16 %v83_v7 }
   0x3   :  { %v76_v2 = vld [vmem:[%s138_s2] sm:$0xff]   ;;  %v69_v4 = vunpack.c.l.bf16 %v68_v1  ;;  %v85_v9 = vld [vmem:[%s138_s2 + $0x8] sm:$0xff]   ;;  %v70_v10 = vunpack.c.h.bf16 %v68_v1  ;;  %v73_v13 = vunpack.c.l.bf16 %v84_v8  ;;  %v74_v17 = vunpack.c.h.bf16 %v84_v8 }
   0x4   :  { %v77_v5 = vunpack.c.l.bf16 %v76_v2  ;;  %v78_v11 = vunpack.c.h.bf16 %v76_v2  ;;  %v81_v15 = vunpack.c.l.bf16 %v85_v9  ;;  %v82_v20 = vunpack.c.h.bf16 %v85_v9 }
   0x5   :  { %v30_v14 = vadd.f32 %v69_v4, %v61_v3  ;;  %v31_v18 = vadd.f32 %v70_v10, %v62_v6  ;;  %v32_v19 = vadd.f32 %v73_v13, %v65_v12  ;;  %v33_v22 = vadd.f32 %v74_v17, %v66_v16 }
   0x7   :  { %v42_v21 = vadd.f32 %v77_v5, %v30_v14  ;;  %v43_v23 = vadd.f32 %v78_v11, %v31_v18  ;;  %v44_v24 = vadd.f32 %v81_v15, %v32_v19  ;;  %v45_v26 = vadd.f32 %v82_v20, %v33_v22 }
   0x9   :  { %v46_v25 = vpack.c.bf16 %v42_v21, %v42_v21  ;;  %v47_v27 = vpack.c.bf16 %v43_v23, %v43_v23  ;;  %v48_v28 = vpack.c.bf16 %v44_v24, %v44_v24  ;;  %v49_v29 = vpack.c.bf16 %v45_v26, %v45_v26 }
   0xb   :  { %51 = vst.msk [vmem:[%s139_s3] sm:$0xf] %vm50_vm0, %v46_v25 }
   0xc   :  { %52 = vst.msk [vmem:[%s139_s3 + $0x4] sm:$0xf] %vm50_vm0, %v47_v27 }
   0xd   :  { %53 = vst.msk [vmem:[%s139_s3 + $0x8] sm:$0xf] %vm50_vm0, %v48_v28 }
   0xe   :  { %54 = vst.msk [vmem:[%s139_s3 + $0xc] sm:$0xf] %vm50_vm0, %v49_v29 }

// kernel: cloudnetp_forward.49
= control target key start
LH: loop header
LB: loop body
LE: loop exit
PB: predicated region body
PF: predicated region fallthrough
CT: control target
= control target key end

     0   :  { %vm44_vm0 = vcmask 261120   ;;  %vm66_vm1 = vcmask 3072   ;;  %s128_s1 = inlined_call_operand.vmem [shape: bf16[32,1], index: 1, kind: input, shape index: {}]   ;;  %s129_s2 = inlined_call_operand.<no memory space> [shape: f32[1,1], index: 2, kind: input, shape index: {}]   ;;  %s130_s0 = inlined_call_operand.vmem [shape: bf16[16,32], index: 0, kind: input, shape index: {}]   ;;  %s131_s3 = inlined_call_operand.vmem [shape: bf16[16,1], index: 3, kind: output, shape index: {}]  }
   0x1   :  { %v88_v0 = vld [vmem:[%s128_s1 + $0x8] sm:$0xff]  ;;  %v8_v1 = vstv %s129_s2  ;;  %v87_v2 = vld [vmem:[%s128_s1] sm:$0xff] }
   0x2   :  { %9 = vst [vmem:[#allocation2] sm:$0x1] %v8_v1  ;;  %54 = vmatpush.bf16.msra.mxu0 %v88_v0  ;;  %v86_v3 = vld [vmem:[%s130_s0] sm:$0xff] }
   0x6   :  { %55 = vmatpush.bf16.msra.mxu0 %v87_v2 }
   0x9   :  { %85 = vmatmul.msk.bf16.vlgmr.msra.gmra.mxu0 %vm44_vm0, %v86_v3  ;;  %v89_v4 = vld [vmem:[#allocation2] ss:$0 sm:$0xff] }
  0x86   :  { %v57_v5 = vpop.f32.mrf.mxu0 }
  0x87   :  { %v58_v6 = vadd.f32 %v89_v4, %v57_v5 }
  0x89   :  { %v62_v7 = vmax.f32 %v58_v6, 0.0 }
  0x8b   :  { %v64_v8 = vpack.c.bf16 %v62_v7, %v62_v7 }
  0x8d   :  { %67 = vst.msk [vmem:[%s131_s3] sm:$0xf] %vm66_vm1, %v64_v8 }
  0x8e   :  { %v59_v9 = vpop.f32.mrf.mxu0 }
  0x8f   :  { %v60_v10 = vadd.f32 %v89_v4, %v59_v9 }
  0x91   :  { %v63_v11 = vmax.f32 %v60_v10, 0.0 }
  0x93   :  { %v65_v12 = vpack.c.bf16 %v63_v11, %v63_v11 }
  0x95   :  { %68 = vst.msk [vmem:[%s131_s3 + $0x4] sm:$0xf] %vm66_vm1, %v65_v12 }

// kernel: cloudnetp_forward.51
= control target key start
LH: loop header
LB: loop body
LE: loop exit
PB: predicated region body
PF: predicated region fallthrough
CT: control target
= control target key end

     0   :  { %vm349_vm0 = vcmask 1043456   ;;  %vm350_vm1 = vcmask 1044480   ;;  %v796_v2 = vmov 65535   ;;  %vm252_vm2 = vcmask 72704   ;;  %s1276_s1 = inlined_call_operand.vmem [shape: bf16[9,1], index: 1, kind: input, shape index: {}]   ;;  %s1277_s0 = inlined_call_operand.vmem [shape: bf16[512,9], index: 0, kind: input, shape index: {}]   ;;  %s1278_s2 = inlined_call_operand.<no memory space> [shape: f32[1,1], index: 2, kind: input, shape index: {}]   ;;  %s1279_s3 = inlined_call_operand.vmem [shape: f32[512,1], index: 3, kind: output, shape index: {}]  }
   0x1   :  { %v724_v0 = vld [vmem:[%s1276_s1] sm:$0xf]  ;;  %v790_v1 = vld [vmem:[%s1276_s1] sm:$0x10]  ;;  %v351_v3 = vsel %vm349_vm0, 4294967295, %v796_v2  ;;  %v759_v11 = vld [vmem:[%s1277_s0 + $0x8] sm:$0xff]  ;;  %v8_v31 = vstv %s1278_s2 }
   0x2   :  { %v725_v4 = vor.u32 %v790_v1, %v724_v0  ;;  %v352_v5 = vsel %vm350_vm1, %v351_v3, 0  ;;  %v758_v7 = vld [vmem:[%s1277_s0] sm:$0xff]  ;;  %v767_v12 = vld [vmem:[%s1277_s0 + $0x48] sm:$0xff]  ;;  %v760_v15 = vld [vmem:[%s1277_s0 + $0x10] sm:$0xff]  ;;  %9 = vst [vmem:[#allocation2] sm:$0x1] %v8_v31 }
   0x3   :  { %v766_v8 = vld [vmem:[%s1277_s0 + $0x40] sm:$0xff]  ;;  %v775_v13 = vld [vmem:[%s1277_s0 + $0x88] sm:$0xff]  ;;  %v768_v16 = vld [vmem:[%s1277_s0 + $0x50] sm:$0xff]  ;;  %vm525_vm3 = vcmask 7168  }
   0x4   :  { %v354_v6 = vand.u32 %v725_v4, %v352_v5  ;;  %v774_v9 = vld [vmem:[%s1277_s0 + $0x80] sm:$0xff]  ;;  %v783_v14 = vld [vmem:[%s1277_s0 + $0xc8] sm:$0xff]  ;;  %v776_v17 = vld [vmem:[%s1277_s0 + $0x90] sm:$0xff] }
   0x5   :  { %v782_v10 = vld [vmem:[%s1277_s0 + $0xc0] sm:$0xff]  ;;  %v784_v18 = vld [vmem:[%s1277_s0 + $0xd0] sm:$0xff]  ;;  %v761_v19 = vld [vmem:[%s1277_s0 + $0x18] sm:$0xff] }
   0x6   :  { %363 = vmatpush.bf16.msra.mxu0 %v354_v6  ;;  %791 = vmatpush.bf16.msra.mxu1 %v354_v6  ;;  %v769_v20 = vld [vmem:[%s1277_s0 + $0x58] sm:$0xff]  ;;  %v762_v23 = vld [vmem:[%s1277_s0 + $0x20] sm:$0xff]  ;;  %v763_v27 = vld [vmem:[%s1277_s0 + $0x28] sm:$0xff] }
   0x7   :  { %792 = vmatpush.bf16.msra.mxu2 %v354_v6  ;;  %793 = vmatpush.bf16.msra.mxu3 %v354_v6  ;;  %v777_v21 = vld [vmem:[%s1277_s0 + $0x98] sm:$0xff]  ;;  %v770_v24 = vld [vmem:[%s1277_s0 + $0x60] sm:$0xff]  ;;  %v771_v28 = vld [vmem:[%s1277_s0 + $0x68] sm:$0xff] }
   0x8   :  { %v785_v22 = vld [vmem:[%s1277_s0 + $0xd8] sm:$0xff]  ;;  %v778_v25 = vld [vmem:[%s1277_s0 + $0xa0] sm:$0xff]  ;;  %v779_v29 = vld [vmem:[%s1277_s0 + $0xa8] sm:$0xff] }
   0x9   :  { %726 = vmatmul.msk.bf16.vlgmr.msra.gmra.mxu0 %vm252_vm2, %v758_v7  ;;  %734 = vmatmul.msk.bf16.vlgmr.msra.gmra.mxu1 %vm252_vm2, %v766_v8  ;;  %v786_v26 = vld [vmem:[%s1277_s0 + $0xe0] sm:$0xff]  ;;  %v787_v30 = vld [vmem:[%s1277_s0 + $0xe8] sm:$0xff]  ;;  %v764_v32 = vld [vmem:[%s1277_s0 + $0x30] sm:$0xff] }
   0xa   :  { %742 = vmatmul.msk.bf16.vlgmr.msra.gmra.mxu2 %vm252_vm2, %v774_v9  ;;  %750 = vmatmul.msk.bf16.vlgmr.msra.gmra.mxu3 %vm252_vm2, %v782_v10  ;;  %v772_v33 = vld [vmem:[%s1277_s0 + $0x70] sm:$0xff]  ;;  %v765_v36 = vld [vmem:[%s1277_s0 + $0x38] sm:$0xff]  ;;  %v954_v40 = vld [vmem:[#allocation2] ss:$0 sm:$0xff] }
   0xb   :  { %v780_v34 = vld [vmem:[%s1277_s0 + $0xb0] sm:$0xff]  ;;  %v773_v37 = vld [vmem:[%s1277_s0 + $0x78] sm:$0xff] }
   0xc   :  { %v788_v35 = vld [vmem:[%s1277_s0 + $0xf0] sm:$0xff]  ;;  %v781_v38 = vld [vmem:[%s1277_s0 + $0xb8] sm:$0xff] }
   0xd   :  { %v789_v39 = vld [vmem:[%s1277_s0 + $0xf8] sm:$0xff] }
  0x19   :  { %727 = vmatmul.msk.bf16.gmra.mxu0 %vm252_vm2, %v759_v11  ;;  %735 = vmatmul.msk.bf16.gmra.mxu1 %vm252_vm2, %v767_v12 }
  0x1a   :  { %743 = vmatmul.msk.bf16.gmra.mxu2 %vm252_vm2, %v775_v13  ;;  %751 = vmatmul.msk.bf16.gmra.mxu3 %vm252_vm2, %v783_v14 }
  0x29   :  { %728 = vmatmul.msk.bf16.gmra.mxu0 %vm252_vm2, %v760_v15  ;;  %736 = vmatmul.msk.bf16.gmra.mxu1 %vm252_vm2, %v768_v16 }
  0x2a   :  { %744 = vmatmul.msk.bf16.gmra.mxu2 %vm252_vm2, %v776_v17  ;;  %752 = vmatmul.msk.bf16.gmra.mxu3 %vm252_vm2, %v784_v18 }
  0x39   :  { %729 = vmatmul.msk.bf16.gmra.mxu0 %vm252_vm2, %v761_v19  ;;  %737 = vmatmul.msk.bf16.gmra.mxu1 %vm252_vm2, %v769_v20 }
  0x3a   :  { %745 = vmatmul.msk.bf16.gmra.mxu2 %vm252_vm2, %v777_v21  ;;  %753 = vmatmul.msk.bf16.gmra.mxu3 %vm252_vm2, %v785_v22 }
  0x49   :  { %730 = vmatmul.msk.bf16.gmra.mxu0 %vm252_vm2, %v762_v23  ;;  %738 = vmatmul.msk.bf16.gmra.mxu1 %vm252_vm2, %v770_v24 }
  0x4a   :  { %746 = vmatmul.msk.bf16.gmra.mxu2 %vm252_vm2, %v778_v25  ;;  %754 = vmatmul.msk.bf16.gmra.mxu3 %vm252_vm2, %v786_v26 }
  0x59   :  { %731 = vmatmul.msk.bf16.gmra.mxu0 %vm252_vm2, %v763_v27  ;;  %739 = vmatmul.msk.bf16.gmra.mxu1 %vm252_vm2, %v771_v28 }
  0x5a   :  { %747 = vmatmul.msk.bf16.gmra.mxu2 %vm252_vm2, %v779_v29  ;;  %755 = vmatmul.msk.bf16.gmra.mxu3 %vm252_vm2, %v787_v30 }
  0x69   :  { %732 = vmatmul.msk.bf16.gmra.mxu0 %vm252_vm2, %v764_v32  ;;  %740 = vmatmul.msk.bf16.gmra.mxu1 %vm252_vm2, %v772_v33 }
  0x6a   :  { %748 = vmatmul.msk.bf16.gmra.mxu2 %vm252_vm2, %v780_v34  ;;  %756 = vmatmul.msk.bf16.gmra.mxu3 %vm252_vm2, %v788_v35 }
  0x79   :  { %733 = vmatmul.msk.bf16.gmra.mxu0 %vm252_vm2, %v765_v36  ;;  %741 = vmatmul.msk.bf16.gmra.mxu1 %vm252_vm2, %v773_v37 }
  0x7a   :  { %749 = vmatmul.msk.bf16.gmra.mxu2 %vm252_vm2, %v781_v38  ;;  %757 = vmatmul.msk.bf16.gmra.mxu3 %vm252_vm2, %v789_v39 }
  0x86   :  { %v365_v41 = vpop.f32.mrf.mxu0  ;;  %v405_v42 = vpop.f32.mrf.mxu1 }
  0x87   :  { %v366_v43 = vadd.f32 %v954_v40, %v365_v41  ;;  %v406_v44 = vadd.f32 %v954_v40, %v405_v42 }
  0x89   :  { %526 = vst.msk [vmem:[%s1279_s3] sm:$0xff] %vm525_vm3, %v366_v43 }
  0x8a   :  { %542 = vst.msk [vmem:[%s1279_s3 + $0x80] sm:$0xff] %vm525_vm3, %v406_v44 }
  0x8d   :  { %v445_v45 = vpop.f32.mrf.mxu2  ;;  %v485_v46 = vpop.f32.mrf.mxu3 }
  0x8e   :  { %v446_v47 = vadd.f32 %v954_v40, %v445_v45  ;;  %v486_v48 = vadd.f32 %v954_v40, %v485_v46  ;;  %v367_v49 = vpop.f32.mrf.mxu0  ;;  %v407_v50 = vpop.f32.mrf.mxu1 }
  0x8f   :  { %v368_v51 = vadd.f32 %v954_v40, %v367_v49  ;;  %v408_v52 = vadd.f32 %v954_v40, %v407_v50 }
  0x90   :  { %558 = vst.msk [vmem:[%s1279_s3 + $0x100] sm:$0xff] %vm525_vm3, %v446_v47 }
  0x91   :  { %574 = vst.msk [vmem:[%s1279_s3 + $0x180] sm:$0xff] %vm525_vm3, %v486_v48 }
  0x92   :  { %527 = vst.msk [vmem:[%s1279_s3 + $0x8] sm:$0xff] %vm525_vm3, %v368_v51 }
  0x93   :  { %543 = vst.msk [vmem:[%s1279_s3 + $0x88] sm:$0xff] %vm525_vm3, %v408_v52 }
  0x95   :  { %v447_v53 = vpop.f32.mrf.mxu2  ;;  %v487_v54 = vpop.f32.mrf.mxu3 }
  0x96   :  { %v448_v55 = vadd.f32 %v954_v40, %v447_v53  ;;  %v488_v56 = vadd.f32 %v954_v40, %v487_v54  ;;  %v370_v57 = vpop.f32.mrf.mxu0  ;;  %v410_v58 = vpop.f32.mrf.mxu1 }
  0x97   :  { %v371_v59 = vadd.f32 %v954_v40, %v370_v57  ;;  %v411_v60 = vadd.f32 %v954_v40, %v410_v58 }
  0x98   :  { %559 = vst.msk [vmem:[%s1279_s3 + $0x108] sm:$0xff] %vm525_vm3, %v448_v55 }
  0x99   :  { %575 = vst.msk [vmem:[%s1279_s3 + $0x188] sm:$0xff] %vm525_vm3, %v488_v56 }
  0x9a   :  { %528 = vst.msk [vmem:[%s1279_s3 + $0x10] sm:$0xff] %vm525_vm3, %v371_v59 }
  0x9b   :  { %544 = vst.msk [vmem:[%s1279_s3 + $0x90] sm:$0xff] %vm525_vm3, %v411_v60 }
  0x9d   :  { %v450_v61 = vpop.f32.mrf.mxu2  ;;  %v490_v62 = vpop.f32.mrf.mxu3 }
  0x9e   :  { %v451_v63 = vadd.f32 %v954_v40, %v450_v61  ;;  %v491_v0 = vadd.f32 %v954_v40, %v490_v62  ;;  %v372_v1 = vpop.f32.mrf.mxu0  ;;  %v412_v2 = vpop.f32.mrf.mxu1 }
  0x9f   :  { %v373_v3 = vadd.f32 %v954_v40, %v372_v1  ;;  %v413_v4 = vadd.f32 %v954_v40, %v412_v2 }
  0xa0   :  { %560 = vst.msk [vmem:[%s1279_s3 + $0x110] sm:$0xff] %vm525_vm3, %v451_v63 }
  0xa1   :  { %576 = vst.msk [vmem:[%s1279_s3 + $0x190] sm:$0xff] %vm525_vm3, %v491_v0 }
  0xa2   :  { %529 = vst.msk [vmem:[%s1279_s3 + $0x18] sm:$0xff] %vm525_vm3, %v373_v3 }
  0xa3   :  { %545 = vst.msk [vmem:[%s1279_s3 + $0x98] sm:$0xff] %vm525_vm3, %v413_v4 }
  0xa5   :  { %v452_v5 = vpop.f32.mrf.mxu2  ;;  %v492_v6 = vpop.f32.mrf.mxu3 }
  0xa6   :  { %v453_v7 = vadd.f32 %v954_v40, %v452_v5  ;;  %v493_v8 = vadd.f32 %v954_v40, %v492_v6  ;;  %v375_v9 = vpop.f32.mrf.mxu0  ;;  %v415_v10 = vpop.f32.mrf.mxu1 }
  0xa7   :  { %v376_v11 = vadd.f32 %v954_v40, %v375_v9  ;;  %v416_v12 = vadd.f32 %v954_v40, %v415_v10 }
  0xa8   :  { %561 = vst.msk [vmem:[%s1279_s3 + $0x118] sm:$0xff] %vm525_vm3, %v453_v7 }
  0xa9   :  { %577 = vst.msk [vmem:[%s1279_s3 + $0x198] sm:$0xff] %vm525_vm3, %v493_v8 }
  0xaa   :  { %530 = vst.msk [vmem:[%s1279_s3 + $0x20] sm:$0xff] %vm525_vm3, %v376_v11 }
  0xab   :  { %546 = vst.msk [vmem:[%s1279_s3 + $0xa0] sm:$0xff] %vm525_vm3, %v416_v12 }
  0xad   :  { %v455_v13 = vpop.f32.mrf.mxu2  ;;  %v495_v14 = vpop.f32.mrf.mxu3 }
  0xae   :  { %v456_v15 = vadd.f32 %v954_v40, %v455_v13  ;;  %v496_v16 = vadd.f32 %v954_v40, %v495_v14  ;;  %v377_v17 = vpop.f32.mrf.mxu0  ;;  %v417_v18 = vpop.f32.mrf.mxu1 }
  0xaf   :  { %v378_v19 = vadd.f32 %v954_v40, %v377_v17  ;;  %v418_v20 = vadd.f32 %v954_v40, %v417_v18 }
  0xb0   :  { %562 = vst.msk [vmem:[%s1279_s3 + $0x120] sm:$0xff] %vm525_vm3, %v456_v15 }
  0xb1   :  { %578 = vst.msk [vmem:[%s1279_s3 + $0x1a0] sm:$0xff] %vm525_vm3, %v496_v16 }
  0xb2   :  { %531 = vst.msk [vmem:[%s1279_s3 + $0x28] sm:$0xff] %vm525_vm3, %v378_v19 }
  0xb3   :  { %547 = vst.msk [vmem:[%s1279_s3 + $0xa8] sm:$0xff] %vm525_vm3, %v418_v20 }
  0xb5   :  { %v457_v21 = vpop.f32.mrf.mxu2  ;;  %v497_v22 = vpop.f32.mrf.mxu3 }
  0xb6   :  { %v458_v23 = vadd.f32 %v954_v40, %v457_v21  ;;  %v498_v24 = vadd.f32 %v954_v40, %v497_v22  ;;  %v380_v25 = vpop.f32.mrf.mxu0  ;;  %v420_v26 = vpop.f32.mrf.mxu1 }
  0xb7   :  { %v381_v27 = vadd.f32 %v954_v40, %v380_v25  ;;  %v421_v28 = vadd.f32 %v954_v40, %v420_v26 }
  0xb8   :  { %563 = vst.msk [vmem:[%s1279_s3 + $0x128] sm:$0xff] %vm525_vm3, %v458_v23 }
  0xb9   :  { %579 = vst.msk [vmem:[%s1279_s3 + $0x1a8] sm:$0xff] %vm525_vm3, %v498_v24 }
  0xba   :  { %532 = vst.msk [vmem:[%s1279_s3 + $0x30] sm:$0xff] %vm525_vm3, %v381_v27 }
  0xbb   :  { %548 = vst.msk [vmem:[%s1279_s3 + $0xb0] sm:$0xff] %vm525_vm3, %v421_v28 }
  0xbd   :  { %v460_v29 = vpop.f32.mrf.mxu2  ;;  %v500_v30 = vpop.f32.mrf.mxu3 }
  0xbe   :  { %v461_v31 = vadd.f32 %v954_v40, %v460_v29  ;;  %v501_v32 = vadd.f32 %v954_v40, %v500_v30  ;;  %v382_v33 = vpop.f32.mrf.mxu0  ;;  %v422_v34 = vpop.f32.mrf.mxu1 }
  0xbf   :  { %v383_v35 = vadd.f32 %v954_v40, %v382_v33  ;;  %v423_v36 = vadd.f32 %v954_v40, %v422_v34 }
  0xc0   :  { %564 = vst.msk [vmem:[%s1279_s3 + $0x130] sm:$0xff] %vm525_vm3, %v461_v31 }
  0xc1   :  { %580 = vst.msk [vmem:[%s1279_s3 + $0x1b0] sm:$0xff] %vm525_vm3, %v501_v32 }
  0xc2   :  { %533 = vst.msk [vmem:[%s1279_s3 + $0x38] sm:$0xff] %vm525_vm3, %v383_v35 }
  0xc3   :  { %549 = vst.msk [vmem:[%s1279_s3 + $0xb8] sm:$0xff] %vm525_vm3, %v423_v36 }
  0xc5   :  { %v462_v37 = vpop.f32.mrf.mxu2  ;;  %v502_v38 = vpop.f32.mrf.mxu3 }
  0xc6   :  { %v463_v39 = vadd.f32 %v954_v40, %v462_v37  ;;  %v503_v41 = vadd.f32 %v954_v40, %v502_v38  ;;  %v385_v42 = vpop.f32.mrf.mxu0  ;;  %v425_v43 = vpop.f32.mrf.mxu1 }
  0xc7   :  { %v386_v44 = vadd.f32 %v954_v40, %v385_v42  ;;  %v426_v45 = vadd.f32 %v954_v40, %v425_v43 }
  0xc8   :  { %565 = vst.msk [vmem:[%s1279_s3 + $0x138] sm:$0xff] %vm525_vm3, %v463_v39 }
  0xc9   :  { %581 = vst.msk [vmem:[%s1279_s3 + $0x1b8] sm:$0xff] %vm525_vm3, %v503_v41 }
  0xca   :  { %534 = vst.msk [vmem:[%s1279_s3 + $0x40] sm:$0xff] %vm525_vm3, %v386_v44 }
  0xcb   :  { %550 = vst.msk [vmem:[%s1279_s3 + $0xc0] sm:$0xff] %vm525_vm3, %v426_v45 }
  0xcd   :  { %v465_v46 = vpop.f32.mrf.mxu2  ;;  %v505_v47 = vpop.f32.mrf.mxu3 }
  0xce   :  { %v466_v48 = vadd.f32 %v954_v40, %v465_v46  ;;  %v506_v49 = vadd.f32 %v954_v40, %v505_v47  ;;  %v387_v50 = vpop.f32.mrf.mxu0  ;;  %v427_v51 = vpop.f32.mrf.mxu1 }
  0xcf   :  { %v388_v52 = vadd.f32 %v954_v40, %v387_v50  ;;  %v428_v53 = vadd.f32 %v954_v40, %v427_v51 }
  0xd0   :  { %566 = vst.msk [vmem:[%s1279_s3 + $0x140] sm:$0xff] %vm525_vm3, %v466_v48 }
  0xd1   :  { %582 = vst.msk [vmem:[%s1279_s3 + $0x1c0] sm:$0xff] %vm525_vm3, %v506_v49 }
  0xd2   :  { %535 = vst.msk [vmem:[%s1279_s3 + $0x48] sm:$0xff] %vm525_vm3, %v388_v52 }
  0xd3   :  { %551 = vst.msk [vmem:[%s1279_s3 + $0xc8] sm:$0xff] %vm525_vm3, %v428_v53 }
  0xd5   :  { %v467_v54 = vpop.f32.mrf.mxu2  ;;  %v507_v55 = vpop.f32.mrf.mxu3 }
  0xd6   :  { %v468_v56 = vadd.f32 %v954_v40, %v467_v54  ;;  %v508_v57 = vadd.f32 %v954_v40, %v507_v55  ;;  %v390_v58 = vpop.f32.mrf.mxu0  ;;  %v430_v59 = vpop.f32.mrf.mxu1 }
  0xd7   :  { %v391_v60 = vadd.f32 %v954_v40, %v390_v58  ;;  %v431_v61 = vadd.f32 %v954_v40, %v430_v59 }
  0xd8   :  { %567 = vst.msk [vmem:[%s1279_s3 + $0x148] sm:$0xff] %vm525_vm3, %v468_v56 }
  0xd9   :  { %583 = vst.msk [vmem:[%s1279_s3 + $0x1c8] sm:$0xff] %vm525_vm3, %v508_v57 }
  0xda   :  { %536 = vst.msk [vmem:[%s1279_s3 + $0x50] sm:$0xff] %vm525_vm3, %v391_v60 }
  0xdb   :  { %552 = vst.msk [vmem:[%s1279_s3 + $0xd0] sm:$0xff] %vm525_vm3, %v431_v61 }
  0xdd   :  { %v470_v62 = vpop.f32.mrf.mxu2  ;;  %v510_v63 = vpop.f32.mrf.mxu3 }
  0xde   :  { %v471_v0 = vadd.f32 %v954_v40, %v470_v62  ;;  %v511_v1 = vadd.f32 %v954_v40, %v510_v63  ;;  %v392_v2 = vpop.f32.mrf.mxu0  ;;  %v432_v3 = vpop.f32.mrf.mxu1 }
  0xdf   :  { %v393_v4 = vadd.f32 %v954_v40, %v392_v2  ;;  %v433_v5 = vadd.f32 %v954_v40, %v432_v3 }
  0xe0   :  { %568 = vst.msk [vmem:[%s1279_s3 + $0x150] sm:$0xff] %vm525_vm3, %v471_v0 }
  0xe1   :  { %584 = vst.msk [vmem:[%s1279_s3 + $0x1d0] sm:$0xff] %vm525_vm3, %v511_v1 }
  0xe2   :  { %537 = vst.msk [vmem:[%s1279_s3 + $0x58] sm:$0xff] %vm525_vm3, %v393_v4 }
  0xe3   :  { %553 = vst.msk [vmem:[%s1279_s3 + $0xd8] sm:$0xff] %vm525_vm3, %v433_v5 }
  0xe5   :  { %v472_v6 = vpop.f32.mrf.mxu2  ;;  %v512_v7 = vpop.f32.mrf.mxu3 }
  0xe6   :  { %v473_v8 = vadd.f32 %v954_v40, %v472_v6  ;;  %v513_v9 = vadd.f32 %v954_v40, %v512_v7  ;;  %v395_v10 = vpop.f32.mrf.mxu0  ;;  %v435_v11 = vpop.f32.mrf.mxu1 }
  0xe7   :  { %v396_v12 = vadd.f32 %v954_v40, %v395_v10  ;;  %v436_v13 = vadd.f32 %v954_v40, %v435_v11 }
  0xe8   :  { %569 = vst.msk [vmem:[%s1279_s3 + $0x158] sm:$0xff] %vm525_vm3, %v473_v8 }
  0xe9   :  { %585 = vst.msk [vmem:[%s1279_s3 + $0x1d8] sm:$0xff] %vm525_vm3, %v513_v9 }
  0xea   :  { %538 = vst.msk [vmem:[%s1279_s3 + $0x60] sm:$0xff] %vm525_vm3, %v396_v12 }
  0xeb   :  { %554 = vst.msk [vmem:[%s1279_s3 + $0xe0] sm:$0xff] %vm525_vm3, %v436_v13 }
  0xed   :  { %v475_v14 = vpop.f32.mrf.mxu2  ;;  %v515_v15 = vpop.f32.mrf.mxu3 }
  0xee   :  { %v476_v16 = vadd.f32 %v954_v40, %v475_v14  ;;  %v516_v17 = vadd.f32 %v954_v40, %v515_v15  ;;  %v397_v18 = vpop.f32.mrf.mxu0  ;;  %v437_v19 = vpop.f32.mrf.mxu1 }
  0xef   :  { %v398_v20 = vadd.f32 %v954_v40, %v397_v18  ;;  %v438_v21 = vadd.f32 %v954_v40, %v437_v19 }
  0xf0   :  { %570 = vst.msk [vmem:[%s1279_s3 + $0x160] sm:$0xff] %vm525_vm3, %v476_v16 }
  0xf1   :  { %586 = vst.msk [vmem:[%s1279_s3 + $0x1e0] sm:$0xff] %vm525_vm3, %v516_v17 }
  0xf2   :  { %539 = vst.msk [vmem:[%s1279_s3 + $0x68] sm:$0xff] %vm525_vm3, %v398_v20 }
  0xf3   :  { %555 = vst.msk [vmem:[%s1279_s3 + $0xe8] sm:$0xff] %vm525_vm3, %v438_v21 }
  0xf5   :  { %v477_v22 = vpop.f32.mrf.mxu2  ;;  %v517_v23 = vpop.f32.mrf.mxu3 }
  0xf6   :  { %v478_v24 = vadd.f32 %v954_v40, %v477_v22  ;;  %v518_v25 = vadd.f32 %v954_v40, %v517_v23  ;;  %v400_v26 = vpop.f32.mrf.mxu0  ;;  %v440_v27 = vpop.f32.mrf.mxu1 }
  0xf7   :  { %v401_v28 = vadd.f32 %v954_v40, %v400_v26  ;;  %v441_v29 = vadd.f32 %v954_v40, %v440_v27 }
  0xf8   :  { %571 = vst.msk [vmem:[%s1279_s3 + $0x168] sm:$0xff] %vm525_vm3, %v478_v24 }
  0xf9   :  { %587 = vst.msk [vmem:[%s1279_s3 + $0x1e8] sm:$0xff] %vm525_vm3, %v518_v25 }
  0xfa   :  { %540 = vst.msk [vmem:[%s1279_s3 + $0x70] sm:$0xff] %vm525_vm3, %v401_v28 }
  0xfb   :  { %556 = vst.msk [vmem:[%s1279_s3 + $0xf0] sm:$0xff] %vm525_vm3, %v441_v29 }
  0xfd   :  { %v480_v30 = vpop.f32.mrf.mxu2  ;;  %v520_v31 = vpop.f32.mrf.mxu3 }
  0xfe   :  { %v481_v32 = vadd.f32 %v954_v40, %v480_v30  ;;  %v521_v33 = vadd.f32 %v954_v40, %v520_v31  ;;  %v402_v34 = vpop.f32.mrf.mxu0  ;;  %v442_v35 = vpop.f32.mrf.mxu1 }
  0xff   :  { %v403_v36 = vadd.f32 %v954_v40, %v402_v34  ;;  %v443_v37 = vadd.f32 %v954_v40, %v442_v35 }
 0x100   :  { %572 = vst.msk [vmem:[%s1279_s3 + $0x170] sm:$0xff] %vm525_vm3, %v481_v32 }
 0x101   :  { %588 = vst.msk [vmem:[%s1279_s3 + $0x1f0] sm:$0xff] %vm525_vm3, %v521_v33 }
 0x102   :  { %541 = vst.msk [vmem:[%s1279_s3 + $0x78] sm:$0xff] %vm525_vm3, %v403_v36 }
 0x103   :  { %557 = vst.msk [vmem:[%s1279_s3 + $0xf8] sm:$0xff] %vm525_vm3, %v443_v37 }
 0x105   :  { %v482_v38 = vpop.f32.mrf.mxu2  ;;  %v522_v39 = vpop.f32.mrf.mxu3 }
 0x106   :  { %v483_v41 = vadd.f32 %v954_v40, %v482_v38  ;;  %v523_v42 = vadd.f32 %v954_v40, %v522_v39 }
 0x108   :  { %573 = vst.msk [vmem:[%s1279_s3 + $0x178] sm:$0xff] %vm525_vm3, %v483_v41 }
 0x109   :  { %589 = vst.msk [vmem:[%s1279_s3 + $0x1f8] sm:$0xff] %vm525_vm3, %v523_v42 }

</bundles_post_ra>
